<compile_context>
chip_gen: v6e
topology: v6e:2x2x1
jax: 0.10.0
libtpu: 0.0.40
codegen_flags: <defaults>
</compile_context>

<pallas_src>
import functools

import jax
import jax.numpy as jnp
from jax.experimental import pallas as pl
from jax.experimental.pallas import tpu as pltpu


def _round_up(x, m):
    return ((x + m - 1) // m) * m


@functools.lru_cache(maxsize=None)
def _vmem_limit_bytes():
    """Generation-aware scoped-VMEM limit (safe on v5e/v6e/v7x)."""
    cap = 64 * 1024 * 1024  # conservative fallback (v7x physical VMEM)
    try:
        info = pltpu.get_tpu_info()
        cap = int(getattr(info, "vmem_capacity_bytes", cap))
    except Exception:
        pass
    # leave headroom for double buffering; never exceed 96 MiB even on 128 MiB parts
    return min((cap * 3) // 4, 96 * 1024 * 1024)


# ---------------------------------------------------------------------------
# Tiled Pallas GEMM with bf16 MXU inputs, f32 accumulation and a fused
# (optional) residual-add + ReLU epilogue.
#   A: [M, K]  B: [K, N]  residual: [M, N] (f32)  ->  [M, N] (f32)
# Grid: (M tiles, N tiles, K tiles); K axis is "arbitrary" with a VMEM f32
# accumulator; M/N axes are "parallel".
# ---------------------------------------------------------------------------
def pallas_gemm(a, b, residual=None, relu=False, out_dtype=jnp.float32):
    M, K = a.shape
    K2, N = b.shape
    assert K == K2
    has_res = residual is not None

    # ---- K tiling -----------------------------------------------------
    MAX_SINGLE_K = 2048
    if K <= MAX_SINGLE_K:
        Kp, TK = K, K                      # single full-K block (exempt from /128 rule)
    else:
        Kp = K if K % 128 == 0 else _round_up(K, 512)
        TK = next(c for c in (1024, 768, 512, 384, 256, 128) if Kp % c == 0)
    if Kp != K:
        a = jnp.pad(a, ((0, 0), (0, Kp - K)))
        b = jnp.pad(b, ((0, Kp - K), (0, 0)))
    nk = Kp // TK

    # ---- M tiling -----------------------------------------------------
    if M >= 512:
        TM = 256                            # fills the 256-wide MXU on v6e/v7x
    elif M >= 128:
        TM = 128
    else:
        TM = _round_up(max(M, 8), 8)
    Mp = _round_up(M, TM)
    if Mp != M:
        a = jnp.pad(a, ((0, Mp - M), (0, 0)))
        if has_res:
            residual = jnp.pad(residual, ((0, Mp - M), (0, 0)))
    nm = Mp // TM

    # ---- N tiling (keeps >=2 parallel steps for late layers) -----------
    if N % 256 == 0 and N >= 512:
        TN = 256
    elif N % 128 == 0:
        TN = 128
    else:
        TN = N
    nn = N // TN

    # bf16 on the MXU (f32 accumulation); halves A/B HBM traffic.
    a = a.astype(jnp.bfloat16)
    b = b.astype(jnp.bfloat16)

    def kernel(*refs):
        if has_res:
            a_ref, b_ref, r_ref, o_ref, acc_ref = refs
        else:
            a_ref, b_ref, o_ref, acc_ref = refs

        @pl.when(pl.program_id(2) == 0)
        def _():
            acc_ref[...] = jnp.zeros_like(acc_ref)

        acc_ref[...] += jnp.dot(a_ref[...], b_ref[...],
                                preferred_element_type=jnp.float32)

        @pl.when(pl.program_id(2) == pl.num_programs(2) - 1)
        def _():
            acc = acc_ref[...]
            if has_res:
                acc = acc + r_ref[...].astype(jnp.float32)
            if relu:
                acc = jnp.maximum(acc, 0.0)
            o_ref[...] = acc.astype(o_ref.dtype)

    in_specs = [
        pl.BlockSpec((TM, TK), lambda i, j, k: (i, k)),
        pl.BlockSpec((TK, TN), lambda i, j, k: (k, j)),
    ]
    inputs = [a, b]
    if has_res:
        in_specs.append(pl.BlockSpec((TM, TN), lambda i, j, k: (i, j)))
        inputs.append(residual)

    bytes_accessed = (a.size * a.dtype.itemsize + b.size * b.dtype.itemsize
                      + Mp * N * 4)
    if has_res:
        bytes_accessed += residual.size * residual.dtype.itemsize

    out = pl.pallas_call(
        kernel,
        out_shape=jax.ShapeDtypeStruct((Mp, N), out_dtype),
        grid=(nm, nn, nk),
        in_specs=in_specs,
        out_specs=pl.BlockSpec((TM, TN), lambda i, j, k: (i, j)),
        scratch_shapes=[pltpu.VMEM((TM, TN), jnp.float32)],
        compiler_params=pltpu.CompilerParams(
            dimension_semantics=("parallel", "parallel", "arbitrary"),
            vmem_limit_bytes=_vmem_limit_bytes(),
        ),
        cost_estimate=pl.CostEstimate(
            flops=2 * M * N * K,
            transcendentals=0,
            bytes_accessed=int(bytes_accessed),
        ),
    )(*inputs)
    return out[:M] if Mp != M else out


# ---------------------------------------------------------------------------
# Conv2d = im2col (glue, fused under jit) + Pallas GEMM (hot path).
# x: NHWC f32, w: PyTorch layout [Cout, Cin, kh, kw].
# ---------------------------------------------------------------------------
def _extract_patches(x, kh, kw, stride, padding, pad_value=0.0):
    N, H, W, C = x.shape
    xp = jnp.pad(
        x,
        ((0, 0), (padding, padding), (padding, padding), (0, 0)),
        constant_values=pad_value,
    )
    Ho = (H + 2 * padding - kh) // stride + 1
    Wo = (W + 2 * padding - kw) // stride + 1
    cols = []
    for dy in range(kh):
        for dx in range(kw):
            cols.append(xp[:, dy: dy + stride * Ho: stride,
                           dx: dx + stride * Wo: stride, :])
    patches = jnp.stack(cols, axis=3)  # [N, Ho, Wo, kh*kw, C]
    return patches, Ho, Wo


def conv2d(x, w, stride=1, padding=0, relu=False, residual=None):
    Cout, Cin, kh, kw = w.shape
    N = x.shape[0]
    patches, Ho, Wo = _extract_patches(x, kh, kw, stride, padding)
    a = patches.reshape(N * Ho * Wo, kh * kw * Cin)
    wmat = jnp.transpose(w, (2, 3, 1, 0)).reshape(kh * kw * Cin, Cout)
    res_flat = (residual.reshape(N * Ho * Wo, Cout)
                if residual is not None else None)
    out = pallas_gemm(a, wmat, residual=res_flat, relu=relu)
    return out.reshape(N, Ho, Wo, Cout)


# ---------------------------------------------------------------------------
# MaxPool2d (k=3, s=2, p=1): tiled Pallas max-reduction over the k*k windows.
# Windows are stacked on the leading axis so the kernel is a pure-VPU
# unrolled elementwise max over (TM, C) slabs; M is tiled with a real grid.
# ---------------------------------------------------------------------------
def maxpool2d(x, k=3, stride=2, padding=1):
    N, H, W, C = x.shape
    xp = jnp.pad(
        x,
        ((0, 0), (padding, padding), (padding, padding), (0, 0)),
        constant_values=-jnp.inf,
    )
    Ho = (H + 2 * padding - k) // stride + 1
    Wo = (W + 2 * padding - k) // stride + 1
    cols = [xp[:, dy: dy + stride * Ho: stride, dx: dx + stride * Wo: stride, :]
            for dy in range(k) for dx in range(k)]
    kk = k * k
    M = N * Ho * Wo
    stacked = jnp.stack(cols, axis=0).reshape(kk, M, C)

    TM = min(512, _round_up(M, 8))
    Mp = _round_up(M, TM)
    if Mp != M:
        stacked = jnp.pad(stacked, ((0, 0), (0, Mp - M), (0, 0)),
                          constant_values=-jnp.inf)

    def kernel(x_ref, o_ref):
        m = x_ref[0]
        for t in range(1, kk):
            m = jnp.maximum(m, x_ref[t])
        o_ref[...] = m

    out = pl.pallas_call(
        kernel,
        out_shape=jax.ShapeDtypeStruct((Mp, C), x.dtype),
        grid=(Mp // TM,),
        in_specs=[pl.BlockSpec((kk, TM, C), lambda i: (0, i, 0))],
        out_specs=pl.BlockSpec((TM, C), lambda i: (i, 0)),
        compiler_params=pltpu.CompilerParams(
            dimension_semantics=("parallel",),
            vmem_limit_bytes=_vmem_limit_bytes(),
        ),
    )(stacked)
    return out[:M].reshape(N, Ho, Wo, C)


# ---------------------------------------------------------------------------
# Global spatial mean (x.mean(3).mean(2)) as a chunked Pallas reduction with
# an f32 VMEM accumulator (grid over H*W chunks).
# ---------------------------------------------------------------------------
def global_mean(x):
    N, H, W, C = x.shape
    HW = H * W
    xr = x.reshape(N, HW, C)
    TCH = min(512, _round_up(HW, 8)) if HW >= 8 else HW
    HWp = _round_up(HW, TCH)
    if HWp != HW:
        xr = jnp.pad(xr, ((0, 0), (0, HWp - HW), (0, 0)))
    nk = HWp // TCH
    inv_hw = 1.0 / float(HW)

    def kernel(x_ref, o_ref, acc_ref):
        @pl.when(pl.program_id(0) == 0)
        def _():
            acc_ref[...] = jnp.zeros_like(acc_ref)

        acc_ref[...] += jnp.sum(x_ref[...].astype(jnp.float32), axis=1)

        @pl.when(pl.program_id(0) == nk - 1)
        def _():
            o_ref[...] = (acc_ref[...] * inv_hw).astype(o_ref.dtype)

    return pl.pallas_call(
        kernel,
        out_shape=jax.ShapeDtypeStruct((N, C), x.dtype),
        grid=(nk,),
        in_specs=[pl.BlockSpec((N, TCH, C), lambda k: (0, k, 0))],
        out_specs=pl.BlockSpec((N, C), lambda k: (0, 0)),
        scratch_shapes=[pltpu.VMEM((N, C), jnp.float32)],
        compiler_params=pltpu.CompilerParams(
            dimension_semantics=("arbitrary",),
            vmem_limit_bytes=_vmem_limit_bytes(),
        ),
    )(xr)


# ---------------------------------------------------------------------------
# BasicBlock (expansion=1); BN folded away (identity at deterministic init).
# ---------------------------------------------------------------------------
def basic_block(x, blk, stride):
    out = conv2d(x, blk["conv1"], stride=stride, padding=1, relu=True)
    if "downsample" in blk:
        identity = conv2d(x, blk["downsample"], stride=stride, padding=0)
    else:
        identity = x
    # conv2 with fused residual add + ReLU epilogue
    out = conv2d(out, blk["conv2"], stride=1, padding=1, relu=True,
                 residual=identity)
    return out


# ---------------------------------------------------------------------------
# Parameter init (kaiming_normal_, mode='fan_out', nonlinearity='relu').
# Params contain only arrays (strides are structural, supplied by the forward),
# so the whole forward can be jitted.
# ---------------------------------------------------------------------------
def _kaiming(key, cout, cin, kh, kw):
    std = (2.0 / (cout * kh * kw)) ** 0.5
    return jax.random.normal(key, (cout, cin, kh, kw), jnp.float32) * std


def init_resnet_params(key, input_size=3, addition_channel=16, layers=(1, 1, 1, 1)):
    keys = iter(jax.random.split(key, 128))
    params = {"conv1": _kaiming(next(keys), 64, input_size, 7, 7)}
    state = {"inplanes": 64}

    def make_layer(planes, blocks, stride=1, addition_planes=0):
        in_ch = state["inplanes"] + addition_planes
        blks = []
        blk = {
            "conv1": _kaiming(next(keys), planes, in_ch, 3, 3),
            "conv2": _kaiming(next(keys), planes, planes, 3, 3),
        }
        if stride != 1 or in_ch != planes:  # block.expansion == 1
            blk["downsample"] = _kaiming(next(keys), planes, in_ch, 1, 1)
        blks.append(blk)
        state["inplanes"] = planes
        for _ in range(1, blocks):
            blks.append({
                "conv1": _kaiming(next(keys), planes, planes, 3, 3),
                "conv2": _kaiming(next(keys), planes, planes, 3, 3),
            })
        return blks

    params["layer1"] = make_layer(64, layers[0])
    params["layer2"] = make_layer(128, layers[1], stride=2)
    params["layer3"] = make_layer(256, layers[2], stride=2,
                                  addition_planes=addition_channel)
    params["layer4"] = make_layer(512, layers[3], stride=2)
    # fc (512 -> num_classes) unused in the features=True forward path.
    return params


# ---------------------------------------------------------------------------
# Forward pass (features=True, early_features=False, return_inter=False).
# ---------------------------------------------------------------------------
def resnet_forward(params, x_nchw, heatmap_nchw):
    x = jnp.transpose(x_nchw, (0, 2, 3, 1))        # NCHW -> NHWC
    hm = jnp.transpose(heatmap_nchw, (0, 2, 3, 1))

    x = conv2d(x, params["conv1"], stride=2, padding=3, relu=True)  # conv1+relu
    x = maxpool2d(x, k=3, stride=2, padding=1)

    for name, first_stride in (("layer1", 1), ("layer2", 2),
                               ("layer3", 2), ("layer4", 2)):
        if name == "layer3":
            x = jnp.concatenate([x, hm], axis=-1)  # torch.cat([x, heatmap], dim=1)
        for bi, blk in enumerate(params[name]):
            x = basic_block(x, blk, stride=first_stride if bi == 0 else 1)

    feat = global_mean(x)                          # x.mean(3).mean(2); view(N,-1)
    return feat, {}                                # features=True path


if __name__ == "__main__":
    key = jax.random.PRNGKey(0)
    kp, kx, kh = jax.random.split(key, 3)

    ADDITION_CHANNEL = 16   # small synthetic stand-in for 42*64
    params = init_resnet_params(kp, input_size=3,
                                addition_channel=ADDITION_CHANNEL,
                                layers=(1, 1, 1, 1))

    # x: [N, C, H, W]; heatmap spatial must match layer2 output (H/8, W/8).
    x = jax.random.normal(kx, (2, 3, 32, 32), jnp.float32)
    heatmap = jax.random.normal(kh, (2, ADDITION_CHANNEL, 4, 4), jnp.float32)

    fwd = jax.jit(resnet_forward)
    feat, extras = fwd(params, x, heatmap)
    jax.block_until_ready(feat)
    assert feat.shape == (2, 512), feat.shape
    assert extras == {}
    print("KERNEL_OK")
</pallas_src>

<mosaic_0001>
module attributes {stable_mosaic.version = 11 : i64} {
  func.func @kernel(%arg0: i32, %arg1: i32, %arg2: i32, %arg3: memref<256x147xbf16, #tpu.memory_space<vmem>>, %arg4: memref<147x64xbf16, #tpu.memory_space<vmem>>, %arg5: memref<256x64xf32, #tpu.memory_space<vmem>>, %arg6: memref<256x64xf32, #tpu.memory_space<vmem>>) attributes {dimension_semantics = [#tpu.dimension_semantics<parallel>, #tpu.dimension_semantics<parallel>, #tpu.dimension_semantics<arbitrary>], iteration_bounds = array<i64: 2, 1, 1>, scalar_prefetch = 0 : i64, scratch_operands = 1 : i64, tpu.core_type = #tpu.core_type<tc>, window_params = [{transform_indices = @transform_0, window_bounds = array<i64: 256, 147>}, {transform_indices = @transform_1, window_bounds = array<i64: 147, 64>}, {transform_indices = @transform_2, window_bounds = array<i64: 256, 64>}]} {
    %c0_i32 = arith.constant 0 : i32
    %0 = arith.cmpi eq, %arg2, %c0_i32 : i32
    %1 = arith.extui %0 : i1 to i32
    %c0_i32_0 = arith.constant 0 : i32
    %2 = arith.cmpi ne, %1, %c0_i32_0 : i32
    scf.if %2 {
      %cst_10 = arith.constant 0.000000e+00 : f32
      %12 = vector.broadcast %cst_10 : f32 to vector<256x64xf32>
      %c0_11 = arith.constant 0 : index
      %c0_12 = arith.constant 0 : index
      %13 = vector.load %arg6[%c0_11, %c0_12] : memref<256x64xf32, #tpu.memory_space<vmem>>, vector<256x64xf32>
      tpu.vector_store %arg6[%c0_11, %c0_12], %12 {strides = array<i32>} : memref<256x64xf32, #tpu.memory_space<vmem>>, vector<256x64xf32>,
    } else {
    }
    %c0 = arith.constant 0 : index
    %c0_1 = arith.constant 0 : index
    %3 = vector.load %arg6[%c0, %c0_1] : memref<256x64xf32, #tpu.memory_space<vmem>>, vector<256x64xf32>
    %c0_2 = arith.constant 0 : index
    %c0_3 = arith.constant 0 : index
    %4 = vector.load %arg3[%c0_2, %c0_3] : memref<256x147xbf16, #tpu.memory_space<vmem>>, vector<256x147xbf16>
    %c0_4 = arith.constant 0 : index
    %c0_5 = arith.constant 0 : index
    %5 = vector.load %arg4[%c0_4, %c0_5] : memref<147x64xbf16, #tpu.memory_space<vmem>>, vector<147x64xbf16>
    %cst = arith.constant dense<0.000000e+00> : vector<256x64xf32>
    %6 = tpu.matmul %4, %5, %cst {dimension_numbers = #tpu.dot_dimension_numbers<[1], [0], [0], [1], [0, 0, 1, 1], [], []>} : vector<256x147xbf16>, vector<147x64xbf16>, vector<256x64xf32> -> vector<256x64xf32>
    %7 = arith.addf %3, %6 : vector<256x64xf32>
    %c0_6 = arith.constant 0 : index
    %c0_7 = arith.constant 0 : index
    %8 = vector.load %arg6[%c0_6, %c0_7] : memref<256x64xf32, #tpu.memory_space<vmem>>, vector<256x64xf32>
    tpu.vector_store %arg6[%c0_6, %c0_7], %7 {strides = array<i32>} : memref<256x64xf32, #tpu.memory_space<vmem>>, vector<256x64xf32>,
    %c0_i32_8 = arith.constant 0 : i32
    %9 = arith.cmpi eq, %arg2, %c0_i32_8 : i32
    %10 = arith.extui %9 : i1 to i32
    %c0_i32_9 = arith.constant 0 : i32
    %11 = arith.cmpi ne, %10, %c0_i32_9 : i32
    scf.if %11 {
      %c0_10 = arith.constant 0 : index
      %c0_11 = arith.constant 0 : index
      %12 = vector.load %arg6[%c0_10, %c0_11] : memref<256x64xf32, #tpu.memory_space<vmem>>, vector<256x64xf32>
      %cst_12 = arith.constant 0.000000e+00 : f32
      %13 = vector.broadcast %cst_12 : f32 to vector<256x64xf32>
      %14 = arith.maximumf %12, %13 : vector<256x64xf32>
      %c0_13 = arith.constant 0 : index
      %c0_14 = arith.constant 0 : index
      %15 = vector.load %arg5[%c0_13, %c0_14] : memref<256x64xf32, #tpu.memory_space<vmem>>, vector<256x64xf32>
      tpu.vector_store %arg5[%c0_13, %c0_14], %14 {strides = array<i32>} : memref<256x64xf32, #tpu.memory_space<vmem>>, vector<256x64xf32>,
    } else {
    }
    return
  }
  func.func @transform_0(%arg0: i32, %arg1: i32, %arg2: i32) -> (i32, i32) {
    %c0_i32 = arith.constant 0 : i32
    return %arg0, %arg2 : i32, i32
  }
  func.func @transform_1(%arg0: i32, %arg1: i32, %arg2: i32) -> (i32, i32) {
    %c0_i32 = arith.constant 0 : i32
    return %arg2, %arg1 : i32, i32
  }
  func.func @transform_2(%arg0: i32, %arg1: i32, %arg2: i32) -> (i32, i32) {
    %c0_i32 = arith.constant 0 : i32
    return %arg0, %arg1 : i32, i32
  }
}

module attributes {stable_mosaic.version = 11 : i64} {
  func.func @kernel(%arg0: i32, %arg1: memref<9x128x64xf32, #tpu.memory_space<vmem>>, %arg2: memref<128x64xf32, #tpu.memory_space<vmem>>) attributes {dimension_semantics = [#tpu.dimension_semantics<parallel>], iteration_bounds = array<i64: 1>, scalar_prefetch = 0 : i64, scratch_operands = 0 : i64, tpu.core_type = #tpu.core_type<tc>, window_params = [{transform_indices = @transform_0, window_bounds = array<i64: 9, 128, 64>}, {transform_indices = @transform_1, window_bounds = array<i64: 128, 64>}]} {
    %c0 = arith.constant 0 : index
    %c0_0 = arith.constant 0 : index
    %c0_1 = arith.constant 0 : index
    %0 = vector.load %arg1[%c0, %c0_0, %c0_1] : memref<9x128x64xf32, #tpu.memory_space<vmem>>, vector<1x128x64xf32>
    %1 = vector.shape_cast %0 : vector<1x128x64xf32> to vector<128x64xf32>
    %c1 = arith.constant 1 : index
    %c0_2 = arith.constant 0 : index
    %c0_3 = arith.constant 0 : index
    %2 = vector.load %arg1[%c1, %c0_2, %c0_3] : memref<9x128x64xf32, #tpu.memory_space<vmem>>, vector<1x128x64xf32>
    %3 = vector.shape_cast %2 : vector<1x128x64xf32> to vector<128x64xf32>
    %4 = arith.maximumf %1, %3 : vector<128x64xf32>
    %c2 = arith.constant 2 : index
    %c0_4 = arith.constant 0 : index
    %c0_5 = arith.constant 0 : index
    %5 = vector.load %arg1[%c2, %c0_4, %c0_5] : memref<9x128x64xf32, #tpu.memory_space<vmem>>, vector<1x128x64xf32>
    %6 = vector.shape_cast %5 : vector<1x128x64xf32> to vector<128x64xf32>
    %7 = arith.maximumf %4, %6 : vector<128x64xf32>
    %c3 = arith.constant 3 : index
    %c0_6 = arith.constant 0 : index
    %c0_7 = arith.constant 0 : index
    %8 = vector.load %arg1[%c3, %c0_6, %c0_7] : memref<9x128x64xf32, #tpu.memory_space<vmem>>, vector<1x128x64xf32>
    %9 = vector.shape_cast %8 : vector<1x128x64xf32> to vector<128x64xf32>
    %10 = arith.maximumf %7, %9 : vector<128x64xf32>
    %c4 = arith.constant 4 : index
    %c0_8 = arith.constant 0 : index
    %c0_9 = arith.constant 0 : index
    %11 = vector.load %arg1[%c4, %c0_8, %c0_9] : memref<9x128x64xf32, #tpu.memory_space<vmem>>, vector<1x128x64xf32>
    %12 = vector.shape_cast %11 : vector<1x128x64xf32> to vector<128x64xf32>
    %13 = arith.maximumf %10, %12 : vector<128x64xf32>
    %c5 = arith.constant 5 : index
    %c0_10 = arith.constant 0 : index
    %c0_11 = arith.constant 0 : index
    %14 = vector.load %arg1[%c5, %c0_10, %c0_11] : memref<9x128x64xf32, #tpu.memory_space<vmem>>, vector<1x128x64xf32>
    %15 = vector.shape_cast %14 : vector<1x128x64xf32> to vector<128x64xf32>
    %16 = arith.maximumf %13, %15 : vector<128x64xf32>
    %c6 = arith.constant 6 : index
    %c0_12 = arith.constant 0 : index
    %c0_13 = arith.constant 0 : index
    %17 = vector.load %arg1[%c6, %c0_12, %c0_13] : memref<9x128x64xf32, #tpu.memory_space<vmem>>, vector<1x128x64xf32>
    %18 = vector.shape_cast %17 : vector<1x128x64xf32> to vector<128x64xf32>
    %19 = arith.maximumf %16, %18 : vector<128x64xf32>
    %c7 = arith.constant 7 : index
    %c0_14 = arith.constant 0 : index
    %c0_15 = arith.constant 0 : index
    %20 = vector.load %arg1[%c7, %c0_14, %c0_15] : memref<9x128x64xf32, #tpu.memory_space<vmem>>, vector<1x128x64xf32>
    %21 = vector.shape_cast %20 : vector<1x128x64xf32> to vector<128x64xf32>
    %22 = arith.maximumf %19, %21 : vector<128x64xf32>
    %c8 = arith.constant 8 : index
    %c0_16 = arith.constant 0 : index
    %c0_17 = arith.constant 0 : index
    %23 = vector.load %arg1[%c8, %c0_16, %c0_17] : memref<9x128x64xf32, #tpu.memory_space<vmem>>, vector<1x128x64xf32>
    %24 = vector.shape_cast %23 : vector<1x128x64xf32> to vector<128x64xf32>
    %25 = arith.maximumf %22, %24 : vector<128x64xf32>
    %c0_18 = arith.constant 0 : index
    %c0_19 = arith.constant 0 : index
    %26 = vector.load %arg2[%c0_18, %c0_19] : memref<128x64xf32, #tpu.memory_space<vmem>>, vector<128x64xf32>
    tpu.vector_store %arg2[%c0_18, %c0_19], %25 {strides = array<i32>} : memref<128x64xf32, #tpu.memory_space<vmem>>, vector<128x64xf32>,
    return
  }
  func.func @transform_0(%arg0: i32) -> (i32, i32, i32) {
    %c0_i32 = arith.constant 0 : i32
    %c0_i32_0 = arith.constant 0 : i32
    %c0_i32_1 = arith.constant 0 : i32
    return %c0_i32, %arg0, %c0_i32_0 : i32, i32, i32
  }
  func.func @transform_1(%arg0: i32) -> (i32, i32) {
    %c0_i32 = arith.constant 0 : i32
    %c0_i32_0 = arith.constant 0 : i32
    return %arg0, %c0_i32 : i32, i32
  }
}

module attributes {stable_mosaic.version = 11 : i64} {
  func.func @kernel(%arg0: i32, %arg1: i32, %arg2: i32, %arg3: memref<128x576xbf16, #tpu.memory_space<vmem>>, %arg4: memref<576x64xbf16, #tpu.memory_space<vmem>>, %arg5: memref<128x64xf32, #tpu.memory_space<vmem>>, %arg6: memref<128x64xf32, #tpu.memory_space<vmem>>) attributes {dimension_semantics = [#tpu.dimension_semantics<parallel>, #tpu.dimension_semantics<parallel>, #tpu.dimension_semantics<arbitrary>], iteration_bounds = array<i64: 1, 1, 1>, scalar_prefetch = 0 : i64, scratch_operands = 1 : i64, tpu.core_type = #tpu.core_type<tc>, window_params = [{transform_indices = @transform_0, window_bounds = array<i64: 128, 576>}, {transform_indices = @transform_1, window_bounds = array<i64: 576, 64>}, {transform_indices = @transform_2, window_bounds = array<i64: 128, 64>}]} {
    %c0_i32 = arith.constant 0 : i32
    %0 = arith.cmpi eq, %arg2, %c0_i32 : i32
    %1 = arith.extui %0 : i1 to i32
    %c0_i32_0 = arith.constant 0 : i32
    %2 = arith.cmpi ne, %1, %c0_i32_0 : i32
    scf.if %2 {
      %cst_10 = arith.constant 0.000000e+00 : f32
      %12 = vector.broadcast %cst_10 : f32 to vector<128x64xf32>
      %c0_11 = arith.constant 0 : index
      %c0_12 = arith.constant 0 : index
      %13 = vector.load %arg6[%c0_11, %c0_12] : memref<128x64xf32, #tpu.memory_space<vmem>>, vector<128x64xf32>
      tpu.vector_store %arg6[%c0_11, %c0_12], %12 {strides = array<i32>} : memref<128x64xf32, #tpu.memory_space<vmem>>, vector<128x64xf32>,
    } else {
    }
    %c0 = arith.constant 0 : index
    %c0_1 = arith.constant 0 : index
    %3 = vector.load %arg6[%c0, %c0_1] : memref<128x64xf32, #tpu.memory_space<vmem>>, vector<128x64xf32>
    %c0_2 = arith.constant 0 : index
    %c0_3 = arith.constant 0 : index
    %4 = vector.load %arg3[%c0_2, %c0_3] : memref<128x576xbf16, #tpu.memory_space<vmem>>, vector<128x576xbf16>
    %c0_4 = arith.constant 0 : index
    %c0_5 = arith.constant 0 : index
    %5 = vector.load %arg4[%c0_4, %c0_5] : memref<576x64xbf16, #tpu.memory_space<vmem>>, vector<576x64xbf16>
    %cst = arith.constant dense<0.000000e+00> : vector<128x64xf32>
    %6 = tpu.matmul %4, %5, %cst {dimension_numbers = #tpu.dot_dimension_numbers<[1], [0], [0], [1], [0, 0, 1, 1], [], []>} : vector<128x576xbf16>, vector<576x64xbf16>, vector<128x64xf32> -> vector<128x64xf32>
    %7 = arith.addf %3, %6 : vector<128x64xf32>
    %c0_6 = arith.constant 0 : index
    %c0_7 = arith.constant 0 : index
    %8 = vector.load %arg6[%c0_6, %c0_7] : memref<128x64xf32, #tpu.memory_space<vmem>>, vector<128x64xf32>
    tpu.vector_store %arg6[%c0_6, %c0_7], %7 {strides = array<i32>} : memref<128x64xf32, #tpu.memory_space<vmem>>, vector<128x64xf32>,
    %c0_i32_8 = arith.constant 0 : i32
    %9 = arith.cmpi eq, %arg2, %c0_i32_8 : i32
    %10 = arith.extui %9 : i1 to i32
    %c0_i32_9 = arith.constant 0 : i32
    %11 = arith.cmpi ne, %10, %c0_i32_9 : i32
    scf.if %11 {
      %c0_10 = arith.constant 0 : index
      %c0_11 = arith.constant 0 : index
      %12 = vector.load %arg6[%c0_10, %c0_11] : memref<128x64xf32, #tpu.memory_space<vmem>>, vector<128x64xf32>
      %cst_12 = arith.constant 0.000000e+00 : f32
      %13 = vector.broadcast %cst_12 : f32 to vector<128x64xf32>
      %14 = arith.maximumf %12, %13 : vector<128x64xf32>
      %c0_13 = arith.constant 0 : index
      %c0_14 = arith.constant 0 : index
      %15 = vector.load %arg5[%c0_13, %c0_14] : memref<128x64xf32, #tpu.memory_space<vmem>>, vector<128x64xf32>
      tpu.vector_store %arg5[%c0_13, %c0_14], %14 {strides = array<i32>} : memref<128x64xf32, #tpu.memory_space<vmem>>, vector<128x64xf32>,
    } else {
    }
    return
  }
  func.func @transform_0(%arg0: i32, %arg1: i32, %arg2: i32) -> (i32, i32) {
    %c0_i32 = arith.constant 0 : i32
    return %arg0, %arg2 : i32, i32
  }
  func.func @transform_1(%arg0: i32, %arg1: i32, %arg2: i32) -> (i32, i32) {
    %c0_i32 = arith.constant 0 : i32
    return %arg2, %arg1 : i32, i32
  }
  func.func @transform_2(%arg0: i32, %arg1: i32, %arg2: i32) -> (i32, i32) {
    %c0_i32 = arith.constant 0 : i32
    return %arg0, %arg1 : i32, i32
  }
}

module attributes {stable_mosaic.version = 11 : i64} {
  func.func @kernel(%arg0: i32, %arg1: i32, %arg2: i32, %arg3: memref<128x576xbf16, #tpu.memory_space<vmem>>, %arg4: memref<576x64xbf16, #tpu.memory_space<vmem>>, %arg5: memref<128x64xf32, #tpu.memory_space<vmem>>, %arg6: memref<128x64xf32, #tpu.memory_space<vmem>>, %arg7: memref<128x64xf32, #tpu.memory_space<vmem>>) attributes {dimension_semantics = [#tpu.dimension_semantics<parallel>, #tpu.dimension_semantics<parallel>, #tpu.dimension_semantics<arbitrary>], iteration_bounds = array<i64: 1, 1, 1>, scalar_prefetch = 0 : i64, scratch_operands = 1 : i64, tpu.core_type = #tpu.core_type<tc>, window_params = [{transform_indices = @transform_0, window_bounds = array<i64: 128, 576>}, {transform_indices = @transform_1, window_bounds = array<i64: 576, 64>}, {transform_indices = @transform_2, window_bounds = array<i64: 128, 64>}, {transform_indices = @transform_3, window_bounds = array<i64: 128, 64>}]} {
    %c0_i32 = arith.constant 0 : i32
    %0 = arith.cmpi eq, %arg2, %c0_i32 : i32
    %1 = arith.extui %0 : i1 to i32
    %c0_i32_0 = arith.constant 0 : i32
    %2 = arith.cmpi ne, %1, %c0_i32_0 : i32
    scf.if %2 {
      %cst_10 = arith.constant 0.000000e+00 : f32
      %12 = vector.broadcast %cst_10 : f32 to vector<128x64xf32>
      %c0_11 = arith.constant 0 : index
      %c0_12 = arith.constant 0 : index
      %13 = vector.load %arg7[%c0_11, %c0_12] : memref<128x64xf32, #tpu.memory_space<vmem>>, vector<128x64xf32>
      tpu.vector_store %arg7[%c0_11, %c0_12], %12 {strides = array<i32>} : memref<128x64xf32, #tpu.memory_space<vmem>>, vector<128x64xf32>,
    } else {
    }
    %c0 = arith.constant 0 : index
    %c0_1 = arith.constant 0 : index
    %3 = vector.load %arg7[%c0, %c0_1] : memref<128x64xf32, #tpu.memory_space<vmem>>, vector<128x64xf32>
    %c0_2 = arith.constant 0 : index
    %c0_3 = arith.constant 0 : index
    %4 = vector.load %arg3[%c0_2, %c0_3] : memref<128x576xbf16, #tpu.memory_space<vmem>>, vector<128x576xbf16>
    %c0_4 = arith.constant 0 : index
    %c0_5 = arith.constant 0 : index
    %5 = vector.load %arg4[%c0_4, %c0_5] : memref<576x64xbf16, #tpu.memory_space<vmem>>, vector<576x64xbf16>
    %cst = arith.constant dense<0.000000e+00> : vector<128x64xf32>
    %6 = tpu.matmul %4, %5, %cst {dimension_numbers = #tpu.dot_dimension_numbers<[1], [0], [0], [1], [0, 0, 1, 1], [], []>} : vector<128x576xbf16>, vector<576x64xbf16>, vector<128x64xf32> -> vector<128x64xf32>
    %7 = arith.addf %3, %6 : vector<128x64xf32>
    %c0_6 = arith.constant 0 : index
    %c0_7 = arith.constant 0 : index
    %8 = vector.load %arg7[%c0_6, %c0_7] : memref<128x64xf32, #tpu.memory_space<vmem>>, vector<128x64xf32>
    tpu.vector_store %arg7[%c0_6, %c0_7], %7 {strides = array<i32>} : memref<128x64xf32, #tpu.memory_space<vmem>>, vector<128x64xf32>,
    %c0_i32_8 = arith.constant 0 : i32
    %9 = arith.cmpi eq, %arg2, %c0_i32_8 : i32
    %10 = arith.extui %9 : i1 to i32
    %c0_i32_9 = arith.constant 0 : i32
    %11 = arith.cmpi ne, %10, %c0_i32_9 : i32
    scf.if %11 {
      %c0_10 = arith.constant 0 : index
      %c0_11 = arith.constant 0 : index
      %12 = vector.load %arg7[%c0_10, %c0_11] : memref<128x64xf32, #tpu.memory_space<vmem>>, vector<128x64xf32>
      %c0_12 = arith.constant 0 : index
      %c0_13 = arith.constant 0 : index
      %13 = vector.load %arg5[%c0_12, %c0_13] : memref<128x64xf32, #tpu.memory_space<vmem>>, vector<128x64xf32>
      %14 = arith.addf %12, %13 : vector<128x64xf32>
      %cst_14 = arith.constant 0.000000e+00 : f32
      %15 = vector.broadcast %cst_14 : f32 to vector<128x64xf32>
      %16 = arith.maximumf %14, %15 : vector<128x64xf32>
      %c0_15 = arith.constant 0 : index
      %c0_16 = arith.constant 0 : index
      %17 = vector.load %arg6[%c0_15, %c0_16] : memref<128x64xf32, #tpu.memory_space<vmem>>, vector<128x64xf32>
      tpu.vector_store %arg6[%c0_15, %c0_16], %16 {strides = array<i32>} : memref<128x64xf32, #tpu.memory_space<vmem>>, vector<128x64xf32>,
    } else {
    }
    return
  }
  func.func @transform_0(%arg0: i32, %arg1: i32, %arg2: i32) -> (i32, i32) {
    %c0_i32 = arith.constant 0 : i32
    return %arg0, %arg2 : i32, i32
  }
  func.func @transform_1(%arg0: i32, %arg1: i32, %arg2: i32) -> (i32, i32) {
    %c0_i32 = arith.constant 0 : i32
    return %arg2, %arg1 : i32, i32
  }
  func.func @transform_2(%arg0: i32, %arg1: i32, %arg2: i32) -> (i32, i32) {
    %c0_i32 = arith.constant 0 : i32
    return %arg0, %arg1 : i32, i32
  }
  func.func @transform_3(%arg0: i32, %arg1: i32, %arg2: i32) -> (i32, i32) {
    %c0_i32 = arith.constant 0 : i32
    return %arg0, %arg1 : i32, i32
  }
}

module attributes {stable_mosaic.version = 11 : i64} {
  func.func @kernel(%arg0: i32, %arg1: i32, %arg2: i32, %arg3: memref<32x576xbf16, #tpu.memory_space<vmem>>, %arg4: memref<576x128xbf16, #tpu.memory_space<vmem>>, %arg5: memref<32x128xf32, #tpu.memory_space<vmem>>, %arg6: memref<32x128xf32, #tpu.memory_space<vmem>>) attributes {dimension_semantics = [#tpu.dimension_semantics<parallel>, #tpu.dimension_semantics<parallel>, #tpu.dimension_semantics<arbitrary>], iteration_bounds = array<i64: 1, 1, 1>, scalar_prefetch = 0 : i64, scratch_operands = 1 : i64, tpu.core_type = #tpu.core_type<tc>, window_params = [{transform_indices = @transform_0, window_bounds = array<i64: 32, 576>}, {transform_indices = @transform_1, window_bounds = array<i64: 576, 128>}, {transform_indices = @transform_2, window_bounds = array<i64: 32, 128>}]} {
    %c0_i32 = arith.constant 0 : i32
    %0 = arith.cmpi eq, %arg2, %c0_i32 : i32
    %1 = arith.extui %0 : i1 to i32
    %c0_i32_0 = arith.constant 0 : i32
    %2 = arith.cmpi ne, %1, %c0_i32_0 : i32
    scf.if %2 {
      %cst_10 = arith.constant 0.000000e+00 : f32
      %12 = vector.broadcast %cst_10 : f32 to vector<32x128xf32>
      %c0_11 = arith.constant 0 : index
      %c0_12 = arith.constant 0 : index
      %13 = vector.load %arg6[%c0_11, %c0_12] : memref<32x128xf32, #tpu.memory_space<vmem>>, vector<32x128xf32>
      tpu.vector_store %arg6[%c0_11, %c0_12], %12 {strides = array<i32>} : memref<32x128xf32, #tpu.memory_space<vmem>>, vector<32x128xf32>,
    } else {
    }
    %c0 = arith.constant 0 : index
    %c0_1 = arith.constant 0 : index
    %3 = vector.load %arg6[%c0, %c0_1] : memref<32x128xf32, #tpu.memory_space<vmem>>, vector<32x128xf32>
    %c0_2 = arith.constant 0 : index
    %c0_3 = arith.constant 0 : index
    %4 = vector.load %arg3[%c0_2, %c0_3] : memref<32x576xbf16, #tpu.memory_space<vmem>>, vector<32x576xbf16>
    %c0_4 = arith.constant 0 : index
    %c0_5 = arith.constant 0 : index
    %5 = vector.load %arg4[%c0_4, %c0_5] : memref<576x128xbf16, #tpu.memory_space<vmem>>, vector<576x128xbf16>
    %cst = arith.constant dense<0.000000e+00> : vector<32x128xf32>
    %6 = tpu.matmul %4, %5, %cst {dimension_numbers = #tpu.dot_dimension_numbers<[1], [0], [0], [1], [0, 0, 1, 1], [], []>} : vector<32x576xbf16>, vector<576x128xbf16>, vector<32x128xf32> -> vector<32x128xf32>
    %7 = arith.addf %3, %6 : vector<32x128xf32>
    %c0_6 = arith.constant 0 : index
    %c0_7 = arith.constant 0 : index
    %8 = vector.load %arg6[%c0_6, %c0_7] : memref<32x128xf32, #tpu.memory_space<vmem>>, vector<32x128xf32>
    tpu.vector_store %arg6[%c0_6, %c0_7], %7 {strides = array<i32>} : memref<32x128xf32, #tpu.memory_space<vmem>>, vector<32x128xf32>,
    %c0_i32_8 = arith.constant 0 : i32
    %9 = arith.cmpi eq, %arg2, %c0_i32_8 : i32
    %10 = arith.extui %9 : i1 to i32
    %c0_i32_9 = arith.constant 0 : i32
    %11 = arith.cmpi ne, %10, %c0_i32_9 : i32
    scf.if %11 {
      %c0_10 = arith.constant 0 : index
      %c0_11 = arith.constant 0 : index
      %12 = vector.load %arg6[%c0_10, %c0_11] : memref<32x128xf32, #tpu.memory_space<vmem>>, vector<32x128xf32>
      %cst_12 = arith.constant 0.000000e+00 : f32
      %13 = vector.broadcast %cst_12 : f32 to vector<32x128xf32>
      %14 = arith.maximumf %12, %13 : vector<32x128xf32>
      %c0_13 = arith.constant 0 : index
      %c0_14 = arith.constant 0 : index
      %15 = vector.load %arg5[%c0_13, %c0_14] : memref<32x128xf32, #tpu.memory_space<vmem>>, vector<32x128xf32>
      tpu.vector_store %arg5[%c0_13, %c0_14], %14 {strides = array<i32>} : memref<32x128xf32, #tpu.memory_space<vmem>>, vector<32x128xf32>,
    } else {
    }
    return
  }
  func.func @transform_0(%arg0: i32, %arg1: i32, %arg2: i32) -> (i32, i32) {
    %c0_i32 = arith.constant 0 : i32
    return %arg0, %arg2 : i32, i32
  }
  func.func @transform_1(%arg0: i32, %arg1: i32, %arg2: i32) -> (i32, i32) {
    %c0_i32 = arith.constant 0 : i32
    return %arg2, %arg1 : i32, i32
  }
  func.func @transform_2(%arg0: i32, %arg1: i32, %arg2: i32) -> (i32, i32) {
    %c0_i32 = arith.constant 0 : i32
    return %arg0, %arg1 : i32, i32
  }
}

module attributes {stable_mosaic.version = 11 : i64} {
  func.func @kernel(%arg0: i32, %arg1: i32, %arg2: i32, %arg3: memref<32x64xbf16, #tpu.memory_space<vmem>>, %arg4: memref<64x128xbf16, #tpu.memory_space<vmem>>, %arg5: memref<32x128xf32, #tpu.memory_space<vmem>>, %arg6: memref<32x128xf32, #tpu.memory_space<vmem>>) attributes {dimension_semantics = [#tpu.dimension_semantics<parallel>, #tpu.dimension_semantics<parallel>, #tpu.dimension_semantics<arbitrary>], iteration_bounds = array<i64: 1, 1, 1>, scalar_prefetch = 0 : i64, scratch_operands = 1 : i64, tpu.core_type = #tpu.core_type<tc>, window_params = [{transform_indices = @transform_0, window_bounds = array<i64: 32, 64>}, {transform_indices = @transform_1, window_bounds = array<i64: 64, 128>}, {transform_indices = @transform_2, window_bounds = array<i64: 32, 128>}]} {
    %c0_i32 = arith.constant 0 : i32
    %0 = arith.cmpi eq, %arg2, %c0_i32 : i32
    %1 = arith.extui %0 : i1 to i32
    %c0_i32_0 = arith.constant 0 : i32
    %2 = arith.cmpi ne, %1, %c0_i32_0 : i32
    scf.if %2 {
      %cst_10 = arith.constant 0.000000e+00 : f32
      %12 = vector.broadcast %cst_10 : f32 to vector<32x128xf32>
      %c0_11 = arith.constant 0 : index
      %c0_12 = arith.constant 0 : index
      %13 = vector.load %arg6[%c0_11, %c0_12] : memref<32x128xf32, #tpu.memory_space<vmem>>, vector<32x128xf32>
      tpu.vector_store %arg6[%c0_11, %c0_12], %12 {strides = array<i32>} : memref<32x128xf32, #tpu.memory_space<vmem>>, vector<32x128xf32>,
    } else {
    }
    %c0 = arith.constant 0 : index
    %c0_1 = arith.constant 0 : index
    %3 = vector.load %arg6[%c0, %c0_1] : memref<32x128xf32, #tpu.memory_space<vmem>>, vector<32x128xf32>
    %c0_2 = arith.constant 0 : index
    %c0_3 = arith.constant 0 : index
    %4 = vector.load %arg3[%c0_2, %c0_3] : memref<32x64xbf16, #tpu.memory_space<vmem>>, vector<32x64xbf16>
    %c0_4 = arith.constant 0 : index
    %c0_5 = arith.constant 0 : index
    %5 = vector.load %arg4[%c0_4, %c0_5] : memref<64x128xbf16, #tpu.memory_space<vmem>>, vector<64x128xbf16>
    %cst = arith.constant dense<0.000000e+00> : vector<32x128xf32>
    %6 = tpu.matmul %4, %5, %cst {dimension_numbers = #tpu.dot_dimension_numbers<[1], [0], [0], [1], [0, 0, 1, 1], [], []>} : vector<32x64xbf16>, vector<64x128xbf16>, vector<32x128xf32> -> vector<32x128xf32>
    %7 = arith.addf %3, %6 : vector<32x128xf32>
    %c0_6 = arith.constant 0 : index
    %c0_7 = arith.constant 0 : index
    %8 = vector.load %arg6[%c0_6, %c0_7] : memref<32x128xf32, #tpu.memory_space<vmem>>, vector<32x128xf32>
    tpu.vector_store %arg6[%c0_6, %c0_7], %7 {strides = array<i32>} : memref<32x128xf32, #tpu.memory_space<vmem>>, vector<32x128xf32>,
    %c0_i32_8 = arith.constant 0 : i32
    %9 = arith.cmpi eq, %arg2, %c0_i32_8 : i32
    %10 = arith.extui %9 : i1 to i32
    %c0_i32_9 = arith.constant 0 : i32
    %11 = arith.cmpi ne, %10, %c0_i32_9 : i32
    scf.if %11 {
      %c0_10 = arith.constant 0 : index
      %c0_11 = arith.constant 0 : index
      %12 = vector.load %arg6[%c0_10, %c0_11] : memref<32x128xf32, #tpu.memory_space<vmem>>, vector<32x128xf32>
      %c0_12 = arith.constant 0 : index
      %c0_13 = arith.constant 0 : index
      %13 = vector.load %arg5[%c0_12, %c0_13] : memref<32x128xf32, #tpu.memory_space<vmem>>, vector<32x128xf32>
      tpu.vector_store %arg5[%c0_12, %c0_13], %12 {strides = array<i32>} : memref<32x128xf32, #tpu.memory_space<vmem>>, vector<32x128xf32>,
    } else {
    }
    return
  }
  func.func @transform_0(%arg0: i32, %arg1: i32, %arg2: i32) -> (i32, i32) {
    %c0_i32 = arith.constant 0 : i32
    return %arg0, %arg2 : i32, i32
  }
  func.func @transform_1(%arg0: i32, %arg1: i32, %arg2: i32) -> (i32, i32) {
    %c0_i32 = arith.constant 0 : i32
    return %arg2, %arg1 : i32, i32
  }
  func.func @transform_2(%arg0: i32, %arg1: i32, %arg2: i32) -> (i32, i32) {
    %c0_i32 = arith.constant 0 : i32
    return %arg0, %arg1 : i32, i32
  }
}

module attributes {stable_mosaic.version = 11 : i64} {
  func.func @kernel(%arg0: i32, %arg1: i32, %arg2: i32, %arg3: memref<32x1152xbf16, #tpu.memory_space<vmem>>, %arg4: memref<1152x128xbf16, #tpu.memory_space<vmem>>, %arg5: memref<32x128xf32, #tpu.memory_space<vmem>>, %arg6: memref<32x128xf32, #tpu.memory_space<vmem>>, %arg7: memref<32x128xf32, #tpu.memory_space<vmem>>) attributes {dimension_semantics = [#tpu.dimension_semantics<parallel>, #tpu.dimension_semantics<parallel>, #tpu.dimension_semantics<arbitrary>], iteration_bounds = array<i64: 1, 1, 1>, scalar_prefetch = 0 : i64, scratch_operands = 1 : i64, tpu.core_type = #tpu.core_type<tc>, window_params = [{transform_indices = @transform_0, window_bounds = array<i64: 32, 1152>}, {transform_indices = @transform_1, window_bounds = array<i64: 1152, 128>}, {transform_indices = @transform_2, window_bounds = array<i64: 32, 128>}, {transform_indices = @transform_3, window_bounds = array<i64: 32, 128>}]} {
    %c0_i32 = arith.constant 0 : i32
    %0 = arith.cmpi eq, %arg2, %c0_i32 : i32
    %1 = arith.extui %0 : i1 to i32
    %c0_i32_0 = arith.constant 0 : i32
    %2 = arith.cmpi ne, %1, %c0_i32_0 : i32
    scf.if %2 {
      %cst_10 = arith.constant 0.000000e+00 : f32
      %12 = vector.broadcast %cst_10 : f32 to vector<32x128xf32>
      %c0_11 = arith.constant 0 : index
      %c0_12 = arith.constant 0 : index
      %13 = vector.load %arg7[%c0_11, %c0_12] : memref<32x128xf32, #tpu.memory_space<vmem>>, vector<32x128xf32>
      tpu.vector_store %arg7[%c0_11, %c0_12], %12 {strides = array<i32>} : memref<32x128xf32, #tpu.memory_space<vmem>>, vector<32x128xf32>,
    } else {
    }
    %c0 = arith.constant 0 : index
    %c0_1 = arith.constant 0 : index
    %3 = vector.load %arg7[%c0, %c0_1] : memref<32x128xf32, #tpu.memory_space<vmem>>, vector<32x128xf32>
    %c0_2 = arith.constant 0 : index
    %c0_3 = arith.constant 0 : index
    %4 = vector.load %arg3[%c0_2, %c0_3] : memref<32x1152xbf16, #tpu.memory_space<vmem>>, vector<32x1152xbf16>
    %c0_4 = arith.constant 0 : index
    %c0_5 = arith.constant 0 : index
    %5 = vector.load %arg4[%c0_4, %c0_5] : memref<1152x128xbf16, #tpu.memory_space<vmem>>, vector<1152x128xbf16>
    %cst = arith.constant dense<0.000000e+00> : vector<32x128xf32>
    %6 = tpu.matmul %4, %5, %cst {dimension_numbers = #tpu.dot_dimension_numbers<[1], [0], [0], [1], [0, 0, 1, 1], [], []>} : vector<32x1152xbf16>, vector<1152x128xbf16>, vector<32x128xf32> -> vector<32x128xf32>
    %7 = arith.addf %3, %6 : vector<32x128xf32>
    %c0_6 = arith.constant 0 : index
    %c0_7 = arith.constant 0 : index
    %8 = vector.load %arg7[%c0_6, %c0_7] : memref<32x128xf32, #tpu.memory_space<vmem>>, vector<32x128xf32>
    tpu.vector_store %arg7[%c0_6, %c0_7], %7 {strides = array<i32>} : memref<32x128xf32, #tpu.memory_space<vmem>>, vector<32x128xf32>,
    %c0_i32_8 = arith.constant 0 : i32
    %9 = arith.cmpi eq, %arg2, %c0_i32_8 : i32
    %10 = arith.extui %9 : i1 to i32
    %c0_i32_9 = arith.constant 0 : i32
    %11 = arith.cmpi ne, %10, %c0_i32_9 : i32
    scf.if %11 {
      %c0_10 = arith.constant 0 : index
      %c0_11 = arith.constant 0 : index
      %12 = vector.load %arg7[%c0_10, %c0_11] : memref<32x128xf32, #tpu.memory_space<vmem>>, vector<32x128xf32>
      %c0_12 = arith.constant 0 : index
      %c0_13 = arith.constant 0 : index
      %13 = vector.load %arg5[%c0_12, %c0_13] : memref<32x128xf32, #tpu.memory_space<vmem>>, vector<32x128xf32>
      %14 = arith.addf %12, %13 : vector<32x128xf32>
      %cst_14 = arith.constant 0.000000e+00 : f32
      %15 = vector.broadcast %cst_14 : f32 to vector<32x128xf32>
      %16 = arith.maximumf %14, %15 : vector<32x128xf32>
      %c0_15 = arith.constant 0 : index
      %c0_16 = arith.constant 0 : index
      %17 = vector.load %arg6[%c0_15, %c0_16] : memref<32x128xf32, #tpu.memory_space<vmem>>, vector<32x128xf32>
      tpu.vector_store %arg6[%c0_15, %c0_16], %16 {strides = array<i32>} : memref<32x128xf32, #tpu.memory_space<vmem>>, vector<32x128xf32>,
    } else {
    }
    return
  }
  func.func @transform_0(%arg0: i32, %arg1: i32, %arg2: i32) -> (i32, i32) {
    %c0_i32 = arith.constant 0 : i32
    return %arg0, %arg2 : i32, i32
  }
  func.func @transform_1(%arg0: i32, %arg1: i32, %arg2: i32) -> (i32, i32) {
    %c0_i32 = arith.constant 0 : i32
    return %arg2, %arg1 : i32, i32
  }
  func.func @transform_2(%arg0: i32, %arg1: i32, %arg2: i32) -> (i32, i32) {
    %c0_i32 = arith.constant 0 : i32
    return %arg0, %arg1 : i32, i32
  }
  func.func @transform_3(%arg0: i32, %arg1: i32, %arg2: i32) -> (i32, i32) {
    %c0_i32 = arith.constant 0 : i32
    return %arg0, %arg1 : i32, i32
  }
}

module attributes {stable_mosaic.version = 11 : i64} {
  func.func @kernel(%arg0: i32, %arg1: i32, %arg2: i32, %arg3: memref<8x1296xbf16, #tpu.memory_space<vmem>>, %arg4: memref<1296x128xbf16, #tpu.memory_space<vmem>>, %arg5: memref<8x128xf32, #tpu.memory_space<vmem>>, %arg6: memref<8x128xf32, #tpu.memory_space<vmem>>) attributes {dimension_semantics = [#tpu.dimension_semantics<parallel>, #tpu.dimension_semantics<parallel>, #tpu.dimension_semantics<arbitrary>], iteration_bounds = array<i64: 1, 2, 1>, scalar_prefetch = 0 : i64, scratch_operands = 1 : i64, tpu.core_type = #tpu.core_type<tc>, window_params = [{transform_indices = @transform_0, window_bounds = array<i64: 8, 1296>}, {transform_indices = @transform_1, window_bounds = array<i64: 1296, 128>}, {transform_indices = @transform_2, window_bounds = array<i64: 8, 128>}]} {
    %c0_i32 = arith.constant 0 : i32
    %0 = arith.cmpi eq, %arg2, %c0_i32 : i32
    %1 = arith.extui %0 : i1 to i32
    %c0_i32_0 = arith.constant 0 : i32
    %2 = arith.cmpi ne, %1, %c0_i32_0 : i32
    scf.if %2 {
      %cst_10 = arith.constant 0.000000e+00 : f32
      %12 = vector.broadcast %cst_10 : f32 to vector<8x128xf32>
      %c0_11 = arith.constant 0 : index
      %c0_12 = arith.constant 0 : index
      %13 = vector.load %arg6[%c0_11, %c0_12] : memref<8x128xf32, #tpu.memory_space<vmem>>, vector<8x128xf32>
      tpu.vector_store %arg6[%c0_11, %c0_12], %12 {strides = array<i32>} : memref<8x128xf32, #tpu.memory_space<vmem>>, vector<8x128xf32>,
    } else {
    }
    %c0 = arith.constant 0 : index
    %c0_1 = arith.constant 0 : index
    %3 = vector.load %arg6[%c0, %c0_1] : memref<8x128xf32, #tpu.memory_space<vmem>>, vector<8x128xf32>
    %c0_2 = arith.constant 0 : index
    %c0_3 = arith.constant 0 : index
    %4 = vector.load %arg3[%c0_2, %c0_3] : memref<8x1296xbf16, #tpu.memory_space<vmem>>, vector<8x1296xbf16>
    %c0_4 = arith.constant 0 : index
    %c0_5 = arith.constant 0 : index
    %5 = vector.load %arg4[%c0_4, %c0_5] : memref<1296x128xbf16, #tpu.memory_space<vmem>>, vector<1296x128xbf16>
    %cst = arith.constant dense<0.000000e+00> : vector<8x128xf32>
    %6 = tpu.matmul %4, %5, %cst {dimension_numbers = #tpu.dot_dimension_numbers<[1], [0], [0], [1], [0, 0, 1, 1], [], []>} : vector<8x1296xbf16>, vector<1296x128xbf16>, vector<8x128xf32> -> vector<8x128xf32>
    %7 = arith.addf %3, %6 : vector<8x128xf32>
    %c0_6 = arith.constant 0 : index
    %c0_7 = arith.constant 0 : index
    %8 = vector.load %arg6[%c0_6, %c0_7] : memref<8x128xf32, #tpu.memory_space<vmem>>, vector<8x128xf32>
    tpu.vector_store %arg6[%c0_6, %c0_7], %7 {strides = array<i32>} : memref<8x128xf32, #tpu.memory_space<vmem>>, vector<8x128xf32>,
    %c0_i32_8 = arith.constant 0 : i32
    %9 = arith.cmpi eq, %arg2, %c0_i32_8 : i32
    %10 = arith.extui %9 : i1 to i32
    %c0_i32_9 = arith.constant 0 : i32
    %11 = arith.cmpi ne, %10, %c0_i32_9 : i32
    scf.if %11 {
      %c0_10 = arith.constant 0 : index
      %c0_11 = arith.constant 0 : index
      %12 = vector.load %arg6[%c0_10, %c0_11] : memref<8x128xf32, #tpu.memory_space<vmem>>, vector<8x128xf32>
      %cst_12 = arith.constant 0.000000e+00 : f32
      %13 = vector.broadcast %cst_12 : f32 to vector<8x128xf32>
      %14 = arith.maximumf %12, %13 : vector<8x128xf32>
      %c0_13 = arith.constant 0 : index
      %c0_14 = arith.constant 0 : index
      %15 = vector.load %arg5[%c0_13, %c0_14] : memref<8x128xf32, #tpu.memory_space<vmem>>, vector<8x128xf32>
      tpu.vector_store %arg5[%c0_13, %c0_14], %14 {strides = array<i32>} : memref<8x128xf32, #tpu.memory_space<vmem>>, vector<8x128xf32>,
    } else {
    }
    return
  }
  func.func @transform_0(%arg0: i32, %arg1: i32, %arg2: i32) -> (i32, i32) {
    %c0_i32 = arith.constant 0 : i32
    return %arg0, %arg2 : i32, i32
  }
  func.func @transform_1(%arg0: i32, %arg1: i32, %arg2: i32) -> (i32, i32) {
    %c0_i32 = arith.constant 0 : i32
    return %arg2, %arg1 : i32, i32
  }
  func.func @transform_2(%arg0: i32, %arg1: i32, %arg2: i32) -> (i32, i32) {
    %c0_i32 = arith.constant 0 : i32
    return %arg0, %arg1 : i32, i32
  }
}

module attributes {stable_mosaic.version = 11 : i64} {
  func.func @kernel(%arg0: i32, %arg1: i32, %arg2: i32, %arg3: memref<8x144xbf16, #tpu.memory_space<vmem>>, %arg4: memref<144x128xbf16, #tpu.memory_space<vmem>>, %arg5: memref<8x128xf32, #tpu.memory_space<vmem>>, %arg6: memref<8x128xf32, #tpu.memory_space<vmem>>) attributes {dimension_semantics = [#tpu.dimension_semantics<parallel>, #tpu.dimension_semantics<parallel>, #tpu.dimension_semantics<arbitrary>], iteration_bounds = array<i64: 1, 2, 1>, scalar_prefetch = 0 : i64, scratch_operands = 1 : i64, tpu.core_type = #tpu.core_type<tc>, window_params = [{transform_indices = @transform_0, window_bounds = array<i64: 8, 144>}, {transform_indices = @transform_1, window_bounds = array<i64: 144, 128>}, {transform_indices = @transform_2, window_bounds = array<i64: 8, 128>}]} {
    %c0_i32 = arith.constant 0 : i32
    %0 = arith.cmpi eq, %arg2, %c0_i32 : i32
    %1 = arith.extui %0 : i1 to i32
    %c0_i32_0 = arith.constant 0 : i32
    %2 = arith.cmpi ne, %1, %c0_i32_0 : i32
    scf.if %2 {
      %cst_10 = arith.constant 0.000000e+00 : f32
      %12 = vector.broadcast %cst_10 : f32 to vector<8x128xf32>
      %c0_11 = arith.constant 0 : index
      %c0_12 = arith.constant 0 : index
      %13 = vector.load %arg6[%c0_11, %c0_12] : memref<8x128xf32, #tpu.memory_space<vmem>>, vector<8x128xf32>
      tpu.vector_store %arg6[%c0_11, %c0_12], %12 {strides = array<i32>} : memref<8x128xf32, #tpu.memory_space<vmem>>, vector<8x128xf32>,
    } else {
    }
    %c0 = arith.constant 0 : index
    %c0_1 = arith.constant 0 : index
    %3 = vector.load %arg6[%c0, %c0_1] : memref<8x128xf32, #tpu.memory_space<vmem>>, vector<8x128xf32>
    %c0_2 = arith.constant 0 : index
    %c0_3 = arith.constant 0 : index
    %4 = vector.load %arg3[%c0_2, %c0_3] : memref<8x144xbf16, #tpu.memory_space<vmem>>, vector<8x144xbf16>
    %c0_4 = arith.constant 0 : index
    %c0_5 = arith.constant 0 : index
    %5 = vector.load %arg4[%c0_4, %c0_5] : memref<144x128xbf16, #tpu.memory_space<vmem>>, vector<144x128xbf16>
    %cst = arith.constant dense<0.000000e+00> : vector<8x128xf32>
    %6 = tpu.matmul %4, %5, %cst {dimension_numbers = #tpu.dot_dimension_numbers<[1], [0], [0], [1], [0, 0, 1, 1], [], []>} : vector<8x144xbf16>, vector<144x128xbf16>, vector<8x128xf32> -> vector<8x128xf32>
    %7 = arith.addf %3, %6 : vector<8x128xf32>
    %c0_6 = arith.constant 0 : index
    %c0_7 = arith.constant 0 : index
    %8 = vector.load %arg6[%c0_6, %c0_7] : memref<8x128xf32, #tpu.memory_space<vmem>>, vector<8x128xf32>
    tpu.vector_store %arg6[%c0_6, %c0_7], %7 {strides = array<i32>} : memref<8x128xf32, #tpu.memory_space<vmem>>, vector<8x128xf32>,
    %c0_i32_8 = arith.constant 0 : i32
    %9 = arith.cmpi eq, %arg2, %c0_i32_8 : i32
    %10 = arith.extui %9 : i1 to i32
    %c0_i32_9 = arith.constant 0 : i32
    %11 = arith.cmpi ne, %10, %c0_i32_9 : i32
    scf.if %11 {
      %c0_10 = arith.constant 0 : index
      %c0_11 = arith.constant 0 : index
      %12 = vector.load %arg6[%c0_10, %c0_11] : memref<8x128xf32, #tpu.memory_space<vmem>>, vector<8x128xf32>
      %c0_12 = arith.constant 0 : index
      %c0_13 = arith.constant 0 : index
      %13 = vector.load %arg5[%c0_12, %c0_13] : memref<8x128xf32, #tpu.memory_space<vmem>>, vector<8x128xf32>
      tpu.vector_store %arg5[%c0_12, %c0_13], %12 {strides = array<i32>} : memref<8x128xf32, #tpu.memory_space<vmem>>, vector<8x128xf32>,
    } else {
    }
    return
  }
  func.func @transform_0(%arg0: i32, %arg1: i32, %arg2: i32) -> (i32, i32) {
    %c0_i32 = arith.constant 0 : i32
    return %arg0, %arg2 : i32, i32
  }
  func.func @transform_1(%arg0: i32, %arg1: i32, %arg2: i32) -> (i32, i32) {
    %c0_i32 = arith.constant 0 : i32
    return %arg2, %arg1 : i32, i32
  }
  func.func @transform_2(%arg0: i32, %arg1: i32, %arg2: i32) -> (i32, i32) {
    %c0_i32 = arith.constant 0 : i32
    return %arg0, %arg1 : i32, i32
  }
}

module attributes {stable_mosaic.version = 11 : i64} {
  func.func @kernel(%arg0: i32, %arg1: i32, %arg2: i32, %arg3: memref<8x768xbf16, #tpu.memory_space<vmem>>, %arg4: memref<768x128xbf16, #tpu.memory_space<vmem>>, %arg5: memref<8x128xf32, #tpu.memory_space<vmem>>, %arg6: memref<8x128xf32, #tpu.memory_space<vmem>>, %arg7: memref<8x128xf32, #tpu.memory_space<vmem>>) attributes {dimension_semantics = [#tpu.dimension_semantics<parallel>, #tpu.dimension_semantics<parallel>, #tpu.dimension_semantics<arbitrary>], iteration_bounds = array<i64: 1, 2, 3>, scalar_prefetch = 0 : i64, scratch_operands = 1 : i64, tpu.core_type = #tpu.core_type<tc>, window_params = [{transform_indices = @transform_0, window_bounds = array<i64: 8, 768>}, {transform_indices = @transform_1, window_bounds = array<i64: 768, 128>}, {transform_indices = @transform_2, window_bounds = array<i64: 8, 128>}, {transform_indices = @transform_3, window_bounds = array<i64: 8, 128>}]} {
    %c0_i32 = arith.constant 0 : i32
    %0 = arith.cmpi eq, %arg2, %c0_i32 : i32
    %1 = arith.extui %0 : i1 to i32
    %c0_i32_0 = arith.constant 0 : i32
    %2 = arith.cmpi ne, %1, %c0_i32_0 : i32
    scf.if %2 {
      %cst_9 = arith.constant 0.000000e+00 : f32
      %12 = vector.broadcast %cst_9 : f32 to vector<8x128xf32>
      %c0_10 = arith.constant 0 : index
      %c0_11 = arith.constant 0 : index
      %13 = vector.load %arg7[%c0_10, %c0_11] : memref<8x128xf32, #tpu.memory_space<vmem>>, vector<8x128xf32>
      tpu.vector_store %arg7[%c0_10, %c0_11], %12 {strides = array<i32>} : memref<8x128xf32, #tpu.memory_space<vmem>>, vector<8x128xf32>,
    } else {
    }
    %c0 = arith.constant 0 : index
    %c0_1 = arith.constant 0 : index
    %3 = vector.load %arg7[%c0, %c0_1] : memref<8x128xf32, #tpu.memory_space<vmem>>, vector<8x128xf32>
    %c0_2 = arith.constant 0 : index
    %c0_3 = arith.constant 0 : index
    %4 = vector.load %arg3[%c0_2, %c0_3] : memref<8x768xbf16, #tpu.memory_space<vmem>>, vector<8x768xbf16>
    %c0_4 = arith.constant 0 : index
    %c0_5 = arith.constant 0 : index
    %5 = vector.load %arg4[%c0_4, %c0_5] : memref<768x128xbf16, #tpu.memory_space<vmem>>, vector<768x128xbf16>
    %cst = arith.constant dense<0.000000e+00> : vector<8x128xf32>
    %6 = tpu.matmul %4, %5, %cst {dimension_numbers = #tpu.dot_dimension_numbers<[1], [0], [0], [1], [0, 0, 1, 1], [], []>} : vector<8x768xbf16>, vector<768x128xbf16>, vector<8x128xf32> -> vector<8x128xf32>
    %7 = arith.addf %3, %6 : vector<8x128xf32>
    %c0_6 = arith.constant 0 : index
    %c0_7 = arith.constant 0 : index
    %8 = vector.load %arg7[%c0_6, %c0_7] : memref<8x128xf32, #tpu.memory_space<vmem>>, vector<8x128xf32>
    tpu.vector_store %arg7[%c0_6, %c0_7], %7 {strides = array<i32>} : memref<8x128xf32, #tpu.memory_space<vmem>>, vector<8x128xf32>,
    %c2_i32 = arith.constant 2 : i32
    %9 = arith.cmpi eq, %arg2, %c2_i32 : i32
    %10 = arith.extui %9 : i1 to i32
    %c0_i32_8 = arith.constant 0 : i32
    %11 = arith.cmpi ne, %10, %c0_i32_8 : i32
    scf.if %11 {
      %c0_9 = arith.constant 0 : index
      %c0_10 = arith.constant 0 : index
      %12 = vector.load %arg7[%c0_9, %c0_10] : memref<8x128xf32, #tpu.memory_space<vmem>>, vector<8x128xf32>
      %c0_11 = arith.constant 0 : index
      %c0_12 = arith.constant 0 : index
      %13 = vector.load %arg5[%c0_11, %c0_12] : memref<8x128xf32, #tpu.memory_space<vmem>>, vector<8x128xf32>
      %14 = arith.addf %12, %13 : vector<8x128xf32>
      %cst_13 = arith.constant 0.000000e+00 : f32
      %15 = vector.broadcast %cst_13 : f32 to vector<8x128xf32>
      %16 = arith.maximumf %14, %15 : vector<8x128xf32>
      %c0_14 = arith.constant 0 : index
      %c0_15 = arith.constant 0 : index
      %17 = vector.load %arg6[%c0_14, %c0_15] : memref<8x128xf32, #tpu.memory_space<vmem>>, vector<8x128xf32>
      tpu.vector_store %arg6[%c0_14, %c0_15], %16 {strides = array<i32>} : memref<8x128xf32, #tpu.memory_space<vmem>>, vector<8x128xf32>,
    } else {
    }
    return
  }
  func.func @transform_0(%arg0: i32, %arg1: i32, %arg2: i32) -> (i32, i32) {
    %c0_i32 = arith.constant 0 : i32
    return %arg0, %arg2 : i32, i32
  }
  func.func @transform_1(%arg0: i32, %arg1: i32, %arg2: i32) -> (i32, i32) {
    %c0_i32 = arith.constant 0 : i32
    return %arg2, %arg1 : i32, i32
  }
  func.func @transform_2(%arg0: i32, %arg1: i32, %arg2: i32) -> (i32, i32) {
    %c0_i32 = arith.constant 0 : i32
    return %arg0, %arg1 : i32, i32
  }
  func.func @transform_3(%arg0: i32, %arg1: i32, %arg2: i32) -> (i32, i32) {
    %c0_i32 = arith.constant 0 : i32
    return %arg0, %arg1 : i32, i32
  }
}

module attributes {stable_mosaic.version = 11 : i64} {
  func.func @kernel(%arg0: i32, %arg1: i32, %arg2: i32, %arg3: memref<8x768xbf16, #tpu.memory_space<vmem>>, %arg4: memref<768x256xbf16, #tpu.memory_space<vmem>>, %arg5: memref<8x256xf32, #tpu.memory_space<vmem>>, %arg6: memref<8x256xf32, #tpu.memory_space<vmem>>) attributes {dimension_semantics = [#tpu.dimension_semantics<parallel>, #tpu.dimension_semantics<parallel>, #tpu.dimension_semantics<arbitrary>], iteration_bounds = array<i64: 1, 2, 3>, scalar_prefetch = 0 : i64, scratch_operands = 1 : i64, tpu.core_type = #tpu.core_type<tc>, window_params = [{transform_indices = @transform_0, window_bounds = array<i64: 8, 768>}, {transform_indices = @transform_1, window_bounds = array<i64: 768, 256>}, {transform_indices = @transform_2, window_bounds = array<i64: 8, 256>}]} {
    %c0_i32 = arith.constant 0 : i32
    %0 = arith.cmpi eq, %arg2, %c0_i32 : i32
    %1 = arith.extui %0 : i1 to i32
    %c0_i32_0 = arith.constant 0 : i32
    %2 = arith.cmpi ne, %1, %c0_i32_0 : i32
    scf.if %2 {
      %cst_9 = arith.constant 0.000000e+00 : f32
      %12 = vector.broadcast %cst_9 : f32 to vector<8x256xf32>
      %c0_10 = arith.constant 0 : index
      %c0_11 = arith.constant 0 : index
      %13 = vector.load %arg6[%c0_10, %c0_11] : memref<8x256xf32, #tpu.memory_space<vmem>>, vector<8x256xf32>
      tpu.vector_store %arg6[%c0_10, %c0_11], %12 {strides = array<i32>} : memref<8x256xf32, #tpu.memory_space<vmem>>, vector<8x256xf32>,
    } else {
    }
    %c0 = arith.constant 0 : index
    %c0_1 = arith.constant 0 : index
    %3 = vector.load %arg6[%c0, %c0_1] : memref<8x256xf32, #tpu.memory_space<vmem>>, vector<8x256xf32>
    %c0_2 = arith.constant 0 : index
    %c0_3 = arith.constant 0 : index
    %4 = vector.load %arg3[%c0_2, %c0_3] : memref<8x768xbf16, #tpu.memory_space<vmem>>, vector<8x768xbf16>
    %c0_4 = arith.constant 0 : index
    %c0_5 = arith.constant 0 : index
    %5 = vector.load %arg4[%c0_4, %c0_5] : memref<768x256xbf16, #tpu.memory_space<vmem>>, vector<768x256xbf16>
    %cst = arith.constant dense<0.000000e+00> : vector<8x256xf32>
    %6 = tpu.matmul %4, %5, %cst {dimension_numbers = #tpu.dot_dimension_numbers<[1], [0], [0], [1], [0, 0, 1, 1], [], []>} : vector<8x768xbf16>, vector<768x256xbf16>, vector<8x256xf32> -> vector<8x256xf32>
    %7 = arith.addf %3, %6 : vector<8x256xf32>
    %c0_6 = arith.constant 0 : index
    %c0_7 = arith.constant 0 : index
    %8 = vector.load %arg6[%c0_6, %c0_7] : memref<8x256xf32, #tpu.memory_space<vmem>>, vector<8x256xf32>
    tpu.vector_store %arg6[%c0_6, %c0_7], %7 {strides = array<i32>} : memref<8x256xf32, #tpu.memory_space<vmem>>, vector<8x256xf32>,
    %c2_i32 = arith.constant 2 : i32
    %9 = arith.cmpi eq, %arg2, %c2_i32 : i32
    %10 = arith.extui %9 : i1 to i32
    %c0_i32_8 = arith.constant 0 : i32
    %11 = arith.cmpi ne, %10, %c0_i32_8 : i32
    scf.if %11 {
      %c0_9 = arith.constant 0 : index
      %c0_10 = arith.constant 0 : index
      %12 = vector.load %arg6[%c0_9, %c0_10] : memref<8x256xf32, #tpu.memory_space<vmem>>, vector<8x256xf32>
      %cst_11 = arith.constant 0.000000e+00 : f32
      %13 = vector.broadcast %cst_11 : f32 to vector<8x256xf32>
      %14 = arith.maximumf %12, %13 : vector<8x256xf32>
      %c0_12 = arith.constant 0 : index
      %c0_13 = arith.constant 0 : index
      %15 = vector.load %arg5[%c0_12, %c0_13] : memref<8x256xf32, #tpu.memory_space<vmem>>, vector<8x256xf32>
      tpu.vector_store %arg5[%c0_12, %c0_13], %14 {strides = array<i32>} : memref<8x256xf32, #tpu.memory_space<vmem>>, vector<8x256xf32>,
    } else {
    }
    return
  }
  func.func @transform_0(%arg0: i32, %arg1: i32, %arg2: i32) -> (i32, i32) {
    %c0_i32 = arith.constant 0 : i32
    return %arg0, %arg2 : i32, i32
  }
  func.func @transform_1(%arg0: i32, %arg1: i32, %arg2: i32) -> (i32, i32) {
    %c0_i32 = arith.constant 0 : i32
    return %arg2, %arg1 : i32, i32
  }
  func.func @transform_2(%arg0: i32, %arg1: i32, %arg2: i32) -> (i32, i32) {
    %c0_i32 = arith.constant 0 : i32
    return %arg0, %arg1 : i32, i32
  }
}

module attributes {stable_mosaic.version = 11 : i64} {
  func.func @kernel(%arg0: i32, %arg1: i32, %arg2: i32, %arg3: memref<8x256xbf16, #tpu.memory_space<vmem>>, %arg4: memref<256x256xbf16, #tpu.memory_space<vmem>>, %arg5: memref<8x256xf32, #tpu.memory_space<vmem>>, %arg6: memref<8x256xf32, #tpu.memory_space<vmem>>) attributes {dimension_semantics = [#tpu.dimension_semantics<parallel>, #tpu.dimension_semantics<parallel>, #tpu.dimension_semantics<arbitrary>], iteration_bounds = array<i64: 1, 2, 1>, scalar_prefetch = 0 : i64, scratch_operands = 1 : i64, tpu.core_type = #tpu.core_type<tc>, window_params = [{transform_indices = @transform_0, window_bounds = array<i64: 8, 256>}, {transform_indices = @transform_1, window_bounds = array<i64: 256, 256>}, {transform_indices = @transform_2, window_bounds = array<i64: 8, 256>}]} {
    %c0_i32 = arith.constant 0 : i32
    %0 = arith.cmpi eq, %arg2, %c0_i32 : i32
    %1 = arith.extui %0 : i1 to i32
    %c0_i32_0 = arith.constant 0 : i32
    %2 = arith.cmpi ne, %1, %c0_i32_0 : i32
    scf.if %2 {
      %cst_10 = arith.constant 0.000000e+00 : f32
      %12 = vector.broadcast %cst_10 : f32 to vector<8x256xf32>
      %c0_11 = arith.constant 0 : index
      %c0_12 = arith.constant 0 : index
      %13 = vector.load %arg6[%c0_11, %c0_12] : memref<8x256xf32, #tpu.memory_space<vmem>>, vector<8x256xf32>
      tpu.vector_store %arg6[%c0_11, %c0_12], %12 {strides = array<i32>} : memref<8x256xf32, #tpu.memory_space<vmem>>, vector<8x256xf32>,
    } else {
    }
    %c0 = arith.constant 0 : index
    %c0_1 = arith.constant 0 : index
    %3 = vector.load %arg6[%c0, %c0_1] : memref<8x256xf32, #tpu.memory_space<vmem>>, vector<8x256xf32>
    %c0_2 = arith.constant 0 : index
    %c0_3 = arith.constant 0 : index
    %4 = vector.load %arg3[%c0_2, %c0_3] : memref<8x256xbf16, #tpu.memory_space<vmem>>, vector<8x256xbf16>
    %c0_4 = arith.constant 0 : index
    %c0_5 = arith.constant 0 : index
    %5 = vector.load %arg4[%c0_4, %c0_5] : memref<256x256xbf16, #tpu.memory_space<vmem>>, vector<256x256xbf16>
    %cst = arith.constant dense<0.000000e+00> : vector<8x256xf32>
    %6 = tpu.matmul %4, %5, %cst {dimension_numbers = #tpu.dot_dimension_numbers<[1], [0], [0], [1], [0, 0, 1, 1], [], []>} : vector<8x256xbf16>, vector<256x256xbf16>, vector<8x256xf32> -> vector<8x256xf32>
    %7 = arith.addf %3, %6 : vector<8x256xf32>
    %c0_6 = arith.constant 0 : index
    %c0_7 = arith.constant 0 : index
    %8 = vector.load %arg6[%c0_6, %c0_7] : memref<8x256xf32, #tpu.memory_space<vmem>>, vector<8x256xf32>
    tpu.vector_store %arg6[%c0_6, %c0_7], %7 {strides = array<i32>} : memref<8x256xf32, #tpu.memory_space<vmem>>, vector<8x256xf32>,
    %c0_i32_8 = arith.constant 0 : i32
    %9 = arith.cmpi eq, %arg2, %c0_i32_8 : i32
    %10 = arith.extui %9 : i1 to i32
    %c0_i32_9 = arith.constant 0 : i32
    %11 = arith.cmpi ne, %10, %c0_i32_9 : i32
    scf.if %11 {
      %c0_10 = arith.constant 0 : index
      %c0_11 = arith.constant 0 : index
      %12 = vector.load %arg6[%c0_10, %c0_11] : memref<8x256xf32, #tpu.memory_space<vmem>>, vector<8x256xf32>
      %c0_12 = arith.constant 0 : index
      %c0_13 = arith.constant 0 : index
      %13 = vector.load %arg5[%c0_12, %c0_13] : memref<8x256xf32, #tpu.memory_space<vmem>>, vector<8x256xf32>
      tpu.vector_store %arg5[%c0_12, %c0_13], %12 {strides = array<i32>} : memref<8x256xf32, #tpu.memory_space<vmem>>, vector<8x256xf32>,
    } else {
    }
    return
  }
  func.func @transform_0(%arg0: i32, %arg1: i32, %arg2: i32) -> (i32, i32) {
    %c0_i32 = arith.constant 0 : i32
    return %arg0, %arg2 : i32, i32
  }
  func.func @transform_1(%arg0: i32, %arg1: i32, %arg2: i32) -> (i32, i32) {
    %c0_i32 = arith.constant 0 : i32
    return %arg2, %arg1 : i32, i32
  }
  func.func @transform_2(%arg0: i32, %arg1: i32, %arg2: i32) -> (i32, i32) {
    %c0_i32 = arith.constant 0 : i32
    return %arg0, %arg1 : i32, i32
  }
}

module attributes {stable_mosaic.version = 11 : i64} {
  func.func @kernel(%arg0: i32, %arg1: i32, %arg2: i32, %arg3: memref<8x768xbf16, #tpu.memory_space<vmem>>, %arg4: memref<768x256xbf16, #tpu.memory_space<vmem>>, %arg5: memref<8x256xf32, #tpu.memory_space<vmem>>, %arg6: memref<8x256xf32, #tpu.memory_space<vmem>>, %arg7: memref<8x256xf32, #tpu.memory_space<vmem>>) attributes {dimension_semantics = [#tpu.dimension_semantics<parallel>, #tpu.dimension_semantics<parallel>, #tpu.dimension_semantics<arbitrary>], iteration_bounds = array<i64: 1, 2, 6>, scalar_prefetch = 0 : i64, scratch_operands = 1 : i64, tpu.core_type = #tpu.core_type<tc>, window_params = [{transform_indices = @transform_0, window_bounds = array<i64: 8, 768>}, {transform_indices = @transform_1, window_bounds = array<i64: 768, 256>}, {transform_indices = @transform_2, window_bounds = array<i64: 8, 256>}, {transform_indices = @transform_3, window_bounds = array<i64: 8, 256>}]} {
    %c0_i32 = arith.constant 0 : i32
    %0 = arith.cmpi eq, %arg2, %c0_i32 : i32
    %1 = arith.extui %0 : i1 to i32
    %c0_i32_0 = arith.constant 0 : i32
    %2 = arith.cmpi ne, %1, %c0_i32_0 : i32
    scf.if %2 {
      %cst_9 = arith.constant 0.000000e+00 : f32
      %12 = vector.broadcast %cst_9 : f32 to vector<8x256xf32>
      %c0_10 = arith.constant 0 : index
      %c0_11 = arith.constant 0 : index
      %13 = vector.load %arg7[%c0_10, %c0_11] : memref<8x256xf32, #tpu.memory_space<vmem>>, vector<8x256xf32>
      tpu.vector_store %arg7[%c0_10, %c0_11], %12 {strides = array<i32>} : memref<8x256xf32, #tpu.memory_space<vmem>>, vector<8x256xf32>,
    } else {
    }
    %c0 = arith.constant 0 : index
    %c0_1 = arith.constant 0 : index
    %3 = vector.load %arg7[%c0, %c0_1] : memref<8x256xf32, #tpu.memory_space<vmem>>, vector<8x256xf32>
    %c0_2 = arith.constant 0 : index
    %c0_3 = arith.constant 0 : index
    %4 = vector.load %arg3[%c0_2, %c0_3] : memref<8x768xbf16, #tpu.memory_space<vmem>>, vector<8x768xbf16>
    %c0_4 = arith.constant 0 : index
    %c0_5 = arith.constant 0 : index
    %5 = vector.load %arg4[%c0_4, %c0_5] : memref<768x256xbf16, #tpu.memory_space<vmem>>, vector<768x256xbf16>
    %cst = arith.constant dense<0.000000e+00> : vector<8x256xf32>
    %6 = tpu.matmul %4, %5, %cst {dimension_numbers = #tpu.dot_dimension_numbers<[1], [0], [0], [1], [0, 0, 1, 1], [], []>} : vector<8x768xbf16>, vector<768x256xbf16>, vector<8x256xf32> -> vector<8x256xf32>
    %7 = arith.addf %3, %6 : vector<8x256xf32>
    %c0_6 = arith.constant 0 : index
    %c0_7 = arith.constant 0 : index
    %8 = vector.load %arg7[%c0_6, %c0_7] : memref<8x256xf32, #tpu.memory_space<vmem>>, vector<8x256xf32>
    tpu.vector_store %arg7[%c0_6, %c0_7], %7 {strides = array<i32>} : memref<8x256xf32, #tpu.memory_space<vmem>>, vector<8x256xf32>,
    %c5_i32 = arith.constant 5 : i32
    %9 = arith.cmpi eq, %arg2, %c5_i32 : i32
    %10 = arith.extui %9 : i1 to i32
    %c0_i32_8 = arith.constant 0 : i32
    %11 = arith.cmpi ne, %10, %c0_i32_8 : i32
    scf.if %11 {
      %c0_9 = arith.constant 0 : index
      %c0_10 = arith.constant 0 : index
      %12 = vector.load %arg7[%c0_9, %c0_10] : memref<8x256xf32, #tpu.memory_space<vmem>>, vector<8x256xf32>
      %c0_11 = arith.constant 0 : index
      %c0_12 = arith.constant 0 : index
      %13 = vector.load %arg5[%c0_11, %c0_12] : memref<8x256xf32, #tpu.memory_space<vmem>>, vector<8x256xf32>
      %14 = arith.addf %12, %13 : vector<8x256xf32>
      %cst_13 = arith.constant 0.000000e+00 : f32
      %15 = vector.broadcast %cst_13 : f32 to vector<8x256xf32>
      %16 = arith.maximumf %14, %15 : vector<8x256xf32>
      %c0_14 = arith.constant 0 : index
      %c0_15 = arith.constant 0 : index
      %17 = vector.load %arg6[%c0_14, %c0_15] : memref<8x256xf32, #tpu.memory_space<vmem>>, vector<8x256xf32>
      tpu.vector_store %arg6[%c0_14, %c0_15], %16 {strides = array<i32>} : memref<8x256xf32, #tpu.memory_space<vmem>>, vector<8x256xf32>,
    } else {
    }
    return
  }
  func.func @transform_0(%arg0: i32, %arg1: i32, %arg2: i32) -> (i32, i32) {
    %c0_i32 = arith.constant 0 : i32
    return %arg0, %arg2 : i32, i32
  }
  func.func @transform_1(%arg0: i32, %arg1: i32, %arg2: i32) -> (i32, i32) {
    %c0_i32 = arith.constant 0 : i32
    return %arg2, %arg1 : i32, i32
  }
  func.func @transform_2(%arg0: i32, %arg1: i32, %arg2: i32) -> (i32, i32) {
    %c0_i32 = arith.constant 0 : i32
    return %arg0, %arg1 : i32, i32
  }
  func.func @transform_3(%arg0: i32, %arg1: i32, %arg2: i32) -> (i32, i32) {
    %c0_i32 = arith.constant 0 : i32
    return %arg0, %arg1 : i32, i32
  }
}

module attributes {stable_mosaic.version = 11 : i64} {
  func.func @kernel(%arg0: i32, %arg1: memref<2x1x512xf32, #tpu.memory_space<vmem>>, %arg2: memref<2x512xf32, #tpu.memory_space<vmem>>, %arg3: memref<2x512xf32, #tpu.memory_space<vmem>>) attributes {dimension_semantics = [#tpu.dimension_semantics<arbitrary>], iteration_bounds = array<i64: 1>, scalar_prefetch = 0 : i64, scratch_operands = 1 : i64, tpu.core_type = #tpu.core_type<tc>, window_params = [{transform_indices = @transform_0, window_bounds = array<i64: 2, 1, 512>}, {pipeline_mode = #tpu.pipeline_mode<synchronous>, transform_indices = @transform_1, window_bounds = array<i64: 2, 512>}]} {
    %c0_i32 = arith.constant 0 : i32
    %0 = arith.cmpi eq, %arg0, %c0_i32 : i32
    %1 = arith.extui %0 : i1 to i32
    %c0_i32_0 = arith.constant 0 : i32
    %2 = arith.cmpi ne, %1, %c0_i32_0 : i32
    scf.if %2 {
      %cst_9 = arith.constant 0.000000e+00 : f32
      %11 = vector.broadcast %cst_9 : f32 to vector<2x512xf32>
      %c0_10 = arith.constant 0 : index
      %c0_11 = arith.constant 0 : index
      %12 = vector.load %arg3[%c0_10, %c0_11] : memref<2x512xf32, #tpu.memory_space<vmem>>, vector<2x512xf32>
      tpu.vector_store %arg3[%c0_10, %c0_11], %11 {strides = array<i32>} : memref<2x512xf32, #tpu.memory_space<vmem>>, vector<2x512xf32>,
    } else {
    }
    %c0 = arith.constant 0 : index
    %c0_1 = arith.constant 0 : index
    %3 = vector.load %arg3[%c0, %c0_1] : memref<2x512xf32, #tpu.memory_space<vmem>>, vector<2x512xf32>
    %c0_2 = arith.constant 0 : index
    %c0_3 = arith.constant 0 : index
    %c0_4 = arith.constant 0 : index
    %4 = vector.load %arg1[%c0_2, %c0_3, %c0_4] : memref<2x1x512xf32, #tpu.memory_space<vmem>>, vector<2x1x512xf32>
    %cst = arith.constant dense<0.000000e+00> : vector<2x512xf32>
    %5 = vector.multi_reduction <add>, %4, %cst [1] : vector<2x1x512xf32> to vector<2x512xf32>
    %6 = arith.addf %3, %5 : vector<2x512xf32>
    %c0_5 = arith.constant 0 : index
    %c0_6 = arith.constant 0 : index
    %7 = vector.load %arg3[%c0_5, %c0_6] : memref<2x512xf32, #tpu.memory_space<vmem>>, vector<2x512xf32>
    tpu.vector_store %arg3[%c0_5, %c0_6], %6 {strides = array<i32>} : memref<2x512xf32, #tpu.memory_space<vmem>>, vector<2x512xf32>,
    %c0_i32_7 = arith.constant 0 : i32
    %8 = arith.cmpi eq, %arg0, %c0_i32_7 : i32
    %9 = arith.extui %8 : i1 to i32
    %c0_i32_8 = arith.constant 0 : i32
    %10 = arith.cmpi ne, %9, %c0_i32_8 : i32
    scf.if %10 {
      %c0_9 = arith.constant 0 : index
      %c0_10 = arith.constant 0 : index
      %11 = vector.load %arg3[%c0_9, %c0_10] : memref<2x512xf32, #tpu.memory_space<vmem>>, vector<2x512xf32>
      %cst_11 = arith.constant 1.000000e+00 : f32
      %12 = vector.broadcast %cst_11 : f32 to vector<2x512xf32>
      %13 = arith.mulf %11, %12 : vector<2x512xf32>
      %c0_12 = arith.constant 0 : index
      %c0_13 = arith.constant 0 : index
      %14 = vector.load %arg2[%c0_12, %c0_13] : memref<2x512xf32, #tpu.memory_space<vmem>>, vector<2x512xf32>
      tpu.vector_store %arg2[%c0_12, %c0_13], %13 {strides = array<i32>} : memref<2x512xf32, #tpu.memory_space<vmem>>, vector<2x512xf32>,
    } else {
    }
    return
  }
  func.func @transform_0(%arg0: i32) -> (i32, i32, i32) {
    %c0_i32 = arith.constant 0 : i32
    %c0_i32_0 = arith.constant 0 : i32
    %c0_i32_1 = arith.constant 0 : i32
    return %c0_i32, %arg0, %c0_i32_0 : i32, i32, i32
  }
  func.func @transform_1(%arg0: i32) -> (i32, i32) {
    %c0_i32 = arith.constant 0 : i32
    %c0_i32_0 = arith.constant 0 : i32
    %c0_i32_1 = arith.constant 0 : i32
    return %c0_i32, %c0_i32_0 : i32, i32
  }
}

</mosaic_0001>

<bundles_post_ra>
// kernel: resnet_forward.14
= control target key start
LH: loop header
LB: loop body
LE: loop exit
PB: predicated region body
PF: predicated region fallthrough
CT: control target
= control target key end

     0   :  { %s1250_s9 = smov 0   ;;  %s1252_s10 = smov 0   ;;  %s1520_s0 = inlined_call_operand.vmem [shape: bf16[512,147], index: 0, kind: input, shape index: {}]   ;;  %s1521_s1 = inlined_call_operand.vmem [shape: bf16[147,64], index: 1, kind: input, shape index: {}]   ;;  %s1522_s2 = inlined_call_operand.vmem [shape: f32[512,64], index: 2, kind: output, shape index: {}]  }
   0x1   :  { %s1254_s11 = smov 0  }
   0x2 LB: > { %s31_s12 = sadd.s32 1, %s1226_s10  ;;  %p1036_p0 = scmp.ge.s32.totalorder %s1230_s11, 1  ;;  %s1230_s11 = sphi %s1254_s11, %s12_s11   ;;  %s1226_s10 = sphi %s1252_s10, %s1524_s10   ;;  %s1222_s9 = sphi %s1250_s9, %s1523_s9  }
   0x3   : > { %p33_p1 = scmp.ge.s32.totalorder %s31_s12, 2  ;;  %p158_p2 = scmp.lt.s32.totalorder %s1230_s11, 3 }
   0x5   : > { %s1526_s12 = smov (%p33_p1, %s31_s12), 0  ;;  %p159_p3 = pnand %p1036_p0, %p158_p2 }
   0x6   : > { %s1037_s19 = sshll.u32 (!%p159_p3), %s1222_s9, 5 }
   0x7   : > { %162 = sbr.rel (%p159_p3) target bundleno = 320 (0x140), region = 28  ;;  %p198_p4 = scmp.lt.s32.totalorder (!%p159_p3), %s1037_s19, 63 }
   0xc   : > { %v1150_v0 = vld [vmem:[%s1521_s1 + $0x38] sm:$0xff]   ;;  %v1232_v1 = vmov 0   ;;  %v1151_v2 = vld [vmem:[%s1521_s1 + $0x30] sm:$0xff]   ;;  %v1152_v3 = vld [vmem:[%s1521_s1 + $0x28] sm:$0xff]   ;;  %s1528_s19 = smov (!%p198_p4, %s1037_s19), 63  ;;  %vm231_vm0 = vcmask 523264  }
   0xd   : > { %604 = vmatprep.subr.bf16.mxu0 %v1232_v1  ;;  %1103 = vmatprep.subr.bf16.mxu1 %v1232_v1  ;;  %v1153_v4 = vld [vmem:[%s1521_s1 + $0x20] sm:$0xff]   ;;  %s1102_s22 = sshll.u32 %s1528_s19, 3  ;;  %v1233_v5 = vmov 0.0   ;;  %v1154_v6 = vld [vmem:[%s1521_s1 + $0x18] sm:$0xff]   ;;  %vm548_vm1 = vcmask 154624   ;;  %v1155_v9 = vld [vmem:[%s1521_s1 + $0x10] sm:$0xff]  }
   0xe   : > { %605 = vmatpush1.bf16.msra.mxu0 %v1150_v0  ;;  %1113 = vmatpush1.bf16.msra.mxu1 %v1150_v0  ;;  %232 = vst.msk [vmem:[#allocation2] sm:$0xff] %vm231_vm0, %v1233_v5  ;;  %233 = vst.msk [vmem:[#allocation2 + $0x8] sm:$0xff] %vm231_vm0, %v1233_v5  ;;  %s1328_s25 = scalar_lea.vmem %s1520_s0, %s1102_s22  ;;  %vm597_vm2 = vcmask 1040384   ;;  %v1156_v10 = vld [vmem:[%s1521_s1 + $0x8] sm:$0xff]   ;;  %vm598_vm3 = vcmask 1041408   ;;  %v1234_v11 = vmov 65535   ;;  %s1417_s15 = scalar_lea.vmem %s1522_s2, %s1102_s22 }
   0xf   : > { %606 = vmatprep.subr.bf16.mxu0 %v1232_v1  ;;  %1104 = vmatprep.subr.bf16.mxu1 %v1232_v1  ;;  %234 = vst.msk [vmem:[#allocation2 + $0x10] sm:$0xff] %vm231_vm0, %v1233_v5  ;;  %235 = vst.msk [vmem:[#allocation2 + $0x18] sm:$0xff] %vm231_vm0, %v1233_v5  ;;  %v1162_v7 = vld [vmem:[%s1328_s25 + $0x4] ss:$8 sps:$4 sm:$0xff]   ;;  %v599_v12 = vsel %vm597_vm2, 4294967295, %v1234_v11 }
  0x10   : > { %236 = vst.msk [vmem:[#allocation2 + $0x20] sm:$0xff] %vm231_vm0, %v1233_v5  ;;  %237 = vst.msk [vmem:[#allocation2 + $0x28] sm:$0xff] %vm231_vm0, %v1233_v5  ;;  %v1165_v8 = vld [vmem:[%s1328_s25 + $0x84] ss:$8 sps:$4 sm:$0xff]   ;;  %1084 = vmatprep.mubr.msk.bf16.mxu0 %vm548_vm1, %v1162_v7  ;;  %v600_v15 = vsel %vm598_vm3, %v599_v12, 0 }
  0x11   : > { %238 = vst.msk [vmem:[#allocation2 + $0x30] sm:$0xff] %vm231_vm0, %v1233_v5  ;;  %239 = vst.msk [vmem:[#allocation2 + $0x38] sm:$0xff] %vm231_vm0, %v1233_v5  ;;  %1092 = vmatprep.mubr.msk.bf16.mxu1 %vm548_vm1, %v1165_v8  ;;  %v1157_v13 = vld [vmem:[%s1521_s1] sm:$0xff]   ;;  %v1158_v14 = vld [vmem:[%s1521_s1 + $0x48] ss:$0 sps:$4 sm:$0x33]  }
  0x12   : > { %607 = vmatpush1.bf16.msra.mxu0 %v1151_v2  ;;  %1114 = vmatpush1.bf16.msra.mxu1 %v1151_v2  ;;  %240 = vst.msk [vmem:[#allocation2 + $0x40] sm:$0xff] %vm231_vm0, %v1233_v5  ;;  %241 = vst.msk [vmem:[#allocation2 + $0x48] sm:$0xff] %vm231_vm0, %v1233_v5  ;;  %v602_v16 = vand.u32 %v1158_v14, %v600_v15  ;;  %v1159_v17 = vld [vmem:[%s1521_s1 + $0x40] sm:$0xff]   ;;  %v1166_v20 = vld [vmem:[%s1328_s25 + $0x14] ss:$8 sps:$4 sm:$0xff]  }
  0x13   : > { %608 = vmatprep.subr.bf16.mxu0 %v1232_v1  ;;  %1105 = vmatprep.subr.bf16.mxu1 %v1232_v1  ;;  %242 = vst.msk [vmem:[#allocation2 + $0x50] sm:$0xff] %vm231_vm0, %v1233_v5  ;;  %243 = vst.msk [vmem:[#allocation2 + $0x58] sm:$0xff] %vm231_vm0, %v1233_v5  ;;  %v1160_v18 = vld [vmem:[%s1328_s25] ss:$8 sps:$4 sm:$0xff]   ;;  %v1168_v21 = vld [vmem:[%s1328_s25 + $0x94] ss:$8 sps:$4 sm:$0xff]  }
  0x14   : > { %244 = vst.msk [vmem:[#allocation2 + $0x60] sm:$0xff] %vm231_vm0, %v1233_v5  ;;  %245 = vst.msk [vmem:[#allocation2 + $0x68] sm:$0xff] %vm231_vm0, %v1233_v5  ;;  %v1163_v19 = vld [vmem:[%s1328_s25 + $0x80] ss:$8 sps:$4 sm:$0xff]   ;;  %v1170_v22 = vld [vmem:[%s1328_s25 + $0x10] ss:$8 sps:$4 sm:$0xff]  }
  0x15   : > { %246 = vst.msk [vmem:[#allocation2 + $0x70] sm:$0xff] %vm231_vm0, %v1233_v5  ;;  %247 = vst.msk [vmem:[#allocation2 + $0x78] sm:$0xff] %vm231_vm0, %v1233_v5  ;;  %v1171_v23 = vld [vmem:[%s1328_s25 + $0x90] ss:$8 sps:$4 sm:$0xff]   ;;  %v1172_v24 = vld [vmem:[%s1328_s25 + $0x24] ss:$8 sps:$4 sm:$0xff]  }
  0x16   : > { %609 = vmatpush1.bf16.msra.mxu0 %v1152_v3  ;;  %1115 = vmatpush1.bf16.msra.mxu1 %v1152_v3  ;;  %248 = vst.msk [vmem:[#allocation2 + $0x80] sm:$0xff] %vm231_vm0, %v1233_v5  ;;  %249 = vst.msk [vmem:[#allocation2 + $0x88] sm:$0xff] %vm231_vm0, %v1233_v5  ;;  %v1174_v25 = vld [vmem:[%s1328_s25 + $0xa4] ss:$8 sps:$4 sm:$0xff]   ;;  %v1176_v26 = vld [vmem:[%s1328_s25 + $0x20] ss:$8 sps:$4 sm:$0xff]  }
  0x17   : > { %610 = vmatprep.subr.bf16.mxu0 %v1232_v1  ;;  %1106 = vmatprep.subr.bf16.mxu1 %v1232_v1  ;;  %250 = vst.msk [vmem:[#allocation2 + $0x90] sm:$0xff] %vm231_vm0, %v1233_v5  ;;  %251 = vst.msk [vmem:[#allocation2 + $0x98] sm:$0xff] %vm231_vm0, %v1233_v5  ;;  %v1177_v27 = vld [vmem:[%s1328_s25 + $0xa0] ss:$8 sps:$4 sm:$0xff]   ;;  %v1178_v28 = vld [vmem:[%s1328_s25 + $0x34] ss:$8 sps:$4 sm:$0xff]  }
  0x18   : > { %252 = vst.msk [vmem:[#allocation2 + $0xa0] sm:$0xff] %vm231_vm0, %v1233_v5  ;;  %253 = vst.msk [vmem:[#allocation2 + $0xa8] sm:$0xff] %vm231_vm0, %v1233_v5  ;;  %v1180_v29 = vld [vmem:[%s1328_s25 + $0xb4] ss:$8 sps:$4 sm:$0xff]   ;;  %v1182_v30 = vld [vmem:[%s1328_s25 + $0x30] ss:$8 sps:$4 sm:$0xff]  }
  0x19   : > { %254 = vst.msk [vmem:[#allocation2 + $0xb0] sm:$0xff] %vm231_vm0, %v1233_v5  ;;  %255 = vst.msk [vmem:[#allocation2 + $0xb8] sm:$0xff] %vm231_vm0, %v1233_v5  ;;  %v1183_v31 = vld [vmem:[%s1328_s25 + $0xb0] ss:$8 sps:$4 sm:$0xff]   ;;  %v1184_v32 = vld [vmem:[%s1328_s25 + $0x44] ss:$8 sps:$4 sm:$0xff]  }
  0x1a   : > { %256 = vst.msk [vmem:[#allocation2 + $0xc0] sm:$0xff] %vm231_vm0, %v1233_v5  ;;  %257 = vst.msk [vmem:[#allocation2 + $0xc8] sm:$0xff] %vm231_vm0, %v1233_v5  ;;  %611 = vmatpush1.bf16.msra.mxu0 %v1153_v4  ;;  %1116 = vmatpush1.bf16.msra.mxu1 %v1153_v4  ;;  %v1186_v33 = vld [vmem:[%s1328_s25 + $0xc4] ss:$8 sps:$4 sm:$0xff]   ;;  %v1188_v34 = vld [vmem:[%s1328_s25 + $0x40] ss:$8 sps:$4 sm:$0xff]  }
  0x1b   : > { %258 = vst.msk [vmem:[#allocation2 + $0xd0] sm:$0xff] %vm231_vm0, %v1233_v5  ;;  %259 = vst.msk [vmem:[#allocation2 + $0xd8] sm:$0xff] %vm231_vm0, %v1233_v5  ;;  %612 = vmatprep.subr.bf16.mxu0 %v1232_v1  ;;  %1107 = vmatprep.subr.bf16.mxu1 %v1232_v1  ;;  %v1189_v35 = vld [vmem:[%s1328_s25 + $0xc0] ss:$8 sps:$4 sm:$0xff]   ;;  %v1190_v36 = vld [vmem:[%s1328_s25 + $0x54] ss:$8 sps:$4 sm:$0xff]  }
  0x1c   : > { %260 = vst.msk [vmem:[#allocation2 + $0xe0] sm:$0xff] %vm231_vm0, %v1233_v5  ;;  %261 = vst.msk [vmem:[#allocation2 + $0xe8] sm:$0xff] %vm231_vm0, %v1233_v5  ;;  %v1192_v37 = vld [vmem:[%s1328_s25 + $0xd4] ss:$8 sps:$4 sm:$0xff]   ;;  %v1194_v38 = vld [vmem:[%s1328_s25 + $0x50] ss:$8 sps:$4 sm:$0xff]  }
  0x1d   : > { %262 = vst.msk [vmem:[#allocation2 + $0xf0] sm:$0xff] %vm231_vm0, %v1233_v5  ;;  %263 = vst.msk [vmem:[#allocation2 + $0xf8] sm:$0xff] %vm231_vm0, %v1233_v5  ;;  %v1195_v39 = vld [vmem:[%s1328_s25 + $0xd0] ss:$8 sps:$4 sm:$0xff]   ;;  %v1196_v40 = vld [vmem:[%s1328_s25 + $0x64] ss:$8 sps:$4 sm:$0xff]  }
  0x1e   : > { %613 = vmatpush1.bf16.msra.mxu0 %v1154_v6  ;;  %1117 = vmatpush1.bf16.msra.mxu1 %v1154_v6  ;;  %v1198_v41 = vld [vmem:[%s1328_s25 + $0xe4] ss:$8 sps:$4 sm:$0xff]   ;;  %v1200_v42 = vld [vmem:[%s1328_s25 + $0x60] ss:$8 sps:$4 sm:$0xff]   ;;  %v1202_v44 = vld [vmem:[%s1328_s25 + $0x74] ss:$8 sps:$4 sm:$0xff]  }
  0x1f   : > { %614 = vmatprep.subr.bf16.mxu0 %v1232_v1  ;;  %1108 = vmatprep.subr.bf16.mxu1 %v1232_v1  ;;  %v1201_v43 = vld [vmem:[%s1328_s25 + $0xe0] ss:$8 sps:$4 sm:$0xff]   ;;  %v1204_v45 = vld [vmem:[%s1328_s25 + $0xf4] ss:$8 sps:$4 sm:$0xff]   ;;  %v1206_v46 = vld [vmem:[%s1328_s25 + $0x70] ss:$8 sps:$4 sm:$0xff]  }
  0x20   : > { %v1207_v47 = vld [vmem:[%s1328_s25 + $0xf0] ss:$8 sps:$4 sm:$0xff]   ;;  %v264_v48 = vld [vmem:[#allocation2] sm:$0xff]  ;;  %v265_v56 = vld [vmem:[#allocation2 + $0x8] sm:$0xff] }
  0x21   : > { %v280_v49 = vld [vmem:[#allocation2 + $0x80] sm:$0xff]  ;;  %v281_v57 = vld [vmem:[#allocation2 + $0x88] sm:$0xff]  ;;  %v266_v0 = vld [vmem:[#allocation2 + $0x10] sm:$0xff] }
  0x22   : > { %615 = vmatpush1.bf16.msra.mxu0 %v1155_v9  ;;  %1118 = vmatpush1.bf16.msra.mxu1 %v1155_v9  ;;  %v267_v6 = vld [vmem:[#allocation2 + $0x18] sm:$0xff] }
  0x23   : > { %616 = vmatprep.subr.bf16.mxu0 %v1232_v1  ;;  %1109 = vmatprep.subr.bf16.mxu1 %v1232_v1  ;;  %v283_v11 = vld [vmem:[#allocation2 + $0x98] sm:$0xff] }
  0x26   : > { %617 = vmatpush1.bf16.msra.mxu0 %v1156_v10  ;;  %1119 = vmatpush1.bf16.msra.mxu1 %v1156_v10 }
  0x27   : > { %618 = vmatprep.subr.bf16.mxu0 %v1232_v1  ;;  %1110 = vmatprep.subr.bf16.mxu1 %v1232_v1 }
  0x2a   : > { %619 = vmatpush1.bf16.msra.mxu0 %v1157_v13  ;;  %1120 = vmatpush1.bf16.msra.mxu1 %v1157_v13 }
  0x2b   : > { %632 = vmatprep.subr.bf16.mxu0 %v1232_v1  ;;  %1111 = vmatprep.subr.bf16.mxu1 %v1232_v1 }
  0x2e   : > { %633 = vmatpush2.bf16.msra.mxu0 %v602_v16  ;;  %1121 = vmatpush2.bf16.msra.mxu1 %v602_v16 }
  0x2f   : > { %634 = vmatprep.subr.bf16.mxu0 %v1232_v1  ;;  %1112 = vmatprep.subr.bf16.mxu1 %v1232_v1  ;;  %v282_v1 = vld [vmem:[#allocation2 + $0x90] sm:$0xff] }
  0x32   : > { %635 = vmatpush2.bf16.msra.mxu0 %v1159_v17  ;;  %1122 = vmatpush2.bf16.msra.mxu1 %v1159_v17 }
  0x35   : > { %637 = vmatmul.mubr.bf16.vlgmr.msra.gmra.mxu0 %v1160_v18  ;;  %701 = vmatmul.mubr.bf16.vlgmr.msra.gmra.mxu1 %v1163_v19  ;;  %v268_v18 = vld [vmem:[#allocation2 + $0x20] sm:$0xff] }
  0x36   : > { %1085 = vmatprep.mubr.msk.bf16.mxu0 %vm548_vm1, %v1166_v20  ;;  %1093 = vmatprep.mubr.msk.bf16.mxu1 %vm548_vm1, %v1168_v21 }
  0x3d   : > { %645 = vmatmul.mubr.bf16.gmra.mxu0 %v1170_v22  ;;  %709 = vmatmul.mubr.bf16.gmra.mxu1 %v1171_v23  ;;  %v284_v23 = vld [vmem:[#allocation2 + $0xa0] sm:$0xff] }
  0x3e   : > { %1086 = vmatprep.mubr.msk.bf16.mxu0 %vm548_vm1, %v1172_v24  ;;  %1094 = vmatprep.mubr.msk.bf16.mxu1 %vm548_vm1, %v1174_v25 }
  0x45   : > { %653 = vmatmul.mubr.bf16.gmra.mxu0 %v1176_v26  ;;  %717 = vmatmul.mubr.bf16.gmra.mxu1 %v1177_v27 }
  0x46   : > { %1087 = vmatprep.mubr.msk.bf16.mxu0 %vm548_vm1, %v1178_v28  ;;  %1095 = vmatprep.mubr.msk.bf16.mxu1 %vm548_vm1, %v1180_v29 }
  0x4d   : > { %661 = vmatmul.mubr.bf16.gmra.mxu0 %v1182_v30  ;;  %725 = vmatmul.mubr.bf16.gmra.mxu1 %v1183_v31  ;;  %v269_v30 = vld [vmem:[#allocation2 + $0x28] sm:$0xff] }
  0x4e   : > { %1088 = vmatprep.mubr.msk.bf16.mxu0 %vm548_vm1, %v1184_v32  ;;  %1096 = vmatprep.mubr.msk.bf16.mxu1 %vm548_vm1, %v1186_v33 }
  0x55   : > { %669 = vmatmul.mubr.bf16.gmra.mxu0 %v1188_v34  ;;  %733 = vmatmul.mubr.bf16.gmra.mxu1 %v1189_v35  ;;  %v285_v35 = vld [vmem:[#allocation2 + $0xa8] sm:$0xff] }
  0x56   : > { %1089 = vmatprep.mubr.msk.bf16.mxu0 %vm548_vm1, %v1190_v36  ;;  %1097 = vmatprep.mubr.msk.bf16.mxu1 %vm548_vm1, %v1192_v37 }
  0x5d   : > { %677 = vmatmul.mubr.bf16.gmra.mxu0 %v1194_v38  ;;  %741 = vmatmul.mubr.bf16.gmra.mxu1 %v1195_v39 }
  0x5e   : > { %1090 = vmatprep.mubr.msk.bf16.mxu0 %vm548_vm1, %v1196_v40  ;;  %1098 = vmatprep.mubr.msk.bf16.mxu1 %vm548_vm1, %v1198_v41 }
  0x65   : > { %685 = vmatmul.mubr.bf16.gmra.mxu0 %v1200_v42  ;;  %749 = vmatmul.mubr.bf16.gmra.mxu1 %v1201_v43  ;;  %v270_v42 = vld [vmem:[#allocation2 + $0x30] sm:$0xff] }
  0x66   : > { %1091 = vmatprep.mubr.msk.bf16.mxu0 %vm548_vm1, %v1202_v44  ;;  %1099 = vmatprep.mubr.msk.bf16.mxu1 %vm548_vm1, %v1204_v45 }
  0x6d   : > { %693 = vmatmul.mubr.bf16.gmra.mxu0 %v1206_v46  ;;  %757 = vmatmul.mubr.bf16.gmra.mxu1 %v1207_v47  ;;  %v286_v47 = vld [vmem:[#allocation2 + $0xb0] sm:$0xff] }
  0xf5   : > { %v638_v50 = vpop.f32.mrf.mxu0  ;;  %v702_v51 = vpop.f32.mrf.mxu1 }
  0xf6   : > { %v765_v52 = vadd.f32 %v638_v50, %v264_v48  ;;  %v781_v53 = vadd.f32 %v702_v51, %v280_v49 }
  0xf7   : > { %v640_v54 = vpop.f32.mrf.mxu0  ;;  %v704_v55 = vpop.f32.mrf.mxu1 }
  0xf8   : > { %798 = vst.msk [vmem:[#allocation2] sm:$0xff] %vm231_vm0, %v765_v52  ;;  %814 = vst.msk [vmem:[#allocation2 + $0x80] sm:$0xff] %vm231_vm0, %v781_v53  ;;  %v271_v54 = vld [vmem:[#allocation2 + $0x38] sm:$0xff] }
  0xf9   : > { %v641_v58 = vpop.f32.mrf.mxu0  ;;  %v705_v59 = vpop.f32.mrf.mxu1 }
  0xfa   : > { %v766_v60 = vadd.f32 %v641_v58, %v265_v56  ;;  %v782_v61 = vadd.f32 %v705_v59, %v281_v57  ;;  %v287_v59 = vld [vmem:[#allocation2 + $0xb8] sm:$0xff] }
  0xfb   : > { %v643_v62 = vpop.f32.mrf.mxu0  ;;  %v707_v63 = vpop.f32.mrf.mxu1 }
  0xfc   : > { %799 = vst.msk [vmem:[#allocation2 + $0x8] sm:$0xff] %vm231_vm0, %v766_v60  ;;  %815 = vst.msk [vmem:[#allocation2 + $0x88] sm:$0xff] %vm231_vm0, %v782_v61 }
  0xfd   : > { %v646_v2 = vpop.f32.mrf.mxu0  ;;  %v710_v3 = vpop.f32.mrf.mxu1 }
  0xfe   : > { %v767_v4 = vadd.f32 %v646_v2, %v266_v0  ;;  %v783_v5 = vadd.f32 %v710_v3, %v282_v1  ;;  %v272_v2 = vld [vmem:[#allocation2 + $0x40] sm:$0xff] }
  0xff   : > { %v833_v7 = vld [vmem:[#allocation2] sm:$0xff]  ;;  %v648_v9 = vpop.f32.mrf.mxu0  ;;  %v712_v10 = vpop.f32.mrf.mxu1 }
 0x100   : > { %v849_v8 = vld [vmem:[#allocation2 + $0x80] sm:$0xff]  ;;  %v865_v12 = vmax.f32 %v833_v7, 0.0  ;;  %800 = vst.msk [vmem:[#allocation2 + $0x10] sm:$0xff] %vm231_vm0, %v767_v4  ;;  %816 = vst.msk [vmem:[#allocation2 + $0x90] sm:$0xff] %vm231_vm0, %v783_v5 }
 0x101   : > { %v881_v13 = vmax.f32 %v849_v8, 0.0  ;;  %v649_v14 = vpop.f32.mrf.mxu0  ;;  %v713_v15 = vpop.f32.mrf.mxu1  ;;  %v288_v7 = vld [vmem:[#allocation2 + $0xc0] sm:$0xff] }
 0x102   : > { %897 = vst.msk [vmem:[%s1417_s15] sm:$0xff] %vm231_vm0, %v865_v12  ;;  %v768_v16 = vadd.f32 %v649_v14, %v267_v6  ;;  %v784_v17 = vadd.f32 %v713_v15, %v283_v11  ;;  %v273_v14 = vld [vmem:[#allocation2 + $0x48] sm:$0xff] }
 0x103   : > { %913 = vst.msk [vmem:[%s1417_s15 + $0x80] sm:$0xff] %vm231_vm0, %v881_v13  ;;  %v834_v19 = vld [vmem:[#allocation2 + $0x8] sm:$0xff]  ;;  %v651_v21 = vpop.f32.mrf.mxu0  ;;  %v715_v22 = vpop.f32.mrf.mxu1 }
 0x104   : > { %v850_v20 = vld [vmem:[#allocation2 + $0x88] sm:$0xff]  ;;  %v866_v24 = vmax.f32 %v834_v19, 0.0  ;;  %801 = vst.msk [vmem:[#allocation2 + $0x18] sm:$0xff] %vm231_vm0, %v768_v16  ;;  %817 = vst.msk [vmem:[#allocation2 + $0x98] sm:$0xff] %vm231_vm0, %v784_v17 }
 0x105   : > { %v882_v25 = vmax.f32 %v850_v20, 0.0  ;;  %v654_v26 = vpop.f32.mrf.mxu0  ;;  %v718_v27 = vpop.f32.mrf.mxu1  ;;  %v289_v19 = vld [vmem:[#allocation2 + $0xc8] sm:$0xff] }
 0x106   : > { %898 = vst.msk [vmem:[%s1417_s15 + $0x8] sm:$0xff] %vm231_vm0, %v866_v24  ;;  %v769_v28 = vadd.f32 %v654_v26, %v268_v18  ;;  %v785_v29 = vadd.f32 %v718_v27, %v284_v23  ;;  %v274_v26 = vld [vmem:[#allocation2 + $0x50] sm:$0xff] }
 0x107   : > { %914 = vst.msk [vmem:[%s1417_s15 + $0x88] sm:$0xff] %vm231_vm0, %v882_v25  ;;  %v835_v31 = vld [vmem:[#allocation2 + $0x10] sm:$0xff]  ;;  %v656_v33 = vpop.f32.mrf.mxu0  ;;  %v720_v34 = vpop.f32.mrf.mxu1 }
 0x108   : > { %v851_v32 = vld [vmem:[#allocation2 + $0x90] sm:$0xff]  ;;  %v867_v36 = vmax.f32 %v835_v31, 0.0  ;;  %802 = vst.msk [vmem:[#allocation2 + $0x20] sm:$0xff] %vm231_vm0, %v769_v28  ;;  %818 = vst.msk [vmem:[#allocation2 + $0xa0] sm:$0xff] %vm231_vm0, %v785_v29 }
 0x109   : > { %v883_v37 = vmax.f32 %v851_v32, 0.0  ;;  %v657_v38 = vpop.f32.mrf.mxu0  ;;  %v721_v39 = vpop.f32.mrf.mxu1  ;;  %v290_v31 = vld [vmem:[#allocation2 + $0xd0] sm:$0xff] }
 0x10a   : > { %899 = vst.msk [vmem:[%s1417_s15 + $0x10] sm:$0xff] %vm231_vm0, %v867_v36  ;;  %v770_v40 = vadd.f32 %v657_v38, %v269_v30  ;;  %v786_v41 = vadd.f32 %v721_v39, %v285_v35  ;;  %v275_v38 = vld [vmem:[#allocation2 + $0x58] sm:$0xff] }
 0x10b   : > { %915 = vst.msk [vmem:[%s1417_s15 + $0x90] sm:$0xff] %vm231_vm0, %v883_v37  ;;  %v836_v43 = vld [vmem:[#allocation2 + $0x18] sm:$0xff]  ;;  %v659_v45 = vpop.f32.mrf.mxu0  ;;  %v723_v46 = vpop.f32.mrf.mxu1 }
 0x10c   : > { %v852_v44 = vld [vmem:[#allocation2 + $0x98] sm:$0xff]  ;;  %v868_v48 = vmax.f32 %v836_v43, 0.0  ;;  %803 = vst.msk [vmem:[#allocation2 + $0x28] sm:$0xff] %vm231_vm0, %v770_v40  ;;  %819 = vst.msk [vmem:[#allocation2 + $0xa8] sm:$0xff] %vm231_vm0, %v786_v41 }
 0x10d   : > { %v884_v49 = vmax.f32 %v852_v44, 0.0  ;;  %v662_v50 = vpop.f32.mrf.mxu0  ;;  %v726_v51 = vpop.f32.mrf.mxu1  ;;  %v291_v43 = vld [vmem:[#allocation2 + $0xd8] sm:$0xff] }
 0x10e   : > { %900 = vst.msk [vmem:[%s1417_s15 + $0x18] sm:$0xff] %vm231_vm0, %v868_v48  ;;  %v771_v52 = vadd.f32 %v662_v50, %v270_v42  ;;  %v787_v53 = vadd.f32 %v726_v51, %v286_v47  ;;  %v276_v50 = vld [vmem:[#allocation2 + $0x60] sm:$0xff] }
 0x10f   : > { %916 = vst.msk [vmem:[%s1417_s15 + $0x98] sm:$0xff] %vm231_vm0, %v884_v49  ;;  %v837_v55 = vld [vmem:[#allocation2 + $0x20] sm:$0xff]  ;;  %v664_v57 = vpop.f32.mrf.mxu0  ;;  %v728_v58 = vpop.f32.mrf.mxu1 }
 0x110   : > { %v853_v56 = vld [vmem:[#allocation2 + $0xa0] sm:$0xff]  ;;  %v869_v60 = vmax.f32 %v837_v55, 0.0  ;;  %804 = vst.msk [vmem:[#allocation2 + $0x30] sm:$0xff] %vm231_vm0, %v771_v52  ;;  %820 = vst.msk [vmem:[#allocation2 + $0xb0] sm:$0xff] %vm231_vm0, %v787_v53 }
 0x111   : > { %v885_v61 = vmax.f32 %v853_v56, 0.0  ;;  %v665_v62 = vpop.f32.mrf.mxu0  ;;  %v729_v63 = vpop.f32.mrf.mxu1  ;;  %v292_v55 = vld [vmem:[#allocation2 + $0xe0] sm:$0xff] }
 0x112   : > { %901 = vst.msk [vmem:[%s1417_s15 + $0x20] sm:$0xff] %vm231_vm0, %v869_v60  ;;  %v772_v0 = vadd.f32 %v665_v62, %v271_v54  ;;  %v788_v1 = vadd.f32 %v729_v63, %v287_v59  ;;  %v277_v62 = vld [vmem:[#allocation2 + $0x68] sm:$0xff] }
 0x113   : > { %917 = vst.msk [vmem:[%s1417_s15 + $0xa0] sm:$0xff] %vm231_vm0, %v885_v61  ;;  %v838_v3 = vld [vmem:[#allocation2 + $0x28] sm:$0xff]  ;;  %v667_v5 = vpop.f32.mrf.mxu0  ;;  %v731_v6 = vpop.f32.mrf.mxu1 }
 0x114   : > { %v854_v4 = vld [vmem:[#allocation2 + $0xa8] sm:$0xff]  ;;  %v870_v8 = vmax.f32 %v838_v3, 0.0  ;;  %805 = vst.msk [vmem:[#allocation2 + $0x38] sm:$0xff] %vm231_vm0, %v772_v0  ;;  %821 = vst.msk [vmem:[#allocation2 + $0xb8] sm:$0xff] %vm231_vm0, %v788_v1 }
 0x115   : > { %v886_v9 = vmax.f32 %v854_v4, 0.0  ;;  %v670_v10 = vpop.f32.mrf.mxu0  ;;  %v734_v11 = vpop.f32.mrf.mxu1  ;;  %v293_v3 = vld [vmem:[#allocation2 + $0xe8] sm:$0xff] }
 0x116   : > { %902 = vst.msk [vmem:[%s1417_s15 + $0x28] sm:$0xff] %vm231_vm0, %v870_v8  ;;  %v773_v12 = vadd.f32 %v670_v10, %v272_v2  ;;  %v789_v13 = vadd.f32 %v734_v11, %v288_v7  ;;  %v278_v10 = vld [vmem:[#allocation2 + $0x70] sm:$0xff] }
 0x117   : > { %918 = vst.msk [vmem:[%s1417_s15 + $0xa8] sm:$0xff] %vm231_vm0, %v886_v9  ;;  %v839_v15 = vld [vmem:[#allocation2 + $0x30] sm:$0xff]  ;;  %v672_v17 = vpop.f32.mrf.mxu0  ;;  %v736_v18 = vpop.f32.mrf.mxu1 }
 0x118   : > { %v855_v16 = vld [vmem:[#allocation2 + $0xb0] sm:$0xff]  ;;  %v871_v20 = vmax.f32 %v839_v15, 0.0  ;;  %806 = vst.msk [vmem:[#allocation2 + $0x40] sm:$0xff] %vm231_vm0, %v773_v12  ;;  %822 = vst.msk [vmem:[#allocation2 + $0xc0] sm:$0xff] %vm231_vm0, %v789_v13 }
 0x119   : > { %v887_v21 = vmax.f32 %v855_v16, 0.0  ;;  %v673_v22 = vpop.f32.mrf.mxu0  ;;  %v737_v23 = vpop.f32.mrf.mxu1  ;;  %v294_v15 = vld [vmem:[#allocation2 + $0xf0] sm:$0xff] }
 0x11a   : > { %903 = vst.msk [vmem:[%s1417_s15 + $0x30] sm:$0xff] %vm231_vm0, %v871_v20  ;;  %v774_v24 = vadd.f32 %v673_v22, %v273_v14  ;;  %v790_v25 = vadd.f32 %v737_v23, %v289_v19  ;;  %v279_v22 = vld [vmem:[#allocation2 + $0x78] sm:$0xff] }
 0x11b   : > { %919 = vst.msk [vmem:[%s1417_s15 + $0xb0] sm:$0xff] %vm231_vm0, %v887_v21  ;;  %v840_v27 = vld [vmem:[#allocation2 + $0x38] sm:$0xff]  ;;  %v675_v29 = vpop.f32.mrf.mxu0  ;;  %v739_v30 = vpop.f32.mrf.mxu1 }
 0x11c   : > { %v856_v28 = vld [vmem:[#allocation2 + $0xb8] sm:$0xff]  ;;  %v872_v32 = vmax.f32 %v840_v27, 0.0  ;;  %807 = vst.msk [vmem:[#allocation2 + $0x48] sm:$0xff] %vm231_vm0, %v774_v24  ;;  %823 = vst.msk [vmem:[#allocation2 + $0xc8] sm:$0xff] %vm231_vm0, %v790_v25 }
 0x11d   : > { %v888_v33 = vmax.f32 %v856_v28, 0.0  ;;  %v678_v34 = vpop.f32.mrf.mxu0  ;;  %v742_v35 = vpop.f32.mrf.mxu1  ;;  %v295_v27 = vld [vmem:[#allocation2 + $0xf8] sm:$0xff] }
 0x11e   : > { %904 = vst.msk [vmem:[%s1417_s15 + $0x38] sm:$0xff] %vm231_vm0, %v872_v32  ;;  %v775_v36 = vadd.f32 %v678_v34, %v274_v26  ;;  %v791_v37 = vadd.f32 %v742_v35, %v290_v31 }
 0x11f   : > { %920 = vst.msk [vmem:[%s1417_s15 + $0xb8] sm:$0xff] %vm231_vm0, %v888_v33  ;;  %v841_v39 = vld [vmem:[#allocation2 + $0x40] sm:$0xff]  ;;  %v680_v41 = vpop.f32.mrf.mxu0  ;;  %v744_v42 = vpop.f32.mrf.mxu1 }
 0x120   : > { %v857_v40 = vld [vmem:[#allocation2 + $0xc0] sm:$0xff]  ;;  %v873_v44 = vmax.f32 %v841_v39, 0.0  ;;  %808 = vst.msk [vmem:[#allocation2 + $0x50] sm:$0xff] %vm231_vm0, %v775_v36  ;;  %824 = vst.msk [vmem:[#allocation2 + $0xd0] sm:$0xff] %vm231_vm0, %v791_v37 }
 0x121   : > { %v889_v45 = vmax.f32 %v857_v40, 0.0  ;;  %v681_v46 = vpop.f32.mrf.mxu0  ;;  %v745_v47 = vpop.f32.mrf.mxu1 }
 0x122   : > { %905 = vst.msk [vmem:[%s1417_s15 + $0x40] sm:$0xff] %vm231_vm0, %v873_v44  ;;  %v776_v48 = vadd.f32 %v681_v46, %v275_v38  ;;  %v792_v49 = vadd.f32 %v745_v47, %v291_v43 }
 0x123   : > { %921 = vst.msk [vmem:[%s1417_s15 + $0xc0] sm:$0xff] %vm231_vm0, %v889_v45  ;;  %v842_v51 = vld [vmem:[#allocation2 + $0x48] sm:$0xff]  ;;  %v683_v53 = vpop.f32.mrf.mxu0  ;;  %v747_v54 = vpop.f32.mrf.mxu1 }
 0x124   : > { %v858_v52 = vld [vmem:[#allocation2 + $0xc8] sm:$0xff]  ;;  %v874_v56 = vmax.f32 %v842_v51, 0.0  ;;  %809 = vst.msk [vmem:[#allocation2 + $0x58] sm:$0xff] %vm231_vm0, %v776_v48  ;;  %825 = vst.msk [vmem:[#allocation2 + $0xd8] sm:$0xff] %vm231_vm0, %v792_v49 }
 0x125   : > { %v890_v57 = vmax.f32 %v858_v52, 0.0  ;;  %v686_v58 = vpop.f32.mrf.mxu0  ;;  %v750_v59 = vpop.f32.mrf.mxu1 }
 0x126   : > { %906 = vst.msk [vmem:[%s1417_s15 + $0x48] sm:$0xff] %vm231_vm0, %v874_v56  ;;  %v777_v60 = vadd.f32 %v686_v58, %v276_v50  ;;  %v793_v61 = vadd.f32 %v750_v59, %v292_v55 }
 0x127   : > { %922 = vst.msk [vmem:[%s1417_s15 + $0xc8] sm:$0xff] %vm231_vm0, %v890_v57  ;;  %v843_v63 = vld [vmem:[#allocation2 + $0x50] sm:$0xff]  ;;  %v688_v1 = vpop.f32.mrf.mxu0  ;;  %v752_v2 = vpop.f32.mrf.mxu1 }
 0x128   : > { %v859_v0 = vld [vmem:[#allocation2 + $0xd0] sm:$0xff]  ;;  %v875_v4 = vmax.f32 %v843_v63, 0.0  ;;  %810 = vst.msk [vmem:[#allocation2 + $0x60] sm:$0xff] %vm231_vm0, %v777_v60  ;;  %826 = vst.msk [vmem:[#allocation2 + $0xe0] sm:$0xff] %vm231_vm0, %v793_v61 }
 0x129   : > { %v891_v5 = vmax.f32 %v859_v0, 0.0  ;;  %v689_v6 = vpop.f32.mrf.mxu0  ;;  %v753_v7 = vpop.f32.mrf.mxu1 }
 0x12a   : > { %907 = vst.msk [vmem:[%s1417_s15 + $0x50] sm:$0xff] %vm231_vm0, %v875_v4  ;;  %v778_v8 = vadd.f32 %v689_v6, %v277_v62  ;;  %v794_v9 = vadd.f32 %v753_v7, %v293_v3 }
 0x12b   : > { %923 = vst.msk [vmem:[%s1417_s15 + $0xd0] sm:$0xff] %vm231_vm0, %v891_v5  ;;  %v844_v11 = vld [vmem:[#allocation2 + $0x58] sm:$0xff]  ;;  %v691_v13 = vpop.f32.mrf.mxu0  ;;  %v755_v14 = vpop.f32.mrf.mxu1 }
 0x12c   : > { %v860_v12 = vld [vmem:[#allocation2 + $0xd8] sm:$0xff]  ;;  %v876_v16 = vmax.f32 %v844_v11, 0.0  ;;  %811 = vst.msk [vmem:[#allocation2 + $0x68] sm:$0xff] %vm231_vm0, %v778_v8  ;;  %827 = vst.msk [vmem:[#allocation2 + $0xe8] sm:$0xff] %vm231_vm0, %v794_v9 }
 0x12d   : > { %v892_v17 = vmax.f32 %v860_v12, 0.0  ;;  %v694_v18 = vpop.f32.mrf.mxu0  ;;  %v758_v19 = vpop.f32.mrf.mxu1 }
 0x12e   : > { %908 = vst.msk [vmem:[%s1417_s15 + $0x58] sm:$0xff] %vm231_vm0, %v876_v16  ;;  %v779_v20 = vadd.f32 %v694_v18, %v278_v10  ;;  %v795_v21 = vadd.f32 %v758_v19, %v294_v15 }
 0x12f   : > { %924 = vst.msk [vmem:[%s1417_s15 + $0xd8] sm:$0xff] %vm231_vm0, %v892_v17  ;;  %v845_v23 = vld [vmem:[#allocation2 + $0x60] sm:$0xff]  ;;  %v696_v25 = vpop.f32.mrf.mxu0  ;;  %v760_v26 = vpop.f32.mrf.mxu1 }
 0x130   : > { %v861_v24 = vld [vmem:[#allocation2 + $0xe0] sm:$0xff]  ;;  %v877_v28 = vmax.f32 %v845_v23, 0.0  ;;  %812 = vst.msk [vmem:[#allocation2 + $0x70] sm:$0xff] %vm231_vm0, %v779_v20  ;;  %828 = vst.msk [vmem:[#allocation2 + $0xf0] sm:$0xff] %vm231_vm0, %v795_v21 }
 0x131   : > { %v893_v29 = vmax.f32 %v861_v24, 0.0  ;;  %v697_v30 = vpop.f32.mrf.mxu0  ;;  %v761_v31 = vpop.f32.mrf.mxu1 }
 0x132   : > { %909 = vst.msk [vmem:[%s1417_s15 + $0x60] sm:$0xff] %vm231_vm0, %v877_v28  ;;  %v780_v32 = vadd.f32 %v697_v30, %v279_v22  ;;  %v796_v33 = vadd.f32 %v761_v31, %v295_v27 }
 0x133   : > { %925 = vst.msk [vmem:[%s1417_s15 + $0xe0] sm:$0xff] %vm231_vm0, %v893_v29  ;;  %v846_v34 = vld [vmem:[#allocation2 + $0x68] sm:$0xff]  ;;  %v699_v36 = vpop.f32.mrf.mxu0  ;;  %v763_v37 = vpop.f32.mrf.mxu1 }
 0x134   : > { %v862_v35 = vld [vmem:[#allocation2 + $0xe8] sm:$0xff]  ;;  %v878_v38 = vmax.f32 %v846_v34, 0.0  ;;  %813 = vst.msk [vmem:[#allocation2 + $0x78] sm:$0xff] %vm231_vm0, %v780_v32  ;;  %829 = vst.msk [vmem:[#allocation2 + $0xf8] sm:$0xff] %vm231_vm0, %v796_v33 }
 0x135   : > { %v894_v39 = vmax.f32 %v862_v35, 0.0 }
 0x136   : > { %910 = vst.msk [vmem:[%s1417_s15 + $0x68] sm:$0xff] %vm231_vm0, %v878_v38 }
 0x137   : > { %926 = vst.msk [vmem:[%s1417_s15 + $0xe8] sm:$0xff] %vm231_vm0, %v894_v39  ;;  %v847_v40 = vld [vmem:[#allocation2 + $0x70] sm:$0xff] }
 0x138   : > { %v863_v41 = vld [vmem:[#allocation2 + $0xf0] sm:$0xff]  ;;  %v879_v42 = vmax.f32 %v847_v40, 0.0 }
 0x139   : > { %v895_v43 = vmax.f32 %v863_v41, 0.0 }
 0x13a   : > { %911 = vst.msk [vmem:[%s1417_s15 + $0x70] sm:$0xff] %vm231_vm0, %v879_v42 }
 0x13b   : > { %927 = vst.msk [vmem:[%s1417_s15 + $0xf0] sm:$0xff] %vm231_vm0, %v895_v43  ;;  %v848_v44 = vld [vmem:[#allocation2 + $0x78] sm:$0xff] }
 0x13c   : > { %v864_v45 = vld [vmem:[#allocation2 + $0xf8] sm:$0xff]  ;;  %v880_v46 = vmax.f32 %v848_v44, 0.0 }
 0x13d   : > { %v896_v47 = vmax.f32 %v864_v45, 0.0 }
 0x13e   : > { %912 = vst.msk [vmem:[%s1417_s15 + $0x78] sm:$0xff] %vm231_vm0, %v880_v46 }
 0x13f   : > { %928 = vst.msk [vmem:[%s1417_s15 + $0xf8] sm:$0xff] %vm231_vm0, %v896_v47 }
 0x140 PF: > { %s12_s11 = sadd.s32 1, %s1230_s11   ;;  %s1523_s9 = smov %s1226_s10 }
 0x141   : > { %p9_p5 = scmp.ge.s32.totalorder %s12_s11, 4   ;;  %s1524_s10 = smov %s1526_s12 }
 0x143   :  { %11 = sbr.rel (!%p9_p5) target bundleno = 2 (0x2), region = 69 }

// kernel: resnet_forward.15
= control target key start
LH: loop header
LB: loop body
LE: loop exit
PB: predicated region body
PF: predicated region fallthrough
CT: control target
= control target key end

     0   :  { %vm288_vm0 = vcmask 523264   ;;  %s943_s0 = inlined_call_operand.vmem [shape: f32[9,128,64], index: 0, kind: input, shape index: {}]   ;;  %s944_s1 = inlined_call_operand.vmem [shape: f32[128,64], index: 1, kind: output, shape index: {}]  }
   0x1   :  { %v8_v0 = vld [vmem:[%s943_s0] sm:$0xff]  ;;  %v9_v6 = vld [vmem:[%s943_s0 + $0x8] sm:$0xff]  ;;  %v10_v15 = vld [vmem:[%s943_s0 + $0x10] sm:$0xff] }
   0x2   :  { %v309_v1 = vld [vmem:[%s943_s0 + $0x80] sm:$0xff]  ;;  %v310_v7 = vld [vmem:[%s943_s0 + $0x88] sm:$0xff]  ;;  %v311_v16 = vld [vmem:[%s943_s0 + $0x90] sm:$0xff] }
   0x3   :  { %v325_v2 = vld [vmem:[%s943_s0 + $0x100] sm:$0xff]  ;;  %v41_v3 = vmax.f32 %v8_v0, %v309_v1  ;;  %v326_v8 = vld [vmem:[%s943_s0 + $0x108] sm:$0xff]  ;;  %v42_v10 = vmax.f32 %v9_v6, %v310_v7  ;;  %v327_v17 = vld [vmem:[%s943_s0 + $0x110] sm:$0xff]  ;;  %v43_v20 = vmax.f32 %v10_v15, %v311_v16 }
   0x4   :  { %v341_v4 = vld [vmem:[%s943_s0 + $0x180] sm:$0xff]  ;;  %v342_v13 = vld [vmem:[%s943_s0 + $0x188] sm:$0xff]  ;;  %v343_v24 = vld [vmem:[%s943_s0 + $0x190] sm:$0xff] }
   0x5   :  { %v74_v5 = vmax.f32 %v41_v3, %v325_v2  ;;  %v357_v9 = vld [vmem:[%s943_s0 + $0x200] sm:$0xff]  ;;  %v75_v14 = vmax.f32 %v42_v10, %v326_v8  ;;  %v358_v19 = vld [vmem:[%s943_s0 + $0x208] sm:$0xff]  ;;  %v76_v26 = vmax.f32 %v43_v20, %v327_v17  ;;  %v11_v27 = vld [vmem:[%s943_s0 + $0x18] sm:$0xff] }
   0x6   :  { %v373_v12 = vld [vmem:[%s943_s0 + $0x280] sm:$0xff]  ;;  %v374_v23 = vld [vmem:[%s943_s0 + $0x288] sm:$0xff]  ;;  %v312_v28 = vld [vmem:[%s943_s0 + $0x98] sm:$0xff] }
   0x7   :  { %v107_v11 = vmax.f32 %v74_v5, %v341_v4  ;;  %v389_v21 = vld [vmem:[%s943_s0 + $0x300] sm:$0xff]  ;;  %v108_v22 = vmax.f32 %v75_v14, %v342_v13  ;;  %v328_v29 = vld [vmem:[%s943_s0 + $0x118] sm:$0xff]  ;;  %v359_v33 = vld [vmem:[%s943_s0 + $0x210] sm:$0xff]  ;;  %v44_v34 = vmax.f32 %v11_v27, %v312_v28  ;;  %v109_v37 = vmax.f32 %v76_v26, %v343_v24 }
   0x8   :  { %v405_v30 = vld [vmem:[%s943_s0 + $0x380] sm:$0xff]  ;;  %v390_v36 = vld [vmem:[%s943_s0 + $0x308] sm:$0xff]  ;;  %v375_v38 = vld [vmem:[%s943_s0 + $0x290] sm:$0xff] }
   0x9   :  { %v140_v18 = vmax.f32 %v107_v11, %v357_v9  ;;  %v421_v31 = vld [vmem:[%s943_s0 + $0x400] sm:$0xff]  ;;  %v141_v32 = vmax.f32 %v108_v22, %v358_v19  ;;  %v344_v39 = vld [vmem:[%s943_s0 + $0x198] sm:$0xff]  ;;  %v77_v41 = vmax.f32 %v44_v34, %v328_v29  ;;  %v406_v46 = vld [vmem:[%s943_s0 + $0x388] sm:$0xff]  ;;  %v142_v48 = vmax.f32 %v109_v37, %v359_v33 }
   0xa   :  { %v12_v42 = vld [vmem:[%s943_s0 + $0x20] sm:$0xff]  ;;  %v422_v47 = vld [vmem:[%s943_s0 + $0x408] sm:$0xff]  ;;  %v360_v49 = vld [vmem:[%s943_s0 + $0x218] sm:$0xff] }
   0xb   :  { %v173_v25 = vmax.f32 %v140_v18, %v373_v12  ;;  %v174_v40 = vmax.f32 %v141_v32, %v374_v23  ;;  %v313_v43 = vld [vmem:[%s943_s0 + $0xa0] sm:$0xff]  ;;  %v391_v52 = vld [vmem:[%s943_s0 + $0x310] sm:$0xff]  ;;  %v110_v53 = vmax.f32 %v77_v41, %v344_v39  ;;  %v376_v54 = vld [vmem:[%s943_s0 + $0x298] sm:$0xff]  ;;  %v175_v57 = vmax.f32 %v142_v48, %v375_v38 }
   0xc   :  { %v329_v44 = vld [vmem:[%s943_s0 + $0x120] sm:$0xff]  ;;  %v45_v50 = vmax.f32 %v12_v42, %v313_v43  ;;  %v13_v59 = vld [vmem:[%s943_s0 + $0x28] sm:$0xff]  ;;  %v407_v63 = vld [vmem:[%s943_s0 + $0x390] sm:$0xff] }
   0xd   :  { %v206_v35 = vmax.f32 %v173_v25, %v389_v21  ;;  %v207_v51 = vmax.f32 %v174_v40, %v390_v36  ;;  %v345_v55 = vld [vmem:[%s943_s0 + $0x1a0] sm:$0xff]  ;;  %v314_v60 = vld [vmem:[%s943_s0 + $0xa8] sm:$0xff]  ;;  %v423_v0 = vld [vmem:[%s943_s0 + $0x410] sm:$0xff]  ;;  %v143_v1 = vmax.f32 %v110_v53, %v360_v49  ;;  %v208_v4 = vmax.f32 %v175_v57, %v391_v52 }
   0xe   :  { %v78_v58 = vmax.f32 %v45_v50, %v329_v44  ;;  %v330_v61 = vld [vmem:[%s943_s0 + $0x128] sm:$0xff]  ;;  %v361_v2 = vld [vmem:[%s943_s0 + $0x220] sm:$0xff]  ;;  %v46_v3 = vmax.f32 %v13_v59, %v314_v60  ;;  %v392_v5 = vld [vmem:[%s943_s0 + $0x318] sm:$0xff] }
   0xf   :  { %v239_v45 = vmax.f32 %v206_v35, %v405_v30  ;;  %v240_v62 = vmax.f32 %v207_v51, %v406_v46  ;;  %v377_v7 = vld [vmem:[%s943_s0 + $0x2a0] sm:$0xff]  ;;  %v346_v8 = vld [vmem:[%s943_s0 + $0x1a8] sm:$0xff]  ;;  %v176_v10 = vmax.f32 %v143_v1, %v376_v54  ;;  %v14_v12 = vld [vmem:[%s943_s0 + $0x30] sm:$0xff]  ;;  %v241_v15 = vmax.f32 %v208_v4, %v407_v63 }
  0x10   :  { %v111_v6 = vmax.f32 %v78_v58, %v345_v55  ;;  %v79_v11 = vmax.f32 %v46_v3, %v330_v61  ;;  %v315_v13 = vld [vmem:[%s943_s0 + $0xb0] sm:$0xff]  ;;  %v408_v16 = vld [vmem:[%s943_s0 + $0x398] sm:$0xff]  ;;  %v362_v19 = vld [vmem:[%s943_s0 + $0x228] sm:$0xff] }
  0x11   :  { %v272_v56 = vmax.f32 %v239_v45, %v421_v31  ;;  %v273_v9 = vmax.f32 %v240_v62, %v422_v47  ;;  %v331_v14 = vld [vmem:[%s943_s0 + $0x130] sm:$0xff]  ;;  %v424_v17 = vld [vmem:[%s943_s0 + $0x418] sm:$0xff]  ;;  %v47_v20 = vmax.f32 %v14_v12, %v315_v13  ;;  %v209_v21 = vmax.f32 %v176_v10, %v392_v5  ;;  %v393_v22 = vld [vmem:[%s943_s0 + $0x320] sm:$0xff] }
  0x12   :  { %v144_v18 = vmax.f32 %v111_v6, %v361_v2  ;;  %v112_v23 = vmax.f32 %v79_v11, %v346_v8  ;;  %v378_v24 = vld [vmem:[%s943_s0 + $0x2a8] sm:$0xff]  ;;  %v347_v25 = vld [vmem:[%s943_s0 + $0x1b0] sm:$0xff]  ;;  %v274_v26 = vmax.f32 %v241_v15, %v423_v0  ;;  %v15_v29 = vld [vmem:[%s943_s0 + $0x38] sm:$0xff] }
  0x13   :  { %289 = vst.msk [vmem:[%s944_s1] sm:$0xff] %vm288_vm0, %v272_v56  ;;  %290 = vst.msk [vmem:[%s944_s1 + $0x8] sm:$0xff] %vm288_vm0, %v273_v9  ;;  %v80_v28 = vmax.f32 %v47_v20, %v331_v14  ;;  %v316_v30 = vld [vmem:[%s943_s0 + $0xb8] sm:$0xff]  ;;  %v242_v32 = vmax.f32 %v209_v21, %v408_v16  ;;  %v409_v33 = vld [vmem:[%s943_s0 + $0x3a0] sm:$0xff] }
  0x14   :  { %v177_v27 = vmax.f32 %v144_v18, %v377_v7  ;;  %v332_v31 = vld [vmem:[%s943_s0 + $0x138] sm:$0xff]  ;;  %v425_v34 = vld [vmem:[%s943_s0 + $0x420] sm:$0xff]  ;;  %v145_v35 = vmax.f32 %v112_v23, %v362_v19  ;;  %v363_v36 = vld [vmem:[%s943_s0 + $0x230] sm:$0xff]  ;;  %v48_v37 = vmax.f32 %v15_v29, %v316_v30  ;;  %291 = vst.msk [vmem:[%s944_s1 + $0x10] sm:$0xff] %vm288_vm0, %v274_v26 }
  0x15   :  { %v394_v39 = vld [vmem:[%s943_s0 + $0x328] sm:$0xff]  ;;  %v113_v40 = vmax.f32 %v80_v28, %v347_v25  ;;  %v379_v41 = vld [vmem:[%s943_s0 + $0x2b0] sm:$0xff]  ;;  %v348_v42 = vld [vmem:[%s943_s0 + $0x1b8] sm:$0xff]  ;;  %v275_v43 = vmax.f32 %v242_v32, %v424_v17 }
  0x16   :  { %v210_v38 = vmax.f32 %v177_v27, %v393_v22  ;;  %v178_v44 = vmax.f32 %v145_v35, %v378_v24  ;;  %v81_v45 = vmax.f32 %v48_v37, %v332_v31  ;;  %v16_v46 = vld [vmem:[%s943_s0 + $0x40] sm:$0xff]  ;;  %v410_v50 = vld [vmem:[%s943_s0 + $0x3a8] sm:$0xff]  ;;  %v364_v53 = vld [vmem:[%s943_s0 + $0x238] sm:$0xff] }
  0x17   :  { %v317_v47 = vld [vmem:[%s943_s0 + $0xc0] sm:$0xff]  ;;  %v426_v51 = vld [vmem:[%s943_s0 + $0x428] sm:$0xff]  ;;  %v146_v52 = vmax.f32 %v113_v40, %v363_v36  ;;  %292 = vst.msk [vmem:[%s944_s1 + $0x18] sm:$0xff] %vm288_vm0, %v275_v43  ;;  %v395_v56 = vld [vmem:[%s943_s0 + $0x330] sm:$0xff] }
  0x18   :  { %v333_v48 = vld [vmem:[%s943_s0 + $0x140] sm:$0xff]  ;;  %v243_v49 = vmax.f32 %v210_v38, %v409_v33  ;;  %v49_v54 = vmax.f32 %v16_v46, %v317_v47  ;;  %v211_v55 = vmax.f32 %v178_v44, %v394_v39  ;;  %v114_v57 = vmax.f32 %v81_v45, %v348_v42  ;;  %v380_v58 = vld [vmem:[%s943_s0 + $0x2b8] sm:$0xff]  ;;  %v17_v63 = vld [vmem:[%s943_s0 + $0x48] sm:$0xff] }
  0x19   :  { %v349_v59 = vld [vmem:[%s943_s0 + $0x1c0] sm:$0xff]  ;;  %v179_v61 = vmax.f32 %v146_v52, %v379_v41  ;;  %v318_v0 = vld [vmem:[%s943_s0 + $0xc8] sm:$0xff]  ;;  %v411_v3 = vld [vmem:[%s943_s0 + $0x3b0] sm:$0xff] }
  0x1a   :  { %v276_v60 = vmax.f32 %v243_v49, %v425_v34  ;;  %v82_v62 = vmax.f32 %v49_v54, %v333_v48  ;;  %v334_v1 = vld [vmem:[%s943_s0 + $0x148] sm:$0xff]  ;;  %v244_v2 = vmax.f32 %v211_v55, %v410_v50  ;;  %v427_v4 = vld [vmem:[%s943_s0 + $0x430] sm:$0xff]  ;;  %v147_v5 = vmax.f32 %v114_v57, %v364_v53  ;;  %v365_v6 = vld [vmem:[%s943_s0 + $0x240] sm:$0xff] }
  0x1b   :  { %v50_v7 = vmax.f32 %v17_v63, %v318_v0  ;;  %v212_v8 = vmax.f32 %v179_v61, %v395_v56  ;;  %v396_v9 = vld [vmem:[%s943_s0 + $0x338] sm:$0xff]  ;;  %v381_v11 = vld [vmem:[%s943_s0 + $0x2c0] sm:$0xff]  ;;  %v350_v12 = vld [vmem:[%s943_s0 + $0x1c8] sm:$0xff] }
  0x1c   :  { %293 = vst.msk [vmem:[%s944_s1 + $0x20] sm:$0xff] %vm288_vm0, %v276_v60  ;;  %v115_v10 = vmax.f32 %v82_v62, %v349_v59  ;;  %v277_v13 = vmax.f32 %v244_v2, %v426_v51  ;;  %v180_v14 = vmax.f32 %v147_v5, %v380_v58  ;;  %v18_v16 = vld [vmem:[%s943_s0 + $0x50] sm:$0xff]  ;;  %v412_v20 = vld [vmem:[%s943_s0 + $0x3b8] sm:$0xff]  ;;  %v366_v23 = vld [vmem:[%s943_s0 + $0x248] sm:$0xff] }
  0x1d   :  { %v83_v15 = vmax.f32 %v50_v7, %v334_v1  ;;  %v319_v17 = vld [vmem:[%s943_s0 + $0xd0] sm:$0xff]  ;;  %v245_v19 = vmax.f32 %v212_v8, %v411_v3  ;;  %v428_v21 = vld [vmem:[%s943_s0 + $0x438] sm:$0xff]  ;;  %v397_v26 = vld [vmem:[%s943_s0 + $0x340] sm:$0xff] }
  0x1e   :  { %v335_v18 = vld [vmem:[%s943_s0 + $0x150] sm:$0xff]  ;;  %v148_v22 = vmax.f32 %v115_v10, %v365_v6  ;;  %v51_v24 = vmax.f32 %v18_v16, %v319_v17  ;;  %294 = vst.msk [vmem:[%s944_s1 + $0x28] sm:$0xff] %vm288_vm0, %v277_v13  ;;  %v213_v25 = vmax.f32 %v180_v14, %v396_v9  ;;  %v382_v28 = vld [vmem:[%s943_s0 + $0x2c8] sm:$0xff]  ;;  %v19_v33 = vld [vmem:[%s943_s0 + $0x58] sm:$0xff] }
  0x1f   :  { %v116_v27 = vmax.f32 %v83_v15, %v350_v12  ;;  %v351_v29 = vld [vmem:[%s943_s0 + $0x1d0] sm:$0xff]  ;;  %v278_v30 = vmax.f32 %v245_v19, %v427_v4  ;;  %v320_v34 = vld [vmem:[%s943_s0 + $0xd8] sm:$0xff]  ;;  %v413_v37 = vld [vmem:[%s943_s0 + $0x3c0] sm:$0xff] }
  0x20   :  { %v181_v31 = vmax.f32 %v148_v22, %v381_v11  ;;  %v84_v32 = vmax.f32 %v51_v24, %v335_v18  ;;  %v336_v35 = vld [vmem:[%s943_s0 + $0x158] sm:$0xff]  ;;  %v246_v36 = vmax.f32 %v213_v25, %v412_v20  ;;  %v429_v38 = vld [vmem:[%s943_s0 + $0x440] sm:$0xff]  ;;  %v367_v40 = vld [vmem:[%s943_s0 + $0x250] sm:$0xff]  ;;  %v52_v41 = vmax.f32 %v19_v33, %v320_v34 }
  0x21   :  { %v149_v39 = vmax.f32 %v116_v27, %v366_v23  ;;  %295 = vst.msk [vmem:[%s944_s1 + $0x30] sm:$0xff] %vm288_vm0, %v278_v30  ;;  %v398_v43 = vld [vmem:[%s943_s0 + $0x348] sm:$0xff]  ;;  %v383_v45 = vld [vmem:[%s943_s0 + $0x2d0] sm:$0xff]  ;;  %v352_v46 = vld [vmem:[%s943_s0 + $0x1d8] sm:$0xff] }
  0x22   :  { %v214_v42 = vmax.f32 %v181_v31, %v397_v26  ;;  %v117_v44 = vmax.f32 %v84_v32, %v351_v29  ;;  %v279_v47 = vmax.f32 %v246_v36, %v428_v21  ;;  %v85_v49 = vmax.f32 %v52_v41, %v336_v35  ;;  %v20_v50 = vld [vmem:[%s943_s0 + $0x60] sm:$0xff]  ;;  %v414_v54 = vld [vmem:[%s943_s0 + $0x3c8] sm:$0xff]  ;;  %v368_v57 = vld [vmem:[%s943_s0 + $0x258] sm:$0xff] }
  0x23   :  { %v182_v48 = vmax.f32 %v149_v39, %v382_v28  ;;  %v321_v51 = vld [vmem:[%s943_s0 + $0xe0] sm:$0xff]  ;;  %v430_v55 = vld [vmem:[%s943_s0 + $0x448] sm:$0xff]  ;;  %v399_v60 = vld [vmem:[%s943_s0 + $0x350] sm:$0xff] }
  0x24   :  { %v337_v52 = vld [vmem:[%s943_s0 + $0x160] sm:$0xff]  ;;  %v247_v53 = vmax.f32 %v214_v42, %v413_v37  ;;  %v150_v56 = vmax.f32 %v117_v44, %v367_v40  ;;  %v53_v58 = vmax.f32 %v20_v50, %v321_v51  ;;  %296 = vst.msk [vmem:[%s944_s1 + $0x38] sm:$0xff] %vm288_vm0, %v279_v47  ;;  %v118_v61 = vmax.f32 %v85_v49, %v352_v46  ;;  %v384_v62 = vld [vmem:[%s943_s0 + $0x2d8] sm:$0xff]  ;;  %v21_v3 = vld [vmem:[%s943_s0 + $0x68] sm:$0xff] }
  0x25   :  { %v215_v59 = vmax.f32 %v182_v48, %v398_v43  ;;  %v353_v63 = vld [vmem:[%s943_s0 + $0x1e0] sm:$0xff]  ;;  %v322_v4 = vld [vmem:[%s943_s0 + $0xe8] sm:$0xff]  ;;  %v415_v7 = vld [vmem:[%s943_s0 + $0x3d0] sm:$0xff] }
  0x26   :  { %v280_v0 = vmax.f32 %v247_v53, %v429_v38  ;;  %v183_v1 = vmax.f32 %v150_v56, %v383_v45  ;;  %v86_v2 = vmax.f32 %v53_v58, %v337_v52  ;;  %v338_v5 = vld [vmem:[%s943_s0 + $0x168] sm:$0xff]  ;;  %v431_v8 = vld [vmem:[%s943_s0 + $0x450] sm:$0xff]  ;;  %v151_v9 = vmax.f32 %v118_v61, %v368_v57  ;;  %v369_v10 = vld [vmem:[%s943_s0 + $0x260] sm:$0xff] }
  0x27   :  { %v248_v6 = vmax.f32 %v215_v59, %v414_v54  ;;  %v54_v11 = vmax.f32 %v21_v3, %v322_v4  ;;  %v400_v13 = vld [vmem:[%s943_s0 + $0x358] sm:$0xff]  ;;  %v385_v15 = vld [vmem:[%s943_s0 + $0x2e0] sm:$0xff]  ;;  %v354_v16 = vld [vmem:[%s943_s0 + $0x1e8] sm:$0xff] }
  0x28   :  { %297 = vst.msk [vmem:[%s944_s1 + $0x40] sm:$0xff] %vm288_vm0, %v280_v0  ;;  %v216_v12 = vmax.f32 %v183_v1, %v399_v60  ;;  %v119_v14 = vmax.f32 %v86_v2, %v353_v63  ;;  %v184_v18 = vmax.f32 %v151_v9, %v384_v62  ;;  %v22_v20 = vld [vmem:[%s943_s0 + $0x70] sm:$0xff]  ;;  %v416_v24 = vld [vmem:[%s943_s0 + $0x3d8] sm:$0xff]  ;;  %v370_v27 = vld [vmem:[%s943_s0 + $0x268] sm:$0xff] }
  0x29   :  { %v281_v17 = vmax.f32 %v248_v6, %v430_v55  ;;  %v87_v19 = vmax.f32 %v54_v11, %v338_v5  ;;  %v323_v21 = vld [vmem:[%s943_s0 + $0xf0] sm:$0xff]  ;;  %v432_v25 = vld [vmem:[%s943_s0 + $0x458] sm:$0xff]  ;;  %v401_v30 = vld [vmem:[%s943_s0 + $0x360] sm:$0xff] }
  0x2a   :  { %v339_v22 = vld [vmem:[%s943_s0 + $0x170] sm:$0xff]  ;;  %v249_v23 = vmax.f32 %v216_v12, %v415_v7  ;;  %v152_v26 = vmax.f32 %v119_v14, %v369_v10  ;;  %v55_v28 = vmax.f32 %v22_v20, %v323_v21  ;;  %v217_v29 = vmax.f32 %v184_v18, %v400_v13  ;;  %v386_v32 = vld [vmem:[%s943_s0 + $0x2e8] sm:$0xff]  ;;  %v23_v37 = vld [vmem:[%s943_s0 + $0x78] sm:$0xff] }
  0x2b   :  { %298 = vst.msk [vmem:[%s944_s1 + $0x48] sm:$0xff] %vm288_vm0, %v281_v17  ;;  %v120_v31 = vmax.f32 %v87_v19, %v354_v16  ;;  %v355_v33 = vld [vmem:[%s943_s0 + $0x1f0] sm:$0xff]  ;;  %v324_v38 = vld [vmem:[%s943_s0 + $0xf8] sm:$0xff]  ;;  %v417_v41 = vld [vmem:[%s943_s0 + $0x3e0] sm:$0xff] }
  0x2c   :  { %v282_v34 = vmax.f32 %v249_v23, %v431_v8  ;;  %v185_v35 = vmax.f32 %v152_v26, %v385_v15  ;;  %v88_v36 = vmax.f32 %v55_v28, %v339_v22  ;;  %v340_v39 = vld [vmem:[%s943_s0 + $0x178] sm:$0xff]  ;;  %v250_v40 = vmax.f32 %v217_v29, %v416_v24  ;;  %v371_v43 = vld [vmem:[%s943_s0 + $0x270] sm:$0xff]  ;;  %v402_v46 = vld [vmem:[%s943_s0 + $0x368] sm:$0xff] }
  0x2d   :  { %v153_v42 = vmax.f32 %v120_v31, %v370_v27  ;;  %v56_v44 = vmax.f32 %v23_v37, %v324_v38  ;;  %v356_v48 = vld [vmem:[%s943_s0 + $0x1f8] sm:$0xff]  ;;  %v433_v50 = vld [vmem:[%s943_s0 + $0x460] sm:$0xff]  ;;  %v387_v52 = vld [vmem:[%s943_s0 + $0x2f0] sm:$0xff] }
  0x2e   :  { %299 = vst.msk [vmem:[%s944_s1 + $0x50] sm:$0xff] %vm288_vm0, %v282_v34  ;;  %v218_v45 = vmax.f32 %v185_v35, %v401_v30  ;;  %v121_v47 = vmax.f32 %v88_v36, %v355_v33  ;;  %v283_v49 = vmax.f32 %v250_v40, %v432_v25  ;;  %v418_v55 = vld [vmem:[%s943_s0 + $0x3e8] sm:$0xff]  ;;  %v372_v57 = vld [vmem:[%s943_s0 + $0x278] sm:$0xff]  ;;  %v403_v59 = vld [vmem:[%s943_s0 + $0x370] sm:$0xff] }
  0x2f   :  { %v186_v51 = vmax.f32 %v153_v42, %v386_v32  ;;  %v89_v53 = vmax.f32 %v56_v44, %v340_v39  ;;  %v434_v62 = vld [vmem:[%s943_s0 + $0x468] sm:$0xff]  ;;  %v388_v0 = vld [vmem:[%s943_s0 + $0x2f8] sm:$0xff]  ;;  %v419_v2 = vld [vmem:[%s943_s0 + $0x3f0] sm:$0xff] }
  0x30   :  { %v251_v54 = vmax.f32 %v218_v45, %v417_v41  ;;  %v154_v56 = vmax.f32 %v121_v47, %v371_v43  ;;  %300 = vst.msk [vmem:[%s944_s1 + $0x58] sm:$0xff] %vm288_vm0, %v283_v49  ;;  %v404_v5 = vld [vmem:[%s943_s0 + $0x378] sm:$0xff]  ;;  %v435_v7 = vld [vmem:[%s943_s0 + $0x470] sm:$0xff] }
  0x31   :  { %v219_v58 = vmax.f32 %v186_v51, %v402_v46  ;;  %v122_v60 = vmax.f32 %v89_v53, %v356_v48  ;;  %v420_v10 = vld [vmem:[%s943_s0 + $0x3f8] sm:$0xff] }
  0x32   :  { %v284_v61 = vmax.f32 %v251_v54, %v433_v50  ;;  %v187_v63 = vmax.f32 %v154_v56, %v387_v52  ;;  %v436_v13 = vld [vmem:[%s943_s0 + $0x478] sm:$0xff] }
  0x33   :  { %v252_v1 = vmax.f32 %v219_v58, %v418_v55  ;;  %v155_v3 = vmax.f32 %v122_v60, %v372_v57 }
  0x34   :  { %301 = vst.msk [vmem:[%s944_s1 + $0x60] sm:$0xff] %vm288_vm0, %v284_v61  ;;  %v220_v4 = vmax.f32 %v187_v63, %v403_v59 }
  0x35   :  { %v285_v6 = vmax.f32 %v252_v1, %v434_v62  ;;  %v188_v8 = vmax.f32 %v155_v3, %v388_v0 }
  0x36   :  { %v253_v9 = vmax.f32 %v220_v4, %v419_v2 }
  0x37   :  { %302 = vst.msk [vmem:[%s944_s1 + $0x68] sm:$0xff] %vm288_vm0, %v285_v6  ;;  %v221_v11 = vmax.f32 %v188_v8, %v404_v5 }
  0x38   :  { %v286_v12 = vmax.f32 %v253_v9, %v435_v7 }
  0x39   :  { %v254_v14 = vmax.f32 %v221_v11, %v420_v10 }
  0x3a   :  { %303 = vst.msk [vmem:[%s944_s1 + $0x70] sm:$0xff] %vm288_vm0, %v286_v12 }
  0x3b   :  { %v287_v15 = vmax.f32 %v254_v14, %v436_v13 }
  0x3d   :  { %304 = vst.msk [vmem:[%s944_s1 + $0x78] sm:$0xff] %vm288_vm0, %v287_v15 }

// kernel: resnet_forward.16
= control target key start
LH: loop header
LB: loop body
LE: loop exit
PB: predicated region body
PF: predicated region fallthrough
CT: control target
= control target key end

     0   :  { %vm16_vm0 = vcmask 523264   ;;  %s1736_s1 = inlined_call_operand.vmem [shape: bf16[576,64], index: 1, kind: input, shape index: {}]   ;;  %s1737_s0 = inlined_call_operand.vmem [shape: bf16[128,576], index: 0, kind: input, shape index: {}]   ;;  %s1738_s2 = inlined_call_operand.vmem [shape: f32[128,64], index: 2, kind: output, shape index: {}]  }
   0x1   :  { %v1245_v0 = vld [vmem:[%s1736_s1 + $0x78] sm:$0xff]   ;;  %v1249_v4 = vld [vmem:[%s1736_s1 + $0x70] sm:$0xff]   ;;  %v1253_v8 = vld [vmem:[%s1736_s1 + $0x68] sm:$0xff]  }
   0x2   :  { %v1246_v1 = vld [vmem:[%s1736_s1 + $0xf8] sm:$0xff]   ;;  %1072 = vmatprep.subr.bf16.mxu0 %v1245_v0  ;;  %v1250_v5 = vld [vmem:[%s1736_s1 + $0xf0] sm:$0xff]   ;;  %v1254_v9 = vld [vmem:[%s1736_s1 + $0xe8] sm:$0xff]  }
   0x3   :  { %v1247_v2 = vld [vmem:[%s1736_s1 + $0x38] sm:$0xff]   ;;  %1136 = vmatprep.subr.bf16.mxu1 %v1246_v1  ;;  %v1251_v6 = vld [vmem:[%s1736_s1 + $0x30] sm:$0xff]   ;;  %v1255_v10 = vld [vmem:[%s1736_s1 + $0x28] sm:$0xff]  }
   0x4   :  { %v1248_v3 = vld [vmem:[%s1736_s1 + $0xb8] sm:$0xff]   ;;  %1073 = vmatpush3.bf16.msra.mxu0 %v1247_v2  ;;  %v1252_v7 = vld [vmem:[%s1736_s1 + $0xb0] sm:$0xff]   ;;  %v1256_v11 = vld [vmem:[%s1736_s1 + $0xa8] sm:$0xff]  }
   0x5   :  { %1137 = vmatpush3.bf16.msra.mxu1 %v1248_v3  ;;  %1074 = vmatprep.subr.bf16.mxu0 %v1249_v4  ;;  %v1257_v12 = vld [vmem:[%s1736_s1 + $0x60] sm:$0xff]   ;;  %v1261_v16 = vld [vmem:[%s1736_s1 + $0x58] sm:$0xff]   ;;  %v1265_v20 = vld [vmem:[%s1736_s1 + $0x50] sm:$0xff]  }
   0x6   :  { %1138 = vmatprep.subr.bf16.mxu1 %v1250_v5  ;;  %v1258_v13 = vld [vmem:[%s1736_s1 + $0xe0] sm:$0xff]   ;;  %v1262_v17 = vld [vmem:[%s1736_s1 + $0xd8] sm:$0xff]   ;;  %v1266_v21 = vld [vmem:[%s1736_s1 + $0xd0] sm:$0xff]  }
   0x7   :  { %v1259_v14 = vld [vmem:[%s1736_s1 + $0x20] sm:$0xff]   ;;  %v1263_v18 = vld [vmem:[%s1736_s1 + $0x18] sm:$0xff]   ;;  %v1267_v22 = vld [vmem:[%s1736_s1 + $0x10] sm:$0xff]  }
   0x8   :  { %1075 = vmatpush3.bf16.msra.mxu0 %v1251_v6  ;;  %v1260_v15 = vld [vmem:[%s1736_s1 + $0xa0] sm:$0xff]   ;;  %v1264_v19 = vld [vmem:[%s1736_s1 + $0x98] sm:$0xff]   ;;  %v1268_v23 = vld [vmem:[%s1736_s1 + $0x90] sm:$0xff]  }
   0x9   :  { %1139 = vmatpush3.bf16.msra.mxu1 %v1252_v7  ;;  %1076 = vmatprep.subr.bf16.mxu0 %v1253_v8  ;;  %v1269_v24 = vld [vmem:[%s1736_s1 + $0x48] sm:$0xff]   ;;  %v1273_v28 = vld [vmem:[%s1736_s1 + $0x40] sm:$0xff]   ;;  %v1283_v36 = vld [vmem:[%s1736_s1 + $0x118] sm:$0xff]  }
   0xa   :  { %1140 = vmatprep.subr.bf16.mxu1 %v1254_v9  ;;  %v1270_v25 = vld [vmem:[%s1736_s1 + $0xc8] sm:$0xff]   ;;  %v1274_v29 = vld [vmem:[%s1736_s1 + $0xc0] sm:$0xff]   ;;  %v1296_v42 = vld [vmem:[%s1736_s1 + $0x110] sm:$0xff]  }
   0xb   :  { %v1271_v26 = vld [vmem:[%s1736_s1 + $0x8] sm:$0xff]   ;;  %v1275_v30 = vld [vmem:[%s1736_s1] sm:$0xff]   ;;  %v1292_v43 = vld [vmem:[%s1737_s0 + $0x5c] ss:$20 sps:$4 sm:$0xff]  }
   0xc   :  { %1077 = vmatpush3.bf16.msra.mxu0 %v1255_v10  ;;  %v1272_v27 = vld [vmem:[%s1736_s1 + $0x88] sm:$0xff]   ;;  %v1276_v31 = vld [vmem:[%s1736_s1 + $0x80] sm:$0xff]   ;;  %v1297_v47 = vld [vmem:[%s1737_s0 + $0x7c] ss:$20 sps:$4 sm:$0xff]  }
   0xd   :  { %1141 = vmatpush3.bf16.msra.mxu1 %v1256_v11  ;;  %1078 = vmatprep.subr.bf16.mxu0 %v1257_v12  ;;  %v1277_v32 = vld [vmem:[%s1737_s0] ss:$20 sps:$4 sm:$0xff]   ;;  %v1279_v33 = vld [vmem:[%s1737_s0 + $0x4] ss:$20 sps:$4 sm:$0xff]   ;;  %v1280_v34 = vld [vmem:[%s1737_s0 + $0x8] ss:$20 sps:$4 sm:$0xff]  }
   0xe   :  { %1142 = vmatprep.subr.bf16.mxu1 %v1258_v13  ;;  %v1282_v35 = vld [vmem:[%s1737_s0 + $0xc] ss:$20 sps:$4 sm:$0xff]   ;;  %642 = vmatprep.mubr.bf16.mxu0 %v1279_v33  ;;  %v1286_v38 = vld [vmem:[%s1737_s0 + $0x34] ss:$20 sps:$4 sm:$0xff]   ;;  %v1289_v40 = vld [vmem:[%s1737_s0 + $0x30] ss:$20 sps:$4 sm:$0xff]  }
   0xf   :  { %739 = vmatprep.mubr.bf16.mxu1 %v1282_v35  ;;  %v1284_v37 = vld [vmem:[%s1737_s0 + $0x2c] ss:$20 sps:$4 sm:$0xff]   ;;  %v1288_v39 = vld [vmem:[%s1737_s0 + $0x28] ss:$20 sps:$4 sm:$0xff]   ;;  %v1294_v44 = vld [vmem:[%s1737_s0 + $0x50] ss:$20 sps:$4 sm:$0xff]  }
  0x10   :  { %1079 = vmatpush3.bf16.msra.mxu0 %v1259_v14  ;;  %v1290_v41 = vld [vmem:[%s1737_s0 + $0x54] ss:$20 sps:$4 sm:$0xff]   ;;  %v1295_v45 = vld [vmem:[%s1737_s0 + $0x58] ss:$20 sps:$4 sm:$0xff]   ;;  %v1322_v49 = vld [vmem:[%s1736_s1 + $0x100] sm:$0xff]   ;;  %v1337_v12 = vmov 0.0  }
  0x11   :  { %1143 = vmatpush3.bf16.msra.mxu1 %v1260_v15  ;;  %1080 = vmatprep.subr.bf16.mxu0 %v1261_v16  ;;  %v1309_v46 = vld [vmem:[%s1736_s1 + $0x108] sm:$0xff]   ;;  %v1299_v48 = vld [vmem:[%s1737_s0 + $0x84] ss:$20 sps:$4 sm:$0xff]   ;;  %v1302_v51 = vld [vmem:[%s1737_s0 + $0x80] ss:$20 sps:$4 sm:$0xff]   ;;  %19 = vst.msk [vmem:[#allocation2 + $0x10] sm:$0xff] %vm16_vm0, %v1337_v12 }
  0x12   :  { %1144 = vmatprep.subr.bf16.mxu1 %v1262_v17  ;;  %v1301_v50 = vld [vmem:[%s1737_s0 + $0x78] ss:$20 sps:$4 sm:$0xff]   ;;  %v1307_v54 = vld [vmem:[%s1737_s0 + $0xa0] ss:$20 sps:$4 sm:$0xff]   ;;  %v1308_v55 = vld [vmem:[%s1737_s0 + $0xa8] ss:$20 sps:$4 sm:$0xff]  }
  0x13   :  { %v1303_v52 = vld [vmem:[%s1737_s0 + $0xa4] ss:$20 sps:$4 sm:$0xff]   ;;  %v1305_v53 = vld [vmem:[%s1737_s0 + $0xac] ss:$20 sps:$4 sm:$0xff]   ;;  %v1312_v57 = vld [vmem:[%s1737_s0 + $0xd4] ss:$20 sps:$4 sm:$0xff]  }
  0x14   :  { %1081 = vmatpush3.bf16.msra.mxu0 %v1263_v18  ;;  %v1310_v56 = vld [vmem:[%s1737_s0 + $0xcc] ss:$20 sps:$4 sm:$0xff]   ;;  %v1314_v58 = vld [vmem:[%s1737_s0 + $0xc8] ss:$20 sps:$4 sm:$0xff]   ;;  %v1315_v59 = vld [vmem:[%s1737_s0 + $0xd0] ss:$20 sps:$4 sm:$0xff]  }
  0x15   :  { %1145 = vmatpush3.bf16.msra.mxu1 %v1264_v19  ;;  %1082 = vmatprep.subr.bf16.mxu0 %v1265_v20  ;;  %v1316_v60 = vld [vmem:[%s1737_s0 + $0xf4] ss:$20 sps:$4 sm:$0xff]   ;;  %v1318_v61 = vld [vmem:[%s1737_s0 + $0xfc] ss:$20 sps:$4 sm:$0xff]   ;;  %v1321_v63 = vld [vmem:[%s1737_s0 + $0xf8] ss:$20 sps:$4 sm:$0xff]  }
  0x16   :  { %1146 = vmatprep.subr.bf16.mxu1 %v1266_v21  ;;  %v1320_v62 = vld [vmem:[%s1737_s0 + $0xf0] ss:$20 sps:$4 sm:$0xff]   ;;  %v1327_v2 = vld [vmem:[%s1737_s0 + $0x118] ss:$20 sps:$4 sm:$0xff]   ;;  %v1328_v3 = vld [vmem:[%s1737_s0 + $0x120] ss:$20 sps:$4 sm:$0xff]  }
  0x17   :  { %v1323_v0 = vld [vmem:[%s1737_s0 + $0x11c] ss:$20 sps:$4 sm:$0xff]   ;;  %v1325_v1 = vld [vmem:[%s1737_s0 + $0x124] ss:$20 sps:$4 sm:$0xff]   ;;  %v1333_v8 = vld [vmem:[%s1737_s0 + $0x60] ss:$20 sps:$4 sm:$0xff]  }
  0x18   :  { %1083 = vmatpush3.bf16.msra.mxu0 %v1267_v22  ;;  %v1329_v4 = vld [vmem:[%s1737_s0 + $0x10] ss:$20 sps:$4 sm:$0xff]   ;;  %v1331_v6 = vld [vmem:[%s1737_s0 + $0x38] ss:$20 sps:$4 sm:$0xff]   ;;  %v1334_v9 = vld [vmem:[%s1737_s0 + $0x100] ss:$20 sps:$4 sm:$0xff]  }
  0x19   :  { %1147 = vmatpush3.bf16.msra.mxu1 %v1268_v23  ;;  %1084 = vmatprep.subr.bf16.mxu0 %v1269_v24  ;;  %v1330_v5 = vld [vmem:[%s1737_s0 + $0xb0] ss:$20 sps:$4 sm:$0xff]   ;;  %v1332_v7 = vld [vmem:[%s1737_s0 + $0xd8] ss:$20 sps:$4 sm:$0xff]   ;;  %v1335_v10 = vld [vmem:[%s1737_s0 + $0x88] ss:$20 sps:$4 sm:$0xff]  }
  0x1a   :  { %1148 = vmatprep.subr.bf16.mxu1 %v1270_v25  ;;  %v1336_v11 = vld [vmem:[%s1737_s0 + $0x128] ss:$20 sps:$4 sm:$0xff]   ;;  %17 = vst.msk [vmem:[#allocation2] sm:$0xff] %vm16_vm0, %v1337_v12  ;;  %18 = vst.msk [vmem:[#allocation2 + $0x8] sm:$0xff] %vm16_vm0, %v1337_v12 }
  0x1b   :  { %20 = vst.msk [vmem:[#allocation2 + $0x18] sm:$0xff] %vm16_vm0, %v1337_v12  ;;  %21 = vst.msk [vmem:[#allocation2 + $0x20] sm:$0xff] %vm16_vm0, %v1337_v12 }
  0x1c   :  { %1085 = vmatpush3.bf16.msra.mxu0 %v1271_v26  ;;  %22 = vst.msk [vmem:[#allocation2 + $0x28] sm:$0xff] %vm16_vm0, %v1337_v12  ;;  %23 = vst.msk [vmem:[#allocation2 + $0x30] sm:$0xff] %vm16_vm0, %v1337_v12 }
  0x1d   :  { %1149 = vmatpush3.bf16.msra.mxu1 %v1272_v27  ;;  %1086 = vmatprep.subr.bf16.mxu0 %v1273_v28  ;;  %24 = vst.msk [vmem:[#allocation2 + $0x38] sm:$0xff] %vm16_vm0, %v1337_v12  ;;  %25 = vst.msk [vmem:[#allocation2 + $0x40] sm:$0xff] %vm16_vm0, %v1337_v12 }
  0x1e   :  { %1150 = vmatprep.subr.bf16.mxu1 %v1274_v29  ;;  %26 = vst.msk [vmem:[#allocation2 + $0x48] sm:$0xff] %vm16_vm0, %v1337_v12  ;;  %27 = vst.msk [vmem:[#allocation2 + $0x50] sm:$0xff] %vm16_vm0, %v1337_v12 }
  0x1f   :  { %28 = vst.msk [vmem:[#allocation2 + $0x58] sm:$0xff] %vm16_vm0, %v1337_v12  ;;  %29 = vst.msk [vmem:[#allocation2 + $0x60] sm:$0xff] %vm16_vm0, %v1337_v12 }
  0x20   :  { %1087 = vmatpush3.bf16.msra.mxu0 %v1275_v30  ;;  %30 = vst.msk [vmem:[#allocation2 + $0x68] sm:$0xff] %vm16_vm0, %v1337_v12  ;;  %31 = vst.msk [vmem:[#allocation2 + $0x70] sm:$0xff] %vm16_vm0, %v1337_v12 }
  0x21   :  { %1151 = vmatpush3.bf16.msra.mxu1 %v1276_v31  ;;  %1212 = vmatprep.subr.bf16.mxu0 %v1283_v36  ;;  %32 = vst.msk [vmem:[#allocation2 + $0x78] sm:$0xff] %vm16_vm0, %v1337_v12 }
  0x22   :  { %1236 = vmatprep.subr.bf16.mxu1 %v1283_v36 }
  0x23   :  { %643 = vmatmul.mubr.bf16.vlgmr.msra.gmra.mxu0 %v1277_v32 }
  0x24   :  { %740 = vmatmul.mubr.bf16.vlgmr.msra.gmra.mxu1 %v1280_v34  ;;  %1213 = vmatpush3.bf16.msra.mxu0 %v1283_v36 }
  0x25   :  { %1240 = vmatpush3.bf16.msra.mxu1 %v1283_v36  ;;  %650 = vmatprep.mubr.bf16.mxu0 %v1284_v37 }
  0x26   :  { %747 = vmatprep.mubr.bf16.mxu1 %v1286_v38  ;;  %1214 = vmatprep.subr.bf16.mxu0 %v1296_v42 }
  0x27   :  { %1237 = vmatprep.subr.bf16.mxu1 %v1296_v42 }
  0x28   :  { %1215 = vmatpush3.bf16.msra.mxu0 %v1296_v42 }
  0x29   :  { %1241 = vmatpush3.bf16.msra.mxu1 %v1296_v42  ;;  %1216 = vmatprep.subr.bf16.mxu0 %v1309_v46 }
  0x2a   :  { %1238 = vmatprep.subr.bf16.mxu1 %v1309_v46 }
  0x2b   :  { %651 = vmatmul.mubr.bf16.gmra.mxu0 %v1288_v39 }
  0x2c   :  { %748 = vmatmul.mubr.bf16.gmra.mxu1 %v1289_v40  ;;  %658 = vmatprep.mubr.bf16.mxu0 %v1290_v41 }
  0x2d   :  { %755 = vmatprep.mubr.bf16.mxu1 %v1292_v43  ;;  %1217 = vmatpush3.bf16.msra.mxu0 %v1309_v46 }
  0x2e   :  { %1242 = vmatpush3.bf16.msra.mxu1 %v1309_v46  ;;  %1218 = vmatprep.subr.bf16.mxu0 %v1322_v49 }
  0x2f   :  { %1239 = vmatprep.subr.bf16.mxu1 %v1322_v49 }
  0x31   :  { %1219 = vmatpush3.bf16.msra.mxu0 %v1322_v49 }
  0x32   :  { %1243 = vmatpush3.bf16.msra.mxu1 %v1322_v49 }
  0x33   :  { %659 = vmatmul.mubr.bf16.gmra.mxu0 %v1294_v44 }
  0x34   :  { %756 = vmatmul.mubr.bf16.gmra.mxu1 %v1295_v45  ;;  %666 = vmatprep.mubr.bf16.mxu0 %v1297_v47 }
  0x35   :  { %763 = vmatprep.mubr.bf16.mxu1 %v1299_v48 }
  0x3b   :  { %667 = vmatmul.mubr.bf16.gmra.mxu0 %v1301_v50 }
  0x3c   :  { %764 = vmatmul.mubr.bf16.gmra.mxu1 %v1302_v51  ;;  %674 = vmatprep.mubr.bf16.mxu0 %v1303_v52 }
  0x3d   :  { %771 = vmatprep.mubr.bf16.mxu1 %v1305_v53 }
  0x43   :  { %675 = vmatmul.mubr.bf16.gmra.mxu0 %v1307_v54 }
  0x44   :  { %772 = vmatmul.mubr.bf16.gmra.mxu1 %v1308_v55  ;;  %682 = vmatprep.mubr.bf16.mxu0 %v1310_v56 }
  0x45   :  { %779 = vmatprep.mubr.bf16.mxu1 %v1312_v57 }
  0x4b   :  { %683 = vmatmul.mubr.bf16.gmra.mxu0 %v1314_v58 }
  0x4c   :  { %780 = vmatmul.mubr.bf16.gmra.mxu1 %v1315_v59  ;;  %690 = vmatprep.mubr.bf16.mxu0 %v1316_v60 }
  0x4d   :  { %787 = vmatprep.mubr.bf16.mxu1 %v1318_v61 }
  0x53   :  { %691 = vmatmul.mubr.bf16.gmra.mxu0 %v1320_v62 }
  0x54   :  { %788 = vmatmul.mubr.bf16.gmra.mxu1 %v1321_v63  ;;  %698 = vmatprep.mubr.bf16.mxu0 %v1323_v0 }
  0x55   :  { %795 = vmatprep.mubr.bf16.mxu1 %v1325_v1 }
  0x5b   :  { %699 = vmatmul.mubr.bf16.gmra.mxu0 %v1327_v2 }
  0x5c   :  { %796 = vmatmul.mubr.bf16.gmra.mxu1 %v1328_v3  ;;  %1220 = vmatprep.mubr.msk.bf16.mxu0 %vm16_vm0, %v1329_v4 }
  0x5d   :  { %1228 = vmatprep.mubr.msk.bf16.mxu1 %vm16_vm0, %v1330_v5 }
  0x63   :  { %1221 = vmatmul.mubr.msk.bf16.vlgmr.msra.gmra.mxu0 %vm16_vm0, %v1331_v6 }
  0x64   :  { %1229 = vmatmul.mubr.msk.bf16.vlgmr.msra.gmra.mxu1 %vm16_vm0, %v1332_v7  ;;  %1224 = vmatprep.mubr.msk.bf16.mxu0 %vm16_vm0, %v1333_v8 }
  0x65   :  { %1232 = vmatprep.mubr.msk.bf16.mxu1 %vm16_vm0, %v1334_v9 }
  0x6b   :  { %1225 = vmatmul.mubr.msk.bf16.gmra.mxu0 %vm16_vm0, %v1335_v10 }
  0x6c   :  { %1233 = vmatmul.mubr.msk.bf16.gmra.mxu1 %vm16_vm0, %v1336_v11 }
  0xe3   :  { %v1088_v13 = vpop.f32.mrf.mxu0 }
  0xe4   :  { %v1152_v14 = vpop.f32.mrf.mxu1 }
  0xe5   :  { %v1089_v15 = vpop.f32.mrf.mxu0 }
  0xe6   :  { %v1153_v16 = vpop.f32.mrf.mxu1  ;;  %v1090_v7 = vadd.f32 %v1089_v15, %v1088_v13 }
  0xe7   :  { %v1091_v17 = vpop.f32.mrf.mxu0  ;;  %v1154_v8 = vadd.f32 %v1153_v16, %v1152_v14 }
  0xe8   :  { %v1155_v18 = vpop.f32.mrf.mxu1 }
  0xe9   :  { %v1092_v19 = vpop.f32.mrf.mxu0  ;;  %v742_v16 = vadd.f32 %v1154_v8, %v1090_v7 }
  0xea   :  { %v1156_v20 = vpop.f32.mrf.mxu1  ;;  %v1093_v10 = vadd.f32 %v1092_v19, %v1091_v17 }
  0xeb   :  { %v1094_v21 = vpop.f32.mrf.mxu0  ;;  %v1157_v11 = vadd.f32 %v1156_v20, %v1155_v18 }
  0xec   :  { %v1158_v22 = vpop.f32.mrf.mxu1 }
  0xed   :  { %v1095_v23 = vpop.f32.mrf.mxu0  ;;  %v745_v17 = vadd.f32 %v1157_v11, %v1093_v10 }
  0xee   :  { %v1159_v24 = vpop.f32.mrf.mxu1  ;;  %v1096_v12 = vadd.f32 %v1095_v23, %v1094_v21  ;;  %v35_v21 = vld [vmem:[#allocation2 + $0x10] sm:$0xff] }
  0xef   :  { %v1097_v25 = vpop.f32.mrf.mxu0 }
  0xf0   :  { %v1161_v26 = vpop.f32.mrf.mxu1 }
  0xf1   :  { %v1098_v27 = vpop.f32.mrf.mxu0 }
  0xf2   :  { %v1162_v28 = vpop.f32.mrf.mxu1 }
  0xf3   :  { %v1100_v29 = vpop.f32.mrf.mxu0 }
  0xf4   :  { %v1164_v30 = vpop.f32.mrf.mxu1 }
  0xf5   :  { %v1101_v31 = vpop.f32.mrf.mxu0 }
  0xf6   :  { %v1165_v32 = vpop.f32.mrf.mxu1 }
  0xf7   :  { %v1605_v33 = vpop.f32.mrf.mxu0 }
  0xf8   :  { %v1607_v34 = vpop.f32.mrf.mxu1 }
  0xf9   :  { %1739 = vst [vmem:[#allocation3_spill] sm:$0xff] %v1607_v34  ;;  %v1609_v35 = vpop.f32.mrf.mxu0 }
  0xfa   :  { %1740 = vst [vmem:[#allocation4_spill] sm:$0xff] %v1609_v35  ;;  %v1611_v36 = vpop.f32.mrf.mxu1 }
  0xfb   :  { %1741 = vst [vmem:[#allocation5_spill] sm:$0xff] %v1611_v36  ;;  %v1106_v37 = vpop.f32.mrf.mxu0  ;;  %v1160_v36 = vadd.f32 %v1159_v24, %v1158_v22 }
  0xfc   :  { %v1170_v38 = vpop.f32.mrf.mxu1 }
  0xfd   :  { %v1107_v39 = vpop.f32.mrf.mxu0  ;;  %v750_v15 = vadd.f32 %v1160_v36, %v1096_v12 }
  0xfe   :  { %v1171_v40 = vpop.f32.mrf.mxu1  ;;  %v1108_v13 = vadd.f32 %v1107_v39, %v1106_v37  ;;  %v33_v37 = vld [vmem:[#allocation2] sm:$0xff] }
  0xff   :  { %v1613_v41 = vpop.f32.mrf.mxu0  ;;  %v1172_v18 = vadd.f32 %v1171_v40, %v1170_v38 }
 0x100   :  { %1742 = vst [vmem:[#allocation6_spill] sm:$0xff] %v1613_v41  ;;  %v1615_v42 = vpop.f32.mrf.mxu1  ;;  %v1102_v41 = vadd.f32 %v1101_v31, %v1100_v29 }
 0x101   :  { %1743 = vst [vmem:[#allocation7_spill] sm:$0xff] %v1615_v42  ;;  %v1617_v43 = vpop.f32.mrf.mxu0  ;;  %v1752_v24 = vld [vmem:[#allocation4_spill] sm:$0xff] }
 0x102   :  { %1744 = vst [vmem:[#allocation8_spill] sm:$0xff] %v1617_v43  ;;  %v1619_v44 = vpop.f32.mrf.mxu1 }
 0x103   :  { %1745 = vst [vmem:[#allocation9_spill] sm:$0xff] %v1619_v44  ;;  %v1112_v45 = vpop.f32.mrf.mxu0 }
 0x104   :  { %v1176_v46 = vpop.f32.mrf.mxu1 }
 0x105   :  { %v1113_v47 = vpop.f32.mrf.mxu0 }
 0x106   :  { %v1177_v48 = vpop.f32.mrf.mxu1 }
 0x107   :  { %v1115_v49 = vpop.f32.mrf.mxu0 }
 0x108   :  { %v1179_v50 = vpop.f32.mrf.mxu1 }
 0x109   :  { %v1116_v51 = vpop.f32.mrf.mxu0 }
 0x10a   :  { %v1180_v52 = vpop.f32.mrf.mxu1  ;;  %v1117_v31 = vadd.f32 %v1116_v51, %v1115_v49 }
 0x10b   :  { %v1118_v53 = vpop.f32.mrf.mxu0 }
 0x10c   :  { %v1182_v54 = vpop.f32.mrf.mxu1 }
 0x10d   :  { %v1119_v55 = vpop.f32.mrf.mxu0 }
 0x10e   :  { %v1183_v56 = vpop.f32.mrf.mxu1  ;;  %v1120_v44 = vadd.f32 %v1119_v55, %v1118_v53  ;;  %v36_v53 = vld [vmem:[#allocation2 + $0x18] sm:$0xff] }
 0x10f   :  { %v1121_v57 = vpop.f32.mrf.mxu0  ;;  %v1184_v42 = vadd.f32 %v1183_v56, %v1182_v54  ;;  %v766_v56 = vadd.f32 %v1172_v18, %v1108_v13  ;;  %v39_v18 = vld [vmem:[#allocation2 + $0x30] sm:$0xff] }
 0x110   :  { %v1185_v58 = vpop.f32.mrf.mxu1 }
 0x111   :  { %v1122_v59 = vpop.f32.mrf.mxu0  ;;  %v782_v23 = vadd.f32 %v1184_v42, %v1120_v44  ;;  %v41_v44 = vld [vmem:[#allocation2 + $0x40] sm:$0xff] }
 0x112   :  { %v1186_v60 = vpop.f32.mrf.mxu1  ;;  %v1123_v19 = vadd.f32 %v1122_v59, %v1121_v57  ;;  %v1755_v59 = vld [vmem:[#allocation6_spill] sm:$0xff] }
 0x113   :  { %v1621_v61 = vpop.f32.mrf.mxu0  ;;  %v1187_v20 = vadd.f32 %v1186_v60, %v1185_v58  ;;  %v44_v58 = vld [vmem:[#allocation2 + $0x58] sm:$0xff]  ;;  %v1756_v60 = vld [vmem:[#allocation8_spill] sm:$0xff] }
 0x114   :  { %1746 = vst [vmem:[#allocation10_spill] sm:$0xff] %v1621_v61  ;;  %v1623_v62 = vpop.f32.mrf.mxu1  ;;  %v1178_v61 = vadd.f32 %v1177_v48, %v1176_v46 }
 0x115   :  { %1747 = vst [vmem:[#allocation11_spill] sm:$0xff] %v1623_v62  ;;  %v1125_v63 = vpop.f32.mrf.mxu0  ;;  %v785_v55 = vadd.f32 %v1187_v20, %v1123_v19  ;;  %v1759_v20 = vld [vmem:[#allocation3_spill] sm:$0xff] }
 0x116   :  { %v1189_v0 = vpop.f32.mrf.mxu1 }
 0x117   :  { %v1625_v1 = vpop.f32.mrf.mxu0 }
 0x118   :  { %1748 = vst [vmem:[#allocation12_spill] sm:$0xff] %v1625_v1  ;;  %v1627_v2 = vpop.f32.mrf.mxu1  ;;  %v1099_v1 = vadd.f32 %v1098_v27, %v1097_v25  ;;  %v1637_v25 = vadd.f32 %v1752_v24, %v1605_v33  ;;  %v43_v27 = vld [vmem:[#allocation2 + $0x50] sm:$0xff] }
 0x119   :  { %1749 = vst [vmem:[#allocation13_spill] sm:$0xff] %v1627_v2  ;;  %v1629_v3 = vpop.f32.mrf.mxu0  ;;  %v1163_v2 = vadd.f32 %v1162_v28, %v1161_v26 }
 0x11a   :  { %1750 = vst [vmem:[#allocation14_spill] sm:$0xff] %v1629_v3  ;;  %v1631_v4 = vpop.f32.mrf.mxu1  ;;  %v1166_v3 = vadd.f32 %v1165_v32, %v1164_v30  ;;  %v1181_v32 = vadd.f32 %v1180_v52, %v1179_v50 }
 0x11b   :  { %1751 = vst [vmem:[#allocation15_spill] sm:$0xff] %v1631_v4  ;;  %v1130_v5 = vpop.f32.mrf.mxu0  ;;  %v1114_v4 = vadd.f32 %v1113_v47, %v1112_v45  ;;  %v753_v29 = vadd.f32 %v1163_v2, %v1099_v1 }
 0x11c   :  { %v1194_v6 = vpop.f32.mrf.mxu1  ;;  %v1639_v30 = vadd.f32 %v1166_v3, %v1102_v41  ;;  %v1753_v41 = vld [vmem:[#allocation10_spill] sm:$0xff]  ;;  %v1754_v49 = vld [vmem:[#allocation11_spill] sm:$0xff]  ;;  %v34_v3 = vld [vmem:[#allocation2 + $0x8] sm:$0xff] }
 0x11d   :  { %v1131_v9 = vpop.f32.mrf.mxu0  ;;  %v774_v39 = vadd.f32 %v1178_v61, %v1114_v4  ;;  %v1126_v57 = vadd.f32 %v1125_v63, %v1753_v41  ;;  %v1190_v50 = vadd.f32 %v1189_v0, %v1754_v49  ;;  %v1111_v61 = vadd.f32 %v1756_v60, %v1755_v59  ;;  %v1758_v63 = vld [vmem:[#allocation9_spill] sm:$0xff] }
 0x11e   :  { %v1195_v34 = vpop.f32.mrf.mxu1  ;;  %v1132_v40 = vadd.f32 %v1131_v9, %v1130_v5  ;;  %v777_v5 = vadd.f32 %v1181_v32, %v1117_v31  ;;  %v42_v9 = vld [vmem:[#allocation2 + $0x48] sm:$0xff] }
 0x11f   :  { %v1633_v43 = vpop.f32.mrf.mxu0  ;;  %v1196_v45 = vadd.f32 %v1195_v34, %v1194_v6  ;;  %v1757_v6 = vld [vmem:[#allocation7_spill] sm:$0xff] }
 0x120   :  { %v1197_v62 = vpop.f32.mrf.mxu1  ;;  %v1175_v7 = vadd.f32 %v1758_v63, %v1757_v6 }
 0x121   :  { %v1134_v35 = vpop.f32.mrf.mxu0  ;;  %v798_v11 = vadd.f32 %v1196_v45, %v1132_v40  ;;  %v45_v40 = vld [vmem:[#allocation2 + $0x60] sm:$0xff] }
 0x122   :  { %v1198_v14 = vpop.f32.mrf.mxu1  ;;  %v1135_v12 = vadd.f32 %v1134_v35, %v1633_v43  ;;  %v1763_v43 = vld [vmem:[#allocation13_spill] sm:$0xff] }
 0x123   :  { %v1222_v22 = vpop.f32.mrf.mxu0  ;;  %v1199_v13 = vadd.f32 %v1198_v14, %v1197_v62  ;;  %v1764_v62 = vld [vmem:[#allocation15_spill] sm:$0xff] }
 0x124   :  { %v847_v26 = vadd.f32 %v1222_v22, %v750_v15  ;;  %v1230_v28 = vpop.f32.mrf.mxu1  ;;  %v1193_v14 = vadd.f32 %v1764_v62, %v1763_v43 }
 0x125   :  { %v879_v36 = vadd.f32 %v1230_v28, %v782_v23  ;;  %v838_v38 = vpop.f32.mrf.mxu0  ;;  %v1761_v28 = vld [vmem:[#allocation12_spill] sm:$0xff] }
 0x126   :  { %v903_v46 = vadd.f32 %v847_v26, %v35_v21  ;;  %v839_v42 = vadd.f32 %v838_v38, %v742_v16  ;;  %v870_v47 = vpop.f32.mrf.mxu1  ;;  %v1760_v21 = vld [vmem:[#allocation5_spill] sm:$0xff] }
 0x127   :  { %v911_v33 = vadd.f32 %v879_v36, %v43_v27  ;;  %v871_v48 = vadd.f32 %v870_v47, %v774_v39  ;;  %v1223_v54 = vpop.f32.mrf.mxu0  ;;  %v1169_v22 = vadd.f32 %v1760_v21, %v1759_v20  ;;  %v790_v27 = vadd.f32 %v1190_v50, %v1126_v57  ;;  %v37_v36 = vld [vmem:[#allocation2 + $0x20] sm:$0xff]  ;;  %v48_v57 = vld [vmem:[#allocation2 + $0x78] sm:$0xff] }
 0x128   :  { %919 = vst.msk [vmem:[#allocation2 + $0x10] sm:$0xff] %vm16_vm0, %v903_v46  ;;  %v901_v51 = vadd.f32 %v839_v42, %v33_v37  ;;  %v850_v52 = vadd.f32 %v1223_v54, %v753_v29  ;;  %v1231_v34 = vpop.f32.mrf.mxu1  ;;  %v1762_v29 = vld [vmem:[#allocation14_spill] sm:$0xff]  ;;  %v769_v46 = vadd.f32 %v1175_v7, %v1111_v61 }
 0x129   :  { %927 = vst.msk [vmem:[#allocation2 + $0x50] sm:$0xff] %vm16_vm0, %v911_v33  ;;  %v909_v1 = vadd.f32 %v871_v48, %v41_v44  ;;  %v882_v2 = vadd.f32 %v1231_v34, %v785_v55  ;;  %v841_v4 = vpop.f32.mrf.mxu0  ;;  %v1129_v35 = vadd.f32 %v1762_v29, %v1761_v28  ;;  %v40_v33 = vld [vmem:[#allocation2 + $0x38] sm:$0xff]  ;;  %v38_v34 = vld [vmem:[#allocation2 + $0x28] sm:$0xff] }
 0x12a   :  { %917 = vst.msk [vmem:[#allocation2] sm:$0xff] %vm16_vm0, %v901_v51  ;;  %v904_v0 = vadd.f32 %v850_v52, %v36_v53  ;;  %v842_v8 = vadd.f32 %v841_v4, %v745_v17  ;;  %v873_v10 = vpop.f32.mrf.mxu1  ;;  %v47_v17 = vld [vmem:[#allocation2 + $0x70] sm:$0xff]  ;;  %v801_v53 = vadd.f32 %v1199_v13, %v1135_v12 }
 0x12b   :  { %925 = vst.msk [vmem:[#allocation2 + $0x40] sm:$0xff] %vm16_vm0, %v909_v1  ;;  %v912_v15 = vadd.f32 %v882_v2, %v44_v58  ;;  %v874_v16 = vadd.f32 %v873_v10, %v777_v5  ;;  %v1226_v19 = vpop.f32.mrf.mxu0  ;;  %v793_v60 = vadd.f32 %v1193_v14, %v1129_v35 }
 0x12c   :  { %920 = vst.msk [vmem:[#allocation2 + $0x18] sm:$0xff] %vm16_vm0, %v904_v0  ;;  %v902_v23 = vadd.f32 %v842_v8, %v34_v3  ;;  %v863_v24 = vadd.f32 %v1226_v19, %v766_v56  ;;  %v1234_v26 = vpop.f32.mrf.mxu1  ;;  %v46_v3 = vld [vmem:[#allocation2 + $0x68] sm:$0xff] }
 0x12d   :  { %928 = vst.msk [vmem:[#allocation2 + $0x58] sm:$0xff] %vm16_vm0, %v912_v15  ;;  %v910_v31 = vadd.f32 %v874_v16, %v42_v9  ;;  %v895_v32 = vadd.f32 %v1234_v26, %v798_v11  ;;  %v854_v37 = vpop.f32.mrf.mxu0 }
 0x12e   :  { %918 = vst.msk [vmem:[#allocation2 + $0x8] sm:$0xff] %vm16_vm0, %v902_v23  ;;  %v907_v38 = vadd.f32 %v863_v24, %v39_v18  ;;  %v855_v39 = vadd.f32 %v854_v37, %v1639_v30  ;;  %v886_v45 = vpop.f32.mrf.mxu1  ;;  %v761_v30 = vadd.f32 %v1169_v22, %v1637_v25 }
 0x12f   :  { %v938_v42 = vld [vmem:[#allocation2 + $0x10] sm:$0xff]  ;;  %926 = vst.msk [vmem:[#allocation2 + $0x48] sm:$0xff] %vm16_vm0, %v910_v31  ;;  %v915_v44 = vadd.f32 %v895_v32, %v47_v17  ;;  %v887_v47 = vadd.f32 %v886_v45, %v790_v27  ;;  %v1227_v48 = vpop.f32.mrf.mxu0 }
 0x130   :  { %v954_v54 = vmax.f32 %v938_v42, 0.0  ;;  %v946_v55 = vld [vmem:[#allocation2 + $0x50] sm:$0xff]  ;;  %923 = vst.msk [vmem:[#allocation2 + $0x30] sm:$0xff] %vm16_vm0, %v907_v38  ;;  %v905_v56 = vadd.f32 %v855_v39, %v37_v36  ;;  %v866_v41 = vadd.f32 %v1227_v48, %v769_v46  ;;  %v1235_v49 = vpop.f32.mrf.mxu1 }
 0x131   :  { %v962_v50 = vmax.f32 %v946_v55, 0.0  ;;  %v936_v51 = vld [vmem:[#allocation2] sm:$0xff]  ;;  %931 = vst.msk [vmem:[#allocation2 + $0x70] sm:$0xff] %vm16_vm0, %v915_v44  ;;  %v913_v52 = vadd.f32 %v887_v47, %v45_v40  ;;  %v898_v58 = vadd.f32 %v1235_v49, %v801_v53  ;;  %v857_v59 = vpop.f32.mrf.mxu0 }
 0x132   :  { %970 = vst.msk [vmem:[%s1738_s2 + $0x10] sm:$0xff] %vm16_vm0, %v954_v54  ;;  %v952_v61 = vmax.f32 %v936_v51, 0.0  ;;  %v944_v1 = vld [vmem:[#allocation2 + $0x40] sm:$0xff]  ;;  %921 = vst.msk [vmem:[#allocation2 + $0x20] sm:$0xff] %vm16_vm0, %v905_v56  ;;  %v908_v2 = vadd.f32 %v866_v41, %v40_v33  ;;  %v858_v25 = vadd.f32 %v857_v59, %v761_v30  ;;  %v889_v4 = vpop.f32.mrf.mxu1 }
 0x133   :  { %978 = vst.msk [vmem:[%s1738_s2 + $0x50] sm:$0xff] %vm16_vm0, %v962_v50  ;;  %v960_v5 = vmax.f32 %v944_v1, 0.0  ;;  %v939_v6 = vld [vmem:[#allocation2 + $0x18] sm:$0xff]  ;;  %929 = vst.msk [vmem:[#allocation2 + $0x60] sm:$0xff] %vm16_vm0, %v913_v52  ;;  %v916_v63 = vadd.f32 %v898_v58, %v48_v57  ;;  %v890_v7 = vadd.f32 %v889_v4, %v793_v60 }
 0x134   :  { %968 = vst.msk [vmem:[%s1738_s2] sm:$0xff] %vm16_vm0, %v952_v61  ;;  %v955_v0 = vmax.f32 %v939_v6, 0.0  ;;  %v947_v8 = vld [vmem:[#allocation2 + $0x58] sm:$0xff]  ;;  %924 = vst.msk [vmem:[#allocation2 + $0x38] sm:$0xff] %vm16_vm0, %v908_v2  ;;  %v906_v9 = vadd.f32 %v858_v25, %v38_v34 }
 0x135   :  { %976 = vst.msk [vmem:[%s1738_s2 + $0x40] sm:$0xff] %vm16_vm0, %v960_v5  ;;  %v963_v10 = vmax.f32 %v947_v8, 0.0  ;;  %v937_v11 = vld [vmem:[#allocation2 + $0x8] sm:$0xff]  ;;  %932 = vst.msk [vmem:[#allocation2 + $0x78] sm:$0xff] %vm16_vm0, %v916_v63  ;;  %v914_v12 = vadd.f32 %v890_v7, %v46_v3 }
 0x136   :  { %971 = vst.msk [vmem:[%s1738_s2 + $0x18] sm:$0xff] %vm16_vm0, %v955_v0  ;;  %v953_v13 = vmax.f32 %v937_v11, 0.0  ;;  %v945_v15 = vld [vmem:[#allocation2 + $0x48] sm:$0xff]  ;;  %922 = vst.msk [vmem:[#allocation2 + $0x28] sm:$0xff] %vm16_vm0, %v906_v9 }
 0x137   :  { %979 = vst.msk [vmem:[%s1738_s2 + $0x58] sm:$0xff] %vm16_vm0, %v963_v10  ;;  %v961_v16 = vmax.f32 %v945_v15, 0.0  ;;  %v942_v18 = vld [vmem:[#allocation2 + $0x30] sm:$0xff]  ;;  %930 = vst.msk [vmem:[#allocation2 + $0x68] sm:$0xff] %vm16_vm0, %v914_v12 }
 0x138   :  { %969 = vst.msk [vmem:[%s1738_s2 + $0x8] sm:$0xff] %vm16_vm0, %v953_v13  ;;  %v958_v19 = vmax.f32 %v942_v18, 0.0  ;;  %v950_v20 = vld [vmem:[#allocation2 + $0x70] sm:$0xff] }
 0x139   :  { %977 = vst.msk [vmem:[%s1738_s2 + $0x48] sm:$0xff] %vm16_vm0, %v961_v16  ;;  %v966_v21 = vmax.f32 %v950_v20, 0.0  ;;  %v940_v22 = vld [vmem:[#allocation2 + $0x20] sm:$0xff] }
 0x13a   :  { %974 = vst.msk [vmem:[%s1738_s2 + $0x30] sm:$0xff] %vm16_vm0, %v958_v19  ;;  %v956_v23 = vmax.f32 %v940_v22, 0.0  ;;  %v948_v24 = vld [vmem:[#allocation2 + $0x60] sm:$0xff] }
 0x13b   :  { %982 = vst.msk [vmem:[%s1738_s2 + $0x70] sm:$0xff] %vm16_vm0, %v966_v21  ;;  %v964_v17 = vmax.f32 %v948_v24, 0.0  ;;  %v943_v26 = vld [vmem:[#allocation2 + $0x38] sm:$0xff] }
 0x13c   :  { %972 = vst.msk [vmem:[%s1738_s2 + $0x20] sm:$0xff] %vm16_vm0, %v956_v23  ;;  %v959_v27 = vmax.f32 %v943_v26, 0.0  ;;  %v951_v28 = vld [vmem:[#allocation2 + $0x78] sm:$0xff] }
 0x13d   :  { %980 = vst.msk [vmem:[%s1738_s2 + $0x60] sm:$0xff] %vm16_vm0, %v964_v17  ;;  %v967_v29 = vmax.f32 %v951_v28, 0.0  ;;  %v941_v35 = vld [vmem:[#allocation2 + $0x28] sm:$0xff] }
 0x13e   :  { %975 = vst.msk [vmem:[%s1738_s2 + $0x38] sm:$0xff] %vm16_vm0, %v959_v27  ;;  %v957_v43 = vmax.f32 %v941_v35, 0.0  ;;  %v949_v62 = vld [vmem:[#allocation2 + $0x68] sm:$0xff] }
 0x13f   :  { %983 = vst.msk [vmem:[%s1738_s2 + $0x78] sm:$0xff] %vm16_vm0, %v967_v29  ;;  %v965_v14 = vmax.f32 %v949_v62, 0.0 }
 0x140   :  { %973 = vst.msk [vmem:[%s1738_s2 + $0x28] sm:$0xff] %vm16_vm0, %v957_v43 }
 0x141   :  { %981 = vst.msk [vmem:[%s1738_s2 + $0x68] sm:$0xff] %vm16_vm0, %v965_v14 }

// kernel: resnet_forward.17
= control target key start
LH: loop header
LB: loop body
LE: loop exit
PB: predicated region body
PF: predicated region fallthrough
CT: control target
= control target key end

     0   :  { %vm19_vm0 = vcmask 523264   ;;  %s1824_s1 = inlined_call_operand.vmem [shape: bf16[576,64], index: 1, kind: input, shape index: {}]   ;;  %s1825_s0 = inlined_call_operand.vmem [shape: bf16[128,576], index: 0, kind: input, shape index: {}]   ;;  %s1826_s2 = inlined_call_operand.vmem [shape: f32[128,64], index: 2, kind: input, shape index: {}]   ;;  %s1827_s3 = inlined_call_operand.vmem [shape: f32[128,64], index: 3, kind: output, shape index: {}]  }
   0x1   :  { %v1280_v0 = vld [vmem:[%s1824_s1 + $0x78] sm:$0xff]   ;;  %v1284_v4 = vld [vmem:[%s1824_s1 + $0x70] sm:$0xff]   ;;  %v1288_v8 = vld [vmem:[%s1824_s1 + $0x68] sm:$0xff]  }
   0x2   :  { %v1281_v1 = vld [vmem:[%s1824_s1 + $0xf8] sm:$0xff]   ;;  %1107 = vmatprep.subr.bf16.mxu0 %v1280_v0  ;;  %v1285_v5 = vld [vmem:[%s1824_s1 + $0xf0] sm:$0xff]   ;;  %v1289_v9 = vld [vmem:[%s1824_s1 + $0xe8] sm:$0xff]  }
   0x3   :  { %v1282_v2 = vld [vmem:[%s1824_s1 + $0x38] sm:$0xff]   ;;  %1171 = vmatprep.subr.bf16.mxu1 %v1281_v1  ;;  %v1286_v6 = vld [vmem:[%s1824_s1 + $0x30] sm:$0xff]   ;;  %v1290_v10 = vld [vmem:[%s1824_s1 + $0x28] sm:$0xff]  }
   0x4   :  { %v1283_v3 = vld [vmem:[%s1824_s1 + $0xb8] sm:$0xff]   ;;  %1108 = vmatpush3.bf16.msra.mxu0 %v1282_v2  ;;  %v1287_v7 = vld [vmem:[%s1824_s1 + $0xb0] sm:$0xff]   ;;  %v1291_v11 = vld [vmem:[%s1824_s1 + $0xa8] sm:$0xff]  }
   0x5   :  { %1172 = vmatpush3.bf16.msra.mxu1 %v1283_v3  ;;  %1109 = vmatprep.subr.bf16.mxu0 %v1284_v4  ;;  %v1292_v12 = vld [vmem:[%s1824_s1 + $0x60] sm:$0xff]   ;;  %v1296_v16 = vld [vmem:[%s1824_s1 + $0x58] sm:$0xff]   ;;  %v1300_v20 = vld [vmem:[%s1824_s1 + $0x50] sm:$0xff]  }
   0x6   :  { %1173 = vmatprep.subr.bf16.mxu1 %v1285_v5  ;;  %v1293_v13 = vld [vmem:[%s1824_s1 + $0xe0] sm:$0xff]   ;;  %v1297_v17 = vld [vmem:[%s1824_s1 + $0xd8] sm:$0xff]   ;;  %v1301_v21 = vld [vmem:[%s1824_s1 + $0xd0] sm:$0xff]  }
   0x7   :  { %v1294_v14 = vld [vmem:[%s1824_s1 + $0x20] sm:$0xff]   ;;  %v1298_v18 = vld [vmem:[%s1824_s1 + $0x18] sm:$0xff]   ;;  %v1302_v22 = vld [vmem:[%s1824_s1 + $0x10] sm:$0xff]  }
   0x8   :  { %1110 = vmatpush3.bf16.msra.mxu0 %v1286_v6  ;;  %v1295_v15 = vld [vmem:[%s1824_s1 + $0xa0] sm:$0xff]   ;;  %v1299_v19 = vld [vmem:[%s1824_s1 + $0x98] sm:$0xff]   ;;  %v1303_v23 = vld [vmem:[%s1824_s1 + $0x90] sm:$0xff]  }
   0x9   :  { %1174 = vmatpush3.bf16.msra.mxu1 %v1287_v7  ;;  %1111 = vmatprep.subr.bf16.mxu0 %v1288_v8  ;;  %v1304_v24 = vld [vmem:[%s1824_s1 + $0x48] sm:$0xff]   ;;  %v1308_v28 = vld [vmem:[%s1824_s1 + $0x40] sm:$0xff]   ;;  %v1318_v36 = vld [vmem:[%s1824_s1 + $0x118] sm:$0xff]  }
   0xa   :  { %1175 = vmatprep.subr.bf16.mxu1 %v1289_v9  ;;  %v1305_v25 = vld [vmem:[%s1824_s1 + $0xc8] sm:$0xff]   ;;  %v1309_v29 = vld [vmem:[%s1824_s1 + $0xc0] sm:$0xff]   ;;  %v1331_v42 = vld [vmem:[%s1824_s1 + $0x110] sm:$0xff]  }
   0xb   :  { %v1306_v26 = vld [vmem:[%s1824_s1 + $0x8] sm:$0xff]   ;;  %v1310_v30 = vld [vmem:[%s1824_s1] sm:$0xff]   ;;  %v1327_v43 = vld [vmem:[%s1825_s0 + $0x5c] ss:$20 sps:$4 sm:$0xff]  }
   0xc   :  { %1112 = vmatpush3.bf16.msra.mxu0 %v1290_v10  ;;  %v1307_v27 = vld [vmem:[%s1824_s1 + $0x88] sm:$0xff]   ;;  %v1311_v31 = vld [vmem:[%s1824_s1 + $0x80] sm:$0xff]   ;;  %v1332_v47 = vld [vmem:[%s1825_s0 + $0x7c] ss:$20 sps:$4 sm:$0xff]  }
   0xd   :  { %1176 = vmatpush3.bf16.msra.mxu1 %v1291_v11  ;;  %1113 = vmatprep.subr.bf16.mxu0 %v1292_v12  ;;  %v1312_v32 = vld [vmem:[%s1825_s0] ss:$20 sps:$4 sm:$0xff]   ;;  %v1314_v33 = vld [vmem:[%s1825_s0 + $0x4] ss:$20 sps:$4 sm:$0xff]   ;;  %v1315_v34 = vld [vmem:[%s1825_s0 + $0x8] ss:$20 sps:$4 sm:$0xff]  }
   0xe   :  { %1177 = vmatprep.subr.bf16.mxu1 %v1293_v13  ;;  %v1317_v35 = vld [vmem:[%s1825_s0 + $0xc] ss:$20 sps:$4 sm:$0xff]   ;;  %645 = vmatprep.mubr.bf16.mxu0 %v1314_v33  ;;  %v1321_v38 = vld [vmem:[%s1825_s0 + $0x34] ss:$20 sps:$4 sm:$0xff]   ;;  %v1324_v40 = vld [vmem:[%s1825_s0 + $0x30] ss:$20 sps:$4 sm:$0xff]  }
   0xf   :  { %742 = vmatprep.mubr.bf16.mxu1 %v1317_v35  ;;  %v1319_v37 = vld [vmem:[%s1825_s0 + $0x2c] ss:$20 sps:$4 sm:$0xff]   ;;  %v1323_v39 = vld [vmem:[%s1825_s0 + $0x28] ss:$20 sps:$4 sm:$0xff]   ;;  %v1329_v44 = vld [vmem:[%s1825_s0 + $0x50] ss:$20 sps:$4 sm:$0xff]  }
  0x10   :  { %1114 = vmatpush3.bf16.msra.mxu0 %v1294_v14  ;;  %v1325_v41 = vld [vmem:[%s1825_s0 + $0x54] ss:$20 sps:$4 sm:$0xff]   ;;  %v1330_v45 = vld [vmem:[%s1825_s0 + $0x58] ss:$20 sps:$4 sm:$0xff]   ;;  %v1357_v49 = vld [vmem:[%s1824_s1 + $0x100] sm:$0xff]   ;;  %v1372_v12 = vmov 0.0  }
  0x11   :  { %1178 = vmatpush3.bf16.msra.mxu1 %v1295_v15  ;;  %1115 = vmatprep.subr.bf16.mxu0 %v1296_v16  ;;  %v1344_v46 = vld [vmem:[%s1824_s1 + $0x108] sm:$0xff]   ;;  %v1334_v48 = vld [vmem:[%s1825_s0 + $0x84] ss:$20 sps:$4 sm:$0xff]   ;;  %v1337_v51 = vld [vmem:[%s1825_s0 + $0x80] ss:$20 sps:$4 sm:$0xff]   ;;  %22 = vst.msk [vmem:[#allocation2 + $0x10] sm:$0xff] %vm19_vm0, %v1372_v12 }
  0x12   :  { %1179 = vmatprep.subr.bf16.mxu1 %v1297_v17  ;;  %v1336_v50 = vld [vmem:[%s1825_s0 + $0x78] ss:$20 sps:$4 sm:$0xff]   ;;  %v1342_v54 = vld [vmem:[%s1825_s0 + $0xa0] ss:$20 sps:$4 sm:$0xff]   ;;  %v1343_v55 = vld [vmem:[%s1825_s0 + $0xa8] ss:$20 sps:$4 sm:$0xff]  }
  0x13   :  { %v1338_v52 = vld [vmem:[%s1825_s0 + $0xa4] ss:$20 sps:$4 sm:$0xff]   ;;  %v1340_v53 = vld [vmem:[%s1825_s0 + $0xac] ss:$20 sps:$4 sm:$0xff]   ;;  %v1347_v57 = vld [vmem:[%s1825_s0 + $0xd4] ss:$20 sps:$4 sm:$0xff]  }
  0x14   :  { %1116 = vmatpush3.bf16.msra.mxu0 %v1298_v18  ;;  %v1345_v56 = vld [vmem:[%s1825_s0 + $0xcc] ss:$20 sps:$4 sm:$0xff]   ;;  %v1349_v58 = vld [vmem:[%s1825_s0 + $0xc8] ss:$20 sps:$4 sm:$0xff]   ;;  %v1350_v59 = vld [vmem:[%s1825_s0 + $0xd0] ss:$20 sps:$4 sm:$0xff]  }
  0x15   :  { %1180 = vmatpush3.bf16.msra.mxu1 %v1299_v19  ;;  %1117 = vmatprep.subr.bf16.mxu0 %v1300_v20  ;;  %v1351_v60 = vld [vmem:[%s1825_s0 + $0xf4] ss:$20 sps:$4 sm:$0xff]   ;;  %v1353_v61 = vld [vmem:[%s1825_s0 + $0xfc] ss:$20 sps:$4 sm:$0xff]   ;;  %v1356_v63 = vld [vmem:[%s1825_s0 + $0xf8] ss:$20 sps:$4 sm:$0xff]  }
  0x16   :  { %1181 = vmatprep.subr.bf16.mxu1 %v1301_v21  ;;  %v1355_v62 = vld [vmem:[%s1825_s0 + $0xf0] ss:$20 sps:$4 sm:$0xff]   ;;  %v1362_v2 = vld [vmem:[%s1825_s0 + $0x118] ss:$20 sps:$4 sm:$0xff]   ;;  %v1363_v3 = vld [vmem:[%s1825_s0 + $0x120] ss:$20 sps:$4 sm:$0xff]  }
  0x17   :  { %v1358_v0 = vld [vmem:[%s1825_s0 + $0x11c] ss:$20 sps:$4 sm:$0xff]   ;;  %v1360_v1 = vld [vmem:[%s1825_s0 + $0x124] ss:$20 sps:$4 sm:$0xff]   ;;  %v1368_v8 = vld [vmem:[%s1825_s0 + $0x60] ss:$20 sps:$4 sm:$0xff]  }
  0x18   :  { %1118 = vmatpush3.bf16.msra.mxu0 %v1302_v22  ;;  %v1364_v4 = vld [vmem:[%s1825_s0 + $0x10] ss:$20 sps:$4 sm:$0xff]   ;;  %v1366_v6 = vld [vmem:[%s1825_s0 + $0x38] ss:$20 sps:$4 sm:$0xff]   ;;  %v1369_v9 = vld [vmem:[%s1825_s0 + $0x100] ss:$20 sps:$4 sm:$0xff]  }
  0x19   :  { %1182 = vmatpush3.bf16.msra.mxu1 %v1303_v23  ;;  %1119 = vmatprep.subr.bf16.mxu0 %v1304_v24  ;;  %v1365_v5 = vld [vmem:[%s1825_s0 + $0xb0] ss:$20 sps:$4 sm:$0xff]   ;;  %v1367_v7 = vld [vmem:[%s1825_s0 + $0xd8] ss:$20 sps:$4 sm:$0xff]   ;;  %v1370_v10 = vld [vmem:[%s1825_s0 + $0x88] ss:$20 sps:$4 sm:$0xff]  }
  0x1a   :  { %1183 = vmatprep.subr.bf16.mxu1 %v1305_v25  ;;  %v1371_v11 = vld [vmem:[%s1825_s0 + $0x128] ss:$20 sps:$4 sm:$0xff]   ;;  %20 = vst.msk [vmem:[#allocation2] sm:$0xff] %vm19_vm0, %v1372_v12  ;;  %21 = vst.msk [vmem:[#allocation2 + $0x8] sm:$0xff] %vm19_vm0, %v1372_v12 }
  0x1b   :  { %23 = vst.msk [vmem:[#allocation2 + $0x18] sm:$0xff] %vm19_vm0, %v1372_v12  ;;  %24 = vst.msk [vmem:[#allocation2 + $0x20] sm:$0xff] %vm19_vm0, %v1372_v12 }
  0x1c   :  { %1120 = vmatpush3.bf16.msra.mxu0 %v1306_v26  ;;  %25 = vst.msk [vmem:[#allocation2 + $0x28] sm:$0xff] %vm19_vm0, %v1372_v12  ;;  %26 = vst.msk [vmem:[#allocation2 + $0x30] sm:$0xff] %vm19_vm0, %v1372_v12 }
  0x1d   :  { %1184 = vmatpush3.bf16.msra.mxu1 %v1307_v27  ;;  %1121 = vmatprep.subr.bf16.mxu0 %v1308_v28  ;;  %27 = vst.msk [vmem:[#allocation2 + $0x38] sm:$0xff] %vm19_vm0, %v1372_v12  ;;  %28 = vst.msk [vmem:[#allocation2 + $0x40] sm:$0xff] %vm19_vm0, %v1372_v12 }
  0x1e   :  { %1185 = vmatprep.subr.bf16.mxu1 %v1309_v29  ;;  %29 = vst.msk [vmem:[#allocation2 + $0x48] sm:$0xff] %vm19_vm0, %v1372_v12  ;;  %30 = vst.msk [vmem:[#allocation2 + $0x50] sm:$0xff] %vm19_vm0, %v1372_v12 }
  0x1f   :  { %31 = vst.msk [vmem:[#allocation2 + $0x58] sm:$0xff] %vm19_vm0, %v1372_v12  ;;  %32 = vst.msk [vmem:[#allocation2 + $0x60] sm:$0xff] %vm19_vm0, %v1372_v12 }
  0x20   :  { %1122 = vmatpush3.bf16.msra.mxu0 %v1310_v30  ;;  %33 = vst.msk [vmem:[#allocation2 + $0x68] sm:$0xff] %vm19_vm0, %v1372_v12  ;;  %34 = vst.msk [vmem:[#allocation2 + $0x70] sm:$0xff] %vm19_vm0, %v1372_v12 }
  0x21   :  { %1186 = vmatpush3.bf16.msra.mxu1 %v1311_v31  ;;  %1247 = vmatprep.subr.bf16.mxu0 %v1318_v36  ;;  %35 = vst.msk [vmem:[#allocation2 + $0x78] sm:$0xff] %vm19_vm0, %v1372_v12 }
  0x22   :  { %1271 = vmatprep.subr.bf16.mxu1 %v1318_v36 }
  0x23   :  { %646 = vmatmul.mubr.bf16.vlgmr.msra.gmra.mxu0 %v1312_v32 }
  0x24   :  { %743 = vmatmul.mubr.bf16.vlgmr.msra.gmra.mxu1 %v1315_v34  ;;  %1248 = vmatpush3.bf16.msra.mxu0 %v1318_v36 }
  0x25   :  { %1275 = vmatpush3.bf16.msra.mxu1 %v1318_v36  ;;  %653 = vmatprep.mubr.bf16.mxu0 %v1319_v37 }
  0x26   :  { %750 = vmatprep.mubr.bf16.mxu1 %v1321_v38  ;;  %1249 = vmatprep.subr.bf16.mxu0 %v1331_v42 }
  0x27   :  { %1272 = vmatprep.subr.bf16.mxu1 %v1331_v42 }
  0x28   :  { %1250 = vmatpush3.bf16.msra.mxu0 %v1331_v42 }
  0x29   :  { %1276 = vmatpush3.bf16.msra.mxu1 %v1331_v42  ;;  %1251 = vmatprep.subr.bf16.mxu0 %v1344_v46 }
  0x2a   :  { %1273 = vmatprep.subr.bf16.mxu1 %v1344_v46 }
  0x2b   :  { %654 = vmatmul.mubr.bf16.gmra.mxu0 %v1323_v39 }
  0x2c   :  { %751 = vmatmul.mubr.bf16.gmra.mxu1 %v1324_v40  ;;  %661 = vmatprep.mubr.bf16.mxu0 %v1325_v41 }
  0x2d   :  { %758 = vmatprep.mubr.bf16.mxu1 %v1327_v43  ;;  %1252 = vmatpush3.bf16.msra.mxu0 %v1344_v46 }
  0x2e   :  { %1277 = vmatpush3.bf16.msra.mxu1 %v1344_v46  ;;  %1253 = vmatprep.subr.bf16.mxu0 %v1357_v49 }
  0x2f   :  { %1274 = vmatprep.subr.bf16.mxu1 %v1357_v49 }
  0x31   :  { %1254 = vmatpush3.bf16.msra.mxu0 %v1357_v49 }
  0x32   :  { %1278 = vmatpush3.bf16.msra.mxu1 %v1357_v49 }
  0x33   :  { %662 = vmatmul.mubr.bf16.gmra.mxu0 %v1329_v44 }
  0x34   :  { %759 = vmatmul.mubr.bf16.gmra.mxu1 %v1330_v45  ;;  %669 = vmatprep.mubr.bf16.mxu0 %v1332_v47 }
  0x35   :  { %766 = vmatprep.mubr.bf16.mxu1 %v1334_v48 }
  0x3b   :  { %670 = vmatmul.mubr.bf16.gmra.mxu0 %v1336_v50 }
  0x3c   :  { %767 = vmatmul.mubr.bf16.gmra.mxu1 %v1337_v51  ;;  %677 = vmatprep.mubr.bf16.mxu0 %v1338_v52 }
  0x3d   :  { %774 = vmatprep.mubr.bf16.mxu1 %v1340_v53 }
  0x43   :  { %678 = vmatmul.mubr.bf16.gmra.mxu0 %v1342_v54 }
  0x44   :  { %775 = vmatmul.mubr.bf16.gmra.mxu1 %v1343_v55  ;;  %685 = vmatprep.mubr.bf16.mxu0 %v1345_v56 }
  0x45   :  { %782 = vmatprep.mubr.bf16.mxu1 %v1347_v57 }
  0x4b   :  { %686 = vmatmul.mubr.bf16.gmra.mxu0 %v1349_v58 }
  0x4c   :  { %783 = vmatmul.mubr.bf16.gmra.mxu1 %v1350_v59  ;;  %693 = vmatprep.mubr.bf16.mxu0 %v1351_v60 }
  0x4d   :  { %790 = vmatprep.mubr.bf16.mxu1 %v1353_v61 }
  0x53   :  { %694 = vmatmul.mubr.bf16.gmra.mxu0 %v1355_v62 }
  0x54   :  { %791 = vmatmul.mubr.bf16.gmra.mxu1 %v1356_v63  ;;  %701 = vmatprep.mubr.bf16.mxu0 %v1358_v0 }
  0x55   :  { %798 = vmatprep.mubr.bf16.mxu1 %v1360_v1 }
  0x5b   :  { %702 = vmatmul.mubr.bf16.gmra.mxu0 %v1362_v2 }
  0x5c   :  { %799 = vmatmul.mubr.bf16.gmra.mxu1 %v1363_v3  ;;  %1255 = vmatprep.mubr.msk.bf16.mxu0 %vm19_vm0, %v1364_v4 }
  0x5d   :  { %1263 = vmatprep.mubr.msk.bf16.mxu1 %vm19_vm0, %v1365_v5 }
  0x63   :  { %1256 = vmatmul.mubr.msk.bf16.vlgmr.msra.gmra.mxu0 %vm19_vm0, %v1366_v6 }
  0x64   :  { %1264 = vmatmul.mubr.msk.bf16.vlgmr.msra.gmra.mxu1 %vm19_vm0, %v1367_v7  ;;  %1259 = vmatprep.mubr.msk.bf16.mxu0 %vm19_vm0, %v1368_v8 }
  0x65   :  { %1267 = vmatprep.mubr.msk.bf16.mxu1 %vm19_vm0, %v1369_v9 }
  0x6b   :  { %1260 = vmatmul.mubr.msk.bf16.gmra.mxu0 %vm19_vm0, %v1370_v10 }
  0x6c   :  { %1268 = vmatmul.mubr.msk.bf16.gmra.mxu1 %vm19_vm0, %v1371_v11 }
  0xe3   :  { %v1123_v13 = vpop.f32.mrf.mxu0 }
  0xe4   :  { %v1187_v14 = vpop.f32.mrf.mxu1 }
  0xe5   :  { %v1124_v15 = vpop.f32.mrf.mxu0 }
  0xe6   :  { %v1188_v16 = vpop.f32.mrf.mxu1  ;;  %v1125_v7 = vadd.f32 %v1124_v15, %v1123_v13 }
  0xe7   :  { %v1126_v17 = vpop.f32.mrf.mxu0  ;;  %v1189_v8 = vadd.f32 %v1188_v16, %v1187_v14 }
  0xe8   :  { %v1190_v18 = vpop.f32.mrf.mxu1 }
  0xe9   :  { %v1127_v19 = vpop.f32.mrf.mxu0  ;;  %v745_v16 = vadd.f32 %v1189_v8, %v1125_v7 }
  0xea   :  { %v1191_v20 = vpop.f32.mrf.mxu1  ;;  %v1128_v10 = vadd.f32 %v1127_v19, %v1126_v17 }
  0xeb   :  { %v1129_v21 = vpop.f32.mrf.mxu0  ;;  %v1192_v11 = vadd.f32 %v1191_v20, %v1190_v18 }
  0xec   :  { %v1193_v22 = vpop.f32.mrf.mxu1 }
  0xed   :  { %v1130_v23 = vpop.f32.mrf.mxu0  ;;  %v748_v17 = vadd.f32 %v1192_v11, %v1128_v10 }
  0xee   :  { %v1194_v24 = vpop.f32.mrf.mxu1  ;;  %v1131_v12 = vadd.f32 %v1130_v23, %v1129_v21  ;;  %v38_v21 = vld [vmem:[#allocation2 + $0x10] sm:$0xff] }
  0xef   :  { %v1132_v25 = vpop.f32.mrf.mxu0 }
  0xf0   :  { %v1196_v26 = vpop.f32.mrf.mxu1 }
  0xf1   :  { %v1133_v27 = vpop.f32.mrf.mxu0 }
  0xf2   :  { %v1197_v28 = vpop.f32.mrf.mxu1 }
  0xf3   :  { %v1135_v29 = vpop.f32.mrf.mxu0 }
  0xf4   :  { %v1199_v30 = vpop.f32.mrf.mxu1 }
  0xf5   :  { %v1136_v31 = vpop.f32.mrf.mxu0 }
  0xf6   :  { %v1200_v32 = vpop.f32.mrf.mxu1 }
  0xf7   :  { %v1645_v33 = vpop.f32.mrf.mxu0 }
  0xf8   :  { %v1647_v34 = vpop.f32.mrf.mxu1 }
  0xf9   :  { %1828 = vst [vmem:[#allocation3_spill] sm:$0xff] %v1647_v34  ;;  %v1649_v35 = vpop.f32.mrf.mxu0 }
  0xfa   :  { %1829 = vst [vmem:[#allocation4_spill] sm:$0xff] %v1649_v35  ;;  %v1651_v36 = vpop.f32.mrf.mxu1 }
  0xfb   :  { %1830 = vst [vmem:[#allocation5_spill] sm:$0xff] %v1651_v36  ;;  %v1141_v37 = vpop.f32.mrf.mxu0  ;;  %v1195_v36 = vadd.f32 %v1194_v24, %v1193_v22 }
  0xfc   :  { %v1205_v38 = vpop.f32.mrf.mxu1 }
  0xfd   :  { %v1142_v39 = vpop.f32.mrf.mxu0  ;;  %v753_v15 = vadd.f32 %v1195_v36, %v1131_v12 }
  0xfe   :  { %v1206_v40 = vpop.f32.mrf.mxu1  ;;  %v1143_v13 = vadd.f32 %v1142_v39, %v1141_v37  ;;  %v36_v37 = vld [vmem:[#allocation2] sm:$0xff] }
  0xff   :  { %v1653_v41 = vpop.f32.mrf.mxu0  ;;  %v1207_v18 = vadd.f32 %v1206_v40, %v1205_v38 }
 0x100   :  { %1831 = vst [vmem:[#allocation6_spill] sm:$0xff] %v1653_v41  ;;  %v1655_v42 = vpop.f32.mrf.mxu1  ;;  %v1137_v41 = vadd.f32 %v1136_v31, %v1135_v29 }
 0x101   :  { %1832 = vst [vmem:[#allocation7_spill] sm:$0xff] %v1655_v42  ;;  %v1657_v43 = vpop.f32.mrf.mxu0  ;;  %v1841_v24 = vld [vmem:[#allocation4_spill] sm:$0xff] }
 0x102   :  { %1833 = vst [vmem:[#allocation8_spill] sm:$0xff] %v1657_v43  ;;  %v1659_v44 = vpop.f32.mrf.mxu1 }
 0x103   :  { %1834 = vst [vmem:[#allocation9_spill] sm:$0xff] %v1659_v44  ;;  %v1147_v45 = vpop.f32.mrf.mxu0 }
 0x104   :  { %v1211_v46 = vpop.f32.mrf.mxu1 }
 0x105   :  { %v1148_v47 = vpop.f32.mrf.mxu0 }
 0x106   :  { %v1212_v48 = vpop.f32.mrf.mxu1 }
 0x107   :  { %v1150_v49 = vpop.f32.mrf.mxu0 }
 0x108   :  { %v1214_v50 = vpop.f32.mrf.mxu1 }
 0x109   :  { %v1151_v51 = vpop.f32.mrf.mxu0 }
 0x10a   :  { %v1215_v52 = vpop.f32.mrf.mxu1  ;;  %v1152_v31 = vadd.f32 %v1151_v51, %v1150_v49 }
 0x10b   :  { %v1153_v53 = vpop.f32.mrf.mxu0 }
 0x10c   :  { %v1217_v54 = vpop.f32.mrf.mxu1 }
 0x10d   :  { %v1154_v55 = vpop.f32.mrf.mxu0 }
 0x10e   :  { %v1218_v56 = vpop.f32.mrf.mxu1  ;;  %v1155_v44 = vadd.f32 %v1154_v55, %v1153_v53  ;;  %v39_v53 = vld [vmem:[#allocation2 + $0x18] sm:$0xff] }
 0x10f   :  { %v1156_v57 = vpop.f32.mrf.mxu0  ;;  %v1219_v42 = vadd.f32 %v1218_v56, %v1217_v54  ;;  %v769_v56 = vadd.f32 %v1207_v18, %v1143_v13  ;;  %v42_v18 = vld [vmem:[#allocation2 + $0x30] sm:$0xff] }
 0x110   :  { %v1220_v58 = vpop.f32.mrf.mxu1 }
 0x111   :  { %v1157_v59 = vpop.f32.mrf.mxu0  ;;  %v785_v23 = vadd.f32 %v1219_v42, %v1155_v44  ;;  %v44_v44 = vld [vmem:[#allocation2 + $0x40] sm:$0xff] }
 0x112   :  { %v1221_v60 = vpop.f32.mrf.mxu1  ;;  %v1158_v19 = vadd.f32 %v1157_v59, %v1156_v57  ;;  %v1844_v59 = vld [vmem:[#allocation6_spill] sm:$0xff] }
 0x113   :  { %v1661_v61 = vpop.f32.mrf.mxu0  ;;  %v1222_v20 = vadd.f32 %v1221_v60, %v1220_v58  ;;  %v47_v58 = vld [vmem:[#allocation2 + $0x58] sm:$0xff]  ;;  %v1845_v60 = vld [vmem:[#allocation8_spill] sm:$0xff] }
 0x114   :  { %1835 = vst [vmem:[#allocation10_spill] sm:$0xff] %v1661_v61  ;;  %v1663_v62 = vpop.f32.mrf.mxu1  ;;  %v1213_v61 = vadd.f32 %v1212_v48, %v1211_v46 }
 0x115   :  { %1836 = vst [vmem:[#allocation11_spill] sm:$0xff] %v1663_v62  ;;  %v1160_v63 = vpop.f32.mrf.mxu0  ;;  %v788_v55 = vadd.f32 %v1222_v20, %v1158_v19  ;;  %v1848_v20 = vld [vmem:[#allocation3_spill] sm:$0xff] }
 0x116   :  { %v1224_v0 = vpop.f32.mrf.mxu1 }
 0x117   :  { %v1665_v1 = vpop.f32.mrf.mxu0 }
 0x118   :  { %1837 = vst [vmem:[#allocation12_spill] sm:$0xff] %v1665_v1  ;;  %v1667_v2 = vpop.f32.mrf.mxu1  ;;  %v1134_v1 = vadd.f32 %v1133_v27, %v1132_v25  ;;  %v1677_v25 = vadd.f32 %v1841_v24, %v1645_v33  ;;  %v46_v27 = vld [vmem:[#allocation2 + $0x50] sm:$0xff] }
 0x119   :  { %1838 = vst [vmem:[#allocation13_spill] sm:$0xff] %v1667_v2  ;;  %v1669_v3 = vpop.f32.mrf.mxu0  ;;  %v1198_v2 = vadd.f32 %v1197_v28, %v1196_v26 }
 0x11a   :  { %1839 = vst [vmem:[#allocation14_spill] sm:$0xff] %v1669_v3  ;;  %v1671_v4 = vpop.f32.mrf.mxu1  ;;  %v1201_v3 = vadd.f32 %v1200_v32, %v1199_v30  ;;  %v1216_v32 = vadd.f32 %v1215_v52, %v1214_v50 }
 0x11b   :  { %1840 = vst [vmem:[#allocation15_spill] sm:$0xff] %v1671_v4  ;;  %v1165_v5 = vpop.f32.mrf.mxu0  ;;  %v1149_v4 = vadd.f32 %v1148_v47, %v1147_v45  ;;  %v756_v29 = vadd.f32 %v1198_v2, %v1134_v1 }
 0x11c   :  { %v1229_v6 = vpop.f32.mrf.mxu1  ;;  %v1679_v30 = vadd.f32 %v1201_v3, %v1137_v41  ;;  %v1842_v41 = vld [vmem:[#allocation10_spill] sm:$0xff]  ;;  %v1843_v49 = vld [vmem:[#allocation11_spill] sm:$0xff]  ;;  %v37_v3 = vld [vmem:[#allocation2 + $0x8] sm:$0xff] }
 0x11d   :  { %v1166_v9 = vpop.f32.mrf.mxu0  ;;  %v777_v39 = vadd.f32 %v1213_v61, %v1149_v4  ;;  %v1161_v57 = vadd.f32 %v1160_v63, %v1842_v41  ;;  %v1225_v50 = vadd.f32 %v1224_v0, %v1843_v49  ;;  %v1146_v61 = vadd.f32 %v1845_v60, %v1844_v59  ;;  %v1847_v63 = vld [vmem:[#allocation9_spill] sm:$0xff]  ;;  %v958_v60 = vld [vmem:[%s1826_s2 + $0x18] sm:$0xff] }
 0x11e   :  { %v1230_v34 = vpop.f32.mrf.mxu1  ;;  %v1167_v40 = vadd.f32 %v1166_v9, %v1165_v5  ;;  %v780_v5 = vadd.f32 %v1216_v32, %v1152_v31  ;;  %v45_v9 = vld [vmem:[#allocation2 + $0x48] sm:$0xff]  ;;  %v957_v31 = vld [vmem:[%s1826_s2 + $0x10] sm:$0xff] }
 0x11f   :  { %v1673_v43 = vpop.f32.mrf.mxu0  ;;  %v1231_v45 = vadd.f32 %v1230_v34, %v1229_v6  ;;  %v1846_v6 = vld [vmem:[#allocation7_spill] sm:$0xff] }
 0x120   :  { %v1232_v62 = vpop.f32.mrf.mxu1  ;;  %v1210_v7 = vadd.f32 %v1847_v63, %v1846_v6 }
 0x121   :  { %v1169_v35 = vpop.f32.mrf.mxu0  ;;  %v801_v11 = vadd.f32 %v1231_v45, %v1167_v40 }
 0x122   :  { %v1233_v14 = vpop.f32.mrf.mxu1  ;;  %v1170_v12 = vadd.f32 %v1169_v35, %v1673_v43  ;;  %v1852_v43 = vld [vmem:[#allocation13_spill] sm:$0xff] }
 0x123   :  { %v1257_v22 = vpop.f32.mrf.mxu0  ;;  %v1234_v13 = vadd.f32 %v1233_v14, %v1232_v62  ;;  %v1853_v62 = vld [vmem:[#allocation15_spill] sm:$0xff] }
 0x124   :  { %v850_v26 = vadd.f32 %v1257_v22, %v753_v15  ;;  %v1265_v28 = vpop.f32.mrf.mxu1  ;;  %v1228_v14 = vadd.f32 %v1853_v62, %v1852_v43  ;;  %v969_v43 = vld [vmem:[%s1826_s2 + $0x70] sm:$0xff] }
 0x125   :  { %v882_v36 = vadd.f32 %v1265_v28, %v785_v23  ;;  %v841_v38 = vpop.f32.mrf.mxu0  ;;  %v1850_v28 = vld [vmem:[#allocation12_spill] sm:$0xff] }
 0x126   :  { %v906_v46 = vadd.f32 %v850_v26, %v38_v21  ;;  %v842_v42 = vadd.f32 %v841_v38, %v745_v16  ;;  %v873_v47 = vpop.f32.mrf.mxu1  ;;  %v1849_v21 = vld [vmem:[#allocation5_spill] sm:$0xff] }
 0x127   :  { %v914_v33 = vadd.f32 %v882_v36, %v46_v27  ;;  %v874_v48 = vadd.f32 %v873_v47, %v777_v39  ;;  %v1258_v54 = vpop.f32.mrf.mxu0  ;;  %v1204_v22 = vadd.f32 %v1849_v21, %v1848_v20  ;;  %v793_v27 = vadd.f32 %v1225_v50, %v1161_v57  ;;  %v965_v39 = vld [vmem:[%s1826_s2 + $0x50] sm:$0xff]  ;;  %v964_v21 = vld [vmem:[%s1826_s2 + $0x48] sm:$0xff] }
 0x128   :  { %922 = vst.msk [vmem:[#allocation2 + $0x10] sm:$0xff] %vm19_vm0, %v906_v46  ;;  %v904_v51 = vadd.f32 %v842_v42, %v36_v37  ;;  %v853_v52 = vadd.f32 %v1258_v54, %v756_v29  ;;  %v1266_v34 = vpop.f32.mrf.mxu1  ;;  %v1851_v29 = vld [vmem:[#allocation14_spill] sm:$0xff]  ;;  %v40_v37 = vld [vmem:[#allocation2 + $0x20] sm:$0xff] }
 0x129   :  { %930 = vst.msk [vmem:[#allocation2 + $0x50] sm:$0xff] %vm19_vm0, %v914_v33  ;;  %v912_v1 = vadd.f32 %v874_v48, %v44_v44  ;;  %v885_v2 = vadd.f32 %v1266_v34, %v788_v55  ;;  %v844_v4 = vpop.f32.mrf.mxu0  ;;  %v1164_v35 = vadd.f32 %v1851_v29, %v1850_v28  ;;  %v48_v46 = vld [vmem:[#allocation2 + $0x60] sm:$0xff]  ;;  %v772_v44 = vadd.f32 %v1210_v7, %v1146_v61  ;;  %v43_v54 = vld [vmem:[#allocation2 + $0x38] sm:$0xff] }
 0x12a   :  { %920 = vst.msk [vmem:[#allocation2] sm:$0xff] %vm19_vm0, %v904_v51  ;;  %v907_v0 = vadd.f32 %v853_v52, %v39_v53  ;;  %v845_v8 = vadd.f32 %v844_v4, %v748_v17  ;;  %v876_v10 = vpop.f32.mrf.mxu1  ;;  %v50_v17 = vld [vmem:[#allocation2 + $0x70] sm:$0xff]  ;;  %v955_v33 = vld [vmem:[%s1826_s2] sm:$0xff]  ;;  %v51_v51 = vld [vmem:[#allocation2 + $0x78] sm:$0xff] }
 0x12b   :  { %928 = vst.msk [vmem:[#allocation2 + $0x40] sm:$0xff] %vm19_vm0, %v912_v1  ;;  %v915_v15 = vadd.f32 %v885_v2, %v47_v58  ;;  %v877_v16 = vadd.f32 %v876_v10, %v780_v5  ;;  %v1261_v19 = vpop.f32.mrf.mxu0  ;;  %v764_v58 = vadd.f32 %v1204_v22, %v1677_v25  ;;  %v41_v2 = vld [vmem:[#allocation2 + $0x28] sm:$0xff]  ;;  %v796_v4 = vadd.f32 %v1228_v14, %v1164_v35  ;;  %v966_v25 = vld [vmem:[%s1826_s2 + $0x58] sm:$0xff] }
 0x12c   :  { %923 = vst.msk [vmem:[#allocation2 + $0x18] sm:$0xff] %vm19_vm0, %v907_v0  ;;  %v905_v23 = vadd.f32 %v845_v8, %v37_v3  ;;  %v866_v24 = vadd.f32 %v1261_v19, %v769_v56  ;;  %v1269_v26 = vpop.f32.mrf.mxu1  ;;  %v804_v56 = vadd.f32 %v1234_v13, %v1170_v12  ;;  %v49_v8 = vld [vmem:[#allocation2 + $0x68] sm:$0xff] }
 0x12d   :  { %931 = vst.msk [vmem:[#allocation2 + $0x58] sm:$0xff] %vm19_vm0, %v915_v15  ;;  %v913_v32 = vadd.f32 %v877_v16, %v45_v9  ;;  %v898_v36 = vadd.f32 %v1269_v26, %v801_v11  ;;  %v857_v38 = vpop.f32.mrf.mxu0  ;;  %v956_v13 = vld [vmem:[%s1826_s2 + $0x8] sm:$0xff]  ;;  %v961_v26 = vld [vmem:[%s1826_s2 + $0x30] sm:$0xff] }
 0x12e   :  { %921 = vst.msk [vmem:[#allocation2 + $0x8] sm:$0xff] %vm19_vm0, %v905_v23  ;;  %v910_v40 = vadd.f32 %v866_v24, %v42_v18  ;;  %v858_v45 = vadd.f32 %v857_v38, %v1679_v30  ;;  %v889_v42 = vpop.f32.mrf.mxu1  ;;  %v963_v30 = vld [vmem:[%s1826_s2 + $0x40] sm:$0xff] }
 0x12f   :  { %v941_v47 = vld [vmem:[#allocation2 + $0x10] sm:$0xff]  ;;  %929 = vst.msk [vmem:[#allocation2 + $0x48] sm:$0xff] %vm19_vm0, %v913_v32  ;;  %v918_v48 = vadd.f32 %v898_v36, %v50_v17  ;;  %v890_v53 = vadd.f32 %v889_v42, %v793_v27  ;;  %v1262_v55 = vpop.f32.mrf.mxu0  ;;  %v959_v32 = vld [vmem:[%s1826_s2 + $0x20] sm:$0xff]  ;;  %v962_v42 = vld [vmem:[%s1826_s2 + $0x38] sm:$0xff] }
 0x130   :  { %v973_v41 = vadd.f32 %v957_v31, %v941_v47  ;;  %v949_v57 = vld [vmem:[#allocation2 + $0x50] sm:$0xff]  ;;  %926 = vst.msk [vmem:[#allocation2 + $0x30] sm:$0xff] %vm19_vm0, %v910_v40  ;;  %v908_v49 = vadd.f32 %v858_v45, %v40_v37  ;;  %v869_v50 = vadd.f32 %v1262_v55, %v772_v44  ;;  %v1270_v52 = vpop.f32.mrf.mxu1 }
 0x131   :  { %v981_v34 = vadd.f32 %v965_v39, %v949_v57  ;;  %v939_v59 = vld [vmem:[#allocation2] sm:$0xff]  ;;  %934 = vst.msk [vmem:[#allocation2 + $0x70] sm:$0xff] %vm19_vm0, %v918_v48  ;;  %v916_v61 = vadd.f32 %v890_v53, %v48_v46  ;;  %v901_v1 = vadd.f32 %v1270_v52, %v804_v56  ;;  %v860_v3 = vpop.f32.mrf.mxu0  ;;  %v970_v48 = vld [vmem:[%s1826_s2 + $0x78] sm:$0xff]  ;;  %v960_v56 = vld [vmem:[%s1826_s2 + $0x28] sm:$0xff] }
 0x132   :  { %v989_v5 = vmax.f32 %v973_v41, 0.0  ;;  %v971_v6 = vadd.f32 %v955_v33, %v939_v59  ;;  %v947_v63 = vld [vmem:[#allocation2 + $0x40] sm:$0xff]  ;;  %924 = vst.msk [vmem:[#allocation2 + $0x20] sm:$0xff] %vm19_vm0, %v908_v49  ;;  %v911_v7 = vadd.f32 %v869_v50, %v43_v54  ;;  %v861_v0 = vadd.f32 %v860_v3, %v764_v58  ;;  %v892_v9 = vpop.f32.mrf.mxu1  ;;  %v968_v49 = vld [vmem:[%s1826_s2 + $0x68] sm:$0xff] }
 0x133   :  { %v997_v10 = vmax.f32 %v981_v34, 0.0  ;;  %v979_v11 = vadd.f32 %v963_v30, %v947_v63  ;;  %v942_v12 = vld [vmem:[#allocation2 + $0x18] sm:$0xff]  ;;  %932 = vst.msk [vmem:[#allocation2 + $0x60] sm:$0xff] %vm19_vm0, %v916_v61  ;;  %v919_v15 = vadd.f32 %v901_v1, %v51_v51  ;;  %v893_v16 = vadd.f32 %v892_v9, %v796_v4  ;;  %v967_v39 = vld [vmem:[%s1826_s2 + $0x60] sm:$0xff] }
 0x134   :  { %1005 = vst.msk [vmem:[%s1827_s3 + $0x10] sm:$0xff] %vm19_vm0, %v989_v5  ;;  %v987_v18 = vmax.f32 %v971_v6, 0.0  ;;  %v974_v19 = vadd.f32 %v958_v60, %v942_v12  ;;  %v950_v20 = vld [vmem:[#allocation2 + $0x58] sm:$0xff]  ;;  %927 = vst.msk [vmem:[#allocation2 + $0x38] sm:$0xff] %vm19_vm0, %v911_v7  ;;  %v909_v22 = vadd.f32 %v861_v0, %v41_v2 }
 0x135   :  { %1013 = vst.msk [vmem:[%s1827_s3 + $0x50] sm:$0xff] %vm19_vm0, %v997_v10  ;;  %v995_v23 = vmax.f32 %v979_v11, 0.0  ;;  %v982_v24 = vadd.f32 %v966_v25, %v950_v20  ;;  %v940_v17 = vld [vmem:[#allocation2 + $0x8] sm:$0xff]  ;;  %935 = vst.msk [vmem:[#allocation2 + $0x78] sm:$0xff] %vm19_vm0, %v919_v15  ;;  %v917_v27 = vadd.f32 %v893_v16, %v49_v8 }
 0x136   :  { %1003 = vst.msk [vmem:[%s1827_s3] sm:$0xff] %vm19_vm0, %v987_v18  ;;  %v990_v28 = vmax.f32 %v974_v19, 0.0  ;;  %v972_v29 = vadd.f32 %v956_v13, %v940_v17  ;;  %v948_v35 = vld [vmem:[#allocation2 + $0x48] sm:$0xff]  ;;  %925 = vst.msk [vmem:[#allocation2 + $0x28] sm:$0xff] %vm19_vm0, %v909_v22 }
 0x137   :  { %1011 = vst.msk [vmem:[%s1827_s3 + $0x40] sm:$0xff] %vm19_vm0, %v995_v23  ;;  %v998_v62 = vmax.f32 %v982_v24, 0.0  ;;  %v980_v14 = vadd.f32 %v964_v21, %v948_v35  ;;  %v945_v31 = vld [vmem:[#allocation2 + $0x30] sm:$0xff]  ;;  %933 = vst.msk [vmem:[#allocation2 + $0x68] sm:$0xff] %vm19_vm0, %v917_v27 }
 0x138   :  { %1006 = vst.msk [vmem:[%s1827_s3 + $0x18] sm:$0xff] %vm19_vm0, %v990_v28  ;;  %v988_v36 = vmax.f32 %v972_v29, 0.0  ;;  %v977_v37 = vadd.f32 %v961_v26, %v945_v31  ;;  %v953_v38 = vld [vmem:[#allocation2 + $0x70] sm:$0xff] }
 0x139   :  { %1014 = vst.msk [vmem:[%s1827_s3 + $0x58] sm:$0xff] %vm19_vm0, %v998_v62  ;;  %v996_v40 = vmax.f32 %v980_v14, 0.0  ;;  %v985_v45 = vadd.f32 %v969_v43, %v953_v38  ;;  %v943_v46 = vld [vmem:[#allocation2 + $0x20] sm:$0xff] }
 0x13a   :  { %1004 = vst.msk [vmem:[%s1827_s3 + $0x8] sm:$0xff] %vm19_vm0, %v988_v36  ;;  %v993_v44 = vmax.f32 %v977_v37, 0.0  ;;  %v975_v47 = vadd.f32 %v959_v32, %v943_v46  ;;  %v951_v33 = vld [vmem:[#allocation2 + $0x60] sm:$0xff] }
 0x13b   :  { %1012 = vst.msk [vmem:[%s1827_s3 + $0x48] sm:$0xff] %vm19_vm0, %v996_v40  ;;  %v1001_v53 = vmax.f32 %v985_v45, 0.0  ;;  %v983_v54 = vadd.f32 %v967_v39, %v951_v33  ;;  %v946_v55 = vld [vmem:[#allocation2 + $0x38] sm:$0xff] }
 0x13c   :  { %1009 = vst.msk [vmem:[%s1827_s3 + $0x30] sm:$0xff] %vm19_vm0, %v993_v44  ;;  %v991_v41 = vmax.f32 %v975_v47, 0.0  ;;  %v978_v57 = vadd.f32 %v962_v42, %v946_v55  ;;  %v954_v30 = vld [vmem:[#allocation2 + $0x78] sm:$0xff] }
 0x13d   :  { %1017 = vst.msk [vmem:[%s1827_s3 + $0x70] sm:$0xff] %vm19_vm0, %v1001_v53  ;;  %v999_v50 = vmax.f32 %v983_v54, 0.0  ;;  %v986_v51 = vadd.f32 %v970_v48, %v954_v30  ;;  %v944_v52 = vld [vmem:[#allocation2 + $0x28] sm:$0xff] }
 0x13e   :  { %1007 = vst.msk [vmem:[%s1827_s3 + $0x20] sm:$0xff] %vm19_vm0, %v991_v41  ;;  %v994_v58 = vmax.f32 %v978_v57, 0.0  ;;  %v976_v34 = vadd.f32 %v960_v56, %v944_v52  ;;  %v952_v59 = vld [vmem:[#allocation2 + $0x68] sm:$0xff] }
 0x13f   :  { %1015 = vst.msk [vmem:[%s1827_s3 + $0x60] sm:$0xff] %vm19_vm0, %v999_v50  ;;  %v1002_v60 = vmax.f32 %v986_v51, 0.0  ;;  %v984_v61 = vadd.f32 %v968_v49, %v952_v59 }
 0x140   :  { %1010 = vst.msk [vmem:[%s1827_s3 + $0x38] sm:$0xff] %vm19_vm0, %v994_v58  ;;  %v992_v1 = vmax.f32 %v976_v34, 0.0 }
 0x141   :  { %1018 = vst.msk [vmem:[%s1827_s3 + $0x78] sm:$0xff] %vm19_vm0, %v1002_v60  ;;  %v1000_v2 = vmax.f32 %v984_v61, 0.0 }
 0x142   :  { %1008 = vst.msk [vmem:[%s1827_s3 + $0x28] sm:$0xff] %vm19_vm0, %v992_v1 }
 0x143   :  { %1016 = vst.msk [vmem:[%s1827_s3 + $0x68] sm:$0xff] %vm19_vm0, %v1000_v2 }

// kernel: resnet_forward.18
= control target key start
LH: loop header
LB: loop body
LE: loop exit
PB: predicated region body
PF: predicated region fallthrough
CT: control target
= control target key end

     0   :  { %vm374_vm0 = vcmask 523264   ;;  %s892_s1 = inlined_call_operand.vmem [shape: bf16[576,128], index: 1, kind: input, shape index: {}]   ;;  %s893_s0 = inlined_call_operand.vmem [shape: bf16[32,576], index: 0, kind: input, shape index: {}]   ;;  %s894_s2 = inlined_call_operand.vmem [shape: f32[32,128], index: 2, kind: output, shape index: {}]  }
   0x1   :  { %v677_v0 = vld [vmem:[%s892_s1 + $0x78] sm:$0xff]   ;;  %v681_v4 = vld [vmem:[%s892_s1 + $0x70] sm:$0xff]   ;;  %v685_v8 = vld [vmem:[%s892_s1 + $0x68] sm:$0xff]  }
   0x2   :  { %v678_v1 = vld [vmem:[%s892_s1 + $0xf8] sm:$0xff]   ;;  %603 = vmatprep.subr.bf16.mxu0 %v677_v0  ;;  %v682_v5 = vld [vmem:[%s892_s1 + $0xf0] sm:$0xff]   ;;  %v686_v9 = vld [vmem:[%s892_s1 + $0xe8] sm:$0xff]  }
   0x3   :  { %v679_v2 = vld [vmem:[%s892_s1 + $0x38] sm:$0xff]   ;;  %631 = vmatprep.subr.bf16.mxu1 %v678_v1  ;;  %v683_v6 = vld [vmem:[%s892_s1 + $0x30] sm:$0xff]   ;;  %v687_v10 = vld [vmem:[%s892_s1 + $0x28] sm:$0xff]  }
   0x4   :  { %v680_v3 = vld [vmem:[%s892_s1 + $0xb8] sm:$0xff]   ;;  %604 = vmatpush3.bf16.msra.mxu0 %v679_v2  ;;  %v684_v7 = vld [vmem:[%s892_s1 + $0xb0] sm:$0xff]   ;;  %v688_v11 = vld [vmem:[%s892_s1 + $0xa8] sm:$0xff]  }
   0x5   :  { %632 = vmatpush3.bf16.msra.mxu1 %v680_v3  ;;  %605 = vmatprep.subr.bf16.mxu0 %v681_v4  ;;  %v689_v12 = vld [vmem:[%s892_s1 + $0x60] sm:$0xff]   ;;  %v693_v16 = vld [vmem:[%s892_s1 + $0x58] sm:$0xff]   ;;  %v697_v20 = vld [vmem:[%s892_s1 + $0x50] sm:$0xff]  }
   0x6   :  { %633 = vmatprep.subr.bf16.mxu1 %v682_v5  ;;  %v690_v13 = vld [vmem:[%s892_s1 + $0xe0] sm:$0xff]   ;;  %v694_v17 = vld [vmem:[%s892_s1 + $0xd8] sm:$0xff]   ;;  %v698_v21 = vld [vmem:[%s892_s1 + $0xd0] sm:$0xff]  }
   0x7   :  { %v691_v14 = vld [vmem:[%s892_s1 + $0x20] sm:$0xff]   ;;  %v695_v18 = vld [vmem:[%s892_s1 + $0x18] sm:$0xff]   ;;  %v699_v22 = vld [vmem:[%s892_s1 + $0x10] sm:$0xff]  }
   0x8   :  { %606 = vmatpush3.bf16.msra.mxu0 %v683_v6  ;;  %v692_v15 = vld [vmem:[%s892_s1 + $0xa0] sm:$0xff]   ;;  %v696_v19 = vld [vmem:[%s892_s1 + $0x98] sm:$0xff]   ;;  %v700_v23 = vld [vmem:[%s892_s1 + $0x90] sm:$0xff]  }
   0x9   :  { %634 = vmatpush3.bf16.msra.mxu1 %v684_v7  ;;  %607 = vmatprep.subr.bf16.mxu0 %v685_v8  ;;  %v701_v24 = vld [vmem:[%s892_s1 + $0x48] sm:$0xff]   ;;  %v705_v28 = vld [vmem:[%s892_s1 + $0x40] sm:$0xff]   ;;  %v715_v36 = vld [vmem:[%s892_s1 + $0x118] sm:$0xff]  }
   0xa   :  { %635 = vmatprep.subr.bf16.mxu1 %v686_v9  ;;  %v702_v25 = vld [vmem:[%s892_s1 + $0xc8] sm:$0xff]   ;;  %v706_v29 = vld [vmem:[%s892_s1 + $0xc0] sm:$0xff]   ;;  %v716_v37 = vld [vmem:[%s892_s1 + $0x110] sm:$0xff]  }
   0xb   :  { %v703_v26 = vld [vmem:[%s892_s1 + $0x8] sm:$0xff]   ;;  %v707_v30 = vld [vmem:[%s892_s1] sm:$0xff]  }
   0xc   :  { %608 = vmatpush3.bf16.msra.mxu0 %v687_v10  ;;  %v704_v27 = vld [vmem:[%s892_s1 + $0x88] sm:$0xff]   ;;  %v708_v31 = vld [vmem:[%s892_s1 + $0x80] sm:$0xff]  }
   0xd   :  { %636 = vmatpush3.bf16.msra.mxu1 %v688_v11  ;;  %609 = vmatprep.subr.bf16.mxu0 %v689_v12  ;;  %v709_v32 = vld [vmem:[%s893_s0] ss:$20 sps:$4 sm:$0xff]   ;;  %v711_v33 = vld [vmem:[%s893_s0 + $0x4] ss:$20 sps:$4 sm:$0xff]   ;;  %v712_v34 = vld [vmem:[%s893_s0 + $0x8] ss:$20 sps:$4 sm:$0xff]  }
   0xe   :  { %637 = vmatprep.subr.bf16.mxu1 %v690_v13  ;;  %v714_v35 = vld [vmem:[%s893_s0 + $0xc] ss:$20 sps:$4 sm:$0xff]   ;;  %413 = vmatprep.mubr.bf16.mxu0 %v711_v33  ;;  %v719_v39 = vld [vmem:[%s893_s0 + $0x34] ss:$20 sps:$4 sm:$0xff]   ;;  %v722_v42 = vld [vmem:[%s893_s0 + $0x30] ss:$20 sps:$4 sm:$0xff]  }
   0xf   :  { %462 = vmatprep.mubr.bf16.mxu1 %v714_v35  ;;  %v717_v38 = vld [vmem:[%s893_s0 + $0x2c] ss:$20 sps:$4 sm:$0xff]   ;;  %v721_v40 = vld [vmem:[%s893_s0 + $0x28] ss:$20 sps:$4 sm:$0xff]   ;;  %v725_v43 = vld [vmem:[%s893_s0 + $0x10] ss:$20 sps:$4 sm:$0xff]  }
  0x10   :  { %610 = vmatpush3.bf16.msra.mxu0 %v691_v14  ;;  %v723_v41 = vld [vmem:[%s892_s1 + $0x108] sm:$0xff]   ;;  %v724_v44 = vld [vmem:[%s892_s1 + $0x100] sm:$0xff]  }
  0x11   :  { %638 = vmatpush3.bf16.msra.mxu1 %v692_v15  ;;  %611 = vmatprep.subr.bf16.mxu0 %v693_v16  ;;  %v726_v45 = vld [vmem:[%s893_s0 + $0x38] ss:$20 sps:$4 sm:$0xff]  }
  0x12   :  { %639 = vmatprep.subr.bf16.mxu1 %v694_v17 }
  0x14   :  { %612 = vmatpush3.bf16.msra.mxu0 %v695_v18 }
  0x15   :  { %640 = vmatpush3.bf16.msra.mxu1 %v696_v19  ;;  %613 = vmatprep.subr.bf16.mxu0 %v697_v20 }
  0x16   :  { %641 = vmatprep.subr.bf16.mxu1 %v698_v21 }
  0x18   :  { %614 = vmatpush3.bf16.msra.mxu0 %v699_v22 }
  0x19   :  { %642 = vmatpush3.bf16.msra.mxu1 %v700_v23  ;;  %615 = vmatprep.subr.bf16.mxu0 %v701_v24 }
  0x1a   :  { %643 = vmatprep.subr.bf16.mxu1 %v702_v25 }
  0x1c   :  { %616 = vmatpush3.bf16.msra.mxu0 %v703_v26 }
  0x1d   :  { %644 = vmatpush3.bf16.msra.mxu1 %v704_v27  ;;  %617 = vmatprep.subr.bf16.mxu0 %v705_v28 }
  0x1e   :  { %645 = vmatprep.subr.bf16.mxu1 %v706_v29 }
  0x20   :  { %618 = vmatpush3.bf16.msra.mxu0 %v707_v30 }
  0x21   :  { %646 = vmatpush3.bf16.msra.mxu1 %v708_v31  ;;  %665 = vmatprep.subr.bf16.mxu0 %v715_v36 }
  0x23   :  { %414 = vmatmul.mubr.bf16.vlgmr.msra.gmra.mxu0 %v709_v32 }
  0x24   :  { %463 = vmatmul.mubr.bf16.vlgmr.msra.gmra.mxu1 %v712_v34  ;;  %666 = vmatpush3.bf16.msra.mxu0 %v715_v36 }
  0x25   :  { %667 = vmatprep.subr.bf16.mxu0 %v716_v37  ;;  %421 = vmatprep.mubr.bf16.mxu0 %v717_v38 }
  0x26   :  { %470 = vmatprep.mubr.bf16.mxu1 %v719_v39 }
  0x28   :  { %668 = vmatpush3.bf16.msra.mxu0 %v716_v37 }
  0x29   :  { %669 = vmatprep.subr.bf16.mxu0 %v723_v41 }
  0x2b   :  { %422 = vmatmul.mubr.bf16.gmra.mxu0 %v721_v40 }
  0x2c   :  { %471 = vmatmul.mubr.bf16.gmra.mxu1 %v722_v42  ;;  %673 = vmatprep.mubr.msk.bf16.mxu0 %vm374_vm0, %v725_v43 }
  0x2d   :  { %670 = vmatpush3.bf16.msra.mxu0 %v723_v41 }
  0x2e   :  { %671 = vmatprep.subr.bf16.mxu0 %v724_v44 }
  0x31   :  { %672 = vmatpush3.bf16.msra.mxu0 %v724_v44 }
  0x34   :  { %674 = vmatmul.mubr.msk.bf16.vlgmr.msra.gmra.mxu0 %vm374_vm0, %v726_v45 }
  0xe3   :  { %v619_v46 = vpop.f32.mrf.mxu0 }
  0xe4   :  { %v647_v47 = vpop.f32.mrf.mxu1 }
  0xe5   :  { %v620_v48 = vpop.f32.mrf.mxu0 }
  0xe6   :  { %v648_v49 = vpop.f32.mrf.mxu1  ;;  %v621_v62 = vadd.f32 %v620_v48, %v619_v46 }
  0xe7   :  { %v622_v50 = vpop.f32.mrf.mxu0  ;;  %v649_v63 = vadd.f32 %v648_v49, %v647_v47 }
  0xe8   :  { %v650_v51 = vpop.f32.mrf.mxu1 }
  0xe9   :  { %v623_v52 = vpop.f32.mrf.mxu0  ;;  %v465_v9 = vadd.f32 %v649_v63, %v621_v62 }
  0xea   :  { %v651_v53 = vpop.f32.mrf.mxu1  ;;  %v624_v6 = vadd.f32 %v623_v52, %v622_v50 }
  0xeb   :  { %v625_v54 = vpop.f32.mrf.mxu0  ;;  %v652_v7 = vadd.f32 %v651_v53, %v650_v51 }
  0xec   :  { %v653_v55 = vpop.f32.mrf.mxu1 }
  0xed   :  { %v626_v56 = vpop.f32.mrf.mxu0  ;;  %v468_v17 = vadd.f32 %v652_v7, %v624_v6 }
  0xee   :  { %v654_v57 = vpop.f32.mrf.mxu1  ;;  %v627_v58 = vadd.f32 %v626_v56, %v625_v54 }
  0xef   :  { %v655_v59 = vadd.f32 %v654_v57, %v653_v55  ;;  %v628_v60 = vpop.f32.mrf.mxu0 }
  0xf0   :  { %v656_v61 = vpop.f32.mrf.mxu1 }
  0xf1   :  { %v629_v0 = vpop.f32.mrf.mxu0  ;;  %v473_v4 = vadd.f32 %v655_v59, %v627_v58 }
  0xf2   :  { %v657_v1 = vpop.f32.mrf.mxu1  ;;  %v630_v2 = vadd.f32 %v629_v0, %v628_v60 }
  0xf3   :  { %v658_v3 = vadd.f32 %v657_v1, %v656_v61 }
  0xf4   :  { %v675_v5 = vpop.f32.mrf.mxu0 }
  0xf5   :  { %v522_v8 = vadd.f32 %v675_v5, %v473_v4  ;;  %v476_v13 = vadd.f32 %v658_v3, %v630_v2 }
  0xf6   :  { %v513_v10 = vpop.f32.mrf.mxu0 }
  0xf7   :  { %v545_v11 = vmax.f32 %v522_v8, 0.0  ;;  %v514_v12 = vadd.f32 %v513_v10, %v465_v9 }
  0xf8   :  { %v676_v14 = vpop.f32.mrf.mxu0 }
  0xf9   :  { %549 = vst [vmem:[%s894_s2 + $0x10] sm:$0xff] %v545_v11  ;;  %v543_v15 = vmax.f32 %v514_v12, 0.0  ;;  %v525_v16 = vadd.f32 %v676_v14, %v476_v13 }
  0xfa   :  { %v516_v18 = vpop.f32.mrf.mxu0 }
  0xfb   :  { %547 = vst [vmem:[%s894_s2] sm:$0xff] %v543_v15  ;;  %v546_v19 = vmax.f32 %v525_v16, 0.0  ;;  %v517_v20 = vadd.f32 %v516_v18, %v468_v17 }
  0xfd   :  { %550 = vst [vmem:[%s894_s2 + $0x18] sm:$0xff] %v546_v19  ;;  %v544_v21 = vmax.f32 %v517_v20, 0.0 }
  0xff   :  { %548 = vst [vmem:[%s894_s2 + $0x8] sm:$0xff] %v544_v21 }

// kernel: resnet_forward.19
= control target key start
LH: loop header
LB: loop body
LE: loop exit
PB: predicated region body
PF: predicated region fallthrough
CT: control target
= control target key end

     0   :  { %vm70_vm0 = vcmask 523264   ;;  %s226_s1 = inlined_call_operand.vmem [shape: bf16[64,128], index: 1, kind: input, shape index: {}]   ;;  %s227_s0 = inlined_call_operand.vmem [shape: bf16[32,64], index: 0, kind: input, shape index: {}]   ;;  %s228_s2 = inlined_call_operand.vmem [shape: f32[32,128], index: 2, kind: output, shape index: {}]  }
   0x1   :  { %v175_v0 = vld [vmem:[%s226_s1 + $0x18] sm:$0xff]   ;;  %v176_v1 = vld [vmem:[%s226_s1 + $0x10] sm:$0xff]   ;;  %v177_v2 = vld [vmem:[%s226_s1 + $0x8] sm:$0xff]  }
   0x2   :  { %163 = vmatprep.subr.bf16.mxu0 %v175_v0  ;;  %v179_v3 = vld [vmem:[%s227_s0] sm:$0xff]   ;;  %v180_v5 = vld [vmem:[%s227_s0 + $0x8] sm:$0xff]  }
   0x3   :  { %164 = vmatpush3.bf16.msra.mxu0 %v175_v0  ;;  %171 = vmatprep.mubr.msk.bf16.mxu0 %vm70_vm0, %v179_v3  ;;  %v178_v4 = vld [vmem:[%s226_s1] sm:$0xff]  }
   0x4   :  { %165 = vmatprep.subr.bf16.mxu0 %v176_v1 }
   0x7   :  { %166 = vmatpush3.bf16.msra.mxu0 %v176_v1 }
   0x8   :  { %167 = vmatprep.subr.bf16.mxu0 %v177_v2 }
   0xb   :  { %168 = vmatpush3.bf16.msra.mxu0 %v177_v2 }
   0xc   :  { %169 = vmatprep.subr.bf16.mxu0 %v178_v4 }
   0xf   :  { %170 = vmatpush3.bf16.msra.mxu0 %v178_v4 }
  0x12   :  { %172 = vmatmul.mubr.msk.bf16.vlgmr.msra.gmra.mxu0 %vm70_vm0, %v180_v5 }
  0xd2   :  { %v173_v6 = vpop.f32.mrf.mxu0 }
  0xd3   :  { %143 = vst [vmem:[%s228_s2 + $0x10] sm:$0xff] %v173_v6 }
  0xd4   :  { %v111_v7 = vpop.f32.mrf.mxu0 }
  0xd5   :  { %141 = vst [vmem:[%s228_s2] sm:$0xff] %v111_v7 }
  0xd6   :  { %v174_v8 = vpop.f32.mrf.mxu0 }
  0xd7   :  { %144 = vst [vmem:[%s228_s2 + $0x18] sm:$0xff] %v174_v8 }
  0xd8   :  { %v114_v9 = vpop.f32.mrf.mxu0 }
  0xd9   :  { %142 = vst [vmem:[%s228_s2 + $0x8] sm:$0xff] %v114_v9 }

// kernel: resnet_forward.20
= control target key start
LH: loop header
LB: loop body
LE: loop exit
PB: predicated region body
PF: predicated region fallthrough
CT: control target
= control target key end

     0   :  { %s1639_s1 = inlined_call_operand.vmem [shape: bf16[1152,128], index: 1, kind: input, shape index: {}]   ;;  %s1640_s0 = inlined_call_operand.vmem [shape: bf16[32,1152], index: 0, kind: input, shape index: {}]   ;;  %s1641_s2 = inlined_call_operand.vmem [shape: f32[32,128], index: 2, kind: input, shape index: {}]   ;;  %s1642_s3 = inlined_call_operand.vmem [shape: f32[32,128], index: 3, kind: output, shape index: {}]  }
   0x1   :  { %v1227_v0 = vld [vmem:[%s1639_s1 + $0x78] sm:$0xff]   ;;  %v1231_v4 = vld [vmem:[%s1639_s1 + $0x70] sm:$0xff]   ;;  %v1235_v8 = vld [vmem:[%s1639_s1 + $0x68] sm:$0xff]  }
   0x2   :  { %v1228_v1 = vld [vmem:[%s1639_s1 + $0xf8] sm:$0xff]   ;;  %1085 = vmatprep.subr.bf16.mxu0 %v1227_v0  ;;  %v1232_v5 = vld [vmem:[%s1639_s1 + $0xf0] sm:$0xff]   ;;  %v1236_v9 = vld [vmem:[%s1639_s1 + $0xe8] sm:$0xff]  }
   0x3   :  { %v1229_v2 = vld [vmem:[%s1639_s1 + $0x38] sm:$0xff]   ;;  %1113 = vmatprep.subr.bf16.mxu1 %v1228_v1  ;;  %v1233_v6 = vld [vmem:[%s1639_s1 + $0x30] sm:$0xff]   ;;  %v1237_v10 = vld [vmem:[%s1639_s1 + $0x28] sm:$0xff]  }
   0x4   :  { %v1230_v3 = vld [vmem:[%s1639_s1 + $0xb8] sm:$0xff]   ;;  %1086 = vmatpush3.bf16.msra.mxu0 %v1229_v2  ;;  %v1234_v7 = vld [vmem:[%s1639_s1 + $0xb0] sm:$0xff]   ;;  %v1238_v11 = vld [vmem:[%s1639_s1 + $0xa8] sm:$0xff]  }
   0x5   :  { %1114 = vmatpush3.bf16.msra.mxu1 %v1230_v3  ;;  %1087 = vmatprep.subr.bf16.mxu0 %v1231_v4  ;;  %v1239_v12 = vld [vmem:[%s1639_s1 + $0x60] sm:$0xff]   ;;  %v1243_v16 = vld [vmem:[%s1639_s1 + $0x58] sm:$0xff]   ;;  %v1247_v20 = vld [vmem:[%s1639_s1 + $0x50] sm:$0xff]  }
   0x6   :  { %1115 = vmatprep.subr.bf16.mxu1 %v1232_v5  ;;  %v1240_v13 = vld [vmem:[%s1639_s1 + $0xe0] sm:$0xff]   ;;  %v1244_v17 = vld [vmem:[%s1639_s1 + $0xd8] sm:$0xff]   ;;  %v1248_v21 = vld [vmem:[%s1639_s1 + $0xd0] sm:$0xff]  }
   0x7   :  { %v1241_v14 = vld [vmem:[%s1639_s1 + $0x20] sm:$0xff]   ;;  %v1245_v18 = vld [vmem:[%s1639_s1 + $0x18] sm:$0xff]   ;;  %v1249_v22 = vld [vmem:[%s1639_s1 + $0x10] sm:$0xff]  }
   0x8   :  { %1088 = vmatpush3.bf16.msra.mxu0 %v1233_v6  ;;  %v1242_v15 = vld [vmem:[%s1639_s1 + $0xa0] sm:$0xff]   ;;  %v1246_v19 = vld [vmem:[%s1639_s1 + $0x98] sm:$0xff]   ;;  %v1250_v23 = vld [vmem:[%s1639_s1 + $0x90] sm:$0xff]  }
   0x9   :  { %1116 = vmatpush3.bf16.msra.mxu1 %v1234_v7  ;;  %1089 = vmatprep.subr.bf16.mxu0 %v1235_v8  ;;  %v1251_v24 = vld [vmem:[%s1639_s1 + $0x48] sm:$0xff]   ;;  %v1255_v28 = vld [vmem:[%s1639_s1 + $0x40] sm:$0xff]   ;;  %v1265_v36 = vld [vmem:[%s1639_s1 + $0x178] sm:$0xff]  }
   0xa   :  { %1117 = vmatprep.subr.bf16.mxu1 %v1236_v9  ;;  %v1252_v25 = vld [vmem:[%s1639_s1 + $0xc8] sm:$0xff]   ;;  %v1256_v29 = vld [vmem:[%s1639_s1 + $0xc0] sm:$0xff]   ;;  %v1266_v37 = vld [vmem:[%s1639_s1 + $0x138] sm:$0xff]  }
   0xb   :  { %v1253_v26 = vld [vmem:[%s1639_s1 + $0x8] sm:$0xff]   ;;  %v1257_v30 = vld [vmem:[%s1639_s1] sm:$0xff]   ;;  %v1267_v38 = vld [vmem:[%s1639_s1 + $0x1f8] sm:$0xff]  }
   0xc   :  { %1090 = vmatpush3.bf16.msra.mxu0 %v1237_v10  ;;  %v1254_v27 = vld [vmem:[%s1639_s1 + $0x88] sm:$0xff]   ;;  %v1258_v31 = vld [vmem:[%s1639_s1 + $0x80] sm:$0xff]   ;;  %v1268_v39 = vld [vmem:[%s1639_s1 + $0x1b8] sm:$0xff]  }
   0xd   :  { %1118 = vmatpush3.bf16.msra.mxu1 %v1238_v11  ;;  %1091 = vmatprep.subr.bf16.mxu0 %v1239_v12  ;;  %v1259_v32 = vld [vmem:[%s1640_s0] ss:$36 sps:$4 sm:$0xff]   ;;  %v1262_v34 = vld [vmem:[%s1640_s0 + $0x8] ss:$36 sps:$4 sm:$0xff]   ;;  %v1269_v40 = vld [vmem:[%s1639_s1 + $0x170] sm:$0xff]  }
   0xe   :  { %1119 = vmatprep.subr.bf16.mxu1 %v1240_v13  ;;  %v1261_v33 = vld [vmem:[%s1640_s0 + $0x4] ss:$36 sps:$4 sm:$0xff]   ;;  %v1264_v35 = vld [vmem:[%s1640_s0 + $0xc] ss:$36 sps:$4 sm:$0xff]   ;;  %v1281_v52 = vld [vmem:[%s1639_s1 + $0x158] sm:$0xff]  }
   0xf   :  { %747 = vmatprep.mubr.bf16.mxu0 %v1261_v33  ;;  %796 = vmatprep.mubr.bf16.mxu1 %v1264_v35  ;;  %v1270_v41 = vld [vmem:[%s1639_s1 + $0x130] sm:$0xff]   ;;  %v1273_v44 = vld [vmem:[%s1639_s1 + $0x168] sm:$0xff]   ;;  %v1277_v48 = vld [vmem:[%s1639_s1 + $0x160] sm:$0xff]  }
  0x10   :  { %1092 = vmatpush3.bf16.msra.mxu0 %v1241_v14  ;;  %v1271_v42 = vld [vmem:[%s1639_s1 + $0x1f0] sm:$0xff]   ;;  %v1274_v45 = vld [vmem:[%s1639_s1 + $0x128] sm:$0xff]   ;;  %v1278_v49 = vld [vmem:[%s1639_s1 + $0x120] sm:$0xff]  }
  0x11   :  { %1120 = vmatpush3.bf16.msra.mxu1 %v1242_v15  ;;  %1093 = vmatprep.subr.bf16.mxu0 %v1243_v16  ;;  %v1272_v43 = vld [vmem:[%s1639_s1 + $0x1b0] sm:$0xff]   ;;  %v1275_v46 = vld [vmem:[%s1639_s1 + $0x1e8] sm:$0xff]   ;;  %v1279_v50 = vld [vmem:[%s1639_s1 + $0x1e0] sm:$0xff]  }
  0x12   :  { %1121 = vmatprep.subr.bf16.mxu1 %v1244_v17  ;;  %v1276_v47 = vld [vmem:[%s1639_s1 + $0x1a8] sm:$0xff]   ;;  %v1280_v51 = vld [vmem:[%s1639_s1 + $0x1a0] sm:$0xff]   ;;  %v1282_v53 = vld [vmem:[%s1639_s1 + $0x118] sm:$0xff]  }
  0x13   :  { %v1283_v54 = vld [vmem:[%s1640_s0 + $0x4c] ss:$36 sps:$4 sm:$0xff]   ;;  %v1285_v55 = vld [vmem:[%s1640_s0 + $0x54] ss:$36 sps:$4 sm:$0xff]   ;;  %v1299_v4 = vld [vmem:[%s1639_s1 + $0x140] sm:$0xff]  }
  0x14   :  { %1094 = vmatpush3.bf16.msra.mxu0 %v1245_v18  ;;  %v1287_v56 = vld [vmem:[%s1639_s1 + $0x1d8] sm:$0xff]   ;;  %v1288_v57 = vld [vmem:[%s1640_s0 + $0x48] ss:$36 sps:$4 sm:$0xff]   ;;  %v1289_v58 = vld [vmem:[%s1640_s0 + $0x50] ss:$36 sps:$4 sm:$0xff]  }
  0x15   :  { %1122 = vmatpush3.bf16.msra.mxu1 %v1246_v19  ;;  %1095 = vmatprep.subr.bf16.mxu0 %v1247_v20  ;;  %v1290_v59 = vld [vmem:[%s1639_s1 + $0x198] sm:$0xff]   ;;  %v1291_v60 = vld [vmem:[%s1639_s1 + $0x150] sm:$0xff]   ;;  %v1295_v0 = vld [vmem:[%s1639_s1 + $0x148] sm:$0xff]  }
  0x16   :  { %1123 = vmatprep.subr.bf16.mxu1 %v1248_v21  ;;  %v1292_v61 = vld [vmem:[%s1639_s1 + $0x110] sm:$0xff]   ;;  %v1296_v1 = vld [vmem:[%s1639_s1 + $0x108] sm:$0xff]   ;;  %v1300_v5 = vld [vmem:[%s1639_s1 + $0x100] sm:$0xff]  }
  0x17   :  { %v1293_v62 = vld [vmem:[%s1639_s1 + $0x1d0] sm:$0xff]   ;;  %v1297_v2 = vld [vmem:[%s1639_s1 + $0x1c8] sm:$0xff]   ;;  %v1301_v6 = vld [vmem:[%s1639_s1 + $0x1c0] sm:$0xff]  }
  0x18   :  { %1096 = vmatpush3.bf16.msra.mxu0 %v1249_v22  ;;  %v1294_v63 = vld [vmem:[%s1639_s1 + $0x190] sm:$0xff]   ;;  %v1298_v3 = vld [vmem:[%s1639_s1 + $0x188] sm:$0xff]   ;;  %v1305_v9 = vld [vmem:[%s1639_s1 + $0x180] sm:$0xff]  }
  0x19   :  { %1124 = vmatpush3.bf16.msra.mxu1 %v1250_v23  ;;  %1097 = vmatprep.subr.bf16.mxu0 %v1251_v24  ;;  %v1302_v7 = vld [vmem:[%s1640_s0 + $0x10] ss:$36 sps:$4 sm:$0xff]   ;;  %v1306_v10 = vld [vmem:[%s1639_s1 + $0x238] sm:$0xff]   ;;  %v1314_v16 = vld [vmem:[%s1639_s1 + $0x228] sm:$0xff]  }
  0x1a   :  { %1125 = vmatprep.subr.bf16.mxu1 %v1252_v25  ;;  %v1304_v8 = vld [vmem:[%s1640_s0 + $0x14] ss:$36 sps:$4 sm:$0xff]   ;;  %v1309_v12 = vld [vmem:[%s1640_s0 + $0x1c] ss:$36 sps:$4 sm:$0xff]   ;;  %v1315_v17 = vld [vmem:[%s1640_s0 + $0x64] ss:$36 sps:$4 sm:$0xff]  }
  0x1b   :  { %v1307_v11 = vld [vmem:[%s1640_s0 + $0x18] ss:$36 sps:$4 sm:$0xff]   ;;  %v1310_v13 = vld [vmem:[%s1639_s1 + $0x230] sm:$0xff]   ;;  %v1317_v18 = vld [vmem:[%s1640_s0 + $0x60] ss:$36 sps:$4 sm:$0xff]  }
  0x1c   :  { %1098 = vmatpush3.bf16.msra.mxu0 %v1253_v26  ;;  %v1311_v14 = vld [vmem:[%s1640_s0 + $0x5c] ss:$36 sps:$4 sm:$0xff]   ;;  %v1320_v22 = vld [vmem:[%s1639_s1 + $0x210] sm:$0xff]   ;;  %v1321_v23 = vld [vmem:[%s1639_s1 + $0x208] sm:$0xff]  }
  0x1d   :  { %1126 = vmatpush3.bf16.msra.mxu1 %v1254_v27  ;;  %1099 = vmatprep.subr.bf16.mxu0 %v1255_v28  ;;  %v1313_v15 = vld [vmem:[%s1640_s0 + $0x58] ss:$36 sps:$4 sm:$0xff]   ;;  %v1318_v19 = vld [vmem:[%s1639_s1 + $0x220] sm:$0xff]   ;;  %v1324_v25 = vld [vmem:[%s1640_s0 + $0x68] ss:$36 sps:$4 sm:$0xff]  }
  0x1e   :  { %1127 = vmatprep.subr.bf16.mxu1 %v1256_v29  ;;  %v1319_v20 = vld [vmem:[%s1639_s1 + $0x218] sm:$0xff]   ;;  %v1323_v21 = vld [vmem:[%s1640_s0 + $0x20] ss:$36 sps:$4 sm:$0xff]  }
  0x1f   :  { %v1322_v24 = vld [vmem:[%s1639_s1 + $0x200] sm:$0xff]  }
  0x20   :  { %1100 = vmatpush3.bf16.msra.mxu0 %v1257_v30 }
  0x21   :  { %1128 = vmatpush3.bf16.msra.mxu1 %v1258_v31  ;;  %1141 = vmatprep.subr.bf16.mxu0 %v1265_v36 }
  0x22   :  { %1169 = vmatprep.subr.bf16.mxu1 %v1267_v38 }
  0x23   :  { %748 = vmatmul.mubr.bf16.vlgmr.msra.gmra.mxu0 %v1259_v32 }
  0x24   :  { %797 = vmatmul.mubr.bf16.vlgmr.msra.gmra.mxu1 %v1262_v34  ;;  %1142 = vmatpush3.bf16.msra.mxu0 %v1266_v37 }
  0x25   :  { %1170 = vmatpush3.bf16.msra.mxu1 %v1268_v39  ;;  %1143 = vmatprep.subr.bf16.mxu0 %v1269_v40 }
  0x26   :  { %1171 = vmatprep.subr.bf16.mxu1 %v1271_v42  ;;  %755 = vmatprep.mubr.bf16.mxu0 %v1283_v54 }
  0x27   :  { %804 = vmatprep.mubr.bf16.mxu1 %v1285_v55 }
  0x28   :  { %1144 = vmatpush3.bf16.msra.mxu0 %v1270_v41 }
  0x29   :  { %1172 = vmatpush3.bf16.msra.mxu1 %v1272_v43  ;;  %1145 = vmatprep.subr.bf16.mxu0 %v1273_v44 }
  0x2a   :  { %1173 = vmatprep.subr.bf16.mxu1 %v1275_v46 }
  0x2b   :  { %756 = vmatmul.mubr.bf16.gmra.mxu0 %v1288_v57 }
  0x2c   :  { %1146 = vmatpush3.bf16.msra.mxu0 %v1274_v45  ;;  %805 = vmatmul.mubr.bf16.gmra.mxu1 %v1289_v58 }
  0x2d   :  { %1174 = vmatpush3.bf16.msra.mxu1 %v1276_v47  ;;  %1147 = vmatprep.subr.bf16.mxu0 %v1277_v48 }
  0x2e   :  { %1175 = vmatprep.subr.bf16.mxu1 %v1279_v50  ;;  %845 = vmatprep.mubr.bf16.mxu0 %v1304_v8 }
  0x2f   :  { %894 = vmatprep.mubr.bf16.mxu1 %v1309_v12 }
  0x30   :  { %1148 = vmatpush3.bf16.msra.mxu0 %v1278_v49 }
  0x31   :  { %1176 = vmatpush3.bf16.msra.mxu1 %v1280_v51  ;;  %1149 = vmatprep.subr.bf16.mxu0 %v1281_v52 }
  0x32   :  { %1177 = vmatprep.subr.bf16.mxu1 %v1287_v56 }
  0x34   :  { %1150 = vmatpush3.bf16.msra.mxu0 %v1282_v53 }
  0x35   :  { %1178 = vmatpush3.bf16.msra.mxu1 %v1290_v59  ;;  %1151 = vmatprep.subr.bf16.mxu0 %v1291_v60 }
  0x36   :  { %1179 = vmatprep.subr.bf16.mxu1 %v1293_v62 }
  0x38   :  { %1152 = vmatpush3.bf16.msra.mxu0 %v1292_v61 }
  0x39   :  { %1180 = vmatpush3.bf16.msra.mxu1 %v1294_v63  ;;  %1153 = vmatprep.subr.bf16.mxu0 %v1295_v0 }
  0x3a   :  { %1181 = vmatprep.subr.bf16.mxu1 %v1297_v2 }
  0x3c   :  { %1154 = vmatpush3.bf16.msra.mxu0 %v1296_v1 }
  0x3d   :  { %1182 = vmatpush3.bf16.msra.mxu1 %v1298_v3  ;;  %1155 = vmatprep.subr.bf16.mxu0 %v1299_v4 }
  0x3e   :  { %1183 = vmatprep.subr.bf16.mxu1 %v1301_v6 }
  0x40   :  { %1156 = vmatpush3.bf16.msra.mxu0 %v1300_v5 }
  0x41   :  { %1184 = vmatpush3.bf16.msra.mxu1 %v1305_v9  ;;  %1207 = vmatprep.subr.bf16.mxu0 %v1306_v10 }
  0x43   :  { %846 = vmatmul.mubr.bf16.vlgmr.msra.gmra.mxu0 %v1302_v7 }
  0x44   :  { %1208 = vmatpush3.bf16.msra.mxu0 %v1306_v10  ;;  %895 = vmatmul.mubr.bf16.vlgmr.msra.gmra.mxu1 %v1307_v11 }
  0x45   :  { %1209 = vmatprep.subr.bf16.mxu0 %v1310_v13  ;;  %853 = vmatprep.mubr.bf16.mxu0 %v1311_v14 }
  0x46   :  { %902 = vmatprep.mubr.bf16.mxu1 %v1315_v17 }
  0x48   :  { %1210 = vmatpush3.bf16.msra.mxu0 %v1310_v13 }
  0x49   :  { %1211 = vmatprep.subr.bf16.mxu0 %v1314_v16 }
  0x4b   :  { %854 = vmatmul.mubr.bf16.gmra.mxu0 %v1313_v15 }
  0x4c   :  { %1212 = vmatpush3.bf16.msra.mxu0 %v1314_v16  ;;  %903 = vmatmul.mubr.bf16.gmra.mxu1 %v1317_v18  ;;  %v977_v18 = vld [vmem:[%s1641_s2 + $0x10] sm:$0xff] }
  0x4d   :  { %1213 = vmatprep.subr.bf16.mxu0 %v1318_v19  ;;  %1223 = vmatprep.mubr.bf16.mxu0 %v1323_v21 }
  0x50   :  { %1214 = vmatpush3.bf16.msra.mxu0 %v1318_v19 }
  0x51   :  { %1215 = vmatprep.subr.bf16.mxu0 %v1319_v20 }
  0x54   :  { %1216 = vmatpush3.bf16.msra.mxu0 %v1319_v20 }
  0x55   :  { %1217 = vmatprep.subr.bf16.mxu0 %v1320_v22 }
  0x58   :  { %1218 = vmatpush3.bf16.msra.mxu0 %v1320_v22 }
  0x59   :  { %1219 = vmatprep.subr.bf16.mxu0 %v1321_v23 }
  0x5c   :  { %1220 = vmatpush3.bf16.msra.mxu0 %v1321_v23 }
  0x5d   :  { %1221 = vmatprep.subr.bf16.mxu0 %v1322_v24 }
  0x60   :  { %1222 = vmatpush3.bf16.msra.mxu0 %v1322_v24  ;;  %v975_v24 = vld [vmem:[%s1641_s2] sm:$0xff] }
  0x63   :  { %1224 = vmatmul.mubr.bf16.vlgmr.msra.gmra.mxu0 %v1324_v25 }
  0xe3   :  { %v1101_v26 = vpop.f32.mrf.mxu0 }
  0xe4   :  { %v1129_v27 = vpop.f32.mrf.mxu1 }
  0xe5   :  { %v1102_v28 = vpop.f32.mrf.mxu0 }
  0xe6   :  { %v1130_v29 = vpop.f32.mrf.mxu1  ;;  %v1103_v57 = vadd.f32 %v1102_v28, %v1101_v26 }
  0xe7   :  { %v1104_v30 = vpop.f32.mrf.mxu0  ;;  %v1131_v58 = vadd.f32 %v1130_v29, %v1129_v27  ;;  %v978_v29 = vld [vmem:[%s1641_s2 + $0x18] sm:$0xff] }
  0xe8   :  { %v1132_v31 = vpop.f32.mrf.mxu1 }
  0xe9   :  { %v1105_v32 = vpop.f32.mrf.mxu0  ;;  %v799_v2 = vadd.f32 %v1131_v58, %v1103_v57 }
  0xea   :  { %v1133_v34 = vpop.f32.mrf.mxu1  ;;  %v1106_v3 = vadd.f32 %v1105_v32, %v1104_v30 }
  0xeb   :  { %v1107_v33 = vpop.f32.mrf.mxu0  ;;  %v1134_v4 = vadd.f32 %v1133_v34, %v1132_v31 }
  0xec   :  { %v1135_v35 = vpop.f32.mrf.mxu1 }
  0xed   :  { %v1108_v36 = vpop.f32.mrf.mxu0  ;;  %v802_v13 = vadd.f32 %v1134_v4, %v1106_v3 }
  0xee   :  { %v1136_v37 = vpop.f32.mrf.mxu1  ;;  %v1109_v55 = vadd.f32 %v1108_v36, %v1107_v33 }
  0xef   :  { %v1110_v38 = vpop.f32.mrf.mxu0  ;;  %v1137_v56 = vadd.f32 %v1136_v37, %v1135_v35  ;;  %v976_v35 = vld [vmem:[%s1641_s2 + $0x8] sm:$0xff] }
  0xf0   :  { %v1138_v39 = vpop.f32.mrf.mxu1 }
  0xf1   :  { %v1111_v40 = vpop.f32.mrf.mxu0  ;;  %v807_v62 = vadd.f32 %v1137_v56, %v1109_v55 }
  0xf2   :  { %v1139_v42 = vpop.f32.mrf.mxu1  ;;  %v1112_v63 = vadd.f32 %v1111_v40, %v1110_v38 }
  0xf3   :  { %v1140_v0 = vadd.f32 %v1139_v42, %v1138_v39 }
  0xf5   :  { %v810_v9 = vadd.f32 %v1140_v0, %v1112_v63 }
 0x103   :  { %v1157_v41 = vpop.f32.mrf.mxu0 }
 0x104   :  { %v1185_v44 = vpop.f32.mrf.mxu1 }
 0x105   :  { %v1158_v43 = vpop.f32.mrf.mxu0 }
 0x106   :  { %v1186_v46 = vpop.f32.mrf.mxu1  ;;  %v1159_v1 = vadd.f32 %v1158_v43, %v1157_v41 }
 0x107   :  { %v1160_v45 = vpop.f32.mrf.mxu0  ;;  %v1187_v11 = vadd.f32 %v1186_v46, %v1185_v44 }
 0x108   :  { %v1188_v48 = vpop.f32.mrf.mxu1  ;;  %v848_v10 = vadd.f32 %v1159_v1, %v799_v2 }
 0x109   :  { %v1161_v47 = vpop.f32.mrf.mxu0 }
 0x10a   :  { %v1189_v50 = vpop.f32.mrf.mxu1  ;;  %v1162_v12 = vadd.f32 %v1161_v47, %v1160_v45  ;;  %v897_v22 = vadd.f32 %v1187_v11, %v848_v10 }
 0x10b   :  { %v1163_v49 = vpop.f32.mrf.mxu0  ;;  %v1190_v20 = vadd.f32 %v1189_v50, %v1188_v48 }
 0x10c   :  { %v1191_v52 = vpop.f32.mrf.mxu1  ;;  %v851_v19 = vadd.f32 %v1162_v12, %v802_v13 }
 0x10d   :  { %v1164_v51 = vpop.f32.mrf.mxu0 }
 0x10e   :  { %v1192_v54 = vpop.f32.mrf.mxu1  ;;  %v1165_v59 = vadd.f32 %v1164_v51, %v1163_v49  ;;  %v900_v33 = vadd.f32 %v1190_v20, %v851_v19 }
 0x10f   :  { %v1166_v53 = vpop.f32.mrf.mxu0  ;;  %v1193_v6 = vadd.f32 %v1192_v54, %v1191_v52 }
 0x110   :  { %v1194_v61 = vpop.f32.mrf.mxu1  ;;  %v856_v5 = vadd.f32 %v1165_v59, %v807_v62 }
 0x111   :  { %v1167_v60 = vpop.f32.mrf.mxu0 }
 0x112   :  { %v1168_v7 = vadd.f32 %v1167_v60, %v1166_v53  ;;  %v1195_v8 = vpop.f32.mrf.mxu1  ;;  %v905_v16 = vadd.f32 %v1193_v6, %v856_v5 }
 0x113   :  { %v1196_v15 = vadd.f32 %v1195_v8, %v1194_v61 }
 0x114   :  { %v859_v14 = vadd.f32 %v1168_v7, %v810_v9 }
 0x116   :  { %v908_v27 = vadd.f32 %v1196_v15, %v859_v14 }
 0x123   :  { %v1225_v17 = vpop.f32.mrf.mxu0 }
 0x124   :  { %v954_v21 = vadd.f32 %v1225_v17, %v905_v16 }
 0x125   :  { %v945_v23 = vpop.f32.mrf.mxu0 }
 0x126   :  { %v981_v25 = vadd.f32 %v977_v18, %v954_v21  ;;  %v946_v26 = vadd.f32 %v945_v23, %v897_v22 }
 0x127   :  { %v1226_v28 = vpop.f32.mrf.mxu0 }
 0x128   :  { %v985_v30 = vmax.f32 %v981_v25, 0.0  ;;  %v979_v31 = vadd.f32 %v975_v24, %v946_v26  ;;  %v957_v32 = vadd.f32 %v1226_v28, %v908_v27 }
 0x129   :  { %v948_v34 = vpop.f32.mrf.mxu0 }
 0x12a   :  { %989 = vst [vmem:[%s1642_s3 + $0x10] sm:$0xff] %v985_v30  ;;  %v983_v36 = vmax.f32 %v979_v31, 0.0  ;;  %v982_v37 = vadd.f32 %v978_v29, %v957_v32  ;;  %v949_v38 = vadd.f32 %v948_v34, %v900_v33 }
 0x12c   :  { %987 = vst [vmem:[%s1642_s3] sm:$0xff] %v983_v36  ;;  %v986_v39 = vmax.f32 %v982_v37, 0.0  ;;  %v980_v40 = vadd.f32 %v976_v35, %v949_v38 }
 0x12e   :  { %990 = vst [vmem:[%s1642_s3 + $0x18] sm:$0xff] %v986_v39  ;;  %v984_v41 = vmax.f32 %v980_v40, 0.0 }
 0x130   :  { %988 = vst [vmem:[%s1642_s3 + $0x8] sm:$0xff] %v984_v41 }

// kernel: resnet_forward.21
= control target key start
LH: loop header
LB: loop body
LE: loop exit
PB: predicated region body
PF: predicated region fallthrough
CT: control target
= control target key end

     0   :  { %s2375_s9 = smov 0   ;;  %s2377_s10 = smov 0   ;;  %s2894_s0 = inlined_call_operand.vmem [shape: bf16[8,1296], index: 0, kind: input, shape index: {}]   ;;  %s2895_s1 = inlined_call_operand.vmem [shape: bf16[1296,256], index: 1, kind: input, shape index: {}]   ;;  %s2896_s2 = inlined_call_operand.vmem [shape: f32[8,256], index: 2, kind: output, shape index: {}]  }
   0x1   :  { %s2379_s11 = smov 0   ;;  %s2381_s12 = smov 0  }
   0x2   :  { %s2383_s13 = smov 0  }
   0x3 LB: > { %s27_s14 = sadd.s32 1, %s2352_s12  ;;  %p75_p1 = scmp.ne.s32.totalorder %s2344_s10, %s2340_s9  ;;  %s2356_s13 = sphi %s2383_s13, %s12_s13   ;;  %s2352_s12 = sphi %s2381_s12, %s2900_s12   ;;  %s2348_s11 = sphi %s2379_s11, %s2899_s11   ;;  %s2344_s10 = sphi %s2377_s10, %s2898_s10   ;;  %s2340_s9 = sphi %s2375_s9, %s2897_s9  }
   0x4   : > { %p29_p0 = scmp.ge.s32.totalorder %s27_s14, 2  ;;  %p76_p2 = scmp.eq.s32.totalorder %s2356_s13, 0 }
   0x5   : > { %s68_s16 = sadd.s32 1, %s2344_s10  ;;  %p1965_p5 = scmp.ge.s32.totalorder %s2356_s13, 2 }
   0x6   : > { %s2902_s14 = smov (%p29_p0, %s27_s14), 0  ;;  %p77_p3 = por %p76_p2, %p75_p1 }
   0x7   : > { %s64_s15 = ssub.s32 %s2352_s12, %s2902_s14  ;;  %142 = sbr.rel (%p1965_p5) target bundleno = 124 (0x7c), region = 20 }
   0x8   : > { %p66_p4 = scmp.eq.s32.totalorder %s64_s15, 0 }
   0xa   : > { %s2410_s17 = scalar_select %p66_p4, %s2344_s10, %s68_s16  }
   0xc   : > { %145 = sbr.rel (!%p77_p3) target bundleno = 124 (0x7c), region = 24  ;;  %s147_s18 = sand.u32 (%p77_p3), 1, %s2344_s10  }
   0xd   : > { %s1966_s19 = sshll.u32 (%p77_p3), %s2352_s12, 2  ;;  %s2182_s20 = smul.u32 (%p77_p3), 648, %s147_s18 }
   0xe   : > { %s2418_s23 = scalar_lea.vmem (%p77_p3), %s2895_s1, %s1966_s19 }
   0xf   : > { %v171_v0 = vld [vmem:[%s2418_s23] sm:$0xf] (%p77_p3)  ;;  %v173_v1 = vld [vmem:[%s2418_s23 + $0x8] sm:$0xf] (%p77_p3)  ;;  %v175_v2 = vld [vmem:[%s2418_s23 + $0x10] sm:$0xf] (%p77_p3) }
  0x10   : > { %v177_v3 = vld [vmem:[%s2418_s23 + $0x18] sm:$0xf] (%p77_p3)  ;;  %v179_v4 = vld [vmem:[%s2418_s23 + $0x20] sm:$0xf] (%p77_p3)  ;;  %s2425_s24 = scalar_lea.vmem (%p77_p3), [#allocation3], %s2182_s20 }
  0x11   : > { %172 = vst [vmem:[%s2425_s24] sm:$0xf] %v171_v0  ;;  %174 = vst [vmem:[%s2425_s24 + $0x4] sm:$0xf] %v173_v1  ;;  %v181_v5 = vld [vmem:[%s2418_s23 + $0x28] sm:$0xf] }
  0x12   : > { %176 = vst [vmem:[%s2425_s24 + $0x8] sm:$0xf] %v175_v2  ;;  %178 = vst [vmem:[%s2425_s24 + $0xc] sm:$0xf] %v177_v3  ;;  %v183_v6 = vld [vmem:[%s2418_s23 + $0x30] sm:$0xf] }
  0x13   : > { %180 = vst [vmem:[%s2425_s24 + $0x10] sm:$0xf] %v179_v4  ;;  %v185_v7 = vld [vmem:[%s2418_s23 + $0x38] sm:$0xf]  ;;  %182 = vst [vmem:[%s2425_s24 + $0x14] sm:$0xf] %v181_v5 }
  0x14   : > { %184 = vst [vmem:[%s2425_s24 + $0x18] sm:$0xf] %v183_v6  ;;  %186 = vst [vmem:[%s2425_s24 + $0x1c] sm:$0xf] %v185_v7  ;;  %v187_v8 = vld [vmem:[%s2418_s23 + $0x40] sm:$0xf] }
  0x15   : > { %v189_v9 = vld [vmem:[%s2418_s23 + $0x48] sm:$0xf]  ;;  %v191_v10 = vld [vmem:[%s2418_s23 + $0x50] sm:$0xf]  ;;  %188 = vst [vmem:[%s2425_s24 + $0x20] sm:$0xf] %v187_v8 }
  0x16   : > { %190 = vst [vmem:[%s2425_s24 + $0x24] sm:$0xf] %v189_v9  ;;  %192 = vst [vmem:[%s2425_s24 + $0x28] sm:$0xf] %v191_v10  ;;  %v193_v11 = vld [vmem:[%s2418_s23 + $0x58] sm:$0xf] }
  0x17   : > { %v195_v12 = vld [vmem:[%s2418_s23 + $0x60] sm:$0xf]  ;;  %v197_v13 = vld [vmem:[%s2418_s23 + $0x68] sm:$0xf]  ;;  %194 = vst [vmem:[%s2425_s24 + $0x2c] sm:$0xf] %v193_v11 }
  0x18   : > { %196 = vst [vmem:[%s2425_s24 + $0x30] sm:$0xf] %v195_v12  ;;  %198 = vst [vmem:[%s2425_s24 + $0x34] sm:$0xf] %v197_v13  ;;  %v199_v14 = vld [vmem:[%s2418_s23 + $0x70] sm:$0xf] }
  0x19   : > { %v201_v15 = vld [vmem:[%s2418_s23 + $0x78] sm:$0xf]  ;;  %v203_v16 = vld [vmem:[%s2418_s23 + $0x80] sm:$0xf]  ;;  %200 = vst [vmem:[%s2425_s24 + $0x38] sm:$0xf] %v199_v14 }
  0x1a   : > { %202 = vst [vmem:[%s2425_s24 + $0x3c] sm:$0xf] %v201_v15  ;;  %204 = vst [vmem:[%s2425_s24 + $0x40] sm:$0xf] %v203_v16  ;;  %v205_v17 = vld [vmem:[%s2418_s23 + $0x88] sm:$0xf] }
  0x1b   : > { %v207_v18 = vld [vmem:[%s2418_s23 + $0x90] sm:$0xf]  ;;  %v209_v19 = vld [vmem:[%s2418_s23 + $0x98] sm:$0xf]  ;;  %206 = vst [vmem:[%s2425_s24 + $0x44] sm:$0xf] %v205_v17 }
  0x1c   : > { %208 = vst [vmem:[%s2425_s24 + $0x48] sm:$0xf] %v207_v18  ;;  %210 = vst [vmem:[%s2425_s24 + $0x4c] sm:$0xf] %v209_v19  ;;  %v211_v20 = vld [vmem:[%s2418_s23 + $0xa0] sm:$0xf] }
  0x1d   : > { %v213_v21 = vld [vmem:[%s2418_s23 + $0xa8] sm:$0xf]  ;;  %v215_v22 = vld [vmem:[%s2418_s23 + $0xb0] sm:$0xf]  ;;  %212 = vst [vmem:[%s2425_s24 + $0x50] sm:$0xf] %v211_v20 }
  0x1e   : > { %214 = vst [vmem:[%s2425_s24 + $0x54] sm:$0xf] %v213_v21  ;;  %216 = vst [vmem:[%s2425_s24 + $0x58] sm:$0xf] %v215_v22  ;;  %v217_v23 = vld [vmem:[%s2418_s23 + $0xb8] sm:$0xf] }
  0x1f   : > { %v219_v24 = vld [vmem:[%s2418_s23 + $0xc0] sm:$0xf]  ;;  %v221_v25 = vld [vmem:[%s2418_s23 + $0xc8] sm:$0xf]  ;;  %218 = vst [vmem:[%s2425_s24 + $0x5c] sm:$0xf] %v217_v23 }
  0x20   : > { %220 = vst [vmem:[%s2425_s24 + $0x60] sm:$0xf] %v219_v24  ;;  %222 = vst [vmem:[%s2425_s24 + $0x64] sm:$0xf] %v221_v25  ;;  %v223_v26 = vld [vmem:[%s2418_s23 + $0xd0] sm:$0xf] }
  0x21   : > { %v225_v27 = vld [vmem:[%s2418_s23 + $0xd8] sm:$0xf]  ;;  %v227_v28 = vld [vmem:[%s2418_s23 + $0xe0] sm:$0xf]  ;;  %224 = vst [vmem:[%s2425_s24 + $0x68] sm:$0xf] %v223_v26 }
  0x22   : > { %226 = vst [vmem:[%s2425_s24 + $0x6c] sm:$0xf] %v225_v27  ;;  %228 = vst [vmem:[%s2425_s24 + $0x70] sm:$0xf] %v227_v28  ;;  %v229_v29 = vld [vmem:[%s2418_s23 + $0xe8] sm:$0xf] }
  0x23   : > { %v231_v30 = vld [vmem:[%s2418_s23 + $0xf0] sm:$0xf]  ;;  %v233_v31 = vld [vmem:[%s2418_s23 + $0xf8] sm:$0xf]  ;;  %230 = vst [vmem:[%s2425_s24 + $0x74] sm:$0xf] %v229_v29 }
  0x24   : > { %232 = vst [vmem:[%s2425_s24 + $0x78] sm:$0xf] %v231_v30  ;;  %234 = vst [vmem:[%s2425_s24 + $0x7c] sm:$0xf] %v233_v31  ;;  %v235_v32 = vld [vmem:[%s2418_s23 + $0x100] sm:$0xf] }
  0x25   : > { %v237_v33 = vld [vmem:[%s2418_s23 + $0x108] sm:$0xf]  ;;  %v239_v34 = vld [vmem:[%s2418_s23 + $0x110] sm:$0xf]  ;;  %236 = vst [vmem:[%s2425_s24 + $0x80] sm:$0xf] %v235_v32 }
  0x26   : > { %238 = vst [vmem:[%s2425_s24 + $0x84] sm:$0xf] %v237_v33  ;;  %240 = vst [vmem:[%s2425_s24 + $0x88] sm:$0xf] %v239_v34  ;;  %v241_v35 = vld [vmem:[%s2418_s23 + $0x118] sm:$0xf] }
  0x27   : > { %v243_v36 = vld [vmem:[%s2418_s23 + $0x120] sm:$0xf]  ;;  %v245_v37 = vld [vmem:[%s2418_s23 + $0x128] sm:$0xf]  ;;  %242 = vst [vmem:[%s2425_s24 + $0x8c] sm:$0xf] %v241_v35 }
  0x28   : > { %244 = vst [vmem:[%s2425_s24 + $0x90] sm:$0xf] %v243_v36  ;;  %246 = vst [vmem:[%s2425_s24 + $0x94] sm:$0xf] %v245_v37  ;;  %v247_v38 = vld [vmem:[%s2418_s23 + $0x130] sm:$0xf] }
  0x29   : > { %v249_v39 = vld [vmem:[%s2418_s23 + $0x138] sm:$0xf]  ;;  %v251_v40 = vld [vmem:[%s2418_s23 + $0x140] sm:$0xf]  ;;  %248 = vst [vmem:[%s2425_s24 + $0x98] sm:$0xf] %v247_v38 }
  0x2a   : > { %250 = vst [vmem:[%s2425_s24 + $0x9c] sm:$0xf] %v249_v39  ;;  %252 = vst [vmem:[%s2425_s24 + $0xa0] sm:$0xf] %v251_v40  ;;  %v253_v41 = vld [vmem:[%s2418_s23 + $0x148] sm:$0xf] }
  0x2b   : > { %v255_v42 = vld [vmem:[%s2418_s23 + $0x150] sm:$0xf]  ;;  %v257_v43 = vld [vmem:[%s2418_s23 + $0x158] sm:$0xf]  ;;  %254 = vst [vmem:[%s2425_s24 + $0xa4] sm:$0xf] %v253_v41 }
  0x2c   : > { %256 = vst [vmem:[%s2425_s24 + $0xa8] sm:$0xf] %v255_v42  ;;  %258 = vst [vmem:[%s2425_s24 + $0xac] sm:$0xf] %v257_v43  ;;  %v259_v44 = vld [vmem:[%s2418_s23 + $0x160] sm:$0xf] }
  0x2d   : > { %v261_v45 = vld [vmem:[%s2418_s23 + $0x168] sm:$0xf]  ;;  %v263_v46 = vld [vmem:[%s2418_s23 + $0x170] sm:$0xf]  ;;  %260 = vst [vmem:[%s2425_s24 + $0xb0] sm:$0xf] %v259_v44 }
  0x2e   : > { %262 = vst [vmem:[%s2425_s24 + $0xb4] sm:$0xf] %v261_v45  ;;  %264 = vst [vmem:[%s2425_s24 + $0xb8] sm:$0xf] %v263_v46  ;;  %v265_v47 = vld [vmem:[%s2418_s23 + $0x178] sm:$0xf] }
  0x2f   : > { %v267_v48 = vld [vmem:[%s2418_s23 + $0x180] sm:$0xf]  ;;  %v269_v49 = vld [vmem:[%s2418_s23 + $0x188] sm:$0xf]  ;;  %266 = vst [vmem:[%s2425_s24 + $0xbc] sm:$0xf] %v265_v47 }
  0x30   : > { %268 = vst [vmem:[%s2425_s24 + $0xc0] sm:$0xf] %v267_v48  ;;  %270 = vst [vmem:[%s2425_s24 + $0xc4] sm:$0xf] %v269_v49  ;;  %v271_v50 = vld [vmem:[%s2418_s23 + $0x190] sm:$0xf] }
  0x31   : > { %v273_v51 = vld [vmem:[%s2418_s23 + $0x198] sm:$0xf]  ;;  %v275_v52 = vld [vmem:[%s2418_s23 + $0x1a0] sm:$0xf]  ;;  %272 = vst [vmem:[%s2425_s24 + $0xc8] sm:$0xf] %v271_v50 }
  0x32   : > { %274 = vst [vmem:[%s2425_s24 + $0xcc] sm:$0xf] %v273_v51  ;;  %276 = vst [vmem:[%s2425_s24 + $0xd0] sm:$0xf] %v275_v52  ;;  %v277_v53 = vld [vmem:[%s2418_s23 + $0x1a8] sm:$0xf] }
  0x33   : > { %v279_v54 = vld [vmem:[%s2418_s23 + $0x1b0] sm:$0xf]  ;;  %v281_v55 = vld [vmem:[%s2418_s23 + $0x1b8] sm:$0xf]  ;;  %278 = vst [vmem:[%s2425_s24 + $0xd4] sm:$0xf] %v277_v53 }
  0x34   : > { %280 = vst [vmem:[%s2425_s24 + $0xd8] sm:$0xf] %v279_v54  ;;  %282 = vst [vmem:[%s2425_s24 + $0xdc] sm:$0xf] %v281_v55  ;;  %v283_v56 = vld [vmem:[%s2418_s23 + $0x1c0] sm:$0xf] }
  0x35   : > { %v285_v57 = vld [vmem:[%s2418_s23 + $0x1c8] sm:$0xf]  ;;  %v287_v58 = vld [vmem:[%s2418_s23 + $0x1d0] sm:$0xf]  ;;  %284 = vst [vmem:[%s2425_s24 + $0xe0] sm:$0xf] %v283_v56 }
  0x36   : > { %286 = vst [vmem:[%s2425_s24 + $0xe4] sm:$0xf] %v285_v57  ;;  %288 = vst [vmem:[%s2425_s24 + $0xe8] sm:$0xf] %v287_v58  ;;  %v289_v59 = vld [vmem:[%s2418_s23 + $0x1d8] sm:$0xf] }
  0x37   : > { %v291_v60 = vld [vmem:[%s2418_s23 + $0x1e0] sm:$0xf]  ;;  %v293_v61 = vld [vmem:[%s2418_s23 + $0x1e8] sm:$0xf]  ;;  %290 = vst [vmem:[%s2425_s24 + $0xec] sm:$0xf] %v289_v59 }
  0x38   : > { %292 = vst [vmem:[%s2425_s24 + $0xf0] sm:$0xf] %v291_v60  ;;  %294 = vst [vmem:[%s2425_s24 + $0xf4] sm:$0xf] %v293_v61  ;;  %v295_v62 = vld [vmem:[%s2418_s23 + $0x1f0] sm:$0xf] }
  0x39   : > { %v297_v63 = vld [vmem:[%s2418_s23 + $0x1f8] sm:$0xf]  ;;  %v299_v0 = vld [vmem:[%s2418_s23 + $0x200] sm:$0xf]  ;;  %296 = vst [vmem:[%s2425_s24 + $0xf8] sm:$0xf] %v295_v62 }
  0x3a   : > { %298 = vst [vmem:[%s2425_s24 + $0xfc] sm:$0xf] %v297_v63  ;;  %300 = vst [vmem:[%s2425_s24 + $0x100] sm:$0xf] %v299_v0  ;;  %v301_v1 = vld [vmem:[%s2418_s23 + $0x208] sm:$0xf] }
  0x3b   : > { %v303_v2 = vld [vmem:[%s2418_s23 + $0x210] sm:$0xf]  ;;  %v305_v3 = vld [vmem:[%s2418_s23 + $0x218] sm:$0xf]  ;;  %302 = vst [vmem:[%s2425_s24 + $0x104] sm:$0xf] %v301_v1 }
  0x3c   : > { %304 = vst [vmem:[%s2425_s24 + $0x108] sm:$0xf] %v303_v2  ;;  %306 = vst [vmem:[%s2425_s24 + $0x10c] sm:$0xf] %v305_v3  ;;  %v307_v4 = vld [vmem:[%s2418_s23 + $0x220] sm:$0xf] }
  0x3d   : > { %v309_v5 = vld [vmem:[%s2418_s23 + $0x228] sm:$0xf]  ;;  %v311_v6 = vld [vmem:[%s2418_s23 + $0x230] sm:$0xf]  ;;  %308 = vst [vmem:[%s2425_s24 + $0x110] sm:$0xf] %v307_v4 }
  0x3e   : > { %310 = vst [vmem:[%s2425_s24 + $0x114] sm:$0xf] %v309_v5  ;;  %312 = vst [vmem:[%s2425_s24 + $0x118] sm:$0xf] %v311_v6  ;;  %v313_v7 = vld [vmem:[%s2418_s23 + $0x238] sm:$0xf] }
  0x3f   : > { %v315_v8 = vld [vmem:[%s2418_s23 + $0x240] sm:$0xf]  ;;  %v317_v9 = vld [vmem:[%s2418_s23 + $0x248] sm:$0xf]  ;;  %314 = vst [vmem:[%s2425_s24 + $0x11c] sm:$0xf] %v313_v7 }
  0x40   : > { %316 = vst [vmem:[%s2425_s24 + $0x120] sm:$0xf] %v315_v8  ;;  %318 = vst [vmem:[%s2425_s24 + $0x124] sm:$0xf] %v317_v9  ;;  %v319_v10 = vld [vmem:[%s2418_s23 + $0x250] sm:$0xf] }
  0x41   : > { %v321_v11 = vld [vmem:[%s2418_s23 + $0x258] sm:$0xf]  ;;  %v323_v12 = vld [vmem:[%s2418_s23 + $0x260] sm:$0xf]  ;;  %320 = vst [vmem:[%s2425_s24 + $0x128] sm:$0xf] %v319_v10 }
  0x42   : > { %322 = vst [vmem:[%s2425_s24 + $0x12c] sm:$0xf] %v321_v11  ;;  %324 = vst [vmem:[%s2425_s24 + $0x130] sm:$0xf] %v323_v12  ;;  %v325_v13 = vld [vmem:[%s2418_s23 + $0x268] sm:$0xf] }
  0x43   : > { %v327_v14 = vld [vmem:[%s2418_s23 + $0x270] sm:$0xf]  ;;  %v329_v15 = vld [vmem:[%s2418_s23 + $0x278] sm:$0xf]  ;;  %326 = vst [vmem:[%s2425_s24 + $0x134] sm:$0xf] %v325_v13 }
  0x44   : > { %328 = vst [vmem:[%s2425_s24 + $0x138] sm:$0xf] %v327_v14  ;;  %330 = vst [vmem:[%s2425_s24 + $0x13c] sm:$0xf] %v329_v15  ;;  %v331_v16 = vld [vmem:[%s2418_s23 + $0x280] sm:$0xf] }
  0x45   : > { %v333_v17 = vld [vmem:[%s2418_s23 + $0x288] sm:$0xf]  ;;  %v335_v18 = vld [vmem:[%s2418_s23 + $0x290] sm:$0xf]  ;;  %332 = vst [vmem:[%s2425_s24 + $0x140] sm:$0xf] %v331_v16 }
  0x46   : > { %334 = vst [vmem:[%s2425_s24 + $0x144] sm:$0xf] %v333_v17  ;;  %336 = vst [vmem:[%s2425_s24 + $0x148] sm:$0xf] %v335_v18  ;;  %v337_v19 = vld [vmem:[%s2418_s23 + $0x298] sm:$0xf] }
  0x47   : > { %v339_v20 = vld [vmem:[%s2418_s23 + $0x2a0] sm:$0xf]  ;;  %v341_v21 = vld [vmem:[%s2418_s23 + $0x2a8] sm:$0xf]  ;;  %338 = vst [vmem:[%s2425_s24 + $0x14c] sm:$0xf] %v337_v19 }
  0x48   : > { %340 = vst [vmem:[%s2425_s24 + $0x150] sm:$0xf] %v339_v20  ;;  %342 = vst [vmem:[%s2425_s24 + $0x154] sm:$0xf] %v341_v21  ;;  %v343_v22 = vld [vmem:[%s2418_s23 + $0x2b0] sm:$0xf] }
  0x49   : > { %v345_v23 = vld [vmem:[%s2418_s23 + $0x2b8] sm:$0xf]  ;;  %v347_v24 = vld [vmem:[%s2418_s23 + $0x2c0] sm:$0xf]  ;;  %344 = vst [vmem:[%s2425_s24 + $0x158] sm:$0xf] %v343_v22 }
  0x4a   : > { %346 = vst [vmem:[%s2425_s24 + $0x15c] sm:$0xf] %v345_v23  ;;  %348 = vst [vmem:[%s2425_s24 + $0x160] sm:$0xf] %v347_v24  ;;  %v349_v25 = vld [vmem:[%s2418_s23 + $0x2c8] sm:$0xf] }
  0x4b   : > { %v351_v26 = vld [vmem:[%s2418_s23 + $0x2d0] sm:$0xf]  ;;  %v353_v27 = vld [vmem:[%s2418_s23 + $0x2d8] sm:$0xf]  ;;  %350 = vst [vmem:[%s2425_s24 + $0x164] sm:$0xf] %v349_v25 }
  0x4c   : > { %352 = vst [vmem:[%s2425_s24 + $0x168] sm:$0xf] %v351_v26  ;;  %354 = vst [vmem:[%s2425_s24 + $0x16c] sm:$0xf] %v353_v27  ;;  %v355_v28 = vld [vmem:[%s2418_s23 + $0x2e0] sm:$0xf] }
  0x4d   : > { %v357_v29 = vld [vmem:[%s2418_s23 + $0x2e8] sm:$0xf]  ;;  %v359_v30 = vld [vmem:[%s2418_s23 + $0x2f0] sm:$0xf]  ;;  %356 = vst [vmem:[%s2425_s24 + $0x170] sm:$0xf] %v355_v28 }
  0x4e   : > { %358 = vst [vmem:[%s2425_s24 + $0x174] sm:$0xf] %v357_v29  ;;  %360 = vst [vmem:[%s2425_s24 + $0x178] sm:$0xf] %v359_v30  ;;  %v361_v31 = vld [vmem:[%s2418_s23 + $0x2f8] sm:$0xf] }
  0x4f   : > { %v363_v32 = vld [vmem:[%s2418_s23 + $0x300] sm:$0xf]  ;;  %v365_v33 = vld [vmem:[%s2418_s23 + $0x308] sm:$0xf]  ;;  %362 = vst [vmem:[%s2425_s24 + $0x17c] sm:$0xf] %v361_v31 }
  0x50   : > { %364 = vst [vmem:[%s2425_s24 + $0x180] sm:$0xf] %v363_v32  ;;  %366 = vst [vmem:[%s2425_s24 + $0x184] sm:$0xf] %v365_v33  ;;  %v367_v34 = vld [vmem:[%s2418_s23 + $0x310] sm:$0xf] }
  0x51   : > { %v369_v35 = vld [vmem:[%s2418_s23 + $0x318] sm:$0xf]  ;;  %v371_v36 = vld [vmem:[%s2418_s23 + $0x320] sm:$0xf]  ;;  %368 = vst [vmem:[%s2425_s24 + $0x188] sm:$0xf] %v367_v34 }
  0x52   : > { %370 = vst [vmem:[%s2425_s24 + $0x18c] sm:$0xf] %v369_v35  ;;  %372 = vst [vmem:[%s2425_s24 + $0x190] sm:$0xf] %v371_v36  ;;  %v373_v37 = vld [vmem:[%s2418_s23 + $0x328] sm:$0xf] }
  0x53   : > { %v375_v38 = vld [vmem:[%s2418_s23 + $0x330] sm:$0xf]  ;;  %v377_v39 = vld [vmem:[%s2418_s23 + $0x338] sm:$0xf]  ;;  %374 = vst [vmem:[%s2425_s24 + $0x194] sm:$0xf] %v373_v37 }
  0x54   : > { %376 = vst [vmem:[%s2425_s24 + $0x198] sm:$0xf] %v375_v38  ;;  %378 = vst [vmem:[%s2425_s24 + $0x19c] sm:$0xf] %v377_v39  ;;  %v379_v40 = vld [vmem:[%s2418_s23 + $0x340] sm:$0xf] }
  0x55   : > { %v381_v41 = vld [vmem:[%s2418_s23 + $0x348] sm:$0xf]  ;;  %v383_v42 = vld [vmem:[%s2418_s23 + $0x350] sm:$0xf]  ;;  %380 = vst [vmem:[%s2425_s24 + $0x1a0] sm:$0xf] %v379_v40 }
  0x56   : > { %382 = vst [vmem:[%s2425_s24 + $0x1a4] sm:$0xf] %v381_v41  ;;  %384 = vst [vmem:[%s2425_s24 + $0x1a8] sm:$0xf] %v383_v42  ;;  %v385_v43 = vld [vmem:[%s2418_s23 + $0x358] sm:$0xf] }
  0x57   : > { %v387_v44 = vld [vmem:[%s2418_s23 + $0x360] sm:$0xf]  ;;  %v389_v45 = vld [vmem:[%s2418_s23 + $0x368] sm:$0xf]  ;;  %386 = vst [vmem:[%s2425_s24 + $0x1ac] sm:$0xf] %v385_v43 }
  0x58   : > { %388 = vst [vmem:[%s2425_s24 + $0x1b0] sm:$0xf] %v387_v44  ;;  %390 = vst [vmem:[%s2425_s24 + $0x1b4] sm:$0xf] %v389_v45  ;;  %v391_v46 = vld [vmem:[%s2418_s23 + $0x370] sm:$0xf] }
  0x59   : > { %v393_v47 = vld [vmem:[%s2418_s23 + $0x378] sm:$0xf]  ;;  %v395_v48 = vld [vmem:[%s2418_s23 + $0x380] sm:$0xf]  ;;  %392 = vst [vmem:[%s2425_s24 + $0x1b8] sm:$0xf] %v391_v46 }
  0x5a   : > { %394 = vst [vmem:[%s2425_s24 + $0x1bc] sm:$0xf] %v393_v47  ;;  %396 = vst [vmem:[%s2425_s24 + $0x1c0] sm:$0xf] %v395_v48  ;;  %v397_v49 = vld [vmem:[%s2418_s23 + $0x388] sm:$0xf] }
  0x5b   : > { %v399_v50 = vld [vmem:[%s2418_s23 + $0x390] sm:$0xf]  ;;  %v401_v51 = vld [vmem:[%s2418_s23 + $0x398] sm:$0xf]  ;;  %398 = vst [vmem:[%s2425_s24 + $0x1c4] sm:$0xf] %v397_v49 }
  0x5c   : > { %400 = vst [vmem:[%s2425_s24 + $0x1c8] sm:$0xf] %v399_v50  ;;  %402 = vst [vmem:[%s2425_s24 + $0x1cc] sm:$0xf] %v401_v51  ;;  %v403_v52 = vld [vmem:[%s2418_s23 + $0x3a0] sm:$0xf] }
  0x5d   : > { %v405_v53 = vld [vmem:[%s2418_s23 + $0x3a8] sm:$0xf]  ;;  %v407_v54 = vld [vmem:[%s2418_s23 + $0x3b0] sm:$0xf]  ;;  %404 = vst [vmem:[%s2425_s24 + $0x1d0] sm:$0xf] %v403_v52 }
  0x5e   : > { %406 = vst [vmem:[%s2425_s24 + $0x1d4] sm:$0xf] %v405_v53  ;;  %408 = vst [vmem:[%s2425_s24 + $0x1d8] sm:$0xf] %v407_v54  ;;  %v409_v55 = vld [vmem:[%s2418_s23 + $0x3b8] sm:$0xf] }
  0x5f   : > { %v411_v56 = vld [vmem:[%s2418_s23 + $0x3c0] sm:$0xf]  ;;  %v413_v57 = vld [vmem:[%s2418_s23 + $0x3c8] sm:$0xf]  ;;  %410 = vst [vmem:[%s2425_s24 + $0x1dc] sm:$0xf] %v409_v55 }
  0x60   : > { %412 = vst [vmem:[%s2425_s24 + $0x1e0] sm:$0xf] %v411_v56  ;;  %414 = vst [vmem:[%s2425_s24 + $0x1e4] sm:$0xf] %v413_v57  ;;  %v415_v58 = vld [vmem:[%s2418_s23 + $0x3d0] sm:$0xf] }
  0x61   : > { %v417_v59 = vld [vmem:[%s2418_s23 + $0x3d8] sm:$0xf]  ;;  %v419_v60 = vld [vmem:[%s2418_s23 + $0x3e0] sm:$0xf]  ;;  %416 = vst [vmem:[%s2425_s24 + $0x1e8] sm:$0xf] %v415_v58 }
  0x62   : > { %418 = vst [vmem:[%s2425_s24 + $0x1ec] sm:$0xf] %v417_v59  ;;  %420 = vst [vmem:[%s2425_s24 + $0x1f0] sm:$0xf] %v419_v60  ;;  %v421_v61 = vld [vmem:[%s2418_s23 + $0x3e8] sm:$0xf] }
  0x63   : > { %v423_v62 = vld [vmem:[%s2418_s23 + $0x3f0] sm:$0xf]  ;;  %v425_v63 = vld [vmem:[%s2418_s23 + $0x3f8] sm:$0xf]  ;;  %422 = vst [vmem:[%s2425_s24 + $0x1f4] sm:$0xf] %v421_v61 }
  0x64   : > { %424 = vst [vmem:[%s2425_s24 + $0x1f8] sm:$0xf] %v423_v62  ;;  %426 = vst [vmem:[%s2425_s24 + $0x1fc] sm:$0xf] %v425_v63  ;;  %v427_v0 = vld [vmem:[%s2418_s23 + $0x400] sm:$0xf] }
  0x65   : > { %v429_v1 = vld [vmem:[%s2418_s23 + $0x408] sm:$0xf]  ;;  %v431_v2 = vld [vmem:[%s2418_s23 + $0x410] sm:$0xf]  ;;  %428 = vst [vmem:[%s2425_s24 + $0x200] sm:$0xf] %v427_v0 }
  0x66   : > { %430 = vst [vmem:[%s2425_s24 + $0x204] sm:$0xf] %v429_v1  ;;  %432 = vst [vmem:[%s2425_s24 + $0x208] sm:$0xf] %v431_v2  ;;  %v433_v3 = vld [vmem:[%s2418_s23 + $0x418] sm:$0xf] }
  0x67   : > { %v435_v4 = vld [vmem:[%s2418_s23 + $0x420] sm:$0xf]  ;;  %v437_v5 = vld [vmem:[%s2418_s23 + $0x428] sm:$0xf]  ;;  %434 = vst [vmem:[%s2425_s24 + $0x20c] sm:$0xf] %v433_v3 }
  0x68   : > { %436 = vst [vmem:[%s2425_s24 + $0x210] sm:$0xf] %v435_v4  ;;  %438 = vst [vmem:[%s2425_s24 + $0x214] sm:$0xf] %v437_v5  ;;  %v439_v6 = vld [vmem:[%s2418_s23 + $0x430] sm:$0xf] }
  0x69   : > { %v441_v7 = vld [vmem:[%s2418_s23 + $0x438] sm:$0xf]  ;;  %v443_v8 = vld [vmem:[%s2418_s23 + $0x440] sm:$0xf]  ;;  %440 = vst [vmem:[%s2425_s24 + $0x218] sm:$0xf] %v439_v6 }
  0x6a   : > { %442 = vst [vmem:[%s2425_s24 + $0x21c] sm:$0xf] %v441_v7  ;;  %444 = vst [vmem:[%s2425_s24 + $0x220] sm:$0xf] %v443_v8  ;;  %v445_v9 = vld [vmem:[%s2418_s23 + $0x448] sm:$0xf] }
  0x6b   : > { %v447_v10 = vld [vmem:[%s2418_s23 + $0x450] sm:$0xf]  ;;  %v449_v11 = vld [vmem:[%s2418_s23 + $0x458] sm:$0xf]  ;;  %446 = vst [vmem:[%s2425_s24 + $0x224] sm:$0xf] %v445_v9 }
  0x6c   : > { %448 = vst [vmem:[%s2425_s24 + $0x228] sm:$0xf] %v447_v10  ;;  %450 = vst [vmem:[%s2425_s24 + $0x22c] sm:$0xf] %v449_v11  ;;  %v451_v12 = vld [vmem:[%s2418_s23 + $0x460] sm:$0xf] }
  0x6d   : > { %v453_v13 = vld [vmem:[%s2418_s23 + $0x468] sm:$0xf]  ;;  %v455_v14 = vld [vmem:[%s2418_s23 + $0x470] sm:$0xf]  ;;  %452 = vst [vmem:[%s2425_s24 + $0x230] sm:$0xf] %v451_v12 }
  0x6e   : > { %454 = vst [vmem:[%s2425_s24 + $0x234] sm:$0xf] %v453_v13  ;;  %456 = vst [vmem:[%s2425_s24 + $0x238] sm:$0xf] %v455_v14  ;;  %v457_v15 = vld [vmem:[%s2418_s23 + $0x478] sm:$0xf] }
  0x6f   : > { %v459_v16 = vld [vmem:[%s2418_s23 + $0x480] sm:$0xf]  ;;  %v461_v17 = vld [vmem:[%s2418_s23 + $0x488] sm:$0xf]  ;;  %458 = vst [vmem:[%s2425_s24 + $0x23c] sm:$0xf] %v457_v15 }
  0x70   : > { %460 = vst [vmem:[%s2425_s24 + $0x240] sm:$0xf] %v459_v16  ;;  %462 = vst [vmem:[%s2425_s24 + $0x244] sm:$0xf] %v461_v17  ;;  %v463_v18 = vld [vmem:[%s2418_s23 + $0x490] sm:$0xf] }
  0x71   : > { %v465_v19 = vld [vmem:[%s2418_s23 + $0x498] sm:$0xf]  ;;  %v467_v20 = vld [vmem:[%s2418_s23 + $0x4a0] sm:$0xf]  ;;  %464 = vst [vmem:[%s2425_s24 + $0x248] sm:$0xf] %v463_v18 }
  0x72   : > { %466 = vst [vmem:[%s2425_s24 + $0x24c] sm:$0xf] %v465_v19  ;;  %468 = vst [vmem:[%s2425_s24 + $0x250] sm:$0xf] %v467_v20  ;;  %v469_v21 = vld [vmem:[%s2418_s23 + $0x4a8] sm:$0xf] }
  0x73   : > { %v471_v22 = vld [vmem:[%s2418_s23 + $0x4b0] sm:$0xf]  ;;  %v473_v23 = vld [vmem:[%s2418_s23 + $0x4b8] sm:$0xf]  ;;  %470 = vst [vmem:[%s2425_s24 + $0x254] sm:$0xf] %v469_v21 }
  0x74   : > { %472 = vst [vmem:[%s2425_s24 + $0x258] sm:$0xf] %v471_v22  ;;  %474 = vst [vmem:[%s2425_s24 + $0x25c] sm:$0xf] %v473_v23  ;;  %v475_v24 = vld [vmem:[%s2418_s23 + $0x4c0] sm:$0xf] }
  0x75   : > { %v477_v25 = vld [vmem:[%s2418_s23 + $0x4c8] sm:$0xf]  ;;  %v479_v26 = vld [vmem:[%s2418_s23 + $0x4d0] sm:$0xf]  ;;  %476 = vst [vmem:[%s2425_s24 + $0x260] sm:$0xf] %v475_v24 }
  0x76   : > { %478 = vst [vmem:[%s2425_s24 + $0x264] sm:$0xf] %v477_v25  ;;  %480 = vst [vmem:[%s2425_s24 + $0x268] sm:$0xf] %v479_v26  ;;  %v481_v27 = vld [vmem:[%s2418_s23 + $0x4d8] sm:$0xf] }
  0x77   : > { %v483_v28 = vld [vmem:[%s2418_s23 + $0x4e0] sm:$0xf]  ;;  %v485_v29 = vld [vmem:[%s2418_s23 + $0x4e8] sm:$0xf]  ;;  %482 = vst [vmem:[%s2425_s24 + $0x26c] sm:$0xf] %v481_v27 }
  0x78   : > { %484 = vst [vmem:[%s2425_s24 + $0x270] sm:$0xf] %v483_v28  ;;  %486 = vst [vmem:[%s2425_s24 + $0x274] sm:$0xf] %v485_v29  ;;  %v487_v30 = vld [vmem:[%s2418_s23 + $0x4f0] sm:$0xf] }
  0x79   : > { %v489_v31 = vld [vmem:[%s2418_s23 + $0x4f8] sm:$0xf]  ;;  %v491_v32 = vld [vmem:[%s2418_s23 + $0x500] sm:$0xf]  ;;  %488 = vst [vmem:[%s2425_s24 + $0x278] sm:$0xf] %v487_v30 }
  0x7a   : > { %490 = vst [vmem:[%s2425_s24 + $0x27c] sm:$0xf] %v489_v31  ;;  %492 = vst [vmem:[%s2425_s24 + $0x280] sm:$0xf] %v491_v32  ;;  %v493_v33 = vld [vmem:[%s2418_s23 + $0x508] sm:$0xf] }
  0x7b   : > { %494 = vst [vmem:[%s2425_s24 + $0x284] sm:$0xf] %v493_v33 }
  0x7c PF: > { %p1967_p6 = scmp.ge.s32.totalorder %s2356_s13, 1  ;;  %p841_p7 = scmp.lt.s32.totalorder %s2356_s13, 3 }
  0x7e   : > { %p842_p8 = pnand %p1967_p6, %p841_p7 }
  0x7f   : > { %s848_s25 = sand.u32 (!%p842_p8), 1, %s2340_s9   ;;  %p894_p9 = scmp.lt.s32.totalorder (!%p842_p8), %s2348_s11, 1 }
  0x80   : > { %845 = sbr.rel (%p842_p8) target bundleno = 436 (0x1b4), region = 65 }
  0x81   : > { %s2183_s30 = smul.u32 (!%p842_p8), 648, %s848_s25 }
  0x83   : > { %s2763_s3 = scalar_lea.vmem (!%p842_p8), [#allocation3], %s2183_s30 }
  0x85   : > { %v2752_v34 = vld [vmem:[%s2894_s0] sm:$0xff]  ;;  %v2757_v35 = vld [vmem:[%s2894_s0 + $0x8] sm:$0xff]  ;;  %v2230_v42 = vld [vmem:[%s2763_s3 + $0x70] sm:$0xff]   ;;  %vm2359_vm0 = vmmov 0   ;;  %vm1599_vm1 = vcmask 130048   ;;  %s2904_s11 = smov (!%p894_p9, %s2348_s11), 1 }
  0x86   : > { %v1970_v36 = vcombine.high %v2752_v34, %v2752_v34  ;;  %v1972_v37 = vcombine.high %v2757_v35, %v2757_v35  ;;  %v2226_v38 = vld [vmem:[%s2763_s3 + $0x78] sm:$0xff]   ;;  %v2231_v43 = vld [vmem:[%s2763_s3 + $0xf0] sm:$0xff]   ;;  %v2234_v46 = vld [vmem:[%s2763_s3 + $0x68] sm:$0xff]   ;;  %v1969_v8 = vcombine.low %v2752_v34, %v2752_v34  ;;  %v1971_v9 = vcombine.low %v2757_v35, %v2757_v35  ;;  %s1968_s18 = sshll.u32 %s2904_s11, 3 }
  0x87   : > { %v2227_v39 = vld [vmem:[%s2763_s3 + $0xf8] sm:$0xff]   ;;  %2064 = vmatprep.subr.bf16.mxu0 %v2226_v38  ;;  %v2232_v44 = vld [vmem:[%s2763_s3 + $0x30] sm:$0xff]   ;;  %v2235_v47 = vld [vmem:[%s2763_s3 + $0xe8] sm:$0xff]   ;;  %s899_s21 = scalar_lea.vmem %s2896_s2, %s1968_s18 }
  0x88   : > { %1635 = vmatprep.mubr.bf16.mxu0 %v1970_v36  ;;  %1675 = vmatprep.mubr.bf16.mxu1 %v1972_v37  ;;  %v2228_v40 = vld [vmem:[%s2763_s3 + $0x38] sm:$0xff]   ;;  %v2233_v45 = vld [vmem:[%s2763_s3 + $0xb0] sm:$0xff]   ;;  %v2236_v48 = vld [vmem:[%s2763_s3 + $0x28] sm:$0xff]  }
  0x89   : > { %2086 = vmatprep.subr.bf16.mxu1 %v2227_v39  ;;  %v2229_v41 = vld [vmem:[%s2763_s3 + $0xb8] sm:$0xff]   ;;  %2065 = vmatpush3.bf16.msra.mxu0 %v2228_v40  ;;  %v2237_v49 = vld [vmem:[%s2763_s3 + $0xa8] sm:$0xff]   ;;  %v2238_v50 = vld [vmem:[%s2763_s3 + $0x60] sm:$0xff]  }
  0x8a   : > { %2087 = vmatpush3.bf16.msra.mxu1 %v2229_v41  ;;  %2066 = vmatprep.subr.bf16.mxu0 %v2230_v42  ;;  %v2239_v51 = vld [vmem:[%s2763_s3 + $0xe0] sm:$0xff]   ;;  %v2242_v54 = vld [vmem:[%s2763_s3 + $0x58] sm:$0xff]   ;;  %v2246_v58 = vld [vmem:[%s2763_s3 + $0x50] sm:$0xff]  }
  0x8b   : > { %2088 = vmatprep.subr.bf16.mxu1 %v2231_v43  ;;  %v2240_v52 = vld [vmem:[%s2763_s3 + $0x20] sm:$0xff]   ;;  %v2243_v55 = vld [vmem:[%s2763_s3 + $0xd8] sm:$0xff]   ;;  %v2247_v59 = vld [vmem:[%s2763_s3 + $0xd0] sm:$0xff]  }
  0x8c   : > { %v2241_v53 = vld [vmem:[%s2763_s3 + $0xa0] sm:$0xff]   ;;  %v2244_v56 = vld [vmem:[%s2763_s3 + $0x18] sm:$0xff]   ;;  %v2248_v60 = vld [vmem:[%s2763_s3 + $0x10] sm:$0xff]  }
  0x8d   : > { %2067 = vmatpush3.bf16.msra.mxu0 %v2232_v44  ;;  %v2245_v57 = vld [vmem:[%s2763_s3 + $0x98] sm:$0xff]   ;;  %v2249_v61 = vld [vmem:[%s2763_s3 + $0x90] sm:$0xff]   ;;  %v2250_v62 = vld [vmem:[%s2763_s3 + $0x48] sm:$0xff]  }
  0x8e   : > { %2089 = vmatpush3.bf16.msra.mxu1 %v2233_v45  ;;  %2068 = vmatprep.subr.bf16.mxu0 %v2234_v46  ;;  %v2251_v63 = vld [vmem:[%s2763_s3 + $0xc8] sm:$0xff]   ;;  %v2254_v2 = vld [vmem:[%s2763_s3 + $0x40] sm:$0xff]   ;;  %v2804_v6 = vld [vmem:[%s2894_s0 + $0x18] sm:$0xff] }
  0x8f   : > { %2090 = vmatprep.subr.bf16.mxu1 %v2235_v47  ;;  %v2252_v0 = vld [vmem:[%s2763_s3 + $0x8] sm:$0xff]   ;;  %v2255_v4 = vld [vmem:[%s2763_s3 + $0xc0] sm:$0xff]   ;;  %v2262_v10 = vld [vmem:[%s2763_s3 + $0x178] sm:$0xff]   ;;  %v1976_v15 = vcombine.high %v2804_v6, %v2804_v6 }
  0x90   : > { %v2253_v1 = vld [vmem:[%s2763_s3 + $0x88] sm:$0xff]   ;;  %v2256_v5 = vld [vmem:[%s2763_s3] sm:$0xff]   ;;  %v2263_v11 = vld [vmem:[%s2763_s3 + $0x138] sm:$0xff]  }
  0x91   : > { %2069 = vmatpush3.bf16.msra.mxu0 %v2236_v48  ;;  %v2797_v3 = vld [vmem:[%s2894_s0 + $0x10] sm:$0xff]  ;;  %v2257_v7 = vld [vmem:[%s2763_s3 + $0x80] sm:$0xff]   ;;  %v2264_v13 = vld [vmem:[%s2763_s3 + $0x1f8] sm:$0xff]   ;;  %v1975_v48 = vcombine.low %v2804_v6, %v2804_v6 }
  0x92   : > { %2091 = vmatpush3.bf16.msra.mxu1 %v2237_v49  ;;  %2070 = vmatprep.subr.bf16.mxu0 %v2238_v50  ;;  %v1974_v12 = vcombine.high %v2797_v3, %v2797_v3  ;;  %v2265_v14 = vld [vmem:[%s2763_s3 + $0x1b8] sm:$0xff]   ;;  %v2266_v16 = vld [vmem:[%s2763_s3 + $0x170] sm:$0xff]   ;;  %v2270_v20 = vld [vmem:[%s2763_s3 + $0x168] sm:$0xff]   ;;  %v1973_v44 = vcombine.low %v2797_v3, %v2797_v3 }
  0x93   : > { %2092 = vmatprep.subr.bf16.mxu1 %v2239_v51  ;;  %v2267_v17 = vld [vmem:[%s2763_s3 + $0x130] sm:$0xff]   ;;  %v2271_v21 = vld [vmem:[%s2763_s3 + $0x128] sm:$0xff]   ;;  %v2274_v24 = vld [vmem:[%s2763_s3 + $0x160] sm:$0xff]   ;;  %v2358_v51 = vmov 0.0  }
  0x94   : > { %v2268_v18 = vld [vmem:[%s2763_s3 + $0x1f0] sm:$0xff]   ;;  %v2272_v22 = vld [vmem:[%s2763_s3 + $0x1e8] sm:$0xff]   ;;  %v2275_v25 = vld [vmem:[%s2763_s3 + $0x120] sm:$0xff]  }
  0x95   : > { %2071 = vmatpush3.bf16.msra.mxu0 %v2240_v52  ;;  %v2269_v19 = vld [vmem:[%s2763_s3 + $0x1b0] sm:$0xff]   ;;  %v2273_v23 = vld [vmem:[%s2763_s3 + $0x1a8] sm:$0xff]   ;;  %v2276_v26 = vld [vmem:[%s2763_s3 + $0x1e0] sm:$0xff]  }
  0x96   : > { %2093 = vmatpush3.bf16.msra.mxu1 %v2241_v53  ;;  %2072 = vmatprep.subr.bf16.mxu0 %v2242_v54  ;;  %v2277_v27 = vld [vmem:[%s2763_s3 + $0x1a0] sm:$0xff]   ;;  %v2278_v28 = vld [vmem:[%s2763_s3 + $0x158] sm:$0xff]   ;;  %v2282_v32 = vld [vmem:[%s2763_s3 + $0x150] sm:$0xff]  }
  0x97   : > { %2094 = vmatprep.subr.bf16.mxu1 %v2243_v55  ;;  %v2279_v29 = vld [vmem:[%s2763_s3 + $0x118] sm:$0xff]   ;;  %v2283_v33 = vld [vmem:[%s2763_s3 + $0x110] sm:$0xff]   ;;  %v2286_v36 = vld [vmem:[%s2763_s3 + $0x148] sm:$0xff]  }
  0x98   : > { %v2280_v30 = vld [vmem:[%s2763_s3 + $0x1d8] sm:$0xff]   ;;  %v2284_v34 = vld [vmem:[%s2763_s3 + $0x1d0] sm:$0xff]   ;;  %v2287_v37 = vld [vmem:[%s2763_s3 + $0x108] sm:$0xff]  }
  0x99   : > { %2073 = vmatpush3.bf16.msra.mxu0 %v2244_v56  ;;  %v2281_v31 = vld [vmem:[%s2763_s3 + $0x198] sm:$0xff]   ;;  %v2285_v35 = vld [vmem:[%s2763_s3 + $0x190] sm:$0xff]   ;;  %v2288_v38 = vld [vmem:[%s2763_s3 + $0x1c8] sm:$0xff]  }
  0x9a   : > { %2095 = vmatpush3.bf16.msra.mxu1 %v2245_v57  ;;  %2074 = vmatprep.subr.bf16.mxu0 %v2246_v58  ;;  %v2289_v39 = vld [vmem:[%s2763_s3 + $0x188] sm:$0xff]   ;;  %v911_v40 = vld [vmem:[%s2894_s0 + $0x20] sm:$0xff]  ;;  %v2300_v50 = vld [vmem:[%s2763_s3 + $0x270] sm:$0xff]  }
  0x9b   : > { %2096 = vmatprep.subr.bf16.mxu1 %v2247_v59  ;;  %v2290_v41 = vld [vmem:[%s2763_s3 + $0x140] sm:$0xff]   ;;  %v2296_v46 = vld [vmem:[%s2763_s3 + $0x278] sm:$0xff]   ;;  %v1978_v47 = vcombine.high %v911_v40, %v911_v40  ;;  %v2301_v52 = vld [vmem:[%s2763_s3 + $0x230] sm:$0xff]   ;;  %v1977_v3 = vcombine.low %v911_v40, %v911_v40 }
  0x9c   : > { %v2291_v42 = vld [vmem:[%s2763_s3 + $0x100] sm:$0xff]   ;;  %v2299_v49 = vld [vmem:[%s2763_s3 + $0x238] sm:$0xff]   ;;  %v2302_v53 = vld [vmem:[%s2763_s3 + $0x268] sm:$0xff]  }
  0x9d   : > { %2075 = vmatpush3.bf16.msra.mxu0 %v2248_v60  ;;  %v2292_v43 = vld [vmem:[%s2763_s3 + $0x1c0] sm:$0xff]   ;;  %v2303_v54 = vld [vmem:[%s2763_s3 + $0x228] sm:$0xff]   ;;  %v2306_v57 = vld [vmem:[%s2763_s3 + $0x258] sm:$0xff]  }
  0x9e   : > { %2097 = vmatpush3.bf16.msra.mxu1 %v2249_v61  ;;  %2076 = vmatprep.subr.bf16.mxu0 %v2250_v62  ;;  %v2295_v45 = vld [vmem:[%s2763_s3 + $0x180] sm:$0xff]   ;;  %v2307_v60 = vld [vmem:[%s2763_s3 + $0x218] sm:$0xff]   ;;  %v2308_v61 = vld [vmem:[%s2763_s3 + $0x250] sm:$0xff]  }
  0x9f   : > { %2098 = vmatprep.subr.bf16.mxu1 %v2251_v63  ;;  %v2304_v55 = vld [vmem:[%s2763_s3 + $0x260] sm:$0xff]   ;;  %v2309_v62 = vld [vmem:[%s2763_s3 + $0x210] sm:$0xff]   ;;  %v2310_v63 = vld [vmem:[%s2763_s3 + $0x248] sm:$0xff]  }
  0xa0   : > { %v2305_v56 = vld [vmem:[%s2763_s3 + $0x220] sm:$0xff]  }
  0xa1   : > { %2077 = vmatpush3.bf16.msra.mxu0 %v2252_v0  ;;  %v2317_v58 = vld [vmem:[%s2894_s0 + $0x28] ss:$0 sps:$4 sm:$0xff]  }
  0xa2   : > { %2099 = vmatpush3.bf16.msra.mxu1 %v2253_v1  ;;  %2078 = vmatprep.subr.bf16.mxu0 %v2254_v2  ;;  %v2313_v59 = vld [vmem:[%s2763_s3 + $0x280] sm:$0xff]   ;;  %v2311_v0 = vld [vmem:[%s2763_s3 + $0x208] sm:$0xff]  }
  0xa3   : > { %2100 = vmatprep.subr.bf16.mxu1 %v2255_v4  ;;  %v2312_v1 = vld [vmem:[%s2763_s3 + $0x240] sm:$0xff]  }
  0xa4   : > { %v2314_v2 = vld [vmem:[%s2763_s3 + $0x200] sm:$0xff]  }
  0xa5   : > { %2079 = vmatpush3.bf16.msra.mxu0 %v2256_v5 }
  0xa6   : > { %2101 = vmatpush3.bf16.msra.mxu1 %v2257_v7  ;;  %2108 = vmatprep.subr.bf16.mxu0 %v2262_v10 }
  0xa7   : > { %2130 = vmatprep.subr.bf16.mxu1 %v2264_v13 }
  0xa8   : > { %1636 = vmatmul.mubr.bf16.vlgmr.msra.gmra.mxu0 %v1969_v8 }
  0xa9   : > { %1676 = vmatmul.mubr.bf16.vlgmr.msra.gmra.mxu1 %v1971_v9  ;;  %2109 = vmatpush3.bf16.msra.mxu0 %v2263_v11 }
  0xaa   : > { %1715 = vmatprep.mubr.bf16.mxu0 %v1974_v12  ;;  %2131 = vmatpush3.bf16.msra.mxu1 %v2265_v14 }
  0xab   : > { %2110 = vmatprep.subr.bf16.mxu0 %v2266_v16  ;;  %1755 = vmatprep.mubr.bf16.mxu1 %v1976_v15 }
  0xac   : > { %2132 = vmatprep.subr.bf16.mxu1 %v2268_v18 }
  0xad   : > { %2111 = vmatpush3.bf16.msra.mxu0 %v2267_v17 }
  0xae   : > { %2133 = vmatpush3.bf16.msra.mxu1 %v2269_v19  ;;  %2112 = vmatprep.subr.bf16.mxu0 %v2270_v20 }
  0xaf   : > { %2134 = vmatprep.subr.bf16.mxu1 %v2272_v22 }
  0xb1   : > { %2113 = vmatpush3.bf16.msra.mxu0 %v2271_v21 }
  0xb2   : > { %2135 = vmatpush3.bf16.msra.mxu1 %v2273_v23  ;;  %2114 = vmatprep.subr.bf16.mxu0 %v2274_v24 }
  0xb3   : > { %2136 = vmatprep.subr.bf16.mxu1 %v2276_v26 }
  0xb5   : > { %2115 = vmatpush3.bf16.msra.mxu0 %v2275_v25 }
  0xb6   : > { %2137 = vmatpush3.bf16.msra.mxu1 %v2277_v27  ;;  %2116 = vmatprep.subr.bf16.mxu0 %v2278_v28 }
  0xb7   : > { %2138 = vmatprep.subr.bf16.mxu1 %v2280_v30 }
  0xb9   : > { %2117 = vmatpush3.bf16.msra.mxu0 %v2279_v29 }
  0xba   : > { %2139 = vmatpush3.bf16.msra.mxu1 %v2281_v31  ;;  %2118 = vmatprep.subr.bf16.mxu0 %v2282_v32 }
  0xbb   : > { %2140 = vmatprep.subr.bf16.mxu1 %v2284_v34 }
  0xbd   : > { %2119 = vmatpush3.bf16.msra.mxu0 %v2283_v33 }
  0xbe   : > { %2141 = vmatpush3.bf16.msra.mxu1 %v2285_v35  ;;  %2120 = vmatprep.subr.bf16.mxu0 %v2286_v36 }
  0xbf   : > { %2142 = vmatprep.subr.bf16.mxu1 %v2288_v38 }
  0xc1   : > { %2121 = vmatpush3.bf16.msra.mxu0 %v2287_v37 }
  0xc2   : > { %2143 = vmatpush3.bf16.msra.mxu1 %v2289_v39  ;;  %2122 = vmatprep.subr.bf16.mxu0 %v2290_v41 }
  0xc3   : > { %2144 = vmatprep.subr.bf16.mxu1 %v2292_v43 }
  0xc5   : > { %2123 = vmatpush3.bf16.msra.mxu0 %v2291_v42 }
  0xc6   : > { %2145 = vmatpush3.bf16.msra.mxu1 %v2295_v45  ;;  %2152 = vmatprep.subr.bf16.mxu0 %v2296_v46 }
  0xc7   : > { %2176 = vmatprep.subr.bf16.mxu1 %v2358_v51 }
  0xc8   : > { %1716 = vmatmul.mubr.bf16.vlgmr.msra.gmra.mxu0 %v1973_v44 }
  0xc9   : > { %2153 = vmatpush3.bf16.msra.mxu0 %v2299_v49  ;;  %1795 = vmatprep.mubr.bf16.mxu0 %v1978_v47 }
  0xca   : > { %1756 = vmatmul.mubr.bf16.vlgmr.msra.gmra.mxu1 %v1975_v48  ;;  %2154 = vmatprep.subr.bf16.mxu0 %v2300_v50 }
  0xcb   : > { %2178 = vmatprep.mubr.msk.bf16.mxu1 %vm2359_vm0, %v2358_v51  ;;  %2177 = vmatpush3.bf16.msra.mxu1 %v2313_v59 }
  0xcd   : > { %2155 = vmatpush3.bf16.msra.mxu0 %v2301_v52 }
  0xce   : > { %2156 = vmatprep.subr.bf16.mxu0 %v2302_v53 }
  0xd1   : > { %2157 = vmatpush3.bf16.msra.mxu0 %v2303_v54 }
  0xd2   : > { %2158 = vmatprep.subr.bf16.mxu0 %v2304_v55  ;;  %2179 = vmatmul.mubr.msk.bf16.vlgmr.msra.gmra.mxu1 %vm1599_vm1, %v2317_v58 }
  0xd5   : > { %2159 = vmatpush3.bf16.msra.mxu0 %v2305_v56 }
  0xd6   : > { %2160 = vmatprep.subr.bf16.mxu0 %v2306_v57 }
  0xd9   : > { %2161 = vmatpush3.bf16.msra.mxu0 %v2307_v60 }
  0xda   : > { %2162 = vmatprep.subr.bf16.mxu0 %v2308_v61 }
  0xdd   : > { %2163 = vmatpush3.bf16.msra.mxu0 %v2309_v62 }
  0xde   : > { %2164 = vmatprep.subr.bf16.mxu0 %v2310_v63 }
  0xe1   : > { %2165 = vmatpush3.bf16.msra.mxu0 %v2311_v0 }
  0xe2   : > { %2166 = vmatprep.subr.bf16.mxu0 %v2312_v1 }
  0xe5   : > { %2167 = vmatpush3.bf16.msra.mxu0 %v2314_v2 }
  0xe8   : > { %1796 = vmatmul.mubr.bf16.vlgmr.msra.gmra.mxu0 %v1977_v3 }
 0x168   : > { %v2080_v4 = vpop.f32.mrf.mxu0 }
 0x169   : > { %v2102_v5 = vpop.f32.mrf.mxu1 }
 0x16a   : > { %v2081_v6 = vpop.f32.mrf.mxu0 }
 0x16b   : > { %v2103_v7 = vpop.f32.mrf.mxu1  ;;  %v2082_v24 = vadd.f32 %v2081_v6, %v2080_v4 }
 0x16c   : > { %v2083_v8 = vpop.f32.mrf.mxu0  ;;  %v2104_v25 = vadd.f32 %v2103_v7, %v2102_v5 }
 0x16d   : > { %v2105_v9 = vpop.f32.mrf.mxu1 }
 0x16e   : > { %v2084_v10 = vpop.f32.mrf.mxu0  ;;  %v1678_v27 = vadd.f32 %v2104_v25, %v2082_v24 }
 0x16f   : > { %v2106_v11 = vpop.f32.mrf.mxu1 }
 0x188   : > { %v2124_v12 = vpop.f32.mrf.mxu0 }
 0x18a   : > { %v2125_v13 = vpop.f32.mrf.mxu0  ;;  %v2146_v14 = vpop.f32.mrf.mxu1 }
 0x18b   : > { %v2126_v26 = vadd.f32 %v2125_v13, %v2124_v12 }
 0x18c   : > { %v2127_v15 = vpop.f32.mrf.mxu0  ;;  %v2147_v16 = vpop.f32.mrf.mxu1 }
 0x18d   : > { %v1718_v28 = vadd.f32 %v2126_v26, %v1678_v27  ;;  %v2148_v29 = vadd.f32 %v2147_v16, %v2146_v14 }
 0x18e   : > { %v2128_v17 = vpop.f32.mrf.mxu0  ;;  %v2149_v18 = vpop.f32.mrf.mxu1 }
 0x18f   : > { %v1758_v32 = vadd.f32 %v2148_v29, %v1718_v28 }
 0x190   : > { %v2150_v19 = vpop.f32.mrf.mxu1 }
 0x192   : > { %v1837_v20 = vpop.f32.mrf.mxu1 }
 0x194   : > { %v2180_v21 = vpop.f32.mrf.mxu1 }
 0x196   : > { %v1840_v22 = vpop.f32.mrf.mxu1 }
 0x198   : > { %v2181_v23 = vpop.f32.mrf.mxu1 }
 0x1a8   : > { %v2168_v30 = vpop.f32.mrf.mxu0 }
 0x1aa   : > { %v2169_v31 = vpop.f32.mrf.mxu0 }
 0x1ab   : > { %v2170_v33 = vadd.f32 %v2169_v31, %v2168_v30 }
 0x1ac   : > { %v2171_v34 = vpop.f32.mrf.mxu0 }
 0x1ad   : > { %v1798_v35 = vadd.f32 %v2170_v33, %v1758_v32 }
 0x1ae   : > { %v2172_v36 = vpop.f32.mrf.mxu0 }
 0x1af   : > { %v1838_v37 = vadd.f32 %v1837_v20, %v1798_v35 }
 0x1b1   : > { %v1849_v38 = vmax.f32 %v1838_v37, 0.0 }
 0x1b3   : > { %1850 = vst [vmem:[%s899_s21] sm:$0xff] %v1849_v38 }
 0x1b4 PF: > { %s12_s13 = sadd.s32 1, %s2356_s13   ;;  %s2897_s9 = smov %s2344_s10 }
 0x1b5   : > { %p9_p10 = scmp.ge.s32.totalorder %s12_s13, 4   ;;  %s2898_s10 = smov %s2410_s17 }
 0x1b6   : > { %s2899_s11 = smov %s2352_s12  ;;  %s2900_s12 = smov %s2902_s14 }
 0x1b7   :  { %11 = sbr.rel (!%p9_p10) target bundleno = 3 (0x3), region = 115 }

// kernel: resnet_forward.22
= control target key start
LH: loop header
LB: loop body
LE: loop exit
PB: predicated region body
PF: predicated region fallthrough
CT: control target
= control target key end

     0   :  { %s703_s9 = smov 0   ;;  %s705_s10 = smov 0   ;;  %s812_s0 = inlined_call_operand.vmem [shape: bf16[8,144], index: 0, kind: input, shape index: {}]   ;;  %s813_s1 = inlined_call_operand.vmem [shape: bf16[144,256], index: 1, kind: input, shape index: {}]   ;;  %s814_s2 = inlined_call_operand.vmem [shape: f32[8,256], index: 2, kind: output, shape index: {}]  }
   0x1   :  { %s707_s11 = smov 0   ;;  %s709_s12 = smov 0  }
   0x2   :  { %s711_s13 = smov 0  }
   0x3 LB: > { %s27_s14 = sadd.s32 1, %s681_s12  ;;  %p75_p1 = scmp.ne.s32.totalorder %s673_s10, %s669_s9  ;;  %s685_s13 = sphi %s711_s13, %s12_s13   ;;  %s681_s12 = sphi %s709_s12, %s818_s12   ;;  %s677_s11 = sphi %s707_s11, %s817_s11   ;;  %s673_s10 = sphi %s705_s10, %s816_s10   ;;  %s669_s9 = sphi %s703_s9, %s815_s9  }
   0x4   : > { %p29_p0 = scmp.ge.s32.totalorder %s27_s14, 2  ;;  %p76_p2 = scmp.eq.s32.totalorder %s685_s13, 0 }
   0x5   : > { %s68_s16 = sadd.s32 1, %s673_s10  ;;  %p575_p5 = scmp.ge.s32.totalorder %s685_s13, 2 }
   0x6   : > { %s820_s14 = smov (%p29_p0, %s27_s14), 0  ;;  %p77_p3 = por %p76_p2, %p75_p1 }
   0x7   : > { %s64_s15 = ssub.s32 %s681_s12, %s820_s14  ;;  %142 = sbr.rel (%p575_p5) target bundleno = 28 (0x1c), region = 20 }
   0x8   : > { %p66_p4 = scmp.eq.s32.totalorder %s64_s15, 0 }
   0xa   : > { %s738_s17 = scalar_select %p66_p4, %s673_s10, %s68_s16  }
   0xc   : > { %145 = sbr.rel (!%p77_p3) target bundleno = 28 (0x1c), region = 24  ;;  %s147_s18 = sand.u32 (%p77_p3), 1, %s673_s10  }
   0xd   : > { %s576_s19 = sshll.u32 (%p77_p3), %s681_s12, 2  ;;  %s593_s20 = smul.u32 (%p77_p3), 72, %s147_s18 }
   0xe   : > { %s746_s23 = scalar_lea.vmem (%p77_p3), %s813_s1, %s576_s19 }
   0xf   : > { %v171_v0 = vld [vmem:[%s746_s23] sm:$0xf] (%p77_p3)  ;;  %v173_v1 = vld [vmem:[%s746_s23 + $0x8] sm:$0xf] (%p77_p3)  ;;  %v175_v2 = vld [vmem:[%s746_s23 + $0x10] sm:$0xf] (%p77_p3) }
  0x10   : > { %v177_v3 = vld [vmem:[%s746_s23 + $0x18] sm:$0xf] (%p77_p3)  ;;  %v179_v4 = vld [vmem:[%s746_s23 + $0x20] sm:$0xf] (%p77_p3)  ;;  %s753_s24 = scalar_lea.vmem (%p77_p3), [#allocation3], %s593_s20 }
  0x11   : > { %172 = vst [vmem:[%s753_s24] sm:$0xf] %v171_v0  ;;  %174 = vst [vmem:[%s753_s24 + $0x4] sm:$0xf] %v173_v1  ;;  %v181_v5 = vld [vmem:[%s746_s23 + $0x28] sm:$0xf] }
  0x12   : > { %176 = vst [vmem:[%s753_s24 + $0x8] sm:$0xf] %v175_v2  ;;  %178 = vst [vmem:[%s753_s24 + $0xc] sm:$0xf] %v177_v3  ;;  %v183_v6 = vld [vmem:[%s746_s23 + $0x30] sm:$0xf] }
  0x13   : > { %180 = vst [vmem:[%s753_s24 + $0x10] sm:$0xf] %v179_v4  ;;  %v185_v7 = vld [vmem:[%s746_s23 + $0x38] sm:$0xf]  ;;  %182 = vst [vmem:[%s753_s24 + $0x14] sm:$0xf] %v181_v5 }
  0x14   : > { %184 = vst [vmem:[%s753_s24 + $0x18] sm:$0xf] %v183_v6  ;;  %186 = vst [vmem:[%s753_s24 + $0x1c] sm:$0xf] %v185_v7  ;;  %v187_v8 = vld [vmem:[%s746_s23 + $0x40] sm:$0xf] }
  0x15   : > { %v189_v9 = vld [vmem:[%s746_s23 + $0x48] sm:$0xf]  ;;  %v191_v10 = vld [vmem:[%s746_s23 + $0x50] sm:$0xf]  ;;  %188 = vst [vmem:[%s753_s24 + $0x20] sm:$0xf] %v187_v8 }
  0x16   : > { %190 = vst [vmem:[%s753_s24 + $0x24] sm:$0xf] %v189_v9  ;;  %192 = vst [vmem:[%s753_s24 + $0x28] sm:$0xf] %v191_v10  ;;  %v193_v11 = vld [vmem:[%s746_s23 + $0x58] sm:$0xf] }
  0x17   : > { %v195_v12 = vld [vmem:[%s746_s23 + $0x60] sm:$0xf]  ;;  %v197_v13 = vld [vmem:[%s746_s23 + $0x68] sm:$0xf]  ;;  %194 = vst [vmem:[%s753_s24 + $0x2c] sm:$0xf] %v193_v11 }
  0x18   : > { %196 = vst [vmem:[%s753_s24 + $0x30] sm:$0xf] %v195_v12  ;;  %198 = vst [vmem:[%s753_s24 + $0x34] sm:$0xf] %v197_v13  ;;  %v199_v14 = vld [vmem:[%s746_s23 + $0x70] sm:$0xf] }
  0x19   : > { %v201_v15 = vld [vmem:[%s746_s23 + $0x78] sm:$0xf]  ;;  %v203_v16 = vld [vmem:[%s746_s23 + $0x80] sm:$0xf]  ;;  %200 = vst [vmem:[%s753_s24 + $0x38] sm:$0xf] %v199_v14 }
  0x1a   : > { %202 = vst [vmem:[%s753_s24 + $0x3c] sm:$0xf] %v201_v15  ;;  %204 = vst [vmem:[%s753_s24 + $0x40] sm:$0xf] %v203_v16  ;;  %v205_v17 = vld [vmem:[%s746_s23 + $0x88] sm:$0xf] }
  0x1b   : > { %206 = vst [vmem:[%s753_s24 + $0x44] sm:$0xf] %v205_v17 }
  0x1c PF: > { %p577_p6 = scmp.ge.s32.totalorder %s685_s13, 1  ;;  %p265_p7 = scmp.lt.s32.totalorder %s685_s13, 3 }
  0x1e   : > { %p266_p8 = pnand %p577_p6, %p265_p7 }
  0x1f   : > { %s272_s25 = sand.u32 (!%p266_p8), 1, %s669_s9   ;;  %p318_p9 = scmp.lt.s32.totalorder (!%p266_p8), %s677_s11, 1 }
  0x20   : > { %269 = sbr.rel (%p266_p8) target bundleno = 273 (0x111), region = 65 }
  0x21   : > { %s594_s28 = smul.u32 (!%p266_p8), 72, %s272_s25 }
  0x23   : > { %s274_s29 = scalar_lea.vmem (!%p266_p8), [#allocation3], %s594_s28 }
  0x25   : > { %v331_v18 = vld [vmem:[%s812_s0] sm:$0xff]  ;;  %vm410_vm0 = vcmask 130048   ;;  %v687_v19 = vmov 0   ;;  %v637_v22 = vld [vmem:[%s274_s29 + $0x30] sm:$0xff]   ;;  %v638_v23 = vld [vmem:[%s274_s29 + $0x28] sm:$0xff]   ;;  %s822_s11 = smov (!%p318_p9, %s677_s11), 1 }
  0x26   : > { %414 = vmatprep.subr.bf16.mxu0 %v687_v19  ;;  %v580_v20 = vcombine.high %v331_v18, %v331_v18  ;;  %v636_v21 = vld [vmem:[%s274_s29 + $0x38] sm:$0xff]   ;;  %v639_v24 = vld [vmem:[%s274_s29 + $0x20] sm:$0xff]   ;;  %v641_v26 = vld [vmem:[%s274_s29 + $0x10] sm:$0xff]   ;;  %v579_v30 = vcombine.low %v331_v18, %v331_v18  ;;  %s578_s30 = sshll.u32 %s822_s11, 3 }
  0x27   : > { %415 = vmatpush1.bf16.msra.mxu0 %v636_v21  ;;  %v640_v25 = vld [vmem:[%s274_s29 + $0x18] sm:$0xff]   ;;  %v642_v27 = vld [vmem:[%s274_s29 + $0x8] sm:$0xff]   ;;  %v643_v28 = vld [vmem:[%s274_s29] sm:$0xff]   ;;  %s323_s5 = scalar_lea.vmem %s814_s2, %s578_s30 }
  0x28   : > { %590 = vmatprep.mubr.msk.bf16.mxu0 %vm410_vm0, %v580_v20  ;;  %416 = vmatprep.subr.bf16.mxu0 %v687_v19  ;;  %v644_v29 = vld [vmem:[%s274_s29 + $0x40] sm:$0xff]  }
  0x2b   : > { %417 = vmatpush1.bf16.msra.mxu0 %v637_v22 }
  0x2c   : > { %418 = vmatprep.subr.bf16.mxu0 %v687_v19 }
  0x2f   : > { %419 = vmatpush1.bf16.msra.mxu0 %v638_v23 }
  0x30   : > { %420 = vmatprep.subr.bf16.mxu0 %v687_v19 }
  0x33   : > { %421 = vmatpush1.bf16.msra.mxu0 %v639_v24 }
  0x34   : > { %422 = vmatprep.subr.bf16.mxu0 %v687_v19 }
  0x37   : > { %423 = vmatpush1.bf16.msra.mxu0 %v640_v25 }
  0x38   : > { %424 = vmatprep.subr.bf16.mxu0 %v687_v19 }
  0x3b   : > { %425 = vmatpush1.bf16.msra.mxu0 %v641_v26 }
  0x3c   : > { %426 = vmatprep.subr.bf16.mxu0 %v687_v19 }
  0x3f   : > { %427 = vmatpush1.bf16.msra.mxu0 %v642_v27 }
  0x40   : > { %428 = vmatprep.subr.bf16.mxu0 %v687_v19 }
  0x43   : > { %429 = vmatpush1.bf16.msra.mxu0 %v643_v28 }
  0x44   : > { %444 = vmatprep.subr.bf16.mxu0 %v687_v19 }
  0x47   : > { %445 = vmatpush2.bf16.msra.mxu0 %v644_v29 }
  0x4a   : > { %447 = vmatmul.mubr.bf16.vlgmr.msra.gmra.mxu0 %v579_v30 }
 0x10a   : > { %v448_v31 = vpop.f32.mrf.mxu0 }
 0x10b   : > { %460 = vst [vmem:[%s323_s5] sm:$0xff] %v448_v31 }
 0x10c   : > { %v450_v32 = vpop.f32.mrf.mxu0 }
 0x10e   : > { %v451_v33 = vpop.f32.mrf.mxu0 }
 0x110   : > { %v452_v34 = vpop.f32.mrf.mxu0 }
 0x111 PF: > { %s12_s13 = sadd.s32 1, %s685_s13   ;;  %s815_s9 = smov %s673_s10 }
 0x112   : > { %p9_p10 = scmp.ge.s32.totalorder %s12_s13, 4   ;;  %s816_s10 = smov %s738_s17 }
 0x113   : > { %s817_s11 = smov %s681_s12  ;;  %s818_s12 = smov %s820_s14 }
 0x114   :  { %11 = sbr.rel (!%p9_p10) target bundleno = 3 (0x3), region = 115 }

// kernel: resnet_forward.23
= control target key start
LH: loop header
LB: loop body
LE: loop exit
PB: predicated region body
PF: predicated region fallthrough
CT: control target
= control target key end

     0   :  { %s1692_s12 = smov 0   ;;  %s1694_s13 = smov 0   ;;  %s2047_s0 = inlined_call_operand.vmem [shape: bf16[8,2304], index: 0, kind: input, shape index: {}]   ;;  %s2048_s1 = inlined_call_operand.vmem [shape: bf16[2304,256], index: 1, kind: input, shape index: {}]   ;;  %s2049_s2 = inlined_call_operand.vmem [shape: f32[8,256], index: 2, kind: input, shape index: {}]   ;;  %s2050_s3 = inlined_call_operand.vmem [shape: f32[8,256], index: 3, kind: output, shape index: {}]  }
   0x1   :  { %s1696_s14 = smov 0   ;;  %s1698_s15 = smov 0  }
   0x2   :  { %s1700_s16 = smov 0   ;;  %s1702_s17 = smov 0  }
   0x3   :  { %s1704_s18 = smov 0  }
   0x4 LB: > { %s25_s19 = sadd.s32 1, %s1661_s16  ;;  %s28_s20 = sadd.s32 1, %s1665_s17  ;;  %s1669_s18 = sphi %s1704_s18, %s13_s18   ;;  %s1665_s17 = sphi %s1702_s17, %s2056_s17   ;;  %s1661_s16 = sphi %s1700_s16, %s2055_s16   ;;  %s1657_s15 = sphi %s1698_s15, %s2054_s15   ;;  %s1653_s14 = sphi %s1696_s14, %s2053_s14   ;;  %s1649_s13 = sphi %s1694_s13, %s2052_s13   ;;  %s1645_s12 = sphi %s1692_s12, %s2051_s12  }
   0x5   : > { %p26_p0 = scmp.ge.s32.totalorder %s25_s19, 3  ;;  %p76_p1 = scmp.ne.s32.totalorder %s1649_s13, %s1645_s12 }
   0x6   : > { %p77_p2 = scmp.eq.s32.totalorder %s1669_s18, 0  ;;  %s69_s24 = sadd.s32 1, %s1649_s13 }
   0x7   : > { %s2058_s19 = smov (%p26_p0, %s25_s19), 0  ;;  %s2060_s20 = smov (!%p26_p0, %s28_s20), %s1665_s17 }
   0x8   : > { %p78_p3 = por %p77_p2, %p76_p1  ;;  %p30_p4 = scmp.ge.s32.totalorder %s2060_s20, 2 }
   0x9   : > { %s64_s21 = ssub.s32 %s1661_s16, %s2058_s19  ;;  %p1370_p6 = scmp.ge.s32.totalorder %s1669_s18, 6 }
   0xa   : > { %s2062_s20 = smov (%p30_p4, %s2060_s20), 0 }
   0xb   : > { %s65_s22 = ssub.s32 %s1665_s17, %s2062_s20  ;;  %158 = sbr.rel (%p1370_p6) target bundleno = 87 (0x57), region = 16 }
   0xc   : > { %s66_s23 = sor.u32 %s65_s22, %s64_s21 }
   0xd   : > { %p67_p5 = scmp.eq.s32.totalorder %s66_s23, 0 }
   0xf   : > { %s1743_s25 = scalar_select %p67_p5, %s1649_s13, %s69_s24  }
  0x10   : > { %174 = sbr.rel (!%p78_p3) target bundleno = 87 (0x57), region = 24  ;;  %s176_s26 = sand.u32 (%p78_p3), 1, %s1649_s13  }
  0x11   : > { %s1435_s27 = smul.u32 (%p78_p3), 192, %s1661_s16 }
  0x12   : > { %s1502_s28 = smul.u32 (%p78_p3), 384, %s176_s26 }
  0x13   : > { %s181_s29 = sadd.s32 (%p78_p3), %s1665_s17, %s1435_s27 }
  0x14   : > { %s1372_s30 = sshll.u32 (%p78_p3), %s181_s29, 2  ;;  %s1757_s7 = scalar_lea.vmem (%p78_p3), [#allocation3], %s1502_s28 }
  0x15   : > { %s1752_s6 = scalar_lea.vmem %s2048_s1, %s1372_s30 }
  0x16   : > { %v200_v0 = vld [vmem:[%s1752_s6] sm:$0xf]  ;;  %v202_v1 = vld [vmem:[%s1752_s6 + $0x8] sm:$0xf]  ;;  %v204_v2 = vld [vmem:[%s1752_s6 + $0x10] sm:$0xf] }
  0x17   : > { %201 = vst [vmem:[%s1757_s7] sm:$0xf] %v200_v0  ;;  %203 = vst [vmem:[%s1757_s7 + $0x4] sm:$0xf] %v202_v1  ;;  %v206_v3 = vld [vmem:[%s1752_s6 + $0x18] sm:$0xf] }
  0x18   : > { %205 = vst [vmem:[%s1757_s7 + $0x8] sm:$0xf] %v204_v2  ;;  %v208_v4 = vld [vmem:[%s1752_s6 + $0x20] sm:$0xf]  ;;  %v210_v5 = vld [vmem:[%s1752_s6 + $0x28] sm:$0xf] }
  0x19   : > { %207 = vst [vmem:[%s1757_s7 + $0xc] sm:$0xf] %v206_v3  ;;  %209 = vst [vmem:[%s1757_s7 + $0x10] sm:$0xf] %v208_v4  ;;  %v212_v6 = vld [vmem:[%s1752_s6 + $0x30] sm:$0xf] }
  0x1a   : > { %211 = vst [vmem:[%s1757_s7 + $0x14] sm:$0xf] %v210_v5  ;;  %v214_v7 = vld [vmem:[%s1752_s6 + $0x38] sm:$0xf]  ;;  %v216_v8 = vld [vmem:[%s1752_s6 + $0x40] sm:$0xf] }
  0x1b   : > { %213 = vst [vmem:[%s1757_s7 + $0x18] sm:$0xf] %v212_v6  ;;  %215 = vst [vmem:[%s1757_s7 + $0x1c] sm:$0xf] %v214_v7  ;;  %v218_v9 = vld [vmem:[%s1752_s6 + $0x48] sm:$0xf] }
  0x1c   : > { %217 = vst [vmem:[%s1757_s7 + $0x20] sm:$0xf] %v216_v8  ;;  %v220_v10 = vld [vmem:[%s1752_s6 + $0x50] sm:$0xf]  ;;  %v222_v11 = vld [vmem:[%s1752_s6 + $0x58] sm:$0xf] }
  0x1d   : > { %219 = vst [vmem:[%s1757_s7 + $0x24] sm:$0xf] %v218_v9  ;;  %221 = vst [vmem:[%s1757_s7 + $0x28] sm:$0xf] %v220_v10  ;;  %v224_v12 = vld [vmem:[%s1752_s6 + $0x60] sm:$0xf] }
  0x1e   : > { %223 = vst [vmem:[%s1757_s7 + $0x2c] sm:$0xf] %v222_v11  ;;  %v226_v13 = vld [vmem:[%s1752_s6 + $0x68] sm:$0xf]  ;;  %v228_v14 = vld [vmem:[%s1752_s6 + $0x70] sm:$0xf] }
  0x1f   : > { %225 = vst [vmem:[%s1757_s7 + $0x30] sm:$0xf] %v224_v12  ;;  %227 = vst [vmem:[%s1757_s7 + $0x34] sm:$0xf] %v226_v13  ;;  %v230_v15 = vld [vmem:[%s1752_s6 + $0x78] sm:$0xf] }
  0x20   : > { %229 = vst [vmem:[%s1757_s7 + $0x38] sm:$0xf] %v228_v14  ;;  %v232_v16 = vld [vmem:[%s1752_s6 + $0x80] sm:$0xf]  ;;  %v234_v17 = vld [vmem:[%s1752_s6 + $0x88] sm:$0xf] }
  0x21   : > { %231 = vst [vmem:[%s1757_s7 + $0x3c] sm:$0xf] %v230_v15  ;;  %233 = vst [vmem:[%s1757_s7 + $0x40] sm:$0xf] %v232_v16  ;;  %v236_v18 = vld [vmem:[%s1752_s6 + $0x90] sm:$0xf] }
  0x22   : > { %235 = vst [vmem:[%s1757_s7 + $0x44] sm:$0xf] %v234_v17  ;;  %v238_v19 = vld [vmem:[%s1752_s6 + $0x98] sm:$0xf]  ;;  %v240_v20 = vld [vmem:[%s1752_s6 + $0xa0] sm:$0xf] }
  0x23   : > { %237 = vst [vmem:[%s1757_s7 + $0x48] sm:$0xf] %v236_v18  ;;  %239 = vst [vmem:[%s1757_s7 + $0x4c] sm:$0xf] %v238_v19  ;;  %v242_v21 = vld [vmem:[%s1752_s6 + $0xa8] sm:$0xf] }
  0x24   : > { %241 = vst [vmem:[%s1757_s7 + $0x50] sm:$0xf] %v240_v20  ;;  %v244_v22 = vld [vmem:[%s1752_s6 + $0xb0] sm:$0xf]  ;;  %v246_v23 = vld [vmem:[%s1752_s6 + $0xb8] sm:$0xf] }
  0x25   : > { %243 = vst [vmem:[%s1757_s7 + $0x54] sm:$0xf] %v242_v21  ;;  %245 = vst [vmem:[%s1757_s7 + $0x58] sm:$0xf] %v244_v22  ;;  %v248_v24 = vld [vmem:[%s1752_s6 + $0xc0] sm:$0xf] }
  0x26   : > { %247 = vst [vmem:[%s1757_s7 + $0x5c] sm:$0xf] %v246_v23  ;;  %v250_v25 = vld [vmem:[%s1752_s6 + $0xc8] sm:$0xf]  ;;  %v252_v26 = vld [vmem:[%s1752_s6 + $0xd0] sm:$0xf] }
  0x27   : > { %249 = vst [vmem:[%s1757_s7 + $0x60] sm:$0xf] %v248_v24  ;;  %251 = vst [vmem:[%s1757_s7 + $0x64] sm:$0xf] %v250_v25  ;;  %v254_v27 = vld [vmem:[%s1752_s6 + $0xd8] sm:$0xf] }
  0x28   : > { %253 = vst [vmem:[%s1757_s7 + $0x68] sm:$0xf] %v252_v26  ;;  %v256_v28 = vld [vmem:[%s1752_s6 + $0xe0] sm:$0xf]  ;;  %v258_v29 = vld [vmem:[%s1752_s6 + $0xe8] sm:$0xf] }
  0x29   : > { %255 = vst [vmem:[%s1757_s7 + $0x6c] sm:$0xf] %v254_v27  ;;  %257 = vst [vmem:[%s1757_s7 + $0x70] sm:$0xf] %v256_v28  ;;  %v260_v30 = vld [vmem:[%s1752_s6 + $0xf0] sm:$0xf] }
  0x2a   : > { %259 = vst [vmem:[%s1757_s7 + $0x74] sm:$0xf] %v258_v29  ;;  %v262_v31 = vld [vmem:[%s1752_s6 + $0xf8] sm:$0xf]  ;;  %v264_v32 = vld [vmem:[%s1752_s6 + $0x100] sm:$0xf] }
  0x2b   : > { %261 = vst [vmem:[%s1757_s7 + $0x78] sm:$0xf] %v260_v30  ;;  %263 = vst [vmem:[%s1757_s7 + $0x7c] sm:$0xf] %v262_v31  ;;  %v266_v33 = vld [vmem:[%s1752_s6 + $0x108] sm:$0xf] }
  0x2c   : > { %265 = vst [vmem:[%s1757_s7 + $0x80] sm:$0xf] %v264_v32  ;;  %v268_v34 = vld [vmem:[%s1752_s6 + $0x110] sm:$0xf]  ;;  %v270_v35 = vld [vmem:[%s1752_s6 + $0x118] sm:$0xf] }
  0x2d   : > { %267 = vst [vmem:[%s1757_s7 + $0x84] sm:$0xf] %v266_v33  ;;  %269 = vst [vmem:[%s1757_s7 + $0x88] sm:$0xf] %v268_v34  ;;  %v272_v36 = vld [vmem:[%s1752_s6 + $0x120] sm:$0xf] }
  0x2e   : > { %271 = vst [vmem:[%s1757_s7 + $0x8c] sm:$0xf] %v270_v35  ;;  %v274_v37 = vld [vmem:[%s1752_s6 + $0x128] sm:$0xf]  ;;  %v276_v38 = vld [vmem:[%s1752_s6 + $0x130] sm:$0xf] }
  0x2f   : > { %273 = vst [vmem:[%s1757_s7 + $0x90] sm:$0xf] %v272_v36  ;;  %275 = vst [vmem:[%s1757_s7 + $0x94] sm:$0xf] %v274_v37  ;;  %v278_v39 = vld [vmem:[%s1752_s6 + $0x138] sm:$0xf] }
  0x30   : > { %277 = vst [vmem:[%s1757_s7 + $0x98] sm:$0xf] %v276_v38  ;;  %v280_v40 = vld [vmem:[%s1752_s6 + $0x140] sm:$0xf]  ;;  %v282_v41 = vld [vmem:[%s1752_s6 + $0x148] sm:$0xf] }
  0x31   : > { %279 = vst [vmem:[%s1757_s7 + $0x9c] sm:$0xf] %v278_v39  ;;  %281 = vst [vmem:[%s1757_s7 + $0xa0] sm:$0xf] %v280_v40  ;;  %v284_v42 = vld [vmem:[%s1752_s6 + $0x150] sm:$0xf] }
  0x32   : > { %283 = vst [vmem:[%s1757_s7 + $0xa4] sm:$0xf] %v282_v41  ;;  %v286_v43 = vld [vmem:[%s1752_s6 + $0x158] sm:$0xf]  ;;  %v288_v44 = vld [vmem:[%s1752_s6 + $0x160] sm:$0xf] }
  0x33   : > { %285 = vst [vmem:[%s1757_s7 + $0xa8] sm:$0xf] %v284_v42  ;;  %287 = vst [vmem:[%s1757_s7 + $0xac] sm:$0xf] %v286_v43  ;;  %v290_v45 = vld [vmem:[%s1752_s6 + $0x168] sm:$0xf] }
  0x34   : > { %289 = vst [vmem:[%s1757_s7 + $0xb0] sm:$0xf] %v288_v44  ;;  %v292_v46 = vld [vmem:[%s1752_s6 + $0x170] sm:$0xf]  ;;  %v294_v47 = vld [vmem:[%s1752_s6 + $0x178] sm:$0xf] }
  0x35   : > { %291 = vst [vmem:[%s1757_s7 + $0xb4] sm:$0xf] %v290_v45  ;;  %293 = vst [vmem:[%s1757_s7 + $0xb8] sm:$0xf] %v292_v46  ;;  %v296_v48 = vld [vmem:[%s1752_s6 + $0x180] sm:$0xf] }
  0x36   : > { %295 = vst [vmem:[%s1757_s7 + $0xbc] sm:$0xf] %v294_v47  ;;  %v298_v49 = vld [vmem:[%s1752_s6 + $0x188] sm:$0xf]  ;;  %v300_v50 = vld [vmem:[%s1752_s6 + $0x190] sm:$0xf] }
  0x37   : > { %297 = vst [vmem:[%s1757_s7 + $0xc0] sm:$0xf] %v296_v48  ;;  %299 = vst [vmem:[%s1757_s7 + $0xc4] sm:$0xf] %v298_v49  ;;  %v302_v51 = vld [vmem:[%s1752_s6 + $0x198] sm:$0xf] }
  0x38   : > { %301 = vst [vmem:[%s1757_s7 + $0xc8] sm:$0xf] %v300_v50  ;;  %v304_v52 = vld [vmem:[%s1752_s6 + $0x1a0] sm:$0xf]  ;;  %v306_v53 = vld [vmem:[%s1752_s6 + $0x1a8] sm:$0xf] }
  0x39   : > { %303 = vst [vmem:[%s1757_s7 + $0xcc] sm:$0xf] %v302_v51  ;;  %305 = vst [vmem:[%s1757_s7 + $0xd0] sm:$0xf] %v304_v52  ;;  %v308_v54 = vld [vmem:[%s1752_s6 + $0x1b0] sm:$0xf] }
  0x3a   : > { %307 = vst [vmem:[%s1757_s7 + $0xd4] sm:$0xf] %v306_v53  ;;  %v310_v55 = vld [vmem:[%s1752_s6 + $0x1b8] sm:$0xf]  ;;  %v312_v56 = vld [vmem:[%s1752_s6 + $0x1c0] sm:$0xf] }
  0x3b   : > { %309 = vst [vmem:[%s1757_s7 + $0xd8] sm:$0xf] %v308_v54  ;;  %311 = vst [vmem:[%s1757_s7 + $0xdc] sm:$0xf] %v310_v55  ;;  %v314_v57 = vld [vmem:[%s1752_s6 + $0x1c8] sm:$0xf] }
  0x3c   : > { %313 = vst [vmem:[%s1757_s7 + $0xe0] sm:$0xf] %v312_v56  ;;  %v316_v58 = vld [vmem:[%s1752_s6 + $0x1d0] sm:$0xf]  ;;  %v318_v59 = vld [vmem:[%s1752_s6 + $0x1d8] sm:$0xf] }
  0x3d   : > { %315 = vst [vmem:[%s1757_s7 + $0xe4] sm:$0xf] %v314_v57  ;;  %317 = vst [vmem:[%s1757_s7 + $0xe8] sm:$0xf] %v316_v58  ;;  %v320_v60 = vld [vmem:[%s1752_s6 + $0x1e0] sm:$0xf] }
  0x3e   : > { %319 = vst [vmem:[%s1757_s7 + $0xec] sm:$0xf] %v318_v59  ;;  %v322_v61 = vld [vmem:[%s1752_s6 + $0x1e8] sm:$0xf]  ;;  %v324_v62 = vld [vmem:[%s1752_s6 + $0x1f0] sm:$0xf] }
  0x3f   : > { %321 = vst [vmem:[%s1757_s7 + $0xf0] sm:$0xf] %v320_v60  ;;  %323 = vst [vmem:[%s1757_s7 + $0xf4] sm:$0xf] %v322_v61  ;;  %v326_v63 = vld [vmem:[%s1752_s6 + $0x1f8] sm:$0xf] }
  0x40   : > { %325 = vst [vmem:[%s1757_s7 + $0xf8] sm:$0xf] %v324_v62  ;;  %v328_v0 = vld [vmem:[%s1752_s6 + $0x200] sm:$0xf]  ;;  %v330_v1 = vld [vmem:[%s1752_s6 + $0x208] sm:$0xf] }
  0x41   : > { %327 = vst [vmem:[%s1757_s7 + $0xfc] sm:$0xf] %v326_v63  ;;  %329 = vst [vmem:[%s1757_s7 + $0x100] sm:$0xf] %v328_v0  ;;  %v332_v2 = vld [vmem:[%s1752_s6 + $0x210] sm:$0xf] }
  0x42   : > { %331 = vst [vmem:[%s1757_s7 + $0x104] sm:$0xf] %v330_v1  ;;  %v334_v3 = vld [vmem:[%s1752_s6 + $0x218] sm:$0xf]  ;;  %v336_v4 = vld [vmem:[%s1752_s6 + $0x220] sm:$0xf] }
  0x43   : > { %333 = vst [vmem:[%s1757_s7 + $0x108] sm:$0xf] %v332_v2  ;;  %335 = vst [vmem:[%s1757_s7 + $0x10c] sm:$0xf] %v334_v3  ;;  %v338_v5 = vld [vmem:[%s1752_s6 + $0x228] sm:$0xf] }
  0x44   : > { %337 = vst [vmem:[%s1757_s7 + $0x110] sm:$0xf] %v336_v4  ;;  %v340_v6 = vld [vmem:[%s1752_s6 + $0x230] sm:$0xf]  ;;  %v342_v7 = vld [vmem:[%s1752_s6 + $0x238] sm:$0xf] }
  0x45   : > { %339 = vst [vmem:[%s1757_s7 + $0x114] sm:$0xf] %v338_v5  ;;  %341 = vst [vmem:[%s1757_s7 + $0x118] sm:$0xf] %v340_v6  ;;  %v344_v8 = vld [vmem:[%s1752_s6 + $0x240] sm:$0xf] }
  0x46   : > { %343 = vst [vmem:[%s1757_s7 + $0x11c] sm:$0xf] %v342_v7  ;;  %v346_v9 = vld [vmem:[%s1752_s6 + $0x248] sm:$0xf]  ;;  %v348_v10 = vld [vmem:[%s1752_s6 + $0x250] sm:$0xf] }
  0x47   : > { %345 = vst [vmem:[%s1757_s7 + $0x120] sm:$0xf] %v344_v8  ;;  %347 = vst [vmem:[%s1757_s7 + $0x124] sm:$0xf] %v346_v9  ;;  %v350_v11 = vld [vmem:[%s1752_s6 + $0x258] sm:$0xf] }
  0x48   : > { %349 = vst [vmem:[%s1757_s7 + $0x128] sm:$0xf] %v348_v10  ;;  %v352_v12 = vld [vmem:[%s1752_s6 + $0x260] sm:$0xf]  ;;  %v354_v13 = vld [vmem:[%s1752_s6 + $0x268] sm:$0xf] }
  0x49   : > { %351 = vst [vmem:[%s1757_s7 + $0x12c] sm:$0xf] %v350_v11  ;;  %353 = vst [vmem:[%s1757_s7 + $0x130] sm:$0xf] %v352_v12  ;;  %v356_v14 = vld [vmem:[%s1752_s6 + $0x270] sm:$0xf] }
  0x4a   : > { %355 = vst [vmem:[%s1757_s7 + $0x134] sm:$0xf] %v354_v13  ;;  %v358_v15 = vld [vmem:[%s1752_s6 + $0x278] sm:$0xf]  ;;  %v360_v16 = vld [vmem:[%s1752_s6 + $0x280] sm:$0xf] }
  0x4b   : > { %357 = vst [vmem:[%s1757_s7 + $0x138] sm:$0xf] %v356_v14  ;;  %359 = vst [vmem:[%s1757_s7 + $0x13c] sm:$0xf] %v358_v15  ;;  %v362_v17 = vld [vmem:[%s1752_s6 + $0x288] sm:$0xf] }
  0x4c   : > { %361 = vst [vmem:[%s1757_s7 + $0x140] sm:$0xf] %v360_v16  ;;  %v364_v18 = vld [vmem:[%s1752_s6 + $0x290] sm:$0xf]  ;;  %v366_v19 = vld [vmem:[%s1752_s6 + $0x298] sm:$0xf] }
  0x4d   : > { %363 = vst [vmem:[%s1757_s7 + $0x144] sm:$0xf] %v362_v17  ;;  %365 = vst [vmem:[%s1757_s7 + $0x148] sm:$0xf] %v364_v18  ;;  %v368_v20 = vld [vmem:[%s1752_s6 + $0x2a0] sm:$0xf] }
  0x4e   : > { %367 = vst [vmem:[%s1757_s7 + $0x14c] sm:$0xf] %v366_v19  ;;  %v370_v21 = vld [vmem:[%s1752_s6 + $0x2a8] sm:$0xf]  ;;  %v372_v22 = vld [vmem:[%s1752_s6 + $0x2b0] sm:$0xf] }
  0x4f   : > { %369 = vst [vmem:[%s1757_s7 + $0x150] sm:$0xf] %v368_v20  ;;  %371 = vst [vmem:[%s1757_s7 + $0x154] sm:$0xf] %v370_v21  ;;  %v374_v23 = vld [vmem:[%s1752_s6 + $0x2b8] sm:$0xf] }
  0x50   : > { %373 = vst [vmem:[%s1757_s7 + $0x158] sm:$0xf] %v372_v22  ;;  %v376_v24 = vld [vmem:[%s1752_s6 + $0x2c0] sm:$0xf]  ;;  %v378_v25 = vld [vmem:[%s1752_s6 + $0x2c8] sm:$0xf] }
  0x51   : > { %375 = vst [vmem:[%s1757_s7 + $0x15c] sm:$0xf] %v374_v23  ;;  %377 = vst [vmem:[%s1757_s7 + $0x160] sm:$0xf] %v376_v24  ;;  %v380_v26 = vld [vmem:[%s1752_s6 + $0x2d0] sm:$0xf] }
  0x52   : > { %379 = vst [vmem:[%s1757_s7 + $0x164] sm:$0xf] %v378_v25  ;;  %v382_v27 = vld [vmem:[%s1752_s6 + $0x2d8] sm:$0xf]  ;;  %v384_v28 = vld [vmem:[%s1752_s6 + $0x2e0] sm:$0xf] }
  0x53   : > { %381 = vst [vmem:[%s1757_s7 + $0x168] sm:$0xf] %v380_v26  ;;  %383 = vst [vmem:[%s1757_s7 + $0x16c] sm:$0xf] %v382_v27  ;;  %v386_v29 = vld [vmem:[%s1752_s6 + $0x2e8] sm:$0xf] }
  0x54   : > { %385 = vst [vmem:[%s1757_s7 + $0x170] sm:$0xf] %v384_v28  ;;  %v388_v30 = vld [vmem:[%s1752_s6 + $0x2f0] sm:$0xf]  ;;  %v390_v31 = vld [vmem:[%s1752_s6 + $0x2f8] sm:$0xf] }
  0x55   : > { %387 = vst [vmem:[%s1757_s7 + $0x174] sm:$0xf] %v386_v29  ;;  %389 = vst [vmem:[%s1757_s7 + $0x178] sm:$0xf] %v388_v30 }
  0x56   : > { %391 = vst [vmem:[%s1757_s7 + $0x17c] sm:$0xf] %v390_v31 }
  0x57 PF: > { %p1373_p7 = scmp.ge.s32.totalorder %s1669_s18, 1  ;;  %p617_p8 = scmp.lt.s32.totalorder %s1669_s18, 7 }
  0x59   : > { %p618_p9 = pnand %p1373_p7, %p617_p8 }
  0x5a   : > { %s624_s8 = sand.u32 (!%p618_p9), 1, %s1645_s12   ;;  %s667_s9 = smul.u32 (!%p618_p9), 6, %s1653_s14 }
  0x5b   : > { %621 = sbr.rel (%p618_p9) target bundleno = 386 (0x182), region = 69  ;;  %p680_p10 = scmp.lt.s32.totalorder (!%p618_p9), %s1657_s15, 1 }
  0x5c   : > { %s1503_s10 = smul.u32 (!%p618_p9), 384, %s624_s8  ;;  %p670_p11 = scmp.lt.s32.totalorder (!%p618_p9), %s667_s9, 17 }
  0x5d   : > { %p1377_p12 = scmp.ne.s32.totalorder (!%p618_p9), %s1653_s14, 0 }
  0x5e   : > { %s1969_s4 = scalar_lea.vmem (!%p618_p9), [#allocation3], %s1503_s10 }
  0x60   : > { %s2064_s9 = smov (!%p670_p11, %s667_s9), 17  ;;  %s2066_s15 = smov (!%p680_p10, %s1657_s15), 1 }
  0x61   : > { %s1374_s11 = sshll.u32 %s2064_s9, 2  ;;  %s1375_s24 = sshll.u32 %s2066_s15, 3 }
  0x62   : > { %s1957_s23 = scalar_lea.vmem %s2047_s0, %s1374_s11  ;;  %s1962_s28 = scalar_lea.vmem %s2049_s2, %s1375_s24 }
  0x63   : > { %s1967_s30 = scalar_lea.vmem %s2050_s3, %s1375_s24  ;;  %698 = sbr.rel (%p1377_p12) target bundleno = 106 (0x6a), region = 77 }
  0x68   : > { %v1671_v32 = vmov 0.0  }
  0x69   : > { %699 = vst [vmem:[#allocation2] sm:$0xff] %v1671_v32 }
  0x6a PF: > { %v1561_v33 = vld [vmem:[%s1969_s4 + $0x78] sm:$0xff]   ;;  %v1565_v37 = vld [vmem:[%s1969_s4 + $0x70] sm:$0xff]   ;;  %v1569_v41 = vld [vmem:[%s1969_s4 + $0x68] sm:$0xff]   ;;  %p1432_p13 = scmp.ne.s32.totalorder %s1653_s14, 2 }
  0x6b   : > { %v1562_v34 = vld [vmem:[%s1969_s4 + $0xf8] sm:$0xff]   ;;  %1436 = vmatprep.subr.bf16.mxu0 %v1561_v33  ;;  %v1566_v38 = vld [vmem:[%s1969_s4 + $0xf0] sm:$0xff]   ;;  %v1570_v42 = vld [vmem:[%s1969_s4 + $0xe8] sm:$0xff]  }
  0x6c   : > { %v1563_v35 = vld [vmem:[%s1969_s4 + $0x38] sm:$0xff]   ;;  %1458 = vmatprep.subr.bf16.mxu1 %v1562_v34  ;;  %v1567_v39 = vld [vmem:[%s1969_s4 + $0x30] sm:$0xff]   ;;  %v1571_v43 = vld [vmem:[%s1969_s4 + $0x28] sm:$0xff]  }
  0x6d   : > { %v1564_v36 = vld [vmem:[%s1969_s4 + $0xb8] sm:$0xff]   ;;  %1437 = vmatpush3.bf16.msra.mxu0 %v1563_v35  ;;  %v1568_v40 = vld [vmem:[%s1969_s4 + $0xb0] sm:$0xff]   ;;  %v1572_v44 = vld [vmem:[%s1969_s4 + $0xa8] sm:$0xff]  }
  0x6e   : > { %1459 = vmatpush3.bf16.msra.mxu1 %v1564_v36  ;;  %1438 = vmatprep.subr.bf16.mxu0 %v1565_v37  ;;  %v1573_v45 = vld [vmem:[%s1969_s4 + $0x60] sm:$0xff]   ;;  %v1577_v49 = vld [vmem:[%s1969_s4 + $0x58] sm:$0xff]   ;;  %v1581_v53 = vld [vmem:[%s1969_s4 + $0x50] sm:$0xff]  }
  0x6f   : > { %1460 = vmatprep.subr.bf16.mxu1 %v1566_v38  ;;  %v1574_v46 = vld [vmem:[%s1969_s4 + $0xe0] sm:$0xff]   ;;  %v1578_v50 = vld [vmem:[%s1969_s4 + $0xd8] sm:$0xff]   ;;  %v1582_v54 = vld [vmem:[%s1969_s4 + $0xd0] sm:$0xff]  }
  0x70   : > { %v1575_v47 = vld [vmem:[%s1969_s4 + $0x20] sm:$0xff]   ;;  %v1579_v51 = vld [vmem:[%s1969_s4 + $0x18] sm:$0xff]   ;;  %v1583_v55 = vld [vmem:[%s1969_s4 + $0x10] sm:$0xff]  }
  0x71   : > { %1439 = vmatpush3.bf16.msra.mxu0 %v1567_v39  ;;  %v1576_v48 = vld [vmem:[%s1969_s4 + $0xa0] sm:$0xff]   ;;  %v1580_v52 = vld [vmem:[%s1969_s4 + $0x98] sm:$0xff]   ;;  %v1584_v56 = vld [vmem:[%s1969_s4 + $0x90] sm:$0xff]  }
  0x72   : > { %1461 = vmatpush3.bf16.msra.mxu1 %v1568_v40  ;;  %1440 = vmatprep.subr.bf16.mxu0 %v1569_v41  ;;  %v1585_v57 = vld [vmem:[%s1969_s4 + $0x48] sm:$0xff]   ;;  %v1589_v61 = vld [vmem:[%s1969_s4 + $0x40] sm:$0xff]   ;;  %v701_v1 = vld [vmem:[%s1957_s23] sm:$0xff] }
  0x73   : > { %1462 = vmatprep.subr.bf16.mxu1 %v1570_v42  ;;  %v1586_v58 = vld [vmem:[%s1969_s4 + $0xc8] sm:$0xff]   ;;  %v1590_v62 = vld [vmem:[%s1969_s4 + $0xc0] sm:$0xff]   ;;  %v1378_v3 = vcombine.low %v701_v1, %v701_v1  ;;  %v1379_v4 = vcombine.high %v701_v1, %v701_v1  ;;  %v1597_v7 = vld [vmem:[%s1969_s4 + $0x178] sm:$0xff]  }
  0x74   : > { %v1587_v59 = vld [vmem:[%s1969_s4 + $0x8] sm:$0xff]   ;;  %v1591_v63 = vld [vmem:[%s1969_s4] sm:$0xff]   ;;  %v1598_v8 = vld [vmem:[%s1969_s4 + $0x138] sm:$0xff]  }
  0x75   : > { %1441 = vmatpush3.bf16.msra.mxu0 %v1571_v43  ;;  %v1588_v60 = vld [vmem:[%s1969_s4 + $0x88] sm:$0xff]   ;;  %v1592_v0 = vld [vmem:[%s1969_s4 + $0x80] sm:$0xff]   ;;  %1141 = vmatprep.mubr.bf16.mxu0 %v1379_v4  ;;  %v1599_v9 = vld [vmem:[%s1969_s4 + $0x170] sm:$0xff]  }
  0x76   : > { %1463 = vmatpush3.bf16.msra.mxu1 %v1572_v44  ;;  %1442 = vmatprep.subr.bf16.mxu0 %v1573_v45  ;;  %v702_v2 = vld [vmem:[%s1957_s23 + $0x8] sm:$0xff]  ;;  %v1600_v10 = vld [vmem:[%s1969_s4 + $0x130] sm:$0xff]   ;;  %v1601_v11 = vld [vmem:[%s1969_s4 + $0x168] sm:$0xff]  }
  0x77   : > { %1464 = vmatprep.subr.bf16.mxu1 %v1574_v46  ;;  %v1380_v5 = vcombine.low %v702_v2, %v702_v2  ;;  %v1381_v6 = vcombine.high %v702_v2, %v702_v2  ;;  %v1602_v12 = vld [vmem:[%s1969_s4 + $0x128] sm:$0xff]   ;;  %v1603_v13 = vld [vmem:[%s1969_s4 + $0x160] sm:$0xff]   ;;  %v1605_v15 = vld [vmem:[%s1969_s4 + $0x158] sm:$0xff]  }
  0x78   : > { %v1604_v14 = vld [vmem:[%s1969_s4 + $0x120] sm:$0xff]   ;;  %v703_v16 = vld [vmem:[%s1957_s23 + $0x10] sm:$0xff]  ;;  %v1606_v18 = vld [vmem:[%s1969_s4 + $0x118] sm:$0xff]  }
  0x79   : > { %1443 = vmatpush3.bf16.msra.mxu0 %v1575_v47  ;;  %1181 = vmatprep.mubr.bf16.mxu1 %v1381_v6  ;;  %v1383_v17 = vcombine.high %v703_v16, %v703_v16  ;;  %v1607_v19 = vld [vmem:[%s1969_s4 + $0x150] sm:$0xff]   ;;  %v1609_v21 = vld [vmem:[%s1969_s4 + $0x148] sm:$0xff]   ;;  %v1611_v23 = vld [vmem:[%s1969_s4 + $0x140] sm:$0xff]   ;;  %v1382_v25 = vcombine.low %v703_v16, %v703_v16 }
  0x7a   : > { %1465 = vmatpush3.bf16.msra.mxu1 %v1576_v48  ;;  %1444 = vmatprep.subr.bf16.mxu0 %v1577_v49  ;;  %v1608_v20 = vld [vmem:[%s1969_s4 + $0x110] sm:$0xff]   ;;  %v1610_v22 = vld [vmem:[%s1969_s4 + $0x108] sm:$0xff]   ;;  %v1612_v24 = vld [vmem:[%s1969_s4 + $0x100] sm:$0xff]  }
  0x7b   : > { %1466 = vmatprep.subr.bf16.mxu1 %v1578_v50  ;;  %v700_v40 = vld [vmem:[#allocation2] sm:$0xff] }
  0x7d   : > { %1445 = vmatpush3.bf16.msra.mxu0 %v1579_v51 }
  0x7e   : > { %1467 = vmatpush3.bf16.msra.mxu1 %v1580_v52  ;;  %1446 = vmatprep.subr.bf16.mxu0 %v1581_v53 }
  0x7f   : > { %1468 = vmatprep.subr.bf16.mxu1 %v1582_v54 }
  0x81   : > { %1447 = vmatpush3.bf16.msra.mxu0 %v1583_v55 }
  0x82   : > { %1469 = vmatpush3.bf16.msra.mxu1 %v1584_v56  ;;  %1448 = vmatprep.subr.bf16.mxu0 %v1585_v57 }
  0x83   : > { %1470 = vmatprep.subr.bf16.mxu1 %v1586_v58 }
  0x85   : > { %1449 = vmatpush3.bf16.msra.mxu0 %v1587_v59 }
  0x86   : > { %1471 = vmatpush3.bf16.msra.mxu1 %v1588_v60  ;;  %1450 = vmatprep.subr.bf16.mxu0 %v1589_v61 }
  0x87   : > { %1472 = vmatprep.subr.bf16.mxu1 %v1590_v62 }
  0x89   : > { %1451 = vmatpush3.bf16.msra.mxu0 %v1591_v63 }
  0x8a   : > { %1473 = vmatpush3.bf16.msra.mxu1 %v1592_v0  ;;  %1480 = vmatprep.subr.bf16.mxu0 %v1597_v7 }
  0x8c   : > { %1142 = vmatmul.mubr.bf16.vlgmr.msra.gmra.mxu0 %v1378_v3 }
  0x8d   : > { %1182 = vmatmul.mubr.bf16.vlgmr.msra.gmra.mxu1 %v1380_v5  ;;  %1481 = vmatpush3.bf16.msra.mxu0 %v1598_v8 }
  0x8e   : > { %1482 = vmatprep.subr.bf16.mxu0 %v1599_v9  ;;  %1221 = vmatprep.mubr.bf16.mxu0 %v1383_v17 }
  0x91   : > { %1483 = vmatpush3.bf16.msra.mxu0 %v1600_v10 }
  0x92   : > { %1484 = vmatprep.subr.bf16.mxu0 %v1601_v11 }
  0x95   : > { %1485 = vmatpush3.bf16.msra.mxu0 %v1602_v12 }
  0x96   : > { %1486 = vmatprep.subr.bf16.mxu0 %v1603_v13 }
  0x99   : > { %1487 = vmatpush3.bf16.msra.mxu0 %v1604_v14 }
  0x9a   : > { %1488 = vmatprep.subr.bf16.mxu0 %v1605_v15 }
  0x9d   : > { %1489 = vmatpush3.bf16.msra.mxu0 %v1606_v18 }
  0x9e   : > { %1490 = vmatprep.subr.bf16.mxu0 %v1607_v19 }
  0xa1   : > { %1491 = vmatpush3.bf16.msra.mxu0 %v1608_v20 }
  0xa2   : > { %1492 = vmatprep.subr.bf16.mxu0 %v1609_v21 }
  0xa5   : > { %1493 = vmatpush3.bf16.msra.mxu0 %v1610_v22 }
  0xa6   : > { %1494 = vmatprep.subr.bf16.mxu0 %v1611_v23 }
  0xa9   : > { %1495 = vmatpush3.bf16.msra.mxu0 %v1612_v24 }
  0xac   : > { %1222 = vmatmul.mubr.bf16.vlgmr.msra.gmra.mxu0 %v1382_v25 }
 0x14c   : > { %v1452_v26 = vpop.f32.mrf.mxu0 }
 0x14d   : > { %v1474_v27 = vpop.f32.mrf.mxu1 }
 0x14e   : > { %v1453_v28 = vpop.f32.mrf.mxu0 }
 0x14f   : > { %v1475_v29 = vpop.f32.mrf.mxu1  ;;  %v1454_v34 = vadd.f32 %v1453_v28, %v1452_v26 }
 0x150   : > { %v1455_v30 = vpop.f32.mrf.mxu0  ;;  %v1476_v35 = vadd.f32 %v1475_v29, %v1474_v27 }
 0x151   : > { %v1477_v31 = vpop.f32.mrf.mxu1 }
 0x152   : > { %v1456_v32 = vpop.f32.mrf.mxu0  ;;  %v1184_v38 = vadd.f32 %v1476_v35, %v1454_v34 }
 0x153   : > { %v1478_v33 = vpop.f32.mrf.mxu1 }
 0x16c   : > { %v1496_v36 = vpop.f32.mrf.mxu0 }
 0x16e   : > { %v1497_v37 = vpop.f32.mrf.mxu0 }
 0x16f   : > { %v1498_v39 = vadd.f32 %v1497_v37, %v1496_v36 }
 0x170   : > { %v1499_v41 = vpop.f32.mrf.mxu0 }
 0x171   : > { %v1224_v42 = vadd.f32 %v1498_v39, %v1184_v38  ;;  %1234 = sbr.rel (%p1432_p13) target bundleno = 386 (0x182), region = 81 }
 0x172   : > { %v1500_v43 = vpop.f32.mrf.mxu0 }
 0x173   : > { %v1229_v44 = vadd.f32 %v1224_v42, %v700_v40 }
 0x175   : > { %1230 = vst [vmem:[#allocation2] sm:$0xff] %v1229_v44 }
 0x176   : > { %v1236_v46 = vld [vmem:[%s1962_s28] sm:$0xff] }
 0x17c   : > { %v1235_v45 = vld [vmem:[#allocation2] sm:$0xff] }
 0x17d   : > { %v1237_v47 = vadd.f32 %v1236_v46, %v1235_v45 }
 0x17f   : > { %v1238_v48 = vmax.f32 %v1237_v47, 0.0 }
 0x181   : > { %1239 = vst [vmem:[%s1967_s30] sm:$0xff] %v1238_v48 }
 0x182 PF: > { %s13_s18 = sadd.s32 1, %s1669_s18   ;;  %s2051_s12 = smov %s1649_s13 }
 0x183   : > { %p10_p0 = scmp.ge.s32.totalorder %s13_s18, 8   ;;  %s2052_s13 = smov %s1743_s25 }
 0x184   : > { %s2053_s14 = smov %s1661_s16  ;;  %s2054_s15 = smov %s1665_s17 }
 0x185   : > { %s2055_s16 = smov %s2058_s19  ;;  %s2056_s17 = smov %s2062_s20 }
 0x186   :  { %12 = sbr.rel (!%p10_p0) target bundleno = 4 (0x4), region = 122 }

// kernel: resnet_forward.24
= control target key start
LH: loop header
LB: loop body
LE: loop exit
PB: predicated region body
PF: predicated region fallthrough
CT: control target
= control target key end

     0   :  { %s1891_s9 = smov 0   ;;  %s1893_s10 = smov 0   ;;  %s2294_s0 = inlined_call_operand.vmem [shape: bf16[8,2304], index: 0, kind: input, shape index: {}]   ;;  %s2295_s1 = inlined_call_operand.vmem [shape: bf16[2304,512], index: 1, kind: input, shape index: {}]   ;;  %s2296_s2 = inlined_call_operand.vmem [shape: f32[8,512], index: 2, kind: output, shape index: {}]  }
   0x1   :  { %s1895_s11 = smov 0   ;;  %s1897_s12 = smov 0  }
   0x2   :  { %s1899_s13 = smov 0   ;;  %s1901_s14 = smov 0  }
   0x3   :  { %s1903_s15 = smov 0  }
   0x4 LB: > { %s24_s16 = sadd.s32 1, %s1865_s13  ;;  %s27_s17 = sadd.s32 1, %s1869_s14  ;;  %s1873_s15 = sphi %s1903_s15, %s12_s15   ;;  %s1869_s14 = sphi %s1901_s14, %s2302_s14   ;;  %s1865_s13 = sphi %s1899_s13, %s2301_s13   ;;  %s1861_s12 = sphi %s1897_s12, %s2300_s12   ;;  %s1857_s11 = sphi %s1895_s11, %s2299_s11   ;;  %s1853_s10 = sphi %s1893_s10, %s2298_s10   ;;  %s1849_s9 = sphi %s1891_s9, %s2297_s9  }
   0x5   : > { %p25_p0 = scmp.ge.s32.totalorder %s24_s16, 3  ;;  %p75_p1 = scmp.ne.s32.totalorder %s1853_s10, %s1849_s9 }
   0x6   : > { %p76_p2 = scmp.eq.s32.totalorder %s1873_s15, 0  ;;  %s68_s21 = sadd.s32 1, %s1853_s10 }
   0x7   : > { %s2304_s16 = smov (%p25_p0, %s24_s16), 0  ;;  %s2306_s17 = smov (!%p25_p0, %s27_s17), %s1869_s14 }
   0x8   : > { %p77_p3 = por %p76_p2, %p75_p1  ;;  %p29_p4 = scmp.ge.s32.totalorder %s2306_s17, 2 }
   0x9   : > { %s63_s18 = ssub.s32 %s1865_s13, %s2304_s16  ;;  %p1495_p6 = scmp.ge.s32.totalorder %s1873_s15, 6 }
   0xa   : > { %s2308_s17 = smov (%p29_p4, %s2306_s17), 0 }
   0xb   : > { %s64_s19 = ssub.s32 %s1869_s14, %s2308_s17  ;;  %129 = sbr.rel (%p1495_p6) target bundleno = 72 (0x48), region = 16 }
   0xc   : > { %s65_s20 = sor.u32 %s64_s19, %s63_s18 }
   0xd   : > { %p66_p5 = scmp.eq.s32.totalorder %s65_s20, 0 }
   0xf   : > { %s1942_s22 = scalar_select %p66_p5, %s1853_s10, %s68_s21  }
  0x10   : > { %145 = sbr.rel (!%p77_p3) target bundleno = 72 (0x48), region = 24  ;;  %s147_s23 = sand.u32 (%p77_p3), 1, %s1853_s10  }
  0x11   : > { %s1610_s24 = smul.u32 (%p77_p3), 768, %s147_s23  ;;  %s1496_s25 = sshll.u32 (%p77_p3), %s1869_s14, 1 }
  0x12   : > { %s1609_s26 = smul.u32 (%p77_p3), 384, %s1865_s13 }
  0x13   : > { %s1956_s4 = scalar_lea.vmem (%p77_p3), [#allocation3], %s1610_s24 }
  0x14   : > { %s153_s27 = sadd.s32 (%p77_p3), %s1609_s26, %s1496_s25 }
  0x15   : > { %s1498_s28 = sshll.u32 %s153_s27, 2 }
  0x16   : > { %s1951_s3 = scalar_lea.vmem %s2295_s1, %s1498_s28 }
  0x17   : > { %v374_v0 = vld [vmem:[%s1951_s3] sm:$0xff]  ;;  %v376_v1 = vld [vmem:[%s1951_s3 + $0x10] sm:$0xff] }
  0x18   : > { %v378_v2 = vld [vmem:[%s1951_s3 + $0x20] sm:$0xff]  ;;  %375 = vst [vmem:[%s1956_s4] sm:$0xff] %v374_v0  ;;  %377 = vst [vmem:[%s1956_s4 + $0x8] sm:$0xff] %v376_v1  ;;  %v380_v3 = vld [vmem:[%s1951_s3 + $0x30] sm:$0xff] }
  0x19   : > { %379 = vst [vmem:[%s1956_s4 + $0x10] sm:$0xff] %v378_v2  ;;  %v382_v4 = vld [vmem:[%s1951_s3 + $0x40] sm:$0xff]  ;;  %v384_v5 = vld [vmem:[%s1951_s3 + $0x50] sm:$0xff]  ;;  %381 = vst [vmem:[%s1956_s4 + $0x18] sm:$0xff] %v380_v3 }
  0x1a   : > { %383 = vst [vmem:[%s1956_s4 + $0x20] sm:$0xff] %v382_v4  ;;  %385 = vst [vmem:[%s1956_s4 + $0x28] sm:$0xff] %v384_v5  ;;  %v386_v6 = vld [vmem:[%s1951_s3 + $0x60] sm:$0xff]  ;;  %v388_v7 = vld [vmem:[%s1951_s3 + $0x70] sm:$0xff] }
  0x1b   : > { %v390_v8 = vld [vmem:[%s1951_s3 + $0x80] sm:$0xff]  ;;  %387 = vst [vmem:[%s1956_s4 + $0x30] sm:$0xff] %v386_v6  ;;  %389 = vst [vmem:[%s1956_s4 + $0x38] sm:$0xff] %v388_v7  ;;  %v392_v9 = vld [vmem:[%s1951_s3 + $0x90] sm:$0xff] }
  0x1c   : > { %391 = vst [vmem:[%s1956_s4 + $0x40] sm:$0xff] %v390_v8  ;;  %v394_v10 = vld [vmem:[%s1951_s3 + $0xa0] sm:$0xff]  ;;  %v396_v11 = vld [vmem:[%s1951_s3 + $0xb0] sm:$0xff]  ;;  %393 = vst [vmem:[%s1956_s4 + $0x48] sm:$0xff] %v392_v9 }
  0x1d   : > { %395 = vst [vmem:[%s1956_s4 + $0x50] sm:$0xff] %v394_v10  ;;  %397 = vst [vmem:[%s1956_s4 + $0x58] sm:$0xff] %v396_v11  ;;  %v398_v12 = vld [vmem:[%s1951_s3 + $0xc0] sm:$0xff]  ;;  %v400_v13 = vld [vmem:[%s1951_s3 + $0xd0] sm:$0xff] }
  0x1e   : > { %v402_v14 = vld [vmem:[%s1951_s3 + $0xe0] sm:$0xff]  ;;  %399 = vst [vmem:[%s1956_s4 + $0x60] sm:$0xff] %v398_v12  ;;  %401 = vst [vmem:[%s1956_s4 + $0x68] sm:$0xff] %v400_v13  ;;  %v404_v15 = vld [vmem:[%s1951_s3 + $0xf0] sm:$0xff] }
  0x1f   : > { %403 = vst [vmem:[%s1956_s4 + $0x70] sm:$0xff] %v402_v14  ;;  %v406_v16 = vld [vmem:[%s1951_s3 + $0x100] sm:$0xff]  ;;  %v408_v17 = vld [vmem:[%s1951_s3 + $0x110] sm:$0xff]  ;;  %405 = vst [vmem:[%s1956_s4 + $0x78] sm:$0xff] %v404_v15 }
  0x20   : > { %407 = vst [vmem:[%s1956_s4 + $0x80] sm:$0xff] %v406_v16  ;;  %409 = vst [vmem:[%s1956_s4 + $0x88] sm:$0xff] %v408_v17  ;;  %v410_v18 = vld [vmem:[%s1951_s3 + $0x120] sm:$0xff]  ;;  %v412_v19 = vld [vmem:[%s1951_s3 + $0x130] sm:$0xff] }
  0x21   : > { %v414_v20 = vld [vmem:[%s1951_s3 + $0x140] sm:$0xff]  ;;  %411 = vst [vmem:[%s1956_s4 + $0x90] sm:$0xff] %v410_v18  ;;  %413 = vst [vmem:[%s1956_s4 + $0x98] sm:$0xff] %v412_v19  ;;  %v416_v21 = vld [vmem:[%s1951_s3 + $0x150] sm:$0xff] }
  0x22   : > { %415 = vst [vmem:[%s1956_s4 + $0xa0] sm:$0xff] %v414_v20  ;;  %v418_v22 = vld [vmem:[%s1951_s3 + $0x160] sm:$0xff]  ;;  %v420_v23 = vld [vmem:[%s1951_s3 + $0x170] sm:$0xff]  ;;  %417 = vst [vmem:[%s1956_s4 + $0xa8] sm:$0xff] %v416_v21 }
  0x23   : > { %419 = vst [vmem:[%s1956_s4 + $0xb0] sm:$0xff] %v418_v22  ;;  %421 = vst [vmem:[%s1956_s4 + $0xb8] sm:$0xff] %v420_v23  ;;  %v422_v24 = vld [vmem:[%s1951_s3 + $0x180] sm:$0xff]  ;;  %v424_v25 = vld [vmem:[%s1951_s3 + $0x190] sm:$0xff] }
  0x24   : > { %v426_v26 = vld [vmem:[%s1951_s3 + $0x1a0] sm:$0xff]  ;;  %423 = vst [vmem:[%s1956_s4 + $0xc0] sm:$0xff] %v422_v24  ;;  %425 = vst [vmem:[%s1956_s4 + $0xc8] sm:$0xff] %v424_v25  ;;  %v428_v27 = vld [vmem:[%s1951_s3 + $0x1b0] sm:$0xff] }
  0x25   : > { %427 = vst [vmem:[%s1956_s4 + $0xd0] sm:$0xff] %v426_v26  ;;  %v430_v28 = vld [vmem:[%s1951_s3 + $0x1c0] sm:$0xff]  ;;  %v432_v29 = vld [vmem:[%s1951_s3 + $0x1d0] sm:$0xff]  ;;  %429 = vst [vmem:[%s1956_s4 + $0xd8] sm:$0xff] %v428_v27 }
  0x26   : > { %431 = vst [vmem:[%s1956_s4 + $0xe0] sm:$0xff] %v430_v28  ;;  %433 = vst [vmem:[%s1956_s4 + $0xe8] sm:$0xff] %v432_v29  ;;  %v434_v30 = vld [vmem:[%s1951_s3 + $0x1e0] sm:$0xff]  ;;  %v436_v31 = vld [vmem:[%s1951_s3 + $0x1f0] sm:$0xff] }
  0x27   : > { %v438_v32 = vld [vmem:[%s1951_s3 + $0x200] sm:$0xff]  ;;  %435 = vst [vmem:[%s1956_s4 + $0xf0] sm:$0xff] %v434_v30  ;;  %437 = vst [vmem:[%s1956_s4 + $0xf8] sm:$0xff] %v436_v31  ;;  %v440_v33 = vld [vmem:[%s1951_s3 + $0x210] sm:$0xff] }
  0x28   : > { %439 = vst [vmem:[%s1956_s4 + $0x100] sm:$0xff] %v438_v32  ;;  %v442_v34 = vld [vmem:[%s1951_s3 + $0x220] sm:$0xff]  ;;  %v444_v35 = vld [vmem:[%s1951_s3 + $0x230] sm:$0xff]  ;;  %441 = vst [vmem:[%s1956_s4 + $0x108] sm:$0xff] %v440_v33 }
  0x29   : > { %443 = vst [vmem:[%s1956_s4 + $0x110] sm:$0xff] %v442_v34  ;;  %445 = vst [vmem:[%s1956_s4 + $0x118] sm:$0xff] %v444_v35  ;;  %v446_v36 = vld [vmem:[%s1951_s3 + $0x240] sm:$0xff]  ;;  %v448_v37 = vld [vmem:[%s1951_s3 + $0x250] sm:$0xff] }
  0x2a   : > { %v450_v38 = vld [vmem:[%s1951_s3 + $0x260] sm:$0xff]  ;;  %447 = vst [vmem:[%s1956_s4 + $0x120] sm:$0xff] %v446_v36  ;;  %449 = vst [vmem:[%s1956_s4 + $0x128] sm:$0xff] %v448_v37  ;;  %v452_v39 = vld [vmem:[%s1951_s3 + $0x270] sm:$0xff] }
  0x2b   : > { %451 = vst [vmem:[%s1956_s4 + $0x130] sm:$0xff] %v450_v38  ;;  %v454_v40 = vld [vmem:[%s1951_s3 + $0x280] sm:$0xff]  ;;  %v456_v41 = vld [vmem:[%s1951_s3 + $0x290] sm:$0xff]  ;;  %453 = vst [vmem:[%s1956_s4 + $0x138] sm:$0xff] %v452_v39 }
  0x2c   : > { %455 = vst [vmem:[%s1956_s4 + $0x140] sm:$0xff] %v454_v40  ;;  %457 = vst [vmem:[%s1956_s4 + $0x148] sm:$0xff] %v456_v41  ;;  %v458_v42 = vld [vmem:[%s1951_s3 + $0x2a0] sm:$0xff]  ;;  %v460_v43 = vld [vmem:[%s1951_s3 + $0x2b0] sm:$0xff] }
  0x2d   : > { %v462_v44 = vld [vmem:[%s1951_s3 + $0x2c0] sm:$0xff]  ;;  %459 = vst [vmem:[%s1956_s4 + $0x150] sm:$0xff] %v458_v42  ;;  %461 = vst [vmem:[%s1956_s4 + $0x158] sm:$0xff] %v460_v43  ;;  %v464_v45 = vld [vmem:[%s1951_s3 + $0x2d0] sm:$0xff] }
  0x2e   : > { %463 = vst [vmem:[%s1956_s4 + $0x160] sm:$0xff] %v462_v44  ;;  %v466_v46 = vld [vmem:[%s1951_s3 + $0x2e0] sm:$0xff]  ;;  %v468_v47 = vld [vmem:[%s1951_s3 + $0x2f0] sm:$0xff]  ;;  %465 = vst [vmem:[%s1956_s4 + $0x168] sm:$0xff] %v464_v45 }
  0x2f   : > { %467 = vst [vmem:[%s1956_s4 + $0x170] sm:$0xff] %v466_v46  ;;  %469 = vst [vmem:[%s1956_s4 + $0x178] sm:$0xff] %v468_v47  ;;  %v470_v48 = vld [vmem:[%s1951_s3 + $0x300] sm:$0xff]  ;;  %v472_v49 = vld [vmem:[%s1951_s3 + $0x310] sm:$0xff] }
  0x30   : > { %v474_v50 = vld [vmem:[%s1951_s3 + $0x320] sm:$0xff]  ;;  %471 = vst [vmem:[%s1956_s4 + $0x180] sm:$0xff] %v470_v48  ;;  %473 = vst [vmem:[%s1956_s4 + $0x188] sm:$0xff] %v472_v49  ;;  %v476_v51 = vld [vmem:[%s1951_s3 + $0x330] sm:$0xff] }
  0x31   : > { %475 = vst [vmem:[%s1956_s4 + $0x190] sm:$0xff] %v474_v50  ;;  %v478_v52 = vld [vmem:[%s1951_s3 + $0x340] sm:$0xff]  ;;  %v480_v53 = vld [vmem:[%s1951_s3 + $0x350] sm:$0xff]  ;;  %477 = vst [vmem:[%s1956_s4 + $0x198] sm:$0xff] %v476_v51 }
  0x32   : > { %479 = vst [vmem:[%s1956_s4 + $0x1a0] sm:$0xff] %v478_v52  ;;  %481 = vst [vmem:[%s1956_s4 + $0x1a8] sm:$0xff] %v480_v53  ;;  %v482_v54 = vld [vmem:[%s1951_s3 + $0x360] sm:$0xff]  ;;  %v484_v55 = vld [vmem:[%s1951_s3 + $0x370] sm:$0xff] }
  0x33   : > { %v486_v56 = vld [vmem:[%s1951_s3 + $0x380] sm:$0xff]  ;;  %483 = vst [vmem:[%s1956_s4 + $0x1b0] sm:$0xff] %v482_v54  ;;  %485 = vst [vmem:[%s1956_s4 + $0x1b8] sm:$0xff] %v484_v55  ;;  %v488_v57 = vld [vmem:[%s1951_s3 + $0x390] sm:$0xff] }
  0x34   : > { %487 = vst [vmem:[%s1956_s4 + $0x1c0] sm:$0xff] %v486_v56  ;;  %v490_v58 = vld [vmem:[%s1951_s3 + $0x3a0] sm:$0xff]  ;;  %v492_v59 = vld [vmem:[%s1951_s3 + $0x3b0] sm:$0xff]  ;;  %489 = vst [vmem:[%s1956_s4 + $0x1c8] sm:$0xff] %v488_v57 }
  0x35   : > { %491 = vst [vmem:[%s1956_s4 + $0x1d0] sm:$0xff] %v490_v58  ;;  %493 = vst [vmem:[%s1956_s4 + $0x1d8] sm:$0xff] %v492_v59  ;;  %v494_v60 = vld [vmem:[%s1951_s3 + $0x3c0] sm:$0xff]  ;;  %v496_v61 = vld [vmem:[%s1951_s3 + $0x3d0] sm:$0xff] }
  0x36   : > { %v498_v62 = vld [vmem:[%s1951_s3 + $0x3e0] sm:$0xff]  ;;  %495 = vst [vmem:[%s1956_s4 + $0x1e0] sm:$0xff] %v494_v60  ;;  %497 = vst [vmem:[%s1956_s4 + $0x1e8] sm:$0xff] %v496_v61  ;;  %v500_v63 = vld [vmem:[%s1951_s3 + $0x3f0] sm:$0xff] }
  0x37   : > { %499 = vst [vmem:[%s1956_s4 + $0x1f0] sm:$0xff] %v498_v62  ;;  %v502_v0 = vld [vmem:[%s1951_s3 + $0x400] sm:$0xff]  ;;  %v504_v1 = vld [vmem:[%s1951_s3 + $0x410] sm:$0xff]  ;;  %501 = vst [vmem:[%s1956_s4 + $0x1f8] sm:$0xff] %v500_v63 }
  0x38   : > { %503 = vst [vmem:[%s1956_s4 + $0x200] sm:$0xff] %v502_v0  ;;  %505 = vst [vmem:[%s1956_s4 + $0x208] sm:$0xff] %v504_v1  ;;  %v506_v2 = vld [vmem:[%s1951_s3 + $0x420] sm:$0xff]  ;;  %v508_v3 = vld [vmem:[%s1951_s3 + $0x430] sm:$0xff] }
  0x39   : > { %v510_v4 = vld [vmem:[%s1951_s3 + $0x440] sm:$0xff]  ;;  %507 = vst [vmem:[%s1956_s4 + $0x210] sm:$0xff] %v506_v2  ;;  %509 = vst [vmem:[%s1956_s4 + $0x218] sm:$0xff] %v508_v3  ;;  %v512_v5 = vld [vmem:[%s1951_s3 + $0x450] sm:$0xff] }
  0x3a   : > { %511 = vst [vmem:[%s1956_s4 + $0x220] sm:$0xff] %v510_v4  ;;  %v514_v6 = vld [vmem:[%s1951_s3 + $0x460] sm:$0xff]  ;;  %v516_v7 = vld [vmem:[%s1951_s3 + $0x470] sm:$0xff]  ;;  %513 = vst [vmem:[%s1956_s4 + $0x228] sm:$0xff] %v512_v5 }
  0x3b   : > { %515 = vst [vmem:[%s1956_s4 + $0x230] sm:$0xff] %v514_v6  ;;  %517 = vst [vmem:[%s1956_s4 + $0x238] sm:$0xff] %v516_v7  ;;  %v518_v8 = vld [vmem:[%s1951_s3 + $0x480] sm:$0xff]  ;;  %v520_v9 = vld [vmem:[%s1951_s3 + $0x490] sm:$0xff] }
  0x3c   : > { %v522_v10 = vld [vmem:[%s1951_s3 + $0x4a0] sm:$0xff]  ;;  %519 = vst [vmem:[%s1956_s4 + $0x240] sm:$0xff] %v518_v8  ;;  %521 = vst [vmem:[%s1956_s4 + $0x248] sm:$0xff] %v520_v9  ;;  %v524_v11 = vld [vmem:[%s1951_s3 + $0x4b0] sm:$0xff] }
  0x3d   : > { %523 = vst [vmem:[%s1956_s4 + $0x250] sm:$0xff] %v522_v10  ;;  %v526_v12 = vld [vmem:[%s1951_s3 + $0x4c0] sm:$0xff]  ;;  %v528_v13 = vld [vmem:[%s1951_s3 + $0x4d0] sm:$0xff]  ;;  %525 = vst [vmem:[%s1956_s4 + $0x258] sm:$0xff] %v524_v11 }
  0x3e   : > { %527 = vst [vmem:[%s1956_s4 + $0x260] sm:$0xff] %v526_v12  ;;  %529 = vst [vmem:[%s1956_s4 + $0x268] sm:$0xff] %v528_v13  ;;  %v530_v14 = vld [vmem:[%s1951_s3 + $0x4e0] sm:$0xff]  ;;  %v532_v15 = vld [vmem:[%s1951_s3 + $0x4f0] sm:$0xff] }
  0x3f   : > { %v534_v16 = vld [vmem:[%s1951_s3 + $0x500] sm:$0xff]  ;;  %531 = vst [vmem:[%s1956_s4 + $0x270] sm:$0xff] %v530_v14  ;;  %533 = vst [vmem:[%s1956_s4 + $0x278] sm:$0xff] %v532_v15  ;;  %v536_v17 = vld [vmem:[%s1951_s3 + $0x510] sm:$0xff] }
  0x40   : > { %535 = vst [vmem:[%s1956_s4 + $0x280] sm:$0xff] %v534_v16  ;;  %v538_v18 = vld [vmem:[%s1951_s3 + $0x520] sm:$0xff]  ;;  %v540_v19 = vld [vmem:[%s1951_s3 + $0x530] sm:$0xff]  ;;  %537 = vst [vmem:[%s1956_s4 + $0x288] sm:$0xff] %v536_v17 }
  0x41   : > { %539 = vst [vmem:[%s1956_s4 + $0x290] sm:$0xff] %v538_v18  ;;  %541 = vst [vmem:[%s1956_s4 + $0x298] sm:$0xff] %v540_v19  ;;  %v542_v20 = vld [vmem:[%s1951_s3 + $0x540] sm:$0xff]  ;;  %v544_v21 = vld [vmem:[%s1951_s3 + $0x550] sm:$0xff] }
  0x42   : > { %v546_v22 = vld [vmem:[%s1951_s3 + $0x560] sm:$0xff]  ;;  %543 = vst [vmem:[%s1956_s4 + $0x2a0] sm:$0xff] %v542_v20  ;;  %545 = vst [vmem:[%s1956_s4 + $0x2a8] sm:$0xff] %v544_v21  ;;  %v548_v23 = vld [vmem:[%s1951_s3 + $0x570] sm:$0xff] }
  0x43   : > { %547 = vst [vmem:[%s1956_s4 + $0x2b0] sm:$0xff] %v546_v22  ;;  %v550_v24 = vld [vmem:[%s1951_s3 + $0x580] sm:$0xff]  ;;  %v552_v25 = vld [vmem:[%s1951_s3 + $0x590] sm:$0xff]  ;;  %549 = vst [vmem:[%s1956_s4 + $0x2b8] sm:$0xff] %v548_v23 }
  0x44   : > { %551 = vst [vmem:[%s1956_s4 + $0x2c0] sm:$0xff] %v550_v24  ;;  %553 = vst [vmem:[%s1956_s4 + $0x2c8] sm:$0xff] %v552_v25  ;;  %v554_v26 = vld [vmem:[%s1951_s3 + $0x5a0] sm:$0xff]  ;;  %v556_v27 = vld [vmem:[%s1951_s3 + $0x5b0] sm:$0xff] }
  0x45   : > { %v558_v28 = vld [vmem:[%s1951_s3 + $0x5c0] sm:$0xff]  ;;  %555 = vst [vmem:[%s1956_s4 + $0x2d0] sm:$0xff] %v554_v26  ;;  %557 = vst [vmem:[%s1956_s4 + $0x2d8] sm:$0xff] %v556_v27  ;;  %v560_v29 = vld [vmem:[%s1951_s3 + $0x5d0] sm:$0xff] }
  0x46   : > { %559 = vst [vmem:[%s1956_s4 + $0x2e0] sm:$0xff] %v558_v28  ;;  %v562_v30 = vld [vmem:[%s1951_s3 + $0x5e0] sm:$0xff]  ;;  %v564_v31 = vld [vmem:[%s1951_s3 + $0x5f0] sm:$0xff]  ;;  %561 = vst [vmem:[%s1956_s4 + $0x2e8] sm:$0xff] %v560_v29 }
  0x47   : > { %563 = vst [vmem:[%s1956_s4 + $0x2f0] sm:$0xff] %v562_v30  ;;  %565 = vst [vmem:[%s1956_s4 + $0x2f8] sm:$0xff] %v564_v31 }
  0x48 PF: > { %p1499_p7 = scmp.ge.s32.totalorder %s1873_s15, 1  ;;  %p570_p8 = scmp.lt.s32.totalorder %s1873_s15, 7 }
  0x4a   : > { %p571_p9 = pnand %p1499_p7, %p570_p8 }
  0x4b   : > { %s577_s5 = sand.u32 (!%p571_p9), 1, %s1849_s9   ;;  %s611_s6 = smul.u32 (!%p571_p9), 6, %s1857_s11 }
  0x4c   : > { %574 = sbr.rel (%p571_p9) target bundleno = 430 (0x1ae), region = 62  ;;  %s1501_s8 = sshll.u32 (!%p571_p9), %s1861_s12, 1 }
  0x4d   : > { %s1611_s7 = smul.u32 (!%p571_p9), 768, %s577_s5  ;;  %p614_p10 = scmp.lt.s32.totalorder (!%p571_p9), %s611_s6, 17 }
  0x4e   : > { %p626_p11 = scmp.lt.s32.totalorder (!%p571_p9), %s1501_s8, 3  ;;  %p1503_p12 = scmp.ne.s32.totalorder (!%p571_p9), %s1857_s11, 0 }
  0x4f   : > { %s2162_s9 = scalar_lea.vmem (!%p571_p9), [#allocation3], %s1611_s7 }
  0x51   : > { %s2310_s6 = smov (!%p614_p10, %s611_s6), 17  ;;  %s2312_s8 = smov (!%p626_p11, %s1501_s8), 3 }
  0x52   : > { %s1500_s18 = sshll.u32 %s2310_s6, 2  ;;  %s1502_s23 = sshll.u32 %s2312_s8, 3 }
  0x53   : > { %s2155_s21 = scalar_lea.vmem %s2294_s0, %s1500_s18  ;;  %s2160_s26 = scalar_lea.vmem %s2296_s2, %s1502_s23 }
  0x54   : > { %636 = sbr.rel (%p1503_p12) target bundleno = 91 (0x5b), region = 70 }
  0x59   : > { %v1875_v32 = vmov 0.0  }
  0x5a   : > { %637 = vst [vmem:[#allocation2] sm:$0xff] %v1875_v32  ;;  %638 = vst [vmem:[#allocation2 + $0x8] sm:$0xff] %v1875_v32 }
  0x5b PF: > { %v1669_v33 = vld [vmem:[%s2162_s9 + $0x74] ss:$8 sps:$4 sm:$0xff]   ;;  %v1673_v35 = vld [vmem:[%s2162_s9 + $0x70] ss:$8 sps:$4 sm:$0xff]   ;;  %v1675_v37 = vld [vmem:[%s2162_s9 + $0x64] ss:$8 sps:$4 sm:$0xff]  }
  0x5c   : > { %v1671_v34 = vld [vmem:[%s2162_s9 + $0x174] ss:$8 sps:$4 sm:$0xff]   ;;  %1241 = vmatprep.subr.bf16.mxu0 %v1669_v33  ;;  %v1674_v36 = vld [vmem:[%s2162_s9 + $0x170] ss:$8 sps:$4 sm:$0xff]   ;;  %v1677_v38 = vld [vmem:[%s2162_s9 + $0x164] ss:$8 sps:$4 sm:$0xff]  }
  0x5d   : > { %1282 = vmatprep.subr.bf16.mxu1 %v1671_v34  ;;  %1242 = vmatpush1.bf16.msra.mxu0 %v1673_v35  ;;  %v1679_v39 = vld [vmem:[%s2162_s9 + $0x60] ss:$8 sps:$4 sm:$0xff]   ;;  %v1681_v41 = vld [vmem:[%s2162_s9 + $0x54] ss:$8 sps:$4 sm:$0xff]   ;;  %v1685_v43 = vld [vmem:[%s2162_s9 + $0x50] ss:$8 sps:$4 sm:$0xff]  }
  0x5e   : > { %1283 = vmatpush1.bf16.msra.mxu1 %v1674_v36  ;;  %1243 = vmatprep.subr.bf16.mxu0 %v1675_v37  ;;  %v1680_v40 = vld [vmem:[%s2162_s9 + $0x160] ss:$8 sps:$4 sm:$0xff]   ;;  %v1683_v42 = vld [vmem:[%s2162_s9 + $0x154] ss:$8 sps:$4 sm:$0xff]   ;;  %v1686_v44 = vld [vmem:[%s2162_s9 + $0x150] ss:$8 sps:$4 sm:$0xff]  }
  0x5f   : > { %1284 = vmatprep.subr.bf16.mxu1 %v1677_v38  ;;  %v1687_v45 = vld [vmem:[%s2162_s9 + $0x44] ss:$8 sps:$4 sm:$0xff]   ;;  %v1691_v47 = vld [vmem:[%s2162_s9 + $0x40] ss:$8 sps:$4 sm:$0xff]   ;;  %v1693_v49 = vld [vmem:[%s2162_s9 + $0x34] ss:$8 sps:$4 sm:$0xff]  }
  0x60   : > { %v1689_v46 = vld [vmem:[%s2162_s9 + $0x144] ss:$8 sps:$4 sm:$0xff]   ;;  %v1692_v48 = vld [vmem:[%s2162_s9 + $0x140] ss:$8 sps:$4 sm:$0xff]   ;;  %v1695_v50 = vld [vmem:[%s2162_s9 + $0x134] ss:$8 sps:$4 sm:$0xff]  }
  0x61   : > { %1244 = vmatpush1.bf16.msra.mxu0 %v1679_v39  ;;  %v1697_v51 = vld [vmem:[%s2162_s9 + $0x30] ss:$8 sps:$4 sm:$0xff]   ;;  %v1699_v53 = vld [vmem:[%s2162_s9 + $0x24] ss:$8 sps:$4 sm:$0xff]   ;;  %v1703_v55 = vld [vmem:[%s2162_s9 + $0x20] ss:$8 sps:$4 sm:$0xff]  }
  0x62   : > { %1285 = vmatpush1.bf16.msra.mxu1 %v1680_v40  ;;  %1245 = vmatprep.subr.bf16.mxu0 %v1681_v41  ;;  %v1698_v52 = vld [vmem:[%s2162_s9 + $0x130] ss:$8 sps:$4 sm:$0xff]   ;;  %v1701_v54 = vld [vmem:[%s2162_s9 + $0x124] ss:$8 sps:$4 sm:$0xff]   ;;  %v1704_v56 = vld [vmem:[%s2162_s9 + $0x120] ss:$8 sps:$4 sm:$0xff]  }
  0x63   : > { %1286 = vmatprep.subr.bf16.mxu1 %v1683_v42  ;;  %v1705_v57 = vld [vmem:[%s2162_s9 + $0x14] ss:$8 sps:$4 sm:$0xff]   ;;  %v1709_v59 = vld [vmem:[%s2162_s9 + $0x10] ss:$8 sps:$4 sm:$0xff]   ;;  %v1711_v61 = vld [vmem:[%s2162_s9 + $0x4] ss:$8 sps:$4 sm:$0xff]  }
  0x64   : > { %v1707_v58 = vld [vmem:[%s2162_s9 + $0x114] ss:$8 sps:$4 sm:$0xff]   ;;  %v1710_v60 = vld [vmem:[%s2162_s9 + $0x110] ss:$8 sps:$4 sm:$0xff]   ;;  %v1713_v62 = vld [vmem:[%s2162_s9 + $0x104] ss:$8 sps:$4 sm:$0xff]  }
  0x65   : > { %1246 = vmatpush1.bf16.msra.mxu0 %v1685_v43  ;;  %v1715_v63 = vld [vmem:[%s2162_s9] ss:$8 sps:$4 sm:$0xff]   ;;  %v1717_v1 = vld [vmem:[%s2162_s9 + $0xf4] ss:$8 sps:$4 sm:$0xff]   ;;  %v1721_v3 = vld [vmem:[%s2162_s9 + $0xf0] ss:$8 sps:$4 sm:$0xff]  }
  0x66   : > { %1287 = vmatpush1.bf16.msra.mxu1 %v1686_v44  ;;  %1247 = vmatprep.subr.bf16.mxu0 %v1687_v45  ;;  %v1716_v0 = vld [vmem:[%s2162_s9 + $0x100] ss:$8 sps:$4 sm:$0xff]   ;;  %v1719_v2 = vld [vmem:[%s2162_s9 + $0x1f4] ss:$8 sps:$4 sm:$0xff]   ;;  %v1722_v4 = vld [vmem:[%s2162_s9 + $0x1f0] ss:$8 sps:$4 sm:$0xff]  }
  0x67   : > { %1288 = vmatprep.subr.bf16.mxu1 %v1689_v46  ;;  %v1723_v5 = vld [vmem:[%s2162_s9 + $0xe4] ss:$8 sps:$4 sm:$0xff]   ;;  %v1727_v7 = vld [vmem:[%s2162_s9 + $0xe0] ss:$8 sps:$4 sm:$0xff]   ;;  %v1729_v9 = vld [vmem:[%s2162_s9 + $0xd4] ss:$8 sps:$4 sm:$0xff]  }
  0x68   : > { %v1725_v6 = vld [vmem:[%s2162_s9 + $0x1e4] ss:$8 sps:$4 sm:$0xff]   ;;  %v1728_v8 = vld [vmem:[%s2162_s9 + $0x1e0] ss:$8 sps:$4 sm:$0xff]   ;;  %v1731_v10 = vld [vmem:[%s2162_s9 + $0x1d4] ss:$8 sps:$4 sm:$0xff]  }
  0x69   : > { %1248 = vmatpush1.bf16.msra.mxu0 %v1691_v47  ;;  %v1733_v11 = vld [vmem:[%s2162_s9 + $0xd0] ss:$8 sps:$4 sm:$0xff]   ;;  %v1735_v13 = vld [vmem:[%s2162_s9 + $0xc4] ss:$8 sps:$4 sm:$0xff]   ;;  %v1739_v18 = vld [vmem:[%s2162_s9 + $0xc0] ss:$8 sps:$4 sm:$0xff]  }
  0x6a   : > { %1289 = vmatpush1.bf16.msra.mxu1 %v1692_v48  ;;  %1249 = vmatprep.subr.bf16.mxu0 %v1693_v49  ;;  %v1734_v12 = vld [vmem:[%s2162_s9 + $0x1d0] ss:$8 sps:$4 sm:$0xff]   ;;  %v1737_v14 = vld [vmem:[%s2162_s9 + $0x1c4] ss:$8 sps:$4 sm:$0xff]   ;;  %v1740_v19 = vld [vmem:[%s2162_s9 + $0x1c0] ss:$8 sps:$4 sm:$0xff]  }
  0x6b   : > { %1290 = vmatprep.subr.bf16.mxu1 %v1695_v50  ;;  %v641_v15 = vld [vmem:[%s2155_s21] sm:$0xff]  ;;  %v642_v17 = vld [vmem:[%s2155_s21 + $0x8] sm:$0xff]  ;;  %v1747_v25 = vld [vmem:[%s2162_s9 + $0xa4] ss:$8 sps:$4 sm:$0xff]   ;;  %p1606_p13 = scmp.ne.s32.totalorder %s1857_s11, 2 }
  0x6c   : > { %v1505_v16 = vcombine.high %v641_v15, %v641_v15  ;;  %v1507_v20 = vcombine.high %v642_v17, %v642_v17  ;;  %v1741_v21 = vld [vmem:[%s2162_s9 + $0xb4] ss:$8 sps:$4 sm:$0xff]   ;;  %v1745_v23 = vld [vmem:[%s2162_s9 + $0xb0] ss:$8 sps:$4 sm:$0xff]   ;;  %v1749_v26 = vld [vmem:[%s2162_s9 + $0x1a4] ss:$8 sps:$4 sm:$0xff]   ;;  %v1504_v38 = vcombine.low %v641_v15, %v641_v15  ;;  %v1506_v39 = vcombine.low %v642_v17, %v642_v17 }
  0x6d   : > { %1250 = vmatpush1.bf16.msra.mxu0 %v1697_v51  ;;  %v1743_v22 = vld [vmem:[%s2162_s9 + $0x1b4] ss:$8 sps:$4 sm:$0xff]   ;;  %v1746_v24 = vld [vmem:[%s2162_s9 + $0x1b0] ss:$8 sps:$4 sm:$0xff]   ;;  %v1751_v27 = vld [vmem:[%s2162_s9 + $0xa0] ss:$8 sps:$4 sm:$0xff]  }
  0x6e   : > { %1291 = vmatpush1.bf16.msra.mxu1 %v1698_v52  ;;  %1251 = vmatprep.subr.bf16.mxu0 %v1699_v53  ;;  %v1752_v28 = vld [vmem:[%s2162_s9 + $0x1a0] ss:$8 sps:$4 sm:$0xff]   ;;  %v1753_v29 = vld [vmem:[%s2162_s9 + $0x94] ss:$8 sps:$4 sm:$0xff]   ;;  %v1757_v31 = vld [vmem:[%s2162_s9 + $0x90] ss:$8 sps:$4 sm:$0xff]  }
  0x6f   : > { %1292 = vmatprep.subr.bf16.mxu1 %v1701_v54  ;;  %1273 = vmatprep.mubr.bf16.mxu0 %v1505_v16  ;;  %v1755_v30 = vld [vmem:[%s2162_s9 + $0x194] ss:$8 sps:$4 sm:$0xff]   ;;  %v1758_v32 = vld [vmem:[%s2162_s9 + $0x190] ss:$8 sps:$4 sm:$0xff]   ;;  %v1759_v33 = vld [vmem:[%s2162_s9 + $0x84] ss:$8 sps:$4 sm:$0xff]  }
  0x70   : > { %1314 = vmatprep.mubr.bf16.mxu1 %v1507_v20  ;;  %v1761_v34 = vld [vmem:[%s2162_s9 + $0x184] ss:$8 sps:$4 sm:$0xff]   ;;  %v1763_v35 = vld [vmem:[%s2162_s9 + $0x80] ss:$8 sps:$4 sm:$0xff]   ;;  %v1771_v37 = vld [vmem:[%s2162_s9 + $0x274] ss:$8 sps:$4 sm:$0xff]  }
  0x71   : > { %1252 = vmatpush1.bf16.msra.mxu0 %v1703_v55  ;;  %v1764_v36 = vld [vmem:[%s2162_s9 + $0x180] ss:$8 sps:$4 sm:$0xff]   ;;  %v1769_v40 = vld [vmem:[%s2162_s9 + $0x270] ss:$8 sps:$4 sm:$0xff]   ;;  %v1774_v42 = vld [vmem:[%s2162_s9 + $0x264] ss:$8 sps:$4 sm:$0xff]  }
  0x72   : > { %1293 = vmatpush1.bf16.msra.mxu1 %v1704_v56  ;;  %1253 = vmatprep.subr.bf16.mxu0 %v1705_v57  ;;  %v2234_v41 = vld [vmem:[%s2155_s21 + $0x10] sm:$0xff]  ;;  %v1777_v45 = vld [vmem:[%s2162_s9 + $0x254] ss:$8 sps:$4 sm:$0xff]   ;;  %v1775_v46 = vld [vmem:[%s2162_s9 + $0x250] ss:$8 sps:$4 sm:$0xff]  }
  0x73   : > { %1294 = vmatprep.subr.bf16.mxu1 %v1707_v58  ;;  %v1509_v43 = vcombine.high %v2234_v41, %v2234_v41  ;;  %v1772_v44 = vld [vmem:[%s2162_s9 + $0x260] ss:$8 sps:$4 sm:$0xff]   ;;  %v1780_v47 = vld [vmem:[%s2162_s9 + $0x244] ss:$8 sps:$4 sm:$0xff]   ;;  %v1783_v49 = vld [vmem:[%s2162_s9 + $0x234] ss:$8 sps:$4 sm:$0xff]  }
  0x74   : > { %v1778_v48 = vld [vmem:[%s2162_s9 + $0x240] ss:$8 sps:$4 sm:$0xff]   ;;  %v1781_v50 = vld [vmem:[%s2162_s9 + $0x230] ss:$8 sps:$4 sm:$0xff]   ;;  %v1786_v51 = vld [vmem:[%s2162_s9 + $0x224] ss:$8 sps:$4 sm:$0xff]  }
  0x75   : > { %1254 = vmatpush1.bf16.msra.mxu0 %v1709_v59  ;;  %v1784_v52 = vld [vmem:[%s2162_s9 + $0x220] ss:$8 sps:$4 sm:$0xff]   ;;  %v1789_v53 = vld [vmem:[%s2162_s9 + $0x214] ss:$8 sps:$4 sm:$0xff]   ;;  %v1787_v54 = vld [vmem:[%s2162_s9 + $0x210] ss:$8 sps:$4 sm:$0xff]  }
  0x76   : > { %1295 = vmatpush1.bf16.msra.mxu1 %v1710_v60  ;;  %1255 = vmatprep.subr.bf16.mxu0 %v1711_v61  ;;  %v1792_v55 = vld [vmem:[%s2162_s9 + $0x204] ss:$8 sps:$4 sm:$0xff]   ;;  %v1790_v56 = vld [vmem:[%s2162_s9 + $0x200] ss:$8 sps:$4 sm:$0xff]   ;;  %v1795_v57 = vld [vmem:[%s2162_s9 + $0x2f4] ss:$8 sps:$4 sm:$0xff]  }
  0x77   : > { %1296 = vmatprep.subr.bf16.mxu1 %v1713_v62  ;;  %v1793_v58 = vld [vmem:[%s2162_s9 + $0x2f0] ss:$8 sps:$4 sm:$0xff]   ;;  %v1798_v59 = vld [vmem:[%s2162_s9 + $0x2e4] ss:$8 sps:$4 sm:$0xff]   ;;  %v1796_v60 = vld [vmem:[%s2162_s9 + $0x2e0] ss:$8 sps:$4 sm:$0xff]  }
  0x78   : > { %v1801_v61 = vld [vmem:[%s2162_s9 + $0x2d4] ss:$8 sps:$4 sm:$0xff]   ;;  %v1799_v62 = vld [vmem:[%s2162_s9 + $0x2d0] ss:$8 sps:$4 sm:$0xff]  }
  0x79   : > { %1256 = vmatpush1.bf16.msra.mxu0 %v1715_v63  ;;  %v1804_v63 = vld [vmem:[%s2162_s9 + $0x2c4] ss:$8 sps:$4 sm:$0xff]  }
  0x7a   : > { %1297 = vmatpush1.bf16.msra.mxu1 %v1716_v0  ;;  %1257 = vmatprep.subr.bf16.mxu0 %v1717_v1  ;;  %v1802_v0 = vld [vmem:[%s2162_s9 + $0x2c0] ss:$8 sps:$4 sm:$0xff]   ;;  %v1807_v1 = vld [vmem:[%s2162_s9 + $0x2b4] ss:$8 sps:$4 sm:$0xff]  }
  0x7b   : > { %1298 = vmatprep.subr.bf16.mxu1 %v1719_v2  ;;  %v1805_v2 = vld [vmem:[%s2162_s9 + $0x2b0] ss:$8 sps:$4 sm:$0xff]  }
  0x7d   : > { %1258 = vmatpush2.bf16.msra.mxu0 %v1721_v3  ;;  %v1810_v3 = vld [vmem:[%s2162_s9 + $0x2a4] ss:$8 sps:$4 sm:$0xff]  }
  0x7e   : > { %1299 = vmatpush2.bf16.msra.mxu1 %v1722_v4  ;;  %1259 = vmatprep.subr.bf16.mxu0 %v1723_v5  ;;  %v1808_v4 = vld [vmem:[%s2162_s9 + $0x2a0] ss:$8 sps:$4 sm:$0xff]   ;;  %v1813_v5 = vld [vmem:[%s2162_s9 + $0x294] ss:$8 sps:$4 sm:$0xff]  }
  0x7f   : > { %1300 = vmatprep.subr.bf16.mxu1 %v1725_v6  ;;  %v1811_v6 = vld [vmem:[%s2162_s9 + $0x290] ss:$8 sps:$4 sm:$0xff]  }
  0x81   : > { %1260 = vmatpush2.bf16.msra.mxu0 %v1727_v7  ;;  %v1816_v7 = vld [vmem:[%s2162_s9 + $0x284] ss:$8 sps:$4 sm:$0xff]  }
  0x82   : > { %1301 = vmatpush2.bf16.msra.mxu1 %v1728_v8  ;;  %1261 = vmatprep.subr.bf16.mxu0 %v1729_v9  ;;  %v1814_v8 = vld [vmem:[%s2162_s9 + $0x280] ss:$8 sps:$4 sm:$0xff]   ;;  %v1508_v9 = vcombine.low %v2234_v41, %v2234_v41 }
  0x83   : > { %1302 = vmatprep.subr.bf16.mxu1 %v1731_v10 }
  0x85   : > { %1262 = vmatpush2.bf16.msra.mxu0 %v1733_v11 }
  0x86   : > { %1303 = vmatpush2.bf16.msra.mxu1 %v1734_v12  ;;  %1263 = vmatprep.subr.bf16.mxu0 %v1735_v13 }
  0x87   : > { %1304 = vmatprep.subr.bf16.mxu1 %v1737_v14 }
  0x89   : > { %1264 = vmatpush2.bf16.msra.mxu0 %v1739_v18 }
  0x8a   : > { %1305 = vmatpush2.bf16.msra.mxu1 %v1740_v19  ;;  %1265 = vmatprep.subr.bf16.mxu0 %v1741_v21  ;;  %v639_v19 = vld [vmem:[#allocation2] sm:$0xff] }
  0x8b   : > { %1306 = vmatprep.subr.bf16.mxu1 %v1743_v22 }
  0x8d   : > { %1266 = vmatpush2.bf16.msra.mxu0 %v1745_v23  ;;  %v640_v23 = vld [vmem:[#allocation2 + $0x8] sm:$0xff] }
  0x8e   : > { %1307 = vmatpush2.bf16.msra.mxu1 %v1746_v24  ;;  %1267 = vmatprep.subr.bf16.mxu0 %v1747_v25 }
  0x8f   : > { %1308 = vmatprep.subr.bf16.mxu1 %v1749_v26 }
  0x91   : > { %1268 = vmatpush2.bf16.msra.mxu0 %v1751_v27 }
  0x92   : > { %1309 = vmatpush2.bf16.msra.mxu1 %v1752_v28  ;;  %1269 = vmatprep.subr.bf16.mxu0 %v1753_v29 }
  0x93   : > { %1310 = vmatprep.subr.bf16.mxu1 %v1755_v30 }
  0x95   : > { %1270 = vmatpush2.bf16.msra.mxu0 %v1757_v31 }
  0x96   : > { %1311 = vmatpush2.bf16.msra.mxu1 %v1758_v32  ;;  %1271 = vmatprep.subr.bf16.mxu0 %v1759_v33 }
  0x97   : > { %1312 = vmatprep.subr.bf16.mxu1 %v1761_v34 }
  0x99   : > { %1272 = vmatpush2.bf16.msra.mxu0 %v1763_v35 }
  0x9a   : > { %1313 = vmatpush2.bf16.msra.mxu1 %v1764_v36  ;;  %1323 = vmatprep.subr.bf16.mxu0 %v1771_v37 }
  0x9c   : > { %1274 = vmatmul.mubr.bf16.vlgmr.msra.gmra.mxu0 %v1504_v38 }
  0x9d   : > { %1315 = vmatmul.mubr.bf16.vlgmr.msra.gmra.mxu1 %v1506_v39  ;;  %1324 = vmatpush1.bf16.msra.mxu0 %v1769_v40 }
  0x9e   : > { %1355 = vmatprep.mubr.bf16.mxu0 %v1509_v43  ;;  %1325 = vmatprep.subr.bf16.mxu0 %v1774_v42 }
  0xa1   : > { %1326 = vmatpush1.bf16.msra.mxu0 %v1772_v44 }
  0xa2   : > { %1327 = vmatprep.subr.bf16.mxu0 %v1777_v45 }
  0xa5   : > { %1328 = vmatpush1.bf16.msra.mxu0 %v1775_v46 }
  0xa6   : > { %1329 = vmatprep.subr.bf16.mxu0 %v1780_v47 }
  0xa9   : > { %1330 = vmatpush1.bf16.msra.mxu0 %v1778_v48 }
  0xaa   : > { %1331 = vmatprep.subr.bf16.mxu0 %v1783_v49 }
  0xad   : > { %1332 = vmatpush1.bf16.msra.mxu0 %v1781_v50 }
  0xae   : > { %1333 = vmatprep.subr.bf16.mxu0 %v1786_v51 }
  0xb1   : > { %1334 = vmatpush1.bf16.msra.mxu0 %v1784_v52 }
  0xb2   : > { %1335 = vmatprep.subr.bf16.mxu0 %v1789_v53 }
  0xb5   : > { %1336 = vmatpush1.bf16.msra.mxu0 %v1787_v54 }
  0xb6   : > { %1337 = vmatprep.subr.bf16.mxu0 %v1792_v55 }
  0xb9   : > { %1338 = vmatpush1.bf16.msra.mxu0 %v1790_v56 }
  0xba   : > { %1339 = vmatprep.subr.bf16.mxu0 %v1795_v57 }
  0xbd   : > { %1340 = vmatpush2.bf16.msra.mxu0 %v1793_v58 }
  0xbe   : > { %1341 = vmatprep.subr.bf16.mxu0 %v1798_v59 }
  0xc1   : > { %1342 = vmatpush2.bf16.msra.mxu0 %v1796_v60 }
  0xc2   : > { %1343 = vmatprep.subr.bf16.mxu0 %v1801_v61 }
  0xc5   : > { %1344 = vmatpush2.bf16.msra.mxu0 %v1799_v62 }
  0xc6   : > { %1345 = vmatprep.subr.bf16.mxu0 %v1804_v63 }
  0xc9   : > { %1346 = vmatpush2.bf16.msra.mxu0 %v1802_v0 }
  0xca   : > { %1347 = vmatprep.subr.bf16.mxu0 %v1807_v1 }
  0xcd   : > { %1348 = vmatpush2.bf16.msra.mxu0 %v1805_v2 }
  0xce   : > { %1349 = vmatprep.subr.bf16.mxu0 %v1810_v3 }
  0xd1   : > { %1350 = vmatpush2.bf16.msra.mxu0 %v1808_v4 }
  0xd2   : > { %1351 = vmatprep.subr.bf16.mxu0 %v1813_v5 }
  0xd5   : > { %1352 = vmatpush2.bf16.msra.mxu0 %v1811_v6 }
  0xd6   : > { %1353 = vmatprep.subr.bf16.mxu0 %v1816_v7 }
  0xd9   : > { %1354 = vmatpush2.bf16.msra.mxu0 %v1814_v8 }
  0xdc   : > { %1356 = vmatmul.mubr.bf16.vlgmr.msra.gmra.mxu0 %v1508_v9 }
 0x15c   : > { %v1275_v10 = vpop.f32.mrf.mxu0 }
 0x15d   : > { %v1316_v11 = vpop.f32.mrf.mxu1 }
 0x15e   : > { %v1277_v12 = vpop.f32.mrf.mxu0  ;;  %v1317_v18 = vadd.f32 %v1316_v11, %v1275_v10 }
 0x15f   : > { %v1318_v13 = vpop.f32.mrf.mxu1 }
 0x160   : > { %v1279_v14 = vpop.f32.mrf.mxu0  ;;  %v1319_v21 = vadd.f32 %v1318_v13, %v1277_v12 }
 0x161   : > { %v1320_v15 = vpop.f32.mrf.mxu1 }
 0x162   : > { %v1280_v16 = vpop.f32.mrf.mxu0 }
 0x163   : > { %v1321_v17 = vpop.f32.mrf.mxu1 }
 0x19c   : > { %v1357_v20 = vpop.f32.mrf.mxu0 }
 0x19d   : > { %v1358_v22 = vadd.f32 %v1357_v20, %v1317_v18 }
 0x19e   : > { %v1359_v24 = vpop.f32.mrf.mxu0 }
 0x19f   : > { %v1364_v25 = vadd.f32 %v1358_v22, %v639_v19  ;;  %v1360_v26 = vadd.f32 %v1359_v24, %v1319_v21  ;;  %1371 = sbr.rel (%p1606_p13) target bundleno = 430 (0x1ae), region = 74 }
 0x1a0   : > { %v1361_v27 = vpop.f32.mrf.mxu0 }
 0x1a1   : > { %1366 = vst [vmem:[#allocation2] sm:$0xff] %v1364_v25  ;;  %v1365_v28 = vadd.f32 %v1360_v26, %v640_v23 }
 0x1a2   : > { %v1362_v29 = vpop.f32.mrf.mxu0 }
 0x1a3   : > { %1367 = vst [vmem:[#allocation2 + $0x8] sm:$0xff] %v1365_v28 }
 0x1a8   : > { %v1372_v30 = vld [vmem:[#allocation2] sm:$0xff] }
 0x1a9   : > { %v1374_v32 = vmax.f32 %v1372_v30, 0.0 }
 0x1aa   : > { %v1373_v31 = vld [vmem:[#allocation2 + $0x8] sm:$0xff] }
 0x1ab   : > { %v1375_v33 = vmax.f32 %v1373_v31, 0.0  ;;  %1376 = vst [vmem:[%s2160_s26] sm:$0xff] %v1374_v32 }
 0x1ad   : > { %1377 = vst [vmem:[%s2160_s26 + $0x8] sm:$0xff] %v1375_v33 }
 0x1ae PF: > { %s12_s15 = sadd.s32 1, %s1873_s15   ;;  %s2297_s9 = smov %s1853_s10 }
 0x1af   : > { %p9_p0 = scmp.ge.s32.totalorder %s12_s15, 8   ;;  %s2298_s10 = smov %s1942_s22 }
 0x1b0   : > { %s2299_s11 = smov %s1865_s13  ;;  %s2300_s12 = smov %s1869_s14 }
 0x1b1   : > { %s2301_s13 = smov %s2304_s16  ;;  %s2302_s14 = smov %s2308_s17 }
 0x1b2   :  { %11 = sbr.rel (!%p9_p0) target bundleno = 4 (0x4), region = 112 }

// kernel: resnet_forward.25
= control target key start
LH: loop header
LB: loop body
LE: loop exit
PB: predicated region body
PF: predicated region fallthrough
CT: control target
= control target key end

     0   :  { %s945_s9 = smov 0   ;;  %s947_s10 = smov 0   ;;  %s1121_s0 = inlined_call_operand.vmem [shape: bf16[8,256], index: 0, kind: input, shape index: {}]   ;;  %s1122_s1 = inlined_call_operand.vmem [shape: bf16[256,512], index: 1, kind: input, shape index: {}]   ;;  %s1123_s2 = inlined_call_operand.vmem [shape: f32[8,512], index: 2, kind: output, shape index: {}]  }
   0x1   :  { %s949_s11 = smov 0   ;;  %s951_s12 = smov 0  }
   0x2   :  { %s953_s13 = smov 0  }
   0x3 LB: > { %s27_s14 = sadd.s32 1, %s924_s12  ;;  %p75_p1 = scmp.ne.s32.totalorder %s916_s10, %s912_s9  ;;  %s928_s13 = sphi %s953_s13, %s12_s13   ;;  %s924_s12 = sphi %s951_s12, %s1127_s12   ;;  %s920_s11 = sphi %s949_s11, %s1126_s11   ;;  %s916_s10 = sphi %s947_s10, %s1125_s10   ;;  %s912_s9 = sphi %s945_s9, %s1124_s9  }
   0x4   : > { %p29_p0 = scmp.ge.s32.totalorder %s27_s14, 2  ;;  %p76_p2 = scmp.eq.s32.totalorder %s928_s13, 0 }
   0x5   : > { %s68_s16 = sadd.s32 1, %s916_s10  ;;  %p755_p5 = scmp.ge.s32.totalorder %s928_s13, 2 }
   0x6   : > { %s1129_s14 = smov (%p29_p0, %s27_s14), 0  ;;  %p77_p3 = por %p76_p2, %p75_p1 }
   0x7   : > { %s64_s15 = ssub.s32 %s924_s12, %s1129_s14  ;;  %142 = sbr.rel (%p755_p5) target bundleno = 32 (0x20), region = 20 }
   0x8   : > { %p66_p4 = scmp.eq.s32.totalorder %s64_s15, 0 }
   0xa   : > { %s980_s17 = scalar_select %p66_p4, %s916_s10, %s68_s16  }
   0xc   : > { %145 = sbr.rel (!%p77_p3) target bundleno = 32 (0x20), region = 24  ;;  %s147_s18 = sand.u32 (%p77_p3), 1, %s916_s10  }
   0xd   : > { %s799_s19 = sshll.u32 (%p77_p3), %s924_s12, 3  ;;  %s756_s20 = sshll.u32 (%p77_p3), %s147_s18, 8 }
   0xe   : > { %s988_s23 = scalar_lea.vmem (%p77_p3), %s1122_s1, %s799_s19  ;;  %s993_s24 = scalar_lea.vmem (%p77_p3), [#allocation3], %s756_s20 }
   0xf   : > { %v246_v0 = vld [vmem:[%s988_s23] sm:$0xff] (%p77_p3)  ;;  %v248_v1 = vld [vmem:[%s988_s23 + $0x10] sm:$0xff] (%p77_p3) }
  0x10   : > { %v250_v2 = vld [vmem:[%s988_s23 + $0x20] sm:$0xff] (%p77_p3)  ;;  %247 = vst [vmem:[%s993_s24] sm:$0xff] (%p77_p3), %v246_v0  ;;  %249 = vst [vmem:[%s993_s24 + $0x8] sm:$0xff] (%p77_p3), %v248_v1  ;;  %v252_v3 = vld [vmem:[%s988_s23 + $0x30] sm:$0xff] (%p77_p3) }
  0x11   : > { %251 = vst [vmem:[%s993_s24 + $0x10] sm:$0xff] %v250_v2  ;;  %v254_v4 = vld [vmem:[%s988_s23 + $0x40] sm:$0xff]  ;;  %v256_v5 = vld [vmem:[%s988_s23 + $0x50] sm:$0xff]  ;;  %253 = vst [vmem:[%s993_s24 + $0x18] sm:$0xff] %v252_v3 }
  0x12   : > { %255 = vst [vmem:[%s993_s24 + $0x20] sm:$0xff] %v254_v4  ;;  %257 = vst [vmem:[%s993_s24 + $0x28] sm:$0xff] %v256_v5  ;;  %v258_v6 = vld [vmem:[%s988_s23 + $0x60] sm:$0xff]  ;;  %v260_v7 = vld [vmem:[%s988_s23 + $0x70] sm:$0xff] }
  0x13   : > { %v262_v8 = vld [vmem:[%s988_s23 + $0x80] sm:$0xff]  ;;  %259 = vst [vmem:[%s993_s24 + $0x30] sm:$0xff] %v258_v6  ;;  %261 = vst [vmem:[%s993_s24 + $0x38] sm:$0xff] %v260_v7  ;;  %v264_v9 = vld [vmem:[%s988_s23 + $0x90] sm:$0xff] }
  0x14   : > { %263 = vst [vmem:[%s993_s24 + $0x40] sm:$0xff] %v262_v8  ;;  %v266_v10 = vld [vmem:[%s988_s23 + $0xa0] sm:$0xff]  ;;  %v268_v11 = vld [vmem:[%s988_s23 + $0xb0] sm:$0xff]  ;;  %265 = vst [vmem:[%s993_s24 + $0x48] sm:$0xff] %v264_v9 }
  0x15   : > { %267 = vst [vmem:[%s993_s24 + $0x50] sm:$0xff] %v266_v10  ;;  %269 = vst [vmem:[%s993_s24 + $0x58] sm:$0xff] %v268_v11  ;;  %v270_v12 = vld [vmem:[%s988_s23 + $0xc0] sm:$0xff]  ;;  %v272_v13 = vld [vmem:[%s988_s23 + $0xd0] sm:$0xff] }
  0x16   : > { %v274_v14 = vld [vmem:[%s988_s23 + $0xe0] sm:$0xff]  ;;  %271 = vst [vmem:[%s993_s24 + $0x60] sm:$0xff] %v270_v12  ;;  %273 = vst [vmem:[%s993_s24 + $0x68] sm:$0xff] %v272_v13  ;;  %v276_v15 = vld [vmem:[%s988_s23 + $0xf0] sm:$0xff] }
  0x17   : > { %275 = vst [vmem:[%s993_s24 + $0x70] sm:$0xff] %v274_v14  ;;  %v278_v16 = vld [vmem:[%s988_s23 + $0x100] sm:$0xff]  ;;  %v280_v17 = vld [vmem:[%s988_s23 + $0x110] sm:$0xff]  ;;  %277 = vst [vmem:[%s993_s24 + $0x78] sm:$0xff] %v276_v15 }
  0x18   : > { %279 = vst [vmem:[%s993_s24 + $0x80] sm:$0xff] %v278_v16  ;;  %281 = vst [vmem:[%s993_s24 + $0x88] sm:$0xff] %v280_v17  ;;  %v282_v18 = vld [vmem:[%s988_s23 + $0x120] sm:$0xff]  ;;  %v284_v19 = vld [vmem:[%s988_s23 + $0x130] sm:$0xff] }
  0x19   : > { %v286_v20 = vld [vmem:[%s988_s23 + $0x140] sm:$0xff]  ;;  %283 = vst [vmem:[%s993_s24 + $0x90] sm:$0xff] %v282_v18  ;;  %285 = vst [vmem:[%s993_s24 + $0x98] sm:$0xff] %v284_v19  ;;  %v288_v21 = vld [vmem:[%s988_s23 + $0x150] sm:$0xff] }
  0x1a   : > { %287 = vst [vmem:[%s993_s24 + $0xa0] sm:$0xff] %v286_v20  ;;  %v290_v22 = vld [vmem:[%s988_s23 + $0x160] sm:$0xff]  ;;  %v292_v23 = vld [vmem:[%s988_s23 + $0x170] sm:$0xff]  ;;  %289 = vst [vmem:[%s993_s24 + $0xa8] sm:$0xff] %v288_v21 }
  0x1b   : > { %291 = vst [vmem:[%s993_s24 + $0xb0] sm:$0xff] %v290_v22  ;;  %293 = vst [vmem:[%s993_s24 + $0xb8] sm:$0xff] %v292_v23  ;;  %v294_v24 = vld [vmem:[%s988_s23 + $0x180] sm:$0xff]  ;;  %v296_v25 = vld [vmem:[%s988_s23 + $0x190] sm:$0xff] }
  0x1c   : > { %v298_v26 = vld [vmem:[%s988_s23 + $0x1a0] sm:$0xff]  ;;  %295 = vst [vmem:[%s993_s24 + $0xc0] sm:$0xff] %v294_v24  ;;  %297 = vst [vmem:[%s993_s24 + $0xc8] sm:$0xff] %v296_v25  ;;  %v300_v27 = vld [vmem:[%s988_s23 + $0x1b0] sm:$0xff] }
  0x1d   : > { %299 = vst [vmem:[%s993_s24 + $0xd0] sm:$0xff] %v298_v26  ;;  %v302_v28 = vld [vmem:[%s988_s23 + $0x1c0] sm:$0xff]  ;;  %v304_v29 = vld [vmem:[%s988_s23 + $0x1d0] sm:$0xff]  ;;  %301 = vst [vmem:[%s993_s24 + $0xd8] sm:$0xff] %v300_v27 }
  0x1e   : > { %303 = vst [vmem:[%s993_s24 + $0xe0] sm:$0xff] %v302_v28  ;;  %305 = vst [vmem:[%s993_s24 + $0xe8] sm:$0xff] %v304_v29  ;;  %v306_v30 = vld [vmem:[%s988_s23 + $0x1e0] sm:$0xff]  ;;  %v308_v31 = vld [vmem:[%s988_s23 + $0x1f0] sm:$0xff] }
  0x1f   : > { %307 = vst [vmem:[%s993_s24 + $0xf0] sm:$0xff] %v306_v30  ;;  %309 = vst [vmem:[%s993_s24 + $0xf8] sm:$0xff] %v308_v31 }
  0x20 PF: > { %p759_p6 = scmp.ge.s32.totalorder %s928_s13, 1  ;;  %p314_p7 = scmp.lt.s32.totalorder %s928_s13, 3 }
  0x22   : > { %p315_p8 = pnand %p759_p6, %p314_p7 }
  0x23   : > { %s321_s25 = sand.u32 (!%p315_p8), 1, %s912_s9   ;;  %s761_s30 = sshll.u32 (!%p315_p8), %s920_s11, 1 }
  0x24   : > { %318 = sbr.rel (%p315_p8) target bundleno = 305 (0x131), region = 62  ;;  %s760_s28 = sshll.u32 (!%p315_p8), %s321_s25, 8 }
  0x25   : > { %s1066_s29 = scalar_lea.vmem (!%p315_p8), [#allocation3], %s760_s28  ;;  %p370_p9 = scmp.lt.s32.totalorder (!%p315_p8), %s761_s30, 3 }
  0x29   : > { %v1062_v32 = vld [vmem:[%s1121_s0] sm:$0xff]  ;;  %v840_v34 = vld [vmem:[%s1066_s29 + $0x74] ss:$8 sps:$4 sm:$0xff]   ;;  %v842_v35 = vld [vmem:[%s1066_s29 + $0x70] ss:$8 sps:$4 sm:$0xff]   ;;  %s1131_s30 = smov (!%p370_p9, %s761_s30), 3 }
  0x2a   : > { %v764_v33 = vcombine.high %v1062_v32, %v1062_v32  ;;  %585 = vmatprep.subr.bf16.mxu0 %v840_v34  ;;  %v843_v36 = vld [vmem:[%s1066_s29 + $0x64] ss:$8 sps:$4 sm:$0xff]   ;;  %v845_v37 = vld [vmem:[%s1066_s29 + $0x60] ss:$8 sps:$4 sm:$0xff]   ;;  %v846_v38 = vld [vmem:[%s1066_s29 + $0x54] ss:$8 sps:$4 sm:$0xff]   ;;  %v763_v2 = vcombine.low %v1062_v32, %v1062_v32 }
  0x2b   : > { %586 = vmatpush1.bf16.msra.mxu0 %v842_v35  ;;  %v848_v39 = vld [vmem:[%s1066_s29 + $0x50] ss:$8 sps:$4 sm:$0xff]   ;;  %v849_v40 = vld [vmem:[%s1066_s29 + $0x44] ss:$8 sps:$4 sm:$0xff]   ;;  %v851_v41 = vld [vmem:[%s1066_s29 + $0x40] ss:$8 sps:$4 sm:$0xff]  }
  0x2c   : > { %617 = vmatprep.mubr.bf16.mxu0 %v764_v33  ;;  %587 = vmatprep.subr.bf16.mxu0 %v843_v36  ;;  %v852_v42 = vld [vmem:[%s1066_s29 + $0x34] ss:$8 sps:$4 sm:$0xff]   ;;  %v854_v43 = vld [vmem:[%s1066_s29 + $0x30] ss:$8 sps:$4 sm:$0xff]   ;;  %v855_v44 = vld [vmem:[%s1066_s29 + $0x24] ss:$8 sps:$4 sm:$0xff]  }
  0x2d   : > { %v857_v45 = vld [vmem:[%s1066_s29 + $0x20] ss:$8 sps:$4 sm:$0xff]   ;;  %v858_v46 = vld [vmem:[%s1066_s29 + $0x14] ss:$8 sps:$4 sm:$0xff]   ;;  %v860_v47 = vld [vmem:[%s1066_s29 + $0x10] ss:$8 sps:$4 sm:$0xff]  }
  0x2e   : > { %v861_v48 = vld [vmem:[%s1066_s29 + $0x4] ss:$8 sps:$4 sm:$0xff]   ;;  %v863_v49 = vld [vmem:[%s1066_s29] ss:$8 sps:$4 sm:$0xff]   ;;  %v864_v50 = vld [vmem:[%s1066_s29 + $0xf4] ss:$8 sps:$4 sm:$0xff]  }
  0x2f   : > { %588 = vmatpush1.bf16.msra.mxu0 %v845_v37  ;;  %v866_v51 = vld [vmem:[%s1066_s29 + $0xf0] ss:$8 sps:$4 sm:$0xff]   ;;  %v867_v52 = vld [vmem:[%s1066_s29 + $0xe4] ss:$8 sps:$4 sm:$0xff]   ;;  %v869_v53 = vld [vmem:[%s1066_s29 + $0xe0] ss:$8 sps:$4 sm:$0xff]  }
  0x30   : > { %589 = vmatprep.subr.bf16.mxu0 %v846_v38  ;;  %v870_v54 = vld [vmem:[%s1066_s29 + $0xd4] ss:$8 sps:$4 sm:$0xff]   ;;  %v872_v55 = vld [vmem:[%s1066_s29 + $0xd0] ss:$8 sps:$4 sm:$0xff]   ;;  %v873_v56 = vld [vmem:[%s1066_s29 + $0xc4] ss:$8 sps:$4 sm:$0xff]  }
  0x31   : > { %v875_v57 = vld [vmem:[%s1066_s29 + $0xc0] ss:$8 sps:$4 sm:$0xff]   ;;  %v876_v58 = vld [vmem:[%s1066_s29 + $0xb4] ss:$8 sps:$4 sm:$0xff]   ;;  %v878_v59 = vld [vmem:[%s1066_s29 + $0xb0] ss:$8 sps:$4 sm:$0xff]  }
  0x32   : > { %v879_v60 = vld [vmem:[%s1066_s29 + $0xa4] ss:$8 sps:$4 sm:$0xff]   ;;  %v881_v61 = vld [vmem:[%s1066_s29 + $0xa0] ss:$8 sps:$4 sm:$0xff]   ;;  %v882_v62 = vld [vmem:[%s1066_s29 + $0x94] ss:$8 sps:$4 sm:$0xff]  }
  0x33   : > { %590 = vmatpush1.bf16.msra.mxu0 %v848_v39  ;;  %v884_v63 = vld [vmem:[%s1066_s29 + $0x90] ss:$8 sps:$4 sm:$0xff]   ;;  %v885_v0 = vld [vmem:[%s1066_s29 + $0x84] ss:$8 sps:$4 sm:$0xff]   ;;  %v887_v1 = vld [vmem:[%s1066_s29 + $0x80] ss:$8 sps:$4 sm:$0xff]  }
  0x34   : > { %591 = vmatprep.subr.bf16.mxu0 %v849_v40  ;;  %s762_s3 = sshll.u32 %s1131_s30, 3 }
  0x35   : > { %s375_s6 = scalar_lea.vmem %s1123_s2, %s762_s3 }
  0x37   : > { %592 = vmatpush1.bf16.msra.mxu0 %v851_v41 }
  0x38   : > { %593 = vmatprep.subr.bf16.mxu0 %v852_v42 }
  0x3b   : > { %594 = vmatpush1.bf16.msra.mxu0 %v854_v43 }
  0x3c   : > { %595 = vmatprep.subr.bf16.mxu0 %v855_v44 }
  0x3f   : > { %596 = vmatpush1.bf16.msra.mxu0 %v857_v45 }
  0x40   : > { %597 = vmatprep.subr.bf16.mxu0 %v858_v46 }
  0x43   : > { %598 = vmatpush1.bf16.msra.mxu0 %v860_v47 }
  0x44   : > { %599 = vmatprep.subr.bf16.mxu0 %v861_v48 }
  0x47   : > { %600 = vmatpush1.bf16.msra.mxu0 %v863_v49 }
  0x48   : > { %601 = vmatprep.subr.bf16.mxu0 %v864_v50 }
  0x4b   : > { %602 = vmatpush2.bf16.msra.mxu0 %v866_v51 }
  0x4c   : > { %603 = vmatprep.subr.bf16.mxu0 %v867_v52 }
  0x4f   : > { %604 = vmatpush2.bf16.msra.mxu0 %v869_v53 }
  0x50   : > { %605 = vmatprep.subr.bf16.mxu0 %v870_v54 }
  0x53   : > { %606 = vmatpush2.bf16.msra.mxu0 %v872_v55 }
  0x54   : > { %607 = vmatprep.subr.bf16.mxu0 %v873_v56 }
  0x57   : > { %608 = vmatpush2.bf16.msra.mxu0 %v875_v57 }
  0x58   : > { %609 = vmatprep.subr.bf16.mxu0 %v876_v58 }
  0x5b   : > { %610 = vmatpush2.bf16.msra.mxu0 %v878_v59 }
  0x5c   : > { %611 = vmatprep.subr.bf16.mxu0 %v879_v60 }
  0x5f   : > { %612 = vmatpush2.bf16.msra.mxu0 %v881_v61 }
  0x60   : > { %613 = vmatprep.subr.bf16.mxu0 %v882_v62 }
  0x63   : > { %614 = vmatpush2.bf16.msra.mxu0 %v884_v63 }
  0x64   : > { %615 = vmatprep.subr.bf16.mxu0 %v885_v0 }
  0x67   : > { %616 = vmatpush2.bf16.msra.mxu0 %v887_v1 }
  0x6a   : > { %618 = vmatmul.mubr.bf16.vlgmr.msra.gmra.mxu0 %v763_v2 }
 0x12a   : > { %v619_v3 = vpop.f32.mrf.mxu0 }
 0x12b   : > { %635 = vst [vmem:[%s375_s6] sm:$0xff] %v619_v3 }
 0x12c   : > { %v621_v4 = vpop.f32.mrf.mxu0 }
 0x12d   : > { %636 = vst [vmem:[%s375_s6 + $0x8] sm:$0xff] %v621_v4 }
 0x12e   : > { %v623_v5 = vpop.f32.mrf.mxu0 }
 0x130   : > { %v624_v6 = vpop.f32.mrf.mxu0 }
 0x131 PF: > { %s12_s13 = sadd.s32 1, %s928_s13   ;;  %s1124_s9 = smov %s916_s10 }
 0x132   : > { %p9_p10 = scmp.ge.s32.totalorder %s12_s13, 4   ;;  %s1125_s10 = smov %s980_s17 }
 0x133   : > { %s1126_s11 = smov %s924_s12  ;;  %s1127_s12 = smov %s1129_s14 }
 0x134   :  { %11 = sbr.rel (!%p9_p10) target bundleno = 3 (0x3), region = 112 }

// kernel: resnet_forward.26
= control target key start
LH: loop header
LB: loop body
LE: loop exit
PB: predicated region body
PF: predicated region fallthrough
CT: control target
= control target key end

     0   :  { %s1983_s12 = smov 0   ;;  %s1985_s13 = smov 0   ;;  %s2393_s0 = inlined_call_operand.vmem [shape: bf16[8,4608], index: 0, kind: input, shape index: {}]   ;;  %s2394_s1 = inlined_call_operand.vmem [shape: bf16[4608,512], index: 1, kind: input, shape index: {}]   ;;  %s2395_s2 = inlined_call_operand.vmem [shape: f32[8,512], index: 2, kind: input, shape index: {}]   ;;  %s2396_s3 = inlined_call_operand.vmem [shape: f32[8,512], index: 3, kind: output, shape index: {}]  }
   0x1   :  { %s1987_s14 = smov 0   ;;  %s1989_s15 = smov 0  }
   0x2   :  { %s1991_s16 = smov 0   ;;  %s1993_s17 = smov 0  }
   0x3   :  { %s1995_s18 = smov 0  }
   0x4 LB: > { %s25_s19 = sadd.s32 1, %s1952_s16  ;;  %s28_s20 = sadd.s32 1, %s1956_s17  ;;  %s1960_s18 = sphi %s1995_s18, %s13_s18   ;;  %s1956_s17 = sphi %s1993_s17, %s2402_s17   ;;  %s1952_s16 = sphi %s1991_s16, %s2401_s16   ;;  %s1948_s15 = sphi %s1989_s15, %s2400_s15   ;;  %s1944_s14 = sphi %s1987_s14, %s2399_s14   ;;  %s1940_s13 = sphi %s1985_s13, %s2398_s13   ;;  %s1936_s12 = sphi %s1983_s12, %s2397_s12  }
   0x5   : > { %p26_p0 = scmp.ge.s32.totalorder %s25_s19, 6  ;;  %p76_p1 = scmp.ne.s32.totalorder %s1940_s13, %s1936_s12 }
   0x6   : > { %p77_p2 = scmp.eq.s32.totalorder %s1960_s18, 0  ;;  %s69_s24 = sadd.s32 1, %s1940_s13 }
   0x7   : > { %s2404_s19 = smov (%p26_p0, %s25_s19), 0  ;;  %s2406_s20 = smov (!%p26_p0, %s28_s20), %s1956_s17 }
   0x8   : > { %p78_p3 = por %p77_p2, %p76_p1  ;;  %p30_p4 = scmp.ge.s32.totalorder %s2406_s20, 2 }
   0x9   : > { %s64_s21 = ssub.s32 %s1952_s16, %s2404_s19  ;;  %p1580_p6 = scmp.ge.s32.totalorder %s1960_s18, 12 }
   0xa   : > { %s2408_s20 = smov (%p30_p4, %s2406_s20), 0 }
   0xb   : > { %s65_s22 = ssub.s32 %s1956_s17, %s2408_s20  ;;  %158 = sbr.rel (%p1580_p6) target bundleno = 72 (0x48), region = 16 }
   0xc   : > { %s66_s23 = sor.u32 %s65_s22, %s64_s21 }
   0xd   : > { %p67_p5 = scmp.eq.s32.totalorder %s66_s23, 0 }
   0xf   : > { %s2034_s25 = scalar_select %p67_p5, %s1940_s13, %s69_s24  }
  0x10   : > { %174 = sbr.rel (!%p78_p3) target bundleno = 72 (0x48), region = 24  ;;  %s176_s26 = sand.u32 (%p78_p3), 1, %s1940_s13  }
  0x11   : > { %s1697_s27 = smul.u32 (%p78_p3), 768, %s176_s26  ;;  %s1581_s28 = sshll.u32 (%p78_p3), %s1956_s17, 1 }
  0x12   : > { %s1696_s29 = smul.u32 (%p78_p3), 384, %s1952_s16 }
  0x13   : > { %s2048_s8 = scalar_lea.vmem (%p78_p3), [#allocation3], %s1697_s27 }
  0x14   : > { %s182_s30 = sadd.s32 (%p78_p3), %s1696_s29, %s1581_s28 }
  0x15   : > { %s1583_s4 = sshll.u32 %s182_s30, 2 }
  0x16   : > { %s2043_s7 = scalar_lea.vmem %s2394_s1, %s1583_s4 }
  0x17   : > { %v403_v0 = vld [vmem:[%s2043_s7] sm:$0xff]  ;;  %v405_v1 = vld [vmem:[%s2043_s7 + $0x10] sm:$0xff] }
  0x18   : > { %v407_v2 = vld [vmem:[%s2043_s7 + $0x20] sm:$0xff]  ;;  %404 = vst [vmem:[%s2048_s8] sm:$0xff] %v403_v0  ;;  %406 = vst [vmem:[%s2048_s8 + $0x8] sm:$0xff] %v405_v1  ;;  %v409_v3 = vld [vmem:[%s2043_s7 + $0x30] sm:$0xff] }
  0x19   : > { %408 = vst [vmem:[%s2048_s8 + $0x10] sm:$0xff] %v407_v2  ;;  %v411_v4 = vld [vmem:[%s2043_s7 + $0x40] sm:$0xff]  ;;  %v413_v5 = vld [vmem:[%s2043_s7 + $0x50] sm:$0xff]  ;;  %410 = vst [vmem:[%s2048_s8 + $0x18] sm:$0xff] %v409_v3 }
  0x1a   : > { %412 = vst [vmem:[%s2048_s8 + $0x20] sm:$0xff] %v411_v4  ;;  %414 = vst [vmem:[%s2048_s8 + $0x28] sm:$0xff] %v413_v5  ;;  %v415_v6 = vld [vmem:[%s2043_s7 + $0x60] sm:$0xff]  ;;  %v417_v7 = vld [vmem:[%s2043_s7 + $0x70] sm:$0xff] }
  0x1b   : > { %v419_v8 = vld [vmem:[%s2043_s7 + $0x80] sm:$0xff]  ;;  %416 = vst [vmem:[%s2048_s8 + $0x30] sm:$0xff] %v415_v6  ;;  %418 = vst [vmem:[%s2048_s8 + $0x38] sm:$0xff] %v417_v7  ;;  %v421_v9 = vld [vmem:[%s2043_s7 + $0x90] sm:$0xff] }
  0x1c   : > { %420 = vst [vmem:[%s2048_s8 + $0x40] sm:$0xff] %v419_v8  ;;  %v423_v10 = vld [vmem:[%s2043_s7 + $0xa0] sm:$0xff]  ;;  %v425_v11 = vld [vmem:[%s2043_s7 + $0xb0] sm:$0xff]  ;;  %422 = vst [vmem:[%s2048_s8 + $0x48] sm:$0xff] %v421_v9 }
  0x1d   : > { %424 = vst [vmem:[%s2048_s8 + $0x50] sm:$0xff] %v423_v10  ;;  %426 = vst [vmem:[%s2048_s8 + $0x58] sm:$0xff] %v425_v11  ;;  %v427_v12 = vld [vmem:[%s2043_s7 + $0xc0] sm:$0xff]  ;;  %v429_v13 = vld [vmem:[%s2043_s7 + $0xd0] sm:$0xff] }
  0x1e   : > { %v431_v14 = vld [vmem:[%s2043_s7 + $0xe0] sm:$0xff]  ;;  %428 = vst [vmem:[%s2048_s8 + $0x60] sm:$0xff] %v427_v12  ;;  %430 = vst [vmem:[%s2048_s8 + $0x68] sm:$0xff] %v429_v13  ;;  %v433_v15 = vld [vmem:[%s2043_s7 + $0xf0] sm:$0xff] }
  0x1f   : > { %432 = vst [vmem:[%s2048_s8 + $0x70] sm:$0xff] %v431_v14  ;;  %v435_v16 = vld [vmem:[%s2043_s7 + $0x100] sm:$0xff]  ;;  %v437_v17 = vld [vmem:[%s2043_s7 + $0x110] sm:$0xff]  ;;  %434 = vst [vmem:[%s2048_s8 + $0x78] sm:$0xff] %v433_v15 }
  0x20   : > { %436 = vst [vmem:[%s2048_s8 + $0x80] sm:$0xff] %v435_v16  ;;  %438 = vst [vmem:[%s2048_s8 + $0x88] sm:$0xff] %v437_v17  ;;  %v439_v18 = vld [vmem:[%s2043_s7 + $0x120] sm:$0xff]  ;;  %v441_v19 = vld [vmem:[%s2043_s7 + $0x130] sm:$0xff] }
  0x21   : > { %v443_v20 = vld [vmem:[%s2043_s7 + $0x140] sm:$0xff]  ;;  %440 = vst [vmem:[%s2048_s8 + $0x90] sm:$0xff] %v439_v18  ;;  %442 = vst [vmem:[%s2048_s8 + $0x98] sm:$0xff] %v441_v19  ;;  %v445_v21 = vld [vmem:[%s2043_s7 + $0x150] sm:$0xff] }
  0x22   : > { %444 = vst [vmem:[%s2048_s8 + $0xa0] sm:$0xff] %v443_v20  ;;  %v447_v22 = vld [vmem:[%s2043_s7 + $0x160] sm:$0xff]  ;;  %v449_v23 = vld [vmem:[%s2043_s7 + $0x170] sm:$0xff]  ;;  %446 = vst [vmem:[%s2048_s8 + $0xa8] sm:$0xff] %v445_v21 }
  0x23   : > { %448 = vst [vmem:[%s2048_s8 + $0xb0] sm:$0xff] %v447_v22  ;;  %450 = vst [vmem:[%s2048_s8 + $0xb8] sm:$0xff] %v449_v23  ;;  %v451_v24 = vld [vmem:[%s2043_s7 + $0x180] sm:$0xff]  ;;  %v453_v25 = vld [vmem:[%s2043_s7 + $0x190] sm:$0xff] }
  0x24   : > { %v455_v26 = vld [vmem:[%s2043_s7 + $0x1a0] sm:$0xff]  ;;  %452 = vst [vmem:[%s2048_s8 + $0xc0] sm:$0xff] %v451_v24  ;;  %454 = vst [vmem:[%s2048_s8 + $0xc8] sm:$0xff] %v453_v25  ;;  %v457_v27 = vld [vmem:[%s2043_s7 + $0x1b0] sm:$0xff] }
  0x25   : > { %456 = vst [vmem:[%s2048_s8 + $0xd0] sm:$0xff] %v455_v26  ;;  %v459_v28 = vld [vmem:[%s2043_s7 + $0x1c0] sm:$0xff]  ;;  %v461_v29 = vld [vmem:[%s2043_s7 + $0x1d0] sm:$0xff]  ;;  %458 = vst [vmem:[%s2048_s8 + $0xd8] sm:$0xff] %v457_v27 }
  0x26   : > { %460 = vst [vmem:[%s2048_s8 + $0xe0] sm:$0xff] %v459_v28  ;;  %462 = vst [vmem:[%s2048_s8 + $0xe8] sm:$0xff] %v461_v29  ;;  %v463_v30 = vld [vmem:[%s2043_s7 + $0x1e0] sm:$0xff]  ;;  %v465_v31 = vld [vmem:[%s2043_s7 + $0x1f0] sm:$0xff] }
  0x27   : > { %v467_v32 = vld [vmem:[%s2043_s7 + $0x200] sm:$0xff]  ;;  %464 = vst [vmem:[%s2048_s8 + $0xf0] sm:$0xff] %v463_v30  ;;  %466 = vst [vmem:[%s2048_s8 + $0xf8] sm:$0xff] %v465_v31  ;;  %v469_v33 = vld [vmem:[%s2043_s7 + $0x210] sm:$0xff] }
  0x28   : > { %468 = vst [vmem:[%s2048_s8 + $0x100] sm:$0xff] %v467_v32  ;;  %v471_v34 = vld [vmem:[%s2043_s7 + $0x220] sm:$0xff]  ;;  %v473_v35 = vld [vmem:[%s2043_s7 + $0x230] sm:$0xff]  ;;  %470 = vst [vmem:[%s2048_s8 + $0x108] sm:$0xff] %v469_v33 }
  0x29   : > { %472 = vst [vmem:[%s2048_s8 + $0x110] sm:$0xff] %v471_v34  ;;  %474 = vst [vmem:[%s2048_s8 + $0x118] sm:$0xff] %v473_v35  ;;  %v475_v36 = vld [vmem:[%s2043_s7 + $0x240] sm:$0xff]  ;;  %v477_v37 = vld [vmem:[%s2043_s7 + $0x250] sm:$0xff] }
  0x2a   : > { %v479_v38 = vld [vmem:[%s2043_s7 + $0x260] sm:$0xff]  ;;  %476 = vst [vmem:[%s2048_s8 + $0x120] sm:$0xff] %v475_v36  ;;  %478 = vst [vmem:[%s2048_s8 + $0x128] sm:$0xff] %v477_v37  ;;  %v481_v39 = vld [vmem:[%s2043_s7 + $0x270] sm:$0xff] }
  0x2b   : > { %480 = vst [vmem:[%s2048_s8 + $0x130] sm:$0xff] %v479_v38  ;;  %v483_v40 = vld [vmem:[%s2043_s7 + $0x280] sm:$0xff]  ;;  %v485_v41 = vld [vmem:[%s2043_s7 + $0x290] sm:$0xff]  ;;  %482 = vst [vmem:[%s2048_s8 + $0x138] sm:$0xff] %v481_v39 }
  0x2c   : > { %484 = vst [vmem:[%s2048_s8 + $0x140] sm:$0xff] %v483_v40  ;;  %486 = vst [vmem:[%s2048_s8 + $0x148] sm:$0xff] %v485_v41  ;;  %v487_v42 = vld [vmem:[%s2043_s7 + $0x2a0] sm:$0xff]  ;;  %v489_v43 = vld [vmem:[%s2043_s7 + $0x2b0] sm:$0xff] }
  0x2d   : > { %v491_v44 = vld [vmem:[%s2043_s7 + $0x2c0] sm:$0xff]  ;;  %488 = vst [vmem:[%s2048_s8 + $0x150] sm:$0xff] %v487_v42  ;;  %490 = vst [vmem:[%s2048_s8 + $0x158] sm:$0xff] %v489_v43  ;;  %v493_v45 = vld [vmem:[%s2043_s7 + $0x2d0] sm:$0xff] }
  0x2e   : > { %492 = vst [vmem:[%s2048_s8 + $0x160] sm:$0xff] %v491_v44  ;;  %v495_v46 = vld [vmem:[%s2043_s7 + $0x2e0] sm:$0xff]  ;;  %v497_v47 = vld [vmem:[%s2043_s7 + $0x2f0] sm:$0xff]  ;;  %494 = vst [vmem:[%s2048_s8 + $0x168] sm:$0xff] %v493_v45 }
  0x2f   : > { %496 = vst [vmem:[%s2048_s8 + $0x170] sm:$0xff] %v495_v46  ;;  %498 = vst [vmem:[%s2048_s8 + $0x178] sm:$0xff] %v497_v47  ;;  %v499_v48 = vld [vmem:[%s2043_s7 + $0x300] sm:$0xff]  ;;  %v501_v49 = vld [vmem:[%s2043_s7 + $0x310] sm:$0xff] }
  0x30   : > { %v503_v50 = vld [vmem:[%s2043_s7 + $0x320] sm:$0xff]  ;;  %500 = vst [vmem:[%s2048_s8 + $0x180] sm:$0xff] %v499_v48  ;;  %502 = vst [vmem:[%s2048_s8 + $0x188] sm:$0xff] %v501_v49  ;;  %v505_v51 = vld [vmem:[%s2043_s7 + $0x330] sm:$0xff] }
  0x31   : > { %504 = vst [vmem:[%s2048_s8 + $0x190] sm:$0xff] %v503_v50  ;;  %v507_v52 = vld [vmem:[%s2043_s7 + $0x340] sm:$0xff]  ;;  %v509_v53 = vld [vmem:[%s2043_s7 + $0x350] sm:$0xff]  ;;  %506 = vst [vmem:[%s2048_s8 + $0x198] sm:$0xff] %v505_v51 }
  0x32   : > { %508 = vst [vmem:[%s2048_s8 + $0x1a0] sm:$0xff] %v507_v52  ;;  %510 = vst [vmem:[%s2048_s8 + $0x1a8] sm:$0xff] %v509_v53  ;;  %v511_v54 = vld [vmem:[%s2043_s7 + $0x360] sm:$0xff]  ;;  %v513_v55 = vld [vmem:[%s2043_s7 + $0x370] sm:$0xff] }
  0x33   : > { %v515_v56 = vld [vmem:[%s2043_s7 + $0x380] sm:$0xff]  ;;  %512 = vst [vmem:[%s2048_s8 + $0x1b0] sm:$0xff] %v511_v54  ;;  %514 = vst [vmem:[%s2048_s8 + $0x1b8] sm:$0xff] %v513_v55  ;;  %v517_v57 = vld [vmem:[%s2043_s7 + $0x390] sm:$0xff] }
  0x34   : > { %516 = vst [vmem:[%s2048_s8 + $0x1c0] sm:$0xff] %v515_v56  ;;  %v519_v58 = vld [vmem:[%s2043_s7 + $0x3a0] sm:$0xff]  ;;  %v521_v59 = vld [vmem:[%s2043_s7 + $0x3b0] sm:$0xff]  ;;  %518 = vst [vmem:[%s2048_s8 + $0x1c8] sm:$0xff] %v517_v57 }
  0x35   : > { %520 = vst [vmem:[%s2048_s8 + $0x1d0] sm:$0xff] %v519_v58  ;;  %522 = vst [vmem:[%s2048_s8 + $0x1d8] sm:$0xff] %v521_v59  ;;  %v523_v60 = vld [vmem:[%s2043_s7 + $0x3c0] sm:$0xff]  ;;  %v525_v61 = vld [vmem:[%s2043_s7 + $0x3d0] sm:$0xff] }
  0x36   : > { %v527_v62 = vld [vmem:[%s2043_s7 + $0x3e0] sm:$0xff]  ;;  %524 = vst [vmem:[%s2048_s8 + $0x1e0] sm:$0xff] %v523_v60  ;;  %526 = vst [vmem:[%s2048_s8 + $0x1e8] sm:$0xff] %v525_v61  ;;  %v529_v63 = vld [vmem:[%s2043_s7 + $0x3f0] sm:$0xff] }
  0x37   : > { %528 = vst [vmem:[%s2048_s8 + $0x1f0] sm:$0xff] %v527_v62  ;;  %v531_v0 = vld [vmem:[%s2043_s7 + $0x400] sm:$0xff]  ;;  %v533_v1 = vld [vmem:[%s2043_s7 + $0x410] sm:$0xff]  ;;  %530 = vst [vmem:[%s2048_s8 + $0x1f8] sm:$0xff] %v529_v63 }
  0x38   : > { %532 = vst [vmem:[%s2048_s8 + $0x200] sm:$0xff] %v531_v0  ;;  %534 = vst [vmem:[%s2048_s8 + $0x208] sm:$0xff] %v533_v1  ;;  %v535_v2 = vld [vmem:[%s2043_s7 + $0x420] sm:$0xff]  ;;  %v537_v3 = vld [vmem:[%s2043_s7 + $0x430] sm:$0xff] }
  0x39   : > { %v539_v4 = vld [vmem:[%s2043_s7 + $0x440] sm:$0xff]  ;;  %536 = vst [vmem:[%s2048_s8 + $0x210] sm:$0xff] %v535_v2  ;;  %538 = vst [vmem:[%s2048_s8 + $0x218] sm:$0xff] %v537_v3  ;;  %v541_v5 = vld [vmem:[%s2043_s7 + $0x450] sm:$0xff] }
  0x3a   : > { %540 = vst [vmem:[%s2048_s8 + $0x220] sm:$0xff] %v539_v4  ;;  %v543_v6 = vld [vmem:[%s2043_s7 + $0x460] sm:$0xff]  ;;  %v545_v7 = vld [vmem:[%s2043_s7 + $0x470] sm:$0xff]  ;;  %542 = vst [vmem:[%s2048_s8 + $0x228] sm:$0xff] %v541_v5 }
  0x3b   : > { %544 = vst [vmem:[%s2048_s8 + $0x230] sm:$0xff] %v543_v6  ;;  %546 = vst [vmem:[%s2048_s8 + $0x238] sm:$0xff] %v545_v7  ;;  %v547_v8 = vld [vmem:[%s2043_s7 + $0x480] sm:$0xff]  ;;  %v549_v9 = vld [vmem:[%s2043_s7 + $0x490] sm:$0xff] }
  0x3c   : > { %v551_v10 = vld [vmem:[%s2043_s7 + $0x4a0] sm:$0xff]  ;;  %548 = vst [vmem:[%s2048_s8 + $0x240] sm:$0xff] %v547_v8  ;;  %550 = vst [vmem:[%s2048_s8 + $0x248] sm:$0xff] %v549_v9  ;;  %v553_v11 = vld [vmem:[%s2043_s7 + $0x4b0] sm:$0xff] }
  0x3d   : > { %552 = vst [vmem:[%s2048_s8 + $0x250] sm:$0xff] %v551_v10  ;;  %v555_v12 = vld [vmem:[%s2043_s7 + $0x4c0] sm:$0xff]  ;;  %v557_v13 = vld [vmem:[%s2043_s7 + $0x4d0] sm:$0xff]  ;;  %554 = vst [vmem:[%s2048_s8 + $0x258] sm:$0xff] %v553_v11 }
  0x3e   : > { %556 = vst [vmem:[%s2048_s8 + $0x260] sm:$0xff] %v555_v12  ;;  %558 = vst [vmem:[%s2048_s8 + $0x268] sm:$0xff] %v557_v13  ;;  %v559_v14 = vld [vmem:[%s2043_s7 + $0x4e0] sm:$0xff]  ;;  %v561_v15 = vld [vmem:[%s2043_s7 + $0x4f0] sm:$0xff] }
  0x3f   : > { %v563_v16 = vld [vmem:[%s2043_s7 + $0x500] sm:$0xff]  ;;  %560 = vst [vmem:[%s2048_s8 + $0x270] sm:$0xff] %v559_v14  ;;  %562 = vst [vmem:[%s2048_s8 + $0x278] sm:$0xff] %v561_v15  ;;  %v565_v17 = vld [vmem:[%s2043_s7 + $0x510] sm:$0xff] }
  0x40   : > { %564 = vst [vmem:[%s2048_s8 + $0x280] sm:$0xff] %v563_v16  ;;  %v567_v18 = vld [vmem:[%s2043_s7 + $0x520] sm:$0xff]  ;;  %v569_v19 = vld [vmem:[%s2043_s7 + $0x530] sm:$0xff]  ;;  %566 = vst [vmem:[%s2048_s8 + $0x288] sm:$0xff] %v565_v17 }
  0x41   : > { %568 = vst [vmem:[%s2048_s8 + $0x290] sm:$0xff] %v567_v18  ;;  %570 = vst [vmem:[%s2048_s8 + $0x298] sm:$0xff] %v569_v19  ;;  %v571_v20 = vld [vmem:[%s2043_s7 + $0x540] sm:$0xff]  ;;  %v573_v21 = vld [vmem:[%s2043_s7 + $0x550] sm:$0xff] }
  0x42   : > { %v575_v22 = vld [vmem:[%s2043_s7 + $0x560] sm:$0xff]  ;;  %572 = vst [vmem:[%s2048_s8 + $0x2a0] sm:$0xff] %v571_v20  ;;  %574 = vst [vmem:[%s2048_s8 + $0x2a8] sm:$0xff] %v573_v21  ;;  %v577_v23 = vld [vmem:[%s2043_s7 + $0x570] sm:$0xff] }
  0x43   : > { %576 = vst [vmem:[%s2048_s8 + $0x2b0] sm:$0xff] %v575_v22  ;;  %v579_v24 = vld [vmem:[%s2043_s7 + $0x580] sm:$0xff]  ;;  %v581_v25 = vld [vmem:[%s2043_s7 + $0x590] sm:$0xff]  ;;  %578 = vst [vmem:[%s2048_s8 + $0x2b8] sm:$0xff] %v577_v23 }
  0x44   : > { %580 = vst [vmem:[%s2048_s8 + $0x2c0] sm:$0xff] %v579_v24  ;;  %582 = vst [vmem:[%s2048_s8 + $0x2c8] sm:$0xff] %v581_v25  ;;  %v583_v26 = vld [vmem:[%s2043_s7 + $0x5a0] sm:$0xff]  ;;  %v585_v27 = vld [vmem:[%s2043_s7 + $0x5b0] sm:$0xff] }
  0x45   : > { %v587_v28 = vld [vmem:[%s2043_s7 + $0x5c0] sm:$0xff]  ;;  %584 = vst [vmem:[%s2048_s8 + $0x2d0] sm:$0xff] %v583_v26  ;;  %586 = vst [vmem:[%s2048_s8 + $0x2d8] sm:$0xff] %v585_v27  ;;  %v589_v29 = vld [vmem:[%s2043_s7 + $0x5d0] sm:$0xff] }
  0x46   : > { %588 = vst [vmem:[%s2048_s8 + $0x2e0] sm:$0xff] %v587_v28  ;;  %v591_v30 = vld [vmem:[%s2043_s7 + $0x5e0] sm:$0xff]  ;;  %v593_v31 = vld [vmem:[%s2043_s7 + $0x5f0] sm:$0xff]  ;;  %590 = vst [vmem:[%s2048_s8 + $0x2e8] sm:$0xff] %v589_v29 }
  0x47   : > { %592 = vst [vmem:[%s2048_s8 + $0x2f0] sm:$0xff] %v591_v30  ;;  %594 = vst [vmem:[%s2048_s8 + $0x2f8] sm:$0xff] %v593_v31 }
  0x48 PF: > { %p1584_p7 = scmp.ge.s32.totalorder %s1960_s18, 1  ;;  %p612_p8 = scmp.lt.s32.totalorder %s1960_s18, 13 }
  0x4a   : > { %p613_p9 = pnand %p1584_p7, %p612_p8 }
  0x4b   : > { %s619_s9 = sand.u32 (!%p613_p9), 1, %s1936_s12   ;;  %s664_s10 = smul.u32 (!%p613_p9), 6, %s1944_s14 }
  0x4c   : > { %616 = sbr.rel (%p613_p9) target bundleno = 432 (0x1b0), region = 66  ;;  %s1586_s21 = sshll.u32 (!%p613_p9), %s1948_s15, 1 }
  0x4d   : > { %s1698_s11 = smul.u32 (!%p613_p9), 768, %s619_s9  ;;  %p667_p10 = scmp.lt.s32.totalorder (!%p613_p9), %s664_s10, 35 }
  0x4e   : > { %p679_p11 = scmp.lt.s32.totalorder (!%p613_p9), %s1586_s21, 3  ;;  %p1590_p12 = scmp.ne.s32.totalorder (!%p613_p9), %s1944_s14, 0 }
  0x4f   : > { %s2259_s5 = scalar_lea.vmem (!%p613_p9), [#allocation3], %s1698_s11 }
  0x51   : > { %s2410_s10 = smov (!%p667_p10, %s664_s10), 35  ;;  %s2412_s21 = smov (!%p679_p11, %s1586_s21), 3 }
  0x52   : > { %s1585_s22 = sshll.u32 %s2410_s10, 2  ;;  %s1587_s27 = sshll.u32 %s2412_s21, 3 }
  0x53   : > { %s2247_s26 = scalar_lea.vmem %s2393_s0, %s1585_s22  ;;  %s2252_s30 = scalar_lea.vmem %s2395_s2, %s1587_s27 }
  0x54   : > { %s2257_s15 = scalar_lea.vmem %s2396_s3, %s1587_s27  ;;  %699 = sbr.rel (%p1590_p12) target bundleno = 91 (0x5b), region = 74 }
  0x59   : > { %v1962_v32 = vmov 0.0  }
  0x5a   : > { %700 = vst [vmem:[#allocation2] sm:$0xff] %v1962_v32  ;;  %701 = vst [vmem:[#allocation2 + $0x8] sm:$0xff] %v1962_v32 }
  0x5b PF: > { %v1756_v33 = vld [vmem:[%s2259_s5 + $0x74] ss:$8 sps:$4 sm:$0xff]   ;;  %v1760_v35 = vld [vmem:[%s2259_s5 + $0x70] ss:$8 sps:$4 sm:$0xff]   ;;  %v1762_v37 = vld [vmem:[%s2259_s5 + $0x64] ss:$8 sps:$4 sm:$0xff]  }
  0x5c   : > { %v1758_v34 = vld [vmem:[%s2259_s5 + $0x174] ss:$8 sps:$4 sm:$0xff]   ;;  %1304 = vmatprep.subr.bf16.mxu0 %v1756_v33  ;;  %v1761_v36 = vld [vmem:[%s2259_s5 + $0x170] ss:$8 sps:$4 sm:$0xff]   ;;  %v1764_v38 = vld [vmem:[%s2259_s5 + $0x164] ss:$8 sps:$4 sm:$0xff]  }
  0x5d   : > { %1345 = vmatprep.subr.bf16.mxu1 %v1758_v34  ;;  %1305 = vmatpush1.bf16.msra.mxu0 %v1760_v35  ;;  %v1766_v39 = vld [vmem:[%s2259_s5 + $0x60] ss:$8 sps:$4 sm:$0xff]   ;;  %v1768_v41 = vld [vmem:[%s2259_s5 + $0x54] ss:$8 sps:$4 sm:$0xff]   ;;  %v1772_v43 = vld [vmem:[%s2259_s5 + $0x50] ss:$8 sps:$4 sm:$0xff]  }
  0x5e   : > { %1346 = vmatpush1.bf16.msra.mxu1 %v1761_v36  ;;  %1306 = vmatprep.subr.bf16.mxu0 %v1762_v37  ;;  %v1767_v40 = vld [vmem:[%s2259_s5 + $0x160] ss:$8 sps:$4 sm:$0xff]   ;;  %v1770_v42 = vld [vmem:[%s2259_s5 + $0x154] ss:$8 sps:$4 sm:$0xff]   ;;  %v1773_v44 = vld [vmem:[%s2259_s5 + $0x150] ss:$8 sps:$4 sm:$0xff]  }
  0x5f   : > { %1347 = vmatprep.subr.bf16.mxu1 %v1764_v38  ;;  %v1774_v45 = vld [vmem:[%s2259_s5 + $0x44] ss:$8 sps:$4 sm:$0xff]   ;;  %v1778_v47 = vld [vmem:[%s2259_s5 + $0x40] ss:$8 sps:$4 sm:$0xff]   ;;  %v1780_v49 = vld [vmem:[%s2259_s5 + $0x34] ss:$8 sps:$4 sm:$0xff]  }
  0x60   : > { %v1776_v46 = vld [vmem:[%s2259_s5 + $0x144] ss:$8 sps:$4 sm:$0xff]   ;;  %v1779_v48 = vld [vmem:[%s2259_s5 + $0x140] ss:$8 sps:$4 sm:$0xff]   ;;  %v1782_v50 = vld [vmem:[%s2259_s5 + $0x134] ss:$8 sps:$4 sm:$0xff]  }
  0x61   : > { %1307 = vmatpush1.bf16.msra.mxu0 %v1766_v39  ;;  %v1784_v51 = vld [vmem:[%s2259_s5 + $0x30] ss:$8 sps:$4 sm:$0xff]   ;;  %v1786_v53 = vld [vmem:[%s2259_s5 + $0x24] ss:$8 sps:$4 sm:$0xff]   ;;  %v1790_v55 = vld [vmem:[%s2259_s5 + $0x20] ss:$8 sps:$4 sm:$0xff]  }
  0x62   : > { %1348 = vmatpush1.bf16.msra.mxu1 %v1767_v40  ;;  %1308 = vmatprep.subr.bf16.mxu0 %v1768_v41  ;;  %v1785_v52 = vld [vmem:[%s2259_s5 + $0x130] ss:$8 sps:$4 sm:$0xff]   ;;  %v1788_v54 = vld [vmem:[%s2259_s5 + $0x124] ss:$8 sps:$4 sm:$0xff]   ;;  %v1791_v56 = vld [vmem:[%s2259_s5 + $0x120] ss:$8 sps:$4 sm:$0xff]  }
  0x63   : > { %1349 = vmatprep.subr.bf16.mxu1 %v1770_v42  ;;  %v1792_v57 = vld [vmem:[%s2259_s5 + $0x14] ss:$8 sps:$4 sm:$0xff]   ;;  %v1796_v59 = vld [vmem:[%s2259_s5 + $0x10] ss:$8 sps:$4 sm:$0xff]   ;;  %v1798_v61 = vld [vmem:[%s2259_s5 + $0x4] ss:$8 sps:$4 sm:$0xff]  }
  0x64   : > { %v1794_v58 = vld [vmem:[%s2259_s5 + $0x114] ss:$8 sps:$4 sm:$0xff]   ;;  %v1797_v60 = vld [vmem:[%s2259_s5 + $0x110] ss:$8 sps:$4 sm:$0xff]   ;;  %v1800_v62 = vld [vmem:[%s2259_s5 + $0x104] ss:$8 sps:$4 sm:$0xff]  }
  0x65   : > { %1309 = vmatpush1.bf16.msra.mxu0 %v1772_v43  ;;  %v1802_v63 = vld [vmem:[%s2259_s5] ss:$8 sps:$4 sm:$0xff]   ;;  %v1804_v1 = vld [vmem:[%s2259_s5 + $0xf4] ss:$8 sps:$4 sm:$0xff]   ;;  %v1808_v3 = vld [vmem:[%s2259_s5 + $0xf0] ss:$8 sps:$4 sm:$0xff]  }
  0x66   : > { %1350 = vmatpush1.bf16.msra.mxu1 %v1773_v44  ;;  %1310 = vmatprep.subr.bf16.mxu0 %v1774_v45  ;;  %v1803_v0 = vld [vmem:[%s2259_s5 + $0x100] ss:$8 sps:$4 sm:$0xff]   ;;  %v1806_v2 = vld [vmem:[%s2259_s5 + $0x1f4] ss:$8 sps:$4 sm:$0xff]   ;;  %v1809_v4 = vld [vmem:[%s2259_s5 + $0x1f0] ss:$8 sps:$4 sm:$0xff]  }
  0x67   : > { %1351 = vmatprep.subr.bf16.mxu1 %v1776_v46  ;;  %v1810_v5 = vld [vmem:[%s2259_s5 + $0xe4] ss:$8 sps:$4 sm:$0xff]   ;;  %v1814_v7 = vld [vmem:[%s2259_s5 + $0xe0] ss:$8 sps:$4 sm:$0xff]   ;;  %v1816_v9 = vld [vmem:[%s2259_s5 + $0xd4] ss:$8 sps:$4 sm:$0xff]  }
  0x68   : > { %v1812_v6 = vld [vmem:[%s2259_s5 + $0x1e4] ss:$8 sps:$4 sm:$0xff]   ;;  %v1815_v8 = vld [vmem:[%s2259_s5 + $0x1e0] ss:$8 sps:$4 sm:$0xff]   ;;  %v1818_v10 = vld [vmem:[%s2259_s5 + $0x1d4] ss:$8 sps:$4 sm:$0xff]  }
  0x69   : > { %1311 = vmatpush1.bf16.msra.mxu0 %v1778_v47  ;;  %v1820_v11 = vld [vmem:[%s2259_s5 + $0xd0] ss:$8 sps:$4 sm:$0xff]   ;;  %v1822_v13 = vld [vmem:[%s2259_s5 + $0xc4] ss:$8 sps:$4 sm:$0xff]   ;;  %v1826_v18 = vld [vmem:[%s2259_s5 + $0xc0] ss:$8 sps:$4 sm:$0xff]  }
  0x6a   : > { %1352 = vmatpush1.bf16.msra.mxu1 %v1779_v48  ;;  %1312 = vmatprep.subr.bf16.mxu0 %v1780_v49  ;;  %v1821_v12 = vld [vmem:[%s2259_s5 + $0x1d0] ss:$8 sps:$4 sm:$0xff]   ;;  %v1824_v14 = vld [vmem:[%s2259_s5 + $0x1c4] ss:$8 sps:$4 sm:$0xff]   ;;  %v1827_v19 = vld [vmem:[%s2259_s5 + $0x1c0] ss:$8 sps:$4 sm:$0xff]  }
  0x6b   : > { %1353 = vmatprep.subr.bf16.mxu1 %v1782_v50  ;;  %v704_v15 = vld [vmem:[%s2247_s26] sm:$0xff]  ;;  %v705_v17 = vld [vmem:[%s2247_s26 + $0x8] sm:$0xff]  ;;  %v1834_v25 = vld [vmem:[%s2259_s5 + $0xa4] ss:$8 sps:$4 sm:$0xff]   ;;  %p1693_p13 = scmp.ne.s32.totalorder %s1944_s14, 5 }
  0x6c   : > { %v1592_v16 = vcombine.high %v704_v15, %v704_v15  ;;  %v1594_v20 = vcombine.high %v705_v17, %v705_v17  ;;  %v1828_v21 = vld [vmem:[%s2259_s5 + $0xb4] ss:$8 sps:$4 sm:$0xff]   ;;  %v1832_v23 = vld [vmem:[%s2259_s5 + $0xb0] ss:$8 sps:$4 sm:$0xff]   ;;  %v1836_v26 = vld [vmem:[%s2259_s5 + $0x1a4] ss:$8 sps:$4 sm:$0xff]   ;;  %v1591_v38 = vcombine.low %v704_v15, %v704_v15  ;;  %v1593_v39 = vcombine.low %v705_v17, %v705_v17 }
  0x6d   : > { %1313 = vmatpush1.bf16.msra.mxu0 %v1784_v51  ;;  %v1830_v22 = vld [vmem:[%s2259_s5 + $0x1b4] ss:$8 sps:$4 sm:$0xff]   ;;  %v1833_v24 = vld [vmem:[%s2259_s5 + $0x1b0] ss:$8 sps:$4 sm:$0xff]   ;;  %v1838_v27 = vld [vmem:[%s2259_s5 + $0xa0] ss:$8 sps:$4 sm:$0xff]  }
  0x6e   : > { %1354 = vmatpush1.bf16.msra.mxu1 %v1785_v52  ;;  %1314 = vmatprep.subr.bf16.mxu0 %v1786_v53  ;;  %v1839_v28 = vld [vmem:[%s2259_s5 + $0x1a0] ss:$8 sps:$4 sm:$0xff]   ;;  %v1840_v29 = vld [vmem:[%s2259_s5 + $0x94] ss:$8 sps:$4 sm:$0xff]   ;;  %v1844_v31 = vld [vmem:[%s2259_s5 + $0x90] ss:$8 sps:$4 sm:$0xff]  }
  0x6f   : > { %1355 = vmatprep.subr.bf16.mxu1 %v1788_v54  ;;  %1336 = vmatprep.mubr.bf16.mxu0 %v1592_v16  ;;  %v1842_v30 = vld [vmem:[%s2259_s5 + $0x194] ss:$8 sps:$4 sm:$0xff]   ;;  %v1845_v32 = vld [vmem:[%s2259_s5 + $0x190] ss:$8 sps:$4 sm:$0xff]   ;;  %v1846_v33 = vld [vmem:[%s2259_s5 + $0x84] ss:$8 sps:$4 sm:$0xff]  }
  0x70   : > { %1377 = vmatprep.mubr.bf16.mxu1 %v1594_v20  ;;  %v1848_v34 = vld [vmem:[%s2259_s5 + $0x184] ss:$8 sps:$4 sm:$0xff]   ;;  %v1850_v35 = vld [vmem:[%s2259_s5 + $0x80] ss:$8 sps:$4 sm:$0xff]   ;;  %v1858_v37 = vld [vmem:[%s2259_s5 + $0x274] ss:$8 sps:$4 sm:$0xff]  }
  0x71   : > { %1315 = vmatpush1.bf16.msra.mxu0 %v1790_v55  ;;  %v1851_v36 = vld [vmem:[%s2259_s5 + $0x180] ss:$8 sps:$4 sm:$0xff]   ;;  %v1856_v40 = vld [vmem:[%s2259_s5 + $0x270] ss:$8 sps:$4 sm:$0xff]   ;;  %v1861_v42 = vld [vmem:[%s2259_s5 + $0x264] ss:$8 sps:$4 sm:$0xff]  }
  0x72   : > { %1356 = vmatpush1.bf16.msra.mxu1 %v1791_v56  ;;  %1316 = vmatprep.subr.bf16.mxu0 %v1792_v57  ;;  %v2331_v41 = vld [vmem:[%s2247_s26 + $0x10] sm:$0xff]  ;;  %v1864_v45 = vld [vmem:[%s2259_s5 + $0x254] ss:$8 sps:$4 sm:$0xff]   ;;  %v1862_v46 = vld [vmem:[%s2259_s5 + $0x250] ss:$8 sps:$4 sm:$0xff]  }
  0x73   : > { %1357 = vmatprep.subr.bf16.mxu1 %v1794_v58  ;;  %v1596_v43 = vcombine.high %v2331_v41, %v2331_v41  ;;  %v1859_v44 = vld [vmem:[%s2259_s5 + $0x260] ss:$8 sps:$4 sm:$0xff]   ;;  %v1867_v47 = vld [vmem:[%s2259_s5 + $0x244] ss:$8 sps:$4 sm:$0xff]   ;;  %v1870_v49 = vld [vmem:[%s2259_s5 + $0x234] ss:$8 sps:$4 sm:$0xff]  }
  0x74   : > { %v1865_v48 = vld [vmem:[%s2259_s5 + $0x240] ss:$8 sps:$4 sm:$0xff]   ;;  %v1868_v50 = vld [vmem:[%s2259_s5 + $0x230] ss:$8 sps:$4 sm:$0xff]   ;;  %v1873_v51 = vld [vmem:[%s2259_s5 + $0x224] ss:$8 sps:$4 sm:$0xff]  }
  0x75   : > { %1317 = vmatpush1.bf16.msra.mxu0 %v1796_v59  ;;  %v1871_v52 = vld [vmem:[%s2259_s5 + $0x220] ss:$8 sps:$4 sm:$0xff]   ;;  %v1876_v53 = vld [vmem:[%s2259_s5 + $0x214] ss:$8 sps:$4 sm:$0xff]   ;;  %v1874_v54 = vld [vmem:[%s2259_s5 + $0x210] ss:$8 sps:$4 sm:$0xff]  }
  0x76   : > { %1358 = vmatpush1.bf16.msra.mxu1 %v1797_v60  ;;  %1318 = vmatprep.subr.bf16.mxu0 %v1798_v61  ;;  %v1879_v55 = vld [vmem:[%s2259_s5 + $0x204] ss:$8 sps:$4 sm:$0xff]   ;;  %v1877_v56 = vld [vmem:[%s2259_s5 + $0x200] ss:$8 sps:$4 sm:$0xff]   ;;  %v1882_v57 = vld [vmem:[%s2259_s5 + $0x2f4] ss:$8 sps:$4 sm:$0xff]  }
  0x77   : > { %1359 = vmatprep.subr.bf16.mxu1 %v1800_v62  ;;  %v1880_v58 = vld [vmem:[%s2259_s5 + $0x2f0] ss:$8 sps:$4 sm:$0xff]   ;;  %v1885_v59 = vld [vmem:[%s2259_s5 + $0x2e4] ss:$8 sps:$4 sm:$0xff]   ;;  %v1883_v60 = vld [vmem:[%s2259_s5 + $0x2e0] ss:$8 sps:$4 sm:$0xff]  }
  0x78   : > { %v1888_v61 = vld [vmem:[%s2259_s5 + $0x2d4] ss:$8 sps:$4 sm:$0xff]   ;;  %v1886_v62 = vld [vmem:[%s2259_s5 + $0x2d0] ss:$8 sps:$4 sm:$0xff]  }
  0x79   : > { %1319 = vmatpush1.bf16.msra.mxu0 %v1802_v63  ;;  %v1891_v63 = vld [vmem:[%s2259_s5 + $0x2c4] ss:$8 sps:$4 sm:$0xff]  }
  0x7a   : > { %1360 = vmatpush1.bf16.msra.mxu1 %v1803_v0  ;;  %1320 = vmatprep.subr.bf16.mxu0 %v1804_v1  ;;  %v1889_v0 = vld [vmem:[%s2259_s5 + $0x2c0] ss:$8 sps:$4 sm:$0xff]   ;;  %v1894_v1 = vld [vmem:[%s2259_s5 + $0x2b4] ss:$8 sps:$4 sm:$0xff]  }
  0x7b   : > { %1361 = vmatprep.subr.bf16.mxu1 %v1806_v2  ;;  %v1892_v2 = vld [vmem:[%s2259_s5 + $0x2b0] ss:$8 sps:$4 sm:$0xff]  }
  0x7d   : > { %1321 = vmatpush2.bf16.msra.mxu0 %v1808_v3  ;;  %v1897_v3 = vld [vmem:[%s2259_s5 + $0x2a4] ss:$8 sps:$4 sm:$0xff]  }
  0x7e   : > { %1362 = vmatpush2.bf16.msra.mxu1 %v1809_v4  ;;  %1322 = vmatprep.subr.bf16.mxu0 %v1810_v5  ;;  %v1895_v4 = vld [vmem:[%s2259_s5 + $0x2a0] ss:$8 sps:$4 sm:$0xff]   ;;  %v1900_v5 = vld [vmem:[%s2259_s5 + $0x294] ss:$8 sps:$4 sm:$0xff]  }
  0x7f   : > { %1363 = vmatprep.subr.bf16.mxu1 %v1812_v6  ;;  %v1898_v6 = vld [vmem:[%s2259_s5 + $0x290] ss:$8 sps:$4 sm:$0xff]  }
  0x81   : > { %1323 = vmatpush2.bf16.msra.mxu0 %v1814_v7  ;;  %v1903_v7 = vld [vmem:[%s2259_s5 + $0x284] ss:$8 sps:$4 sm:$0xff]  }
  0x82   : > { %1364 = vmatpush2.bf16.msra.mxu1 %v1815_v8  ;;  %1324 = vmatprep.subr.bf16.mxu0 %v1816_v9  ;;  %v1901_v8 = vld [vmem:[%s2259_s5 + $0x280] ss:$8 sps:$4 sm:$0xff]   ;;  %v1595_v9 = vcombine.low %v2331_v41, %v2331_v41 }
  0x83   : > { %1365 = vmatprep.subr.bf16.mxu1 %v1818_v10 }
  0x85   : > { %1325 = vmatpush2.bf16.msra.mxu0 %v1820_v11 }
  0x86   : > { %1366 = vmatpush2.bf16.msra.mxu1 %v1821_v12  ;;  %1326 = vmatprep.subr.bf16.mxu0 %v1822_v13 }
  0x87   : > { %1367 = vmatprep.subr.bf16.mxu1 %v1824_v14 }
  0x89   : > { %1327 = vmatpush2.bf16.msra.mxu0 %v1826_v18 }
  0x8a   : > { %1368 = vmatpush2.bf16.msra.mxu1 %v1827_v19  ;;  %1328 = vmatprep.subr.bf16.mxu0 %v1828_v21  ;;  %v702_v19 = vld [vmem:[#allocation2] sm:$0xff] }
  0x8b   : > { %1369 = vmatprep.subr.bf16.mxu1 %v1830_v22 }
  0x8d   : > { %1329 = vmatpush2.bf16.msra.mxu0 %v1832_v23  ;;  %v703_v23 = vld [vmem:[#allocation2 + $0x8] sm:$0xff] }
  0x8e   : > { %1370 = vmatpush2.bf16.msra.mxu1 %v1833_v24  ;;  %1330 = vmatprep.subr.bf16.mxu0 %v1834_v25 }
  0x8f   : > { %1371 = vmatprep.subr.bf16.mxu1 %v1836_v26 }
  0x91   : > { %1331 = vmatpush2.bf16.msra.mxu0 %v1838_v27 }
  0x92   : > { %1372 = vmatpush2.bf16.msra.mxu1 %v1839_v28  ;;  %1332 = vmatprep.subr.bf16.mxu0 %v1840_v29 }
  0x93   : > { %1373 = vmatprep.subr.bf16.mxu1 %v1842_v30 }
  0x95   : > { %1333 = vmatpush2.bf16.msra.mxu0 %v1844_v31 }
  0x96   : > { %1374 = vmatpush2.bf16.msra.mxu1 %v1845_v32  ;;  %1334 = vmatprep.subr.bf16.mxu0 %v1846_v33 }
  0x97   : > { %1375 = vmatprep.subr.bf16.mxu1 %v1848_v34 }
  0x99   : > { %1335 = vmatpush2.bf16.msra.mxu0 %v1850_v35 }
  0x9a   : > { %1376 = vmatpush2.bf16.msra.mxu1 %v1851_v36  ;;  %1386 = vmatprep.subr.bf16.mxu0 %v1858_v37 }
  0x9c   : > { %1337 = vmatmul.mubr.bf16.vlgmr.msra.gmra.mxu0 %v1591_v38 }
  0x9d   : > { %1378 = vmatmul.mubr.bf16.vlgmr.msra.gmra.mxu1 %v1593_v39  ;;  %1387 = vmatpush1.bf16.msra.mxu0 %v1856_v40 }
  0x9e   : > { %1418 = vmatprep.mubr.bf16.mxu0 %v1596_v43  ;;  %1388 = vmatprep.subr.bf16.mxu0 %v1861_v42 }
  0xa1   : > { %1389 = vmatpush1.bf16.msra.mxu0 %v1859_v44 }
  0xa2   : > { %1390 = vmatprep.subr.bf16.mxu0 %v1864_v45 }
  0xa5   : > { %1391 = vmatpush1.bf16.msra.mxu0 %v1862_v46 }
  0xa6   : > { %1392 = vmatprep.subr.bf16.mxu0 %v1867_v47 }
  0xa9   : > { %1393 = vmatpush1.bf16.msra.mxu0 %v1865_v48 }
  0xaa   : > { %1394 = vmatprep.subr.bf16.mxu0 %v1870_v49 }
  0xad   : > { %1395 = vmatpush1.bf16.msra.mxu0 %v1868_v50 }
  0xae   : > { %1396 = vmatprep.subr.bf16.mxu0 %v1873_v51 }
  0xb1   : > { %1397 = vmatpush1.bf16.msra.mxu0 %v1871_v52 }
  0xb2   : > { %1398 = vmatprep.subr.bf16.mxu0 %v1876_v53 }
  0xb5   : > { %1399 = vmatpush1.bf16.msra.mxu0 %v1874_v54 }
  0xb6   : > { %1400 = vmatprep.subr.bf16.mxu0 %v1879_v55 }
  0xb9   : > { %1401 = vmatpush1.bf16.msra.mxu0 %v1877_v56 }
  0xba   : > { %1402 = vmatprep.subr.bf16.mxu0 %v1882_v57 }
  0xbd   : > { %1403 = vmatpush2.bf16.msra.mxu0 %v1880_v58 }
  0xbe   : > { %1404 = vmatprep.subr.bf16.mxu0 %v1885_v59 }
  0xc1   : > { %1405 = vmatpush2.bf16.msra.mxu0 %v1883_v60 }
  0xc2   : > { %1406 = vmatprep.subr.bf16.mxu0 %v1888_v61 }
  0xc5   : > { %1407 = vmatpush2.bf16.msra.mxu0 %v1886_v62 }
  0xc6   : > { %1408 = vmatprep.subr.bf16.mxu0 %v1891_v63 }
  0xc9   : > { %1409 = vmatpush2.bf16.msra.mxu0 %v1889_v0 }
  0xca   : > { %1410 = vmatprep.subr.bf16.mxu0 %v1894_v1 }
  0xcd   : > { %1411 = vmatpush2.bf16.msra.mxu0 %v1892_v2 }
  0xce   : > { %1412 = vmatprep.subr.bf16.mxu0 %v1897_v3 }
  0xd1   : > { %1413 = vmatpush2.bf16.msra.mxu0 %v1895_v4 }
  0xd2   : > { %1414 = vmatprep.subr.bf16.mxu0 %v1900_v5 }
  0xd5   : > { %1415 = vmatpush2.bf16.msra.mxu0 %v1898_v6 }
  0xd6   : > { %1416 = vmatprep.subr.bf16.mxu0 %v1903_v7 }
  0xd9   : > { %1417 = vmatpush2.bf16.msra.mxu0 %v1901_v8 }
  0xdc   : > { %1419 = vmatmul.mubr.bf16.vlgmr.msra.gmra.mxu0 %v1595_v9 }
 0x15c   : > { %v1338_v10 = vpop.f32.mrf.mxu0 }
 0x15d   : > { %v1379_v11 = vpop.f32.mrf.mxu1 }
 0x15e   : > { %v1340_v12 = vpop.f32.mrf.mxu0  ;;  %v1380_v18 = vadd.f32 %v1379_v11, %v1338_v10 }
 0x15f   : > { %v1381_v13 = vpop.f32.mrf.mxu1 }
 0x160   : > { %v1342_v14 = vpop.f32.mrf.mxu0  ;;  %v1382_v21 = vadd.f32 %v1381_v13, %v1340_v12 }
 0x161   : > { %v1383_v15 = vpop.f32.mrf.mxu1 }
 0x162   : > { %v1343_v16 = vpop.f32.mrf.mxu0 }
 0x163   : > { %v1384_v17 = vpop.f32.mrf.mxu1 }
 0x19c   : > { %v1420_v20 = vpop.f32.mrf.mxu0 }
 0x19d   : > { %v1421_v22 = vadd.f32 %v1420_v20, %v1380_v18 }
 0x19e   : > { %v1422_v24 = vpop.f32.mrf.mxu0 }
 0x19f   : > { %v1427_v25 = vadd.f32 %v1421_v22, %v702_v19  ;;  %v1423_v26 = vadd.f32 %v1422_v24, %v1382_v21  ;;  %1434 = sbr.rel (%p1693_p13) target bundleno = 432 (0x1b0), region = 78 }
 0x1a0   : > { %v1424_v27 = vpop.f32.mrf.mxu0 }
 0x1a1   : > { %1429 = vst [vmem:[#allocation2] sm:$0xff] %v1427_v25  ;;  %v1428_v28 = vadd.f32 %v1423_v26, %v703_v23 }
 0x1a2   : > { %v1425_v29 = vpop.f32.mrf.mxu0 }
 0x1a3   : > { %1430 = vst [vmem:[#allocation2 + $0x8] sm:$0xff] %v1428_v28 }
 0x1a4   : > { %v1437_v31 = vld [vmem:[%s2252_s30] sm:$0xff]  ;;  %v1438_v34 = vld [vmem:[%s2252_s30 + $0x8] sm:$0xff] }
 0x1a8   : > { %v1435_v30 = vld [vmem:[#allocation2] sm:$0xff] }
 0x1a9   : > { %v1439_v33 = vadd.f32 %v1437_v31, %v1435_v30 }
 0x1aa   : > { %v1436_v32 = vld [vmem:[#allocation2 + $0x8] sm:$0xff] }
 0x1ab   : > { %v1440_v35 = vadd.f32 %v1438_v34, %v1436_v32  ;;  %v1441_v36 = vmax.f32 %v1439_v33, 0.0 }
 0x1ad   : > { %v1442_v37 = vmax.f32 %v1440_v35, 0.0  ;;  %1443 = vst [vmem:[%s2257_s15] sm:$0xff] %v1441_v36 }
 0x1af   : > { %1444 = vst [vmem:[%s2257_s15 + $0x8] sm:$0xff] %v1442_v37 }
 0x1b0 PF: > { %s13_s18 = sadd.s32 1, %s1960_s18   ;;  %s2397_s12 = smov %s1940_s13 }
 0x1b1   : > { %p10_p0 = scmp.ge.s32.totalorder %s13_s18, 14   ;;  %s2398_s13 = smov %s2034_s25 }
 0x1b2   : > { %s2399_s14 = smov %s1952_s16  ;;  %s2400_s15 = smov %s1956_s17 }
 0x1b3   : > { %s2401_s16 = smov %s2404_s19  ;;  %s2402_s17 = smov %s2408_s20 }
 0x1b4   :  { %12 = sbr.rel (!%p10_p0) target bundleno = 4 (0x4), region = 119 }

// kernel: resnet_forward.27
= control target key start
LH: loop header
LB: loop body
LE: loop exit
PB: predicated region body
PF: predicated region fallthrough
CT: control target
= control target key end

     0   :  { %s93_s0 = inlined_call_operand.vmem [shape: f32[2,1,512], index: 0, kind: input, shape index: {}]   ;;  %s94_s1 = inlined_call_operand.hbm [shape: f32[2,512], index: 1, kind: output, shape index: {}]  }
   0x1   :  { %v53_v0 = vld [vmem:[%s93_s0] sm:$0xff]  }
   0x2   :  { %6 = vsyncpa [#allocation4], 0  ;;  %s76_s8 = smov [#allocation3]   ;;  %51 = vst.sshfl [vmem:[#allocation3] sm:$0xff pattern:$0x75316420] %v53_v0 }
   0x3   :  { %s43_s9 = sshll.u32 %s76_s8, 4  ;;  %s44_s9 = int_to_ptr.vmem [resolvable:$true] %s43_s9 }
   0x4   :  { %s54_s10 = scalar_lea.vmem %s44_s9, 128  ;;  %p59_p1 = scmp.lt.s32.totalorder %s44_s9, %s44_s9 }
   0x5   :  { %p55_p0 = scmp.ne.s32.totalorder %s44_s9, %s54_s10  ;;  %p60_p2 = scmp.lt.s32.totalorder %s54_s10, %s54_s10 }
   0x7   :  { %p61_p3 = por %p60_p2, %p59_p1 }
   0x9   :  { %p62_p4 = pnand %p61_p3, %p55_p0 }
   0xb   :  { %65 = shalt.err (!%p62_p4)
}
   0xc   :  { %46 = dma.vmem_to_hbm [thread:$0]  %s44_s9, 128, %s94_s1, [#allocation4]  }
   0xd   :  { %74 = dma.done.wait [#allocation4], 128  }
   0xe   :  { %75 = vsyncadd [#allocation4], 4294967168 }
   0xf   :  { %50 = vsyncpa [#allocation4], 1 }

</bundles_post_ra>
